<compile_context>
chip_gen: v7x
topology: tpu7x:2x2x1
jax: 0.10.0
libtpu: 0.0.40
codegen_flags: <defaults>
</compile_context>

<pallas_src>
import jax
import jax.numpy as jnp
from jax import lax
from jax.experimental import pallas as pl
from jax.experimental.pallas import tpu as pltpu

_BN_EPS = 1e-3


def _round_up(x, m):
    return (x + m - 1) // m * m


# --------------------------- BN folding (eval mode) -------------------------

def _fold_bn(p):
    """Fold eval-mode BatchNorm (eps=1e-3) into the conv.
    Returns (weight bf16 [KH,KW,Cin,Cout] scaled, bias f32 [1,Cout])."""
    scale = p["gamma"] / jnp.sqrt(p["var"] + _BN_EPS)                  # [Cout]
    w = (p["w"].astype(jnp.float32) * scale).astype(jnp.bfloat16)
    b = (p["beta"] - p["mean"] * scale).reshape(1, -1).astype(jnp.float32)
    return w, b


# ------------------------------ fused kernel --------------------------------

def _make_mixed5b_kernel(H, W):
    HW = H * W
    # Padded row widths rounded up to 8 sublanes -> every flat offset used below
    # (kh*Wp, (h+pad)*Wp, h*Wp) is sublane-phase aligned.
    Wp3 = _round_up(W + 2, 8)            # 3x3 conv / 3x3 pool, pad = 1
    Wp5 = _round_up(W + 4, 8)            # 5x5 conv,            pad = 2
    R3 = (H - 1) * Wp3 + W               # conv output rows (r = h*Wp + w)
    R5 = (H - 1) * Wp5 + W
    S3 = _round_up((H + 1) * Wp3 + W, 8)  # kw-im2col scratch rows, K = 3
    S5 = _round_up((H + 3) * Wp5 + W, 8)  # kw-im2col scratch rows, K = 5

    def kernel(x_ref,
               ws_ref, b0_ref, b1a_ref, b2a_ref,
               w1b_ref, b1b_ref,
               w2b_ref, b2b_ref, w2c_ref, b2c_ref,
               wp_ref, b3_ref,
               o0_ref, o1_ref, o2_ref, o3_ref,
               s5, s3a, s3b):
        f32, bf16 = jnp.float32, jnp.bfloat16

        # The kw-im2col scratches need a zero halo around the strips written
        # below.  NOTE: do not gate this on program_id()==0 -- with the batch
        # axis "parallel" each TensorCore owns a disjoint grid slice and has
        # private scratch, so every step clears its (bf16) buffers.
        s5[...] = jnp.zeros_like(s5)
        s3a[...] = jnp.zeros_like(s3a)
        s3b[...] = jnp.zeros_like(s3b)

        x = x_ref[0]                                          # [HW, 192] bf16

        # ---- all four 1x1 stems in ONE wide MXU pass ------------------------
        # ws columns: [0:96)=branch0, [128:176)=branch1, [256:320)=branch2,
        # [384:448)=branch3 -> slices below are 128-lane aligned.
        y = jnp.dot(x, ws_ref[...], preferred_element_type=f32)    # [HW, 512]

        # ---- branch 0: 1x1(96) ----------------------------------------------
        o0_ref[0] = jnp.maximum(y[:, 0:96] + b0_ref[...], 0.0).astype(o0_ref.dtype)

        def fill(dst, t, K, pad, Wp, col_stride, src_stride):
            """kw-im2col fill of the padded-flat scratch:
               dst[(h+pad)*Wp + pad - kw + w, kw*col_stride + c] = t[h*src_stride + w, c].
               Unwritten positions must already be zero (halo)."""
            Cin = t.shape[1]
            tb = t.astype(bf16)                       # cast once, not per tap
            for kw in range(K):
                c0 = kw * col_stride
                for h in range(H):
                    d0 = (h + pad) * Wp + pad - kw
                    s0 = h * src_stride
                    dst[d0:d0 + W, c0:c0 + Cin] = tb[s0:s0 + W, :]

        def conv(src_ref, w_ref, K, Wp, R):
            """sum_kh  src[kh*Wp : kh*Wp+R, :] @ w[kh]   (f32 accumulate).
               Slices start at multiples of Wp (multiple of 8) -> aligned."""
            acc = None
            for kh in range(K):
                lhs = src_ref[kh * Wp: kh * Wp + R, :]
                part = jnp.dot(lhs, w_ref[kh], preferred_element_type=f32)
                acc = part if acc is None else acc + part
            return acc

        # ---- branch 1: 1x1(48) -> 5x5(64), pad 2 ------------------------------
        t1 = jnp.maximum(y[:, 128:176] + b1a_ref[...], 0.0)         # [HW, 48]
        fill(s5, t1, 5, 2, Wp5, 48, W)
        a1 = jnp.maximum(conv(s5, w1b_ref, 5, Wp5, R5) + b1b_ref[...], 0.0)
        o1_ref[0] = a1.astype(o1_ref.dtype)                         # one dense store

        # ---- branch 2: 1x1(64) -> 3x3(96) -> 3x3(96), pad 1 -------------------
        t2 = jnp.maximum(y[:, 256:320] + b2a_ref[...], 0.0)         # [HW, 64]
        fill(s3a, t2, 3, 1, Wp3, 64, W)
        u = jnp.maximum(conv(s3a, w2b_ref, 3, Wp3, R3) + b2b_ref[...], 0.0)
        fill(s3b, u, 3, 1, Wp3, 96, Wp3)                            # u rows at h*Wp3+w
        a2 = jnp.maximum(conv(s3b, w2c_ref, 3, Wp3, R3) + b2c_ref[...], 0.0)
        o2_ref[0] = a2.astype(o2_ref.dtype)

        # ---- branch 3: avgpool3 (stride1, pad1, count_include_pad=False) -> 1x1(64)
        # The 1x1 conv is channel-only and commutes with the spatial pool: the
        # matmul already ran in the wide stem dot; pool the 64-channel result on
        # the MXU with an identity-block weight, re-using s3a (same strips as
        # branch 2's first conv -> the zero halo is still valid).
        y3 = y[:, 384:448]                                          # [HW, 64] (raw)
        fill(s3a, y3, 3, 1, Wp3, 64, W)
        p3 = conv(s3a, wp_ref, 3, Wp3, R3)                          # 3x3 window sums
        # per-position 1 / (number of valid taps), hoisted out of the row loop
        wi = lax.broadcasted_iota(jnp.int32, (W, 1), 0)
        cw = 3.0 - (wi == 0).astype(f32) - (wi == W - 1).astype(f32)     # [W, 1]
        cw_inv = pl.reciprocal(cw, approx=True)
        scale_by_ch = {}
        for h in range(H):
            chv = 3 - (1 if h == 0 else 0) - (1 if h == H - 1 else 0)
            if chv not in scale_by_ch:
                scale_by_ch[chv] = cw_inv * (1.0 / chv)
            row = p3[h * Wp3:h * Wp3 + W, :] * scale_by_ch[chv] + b3_ref[...]
            o3_ref[0, h * Wp3:h * Wp3 + W, :] = jnp.maximum(row, 0.0).astype(o3_ref.dtype)

    dims = dict(HW=HW, Wp3=Wp3, Wp5=Wp5, R3=R3, R5=R5, S3=S3, S5=S5)
    return kernel, dims


# --------------------------------- wrapper ----------------------------------

def mixed_5b(x_nchw, params):
    """Forward pass of Mixed_5b.  Input / output are NCHW like the PyTorch module."""
    x = jnp.transpose(x_nchw, (0, 2, 3, 1))                         # NHWC
    N, H, W, Cin = x.shape
    assert Cin == 192, "Mixed_5b expects 192 input channels"
    HW = H * W
    x_flat = x.reshape(N, HW, Cin).astype(jnp.bfloat16)

    w0, b0 = _fold_bn(params["b0"])
    w1a, b1a = _fold_bn(params["b1_0"])
    w1b, b1b = _fold_bn(params["b1_1"])
    w2a, b2a = _fold_bn(params["b2_0"])
    w2b, b2b = _fold_bn(params["b2_1"])
    w2c, b2c = _fold_bn(params["b2_2"])
    w3, b3 = _fold_bn(params["b3_1"])

    # Fused 1x1 stem weight: branch blocks start on 128-lane boundaries.
    ws = jnp.zeros((192, 512), jnp.bfloat16)
    ws = ws.at[:, 0:96].set(w0.reshape(192, 96))
    ws = ws.at[:, 128:176].set(w1a.reshape(192, 48))
    ws = ws.at[:, 256:320].set(w2a.reshape(192, 64))
    ws = ws.at[:, 384:448].set(w3.reshape(192, 64))

    # Spatial weights in kh-major / kw-im2col layout: [kh, kw*Cin + ci, co].
    w1b = w1b.reshape(5, 5 * 48, 64)
    w2b = w2b.reshape(3, 3 * 64, 96)
    w2c = w2c.reshape(3, 3 * 96, 96)
    # 3x3 sum-pool as identity blocks (same layout).
    eye64 = jnp.eye(64, dtype=jnp.bfloat16)
    wpool = jnp.tile(jnp.concatenate([eye64, eye64, eye64], axis=0)[None], (3, 1, 1))

    kernel, d = _make_mixed5b_kernel(H, W)
    Wp3, Wp5, R3, R5, S3, S5 = d["Wp3"], d["Wp5"], d["R3"], d["R5"], d["S3"], d["S5"]

    def rep(a):                          # whole-array operand, same every grid step
        nd = a.ndim
        return pl.BlockSpec(a.shape, lambda n, nd=nd: (0,) * nd)

    out_shapes = (
        jax.ShapeDtypeStruct((N, HW, 96), jnp.bfloat16),   # branch 0 (dense rows)
        jax.ShapeDtypeStruct((N, R5, 64), jnp.bfloat16),   # branch 1 (rows h*Wp5 + w)
        jax.ShapeDtypeStruct((N, R3, 96), jnp.bfloat16),   # branch 2 (rows h*Wp3 + w)
        jax.ShapeDtypeStruct((N, R3, 64), jnp.bfloat16),   # branch 3 (rows h*Wp3 + w)
    )
    out_specs = tuple(
        pl.BlockSpec((1,) + s.shape[1:], lambda n: (n, 0, 0)) for s in out_shapes)

    flops = N * 2 * (HW * 192 * 512 + 5 * R5 * 240 * 64
                     + 3 * R3 * 192 * 96 + 3 * R3 * 288 * 96 + 3 * R3 * 192 * 64)
    bytes_accessed = (N * HW * 192 * 2
                      + 2 * (192 * 512 + 5 * 240 * 64 + 3 * 192 * 96
                             + 3 * 288 * 96 + 3 * 192 * 64)
                      + N * 2 * (HW * 96 + R5 * 64 + R3 * 96 + R3 * 64))

    o0, o1, o2, o3 = pl.pallas_call(
        kernel,
        out_shape=out_shapes,
        grid=(N,),
        in_specs=[
            pl.BlockSpec((1, HW, Cin), lambda n: (n, 0, 0)),
            rep(ws), rep(b0), rep(b1a), rep(b2a),
            rep(w1b), rep(b1b),
            rep(w2b), rep(b2b), rep(w2c), rep(b2c),
            rep(wpool), rep(b3),
        ],
        out_specs=out_specs,
        scratch_shapes=[
            pltpu.VMEM((S5, 5 * 48), jnp.bfloat16),   # branch 1: kw-im2col (5x5)
            pltpu.VMEM((S3, 3 * 64), jnp.bfloat16),   # branch 2a + branch 3 (shared)
            pltpu.VMEM((S3, 3 * 96), jnp.bfloat16),   # branch 2b
        ],
        compiler_params=pltpu.CompilerParams(
            dimension_semantics=("parallel",),
            vmem_limit_bytes=64 * 1024 * 1024),
        cost_estimate=pl.CostEstimate(
            flops=flops, transcendentals=N * R3, bytes_accessed=bytes_accessed),
    )(x_flat, ws, b0, b1a, b2a, w1b, b1b, w2b, b2b, w2c, b2c, wpool, b3)

    # Un-flatten the padded-flat row layout; XLA fuses the pad/reshape/slice with
    # the channel concat and the NHWC -> NCHW layout copy.
    def unflat(o, stride):
        rows, C = o.shape[1], o.shape[2]
        pad = H * stride - rows
        if pad:
            o = jnp.pad(o, ((0, 0), (0, pad), (0, 0)))
        return o.reshape(N, H, stride, C)[:, :, :W, :]

    out = jnp.concatenate(
        [unflat(o0, W), unflat(o1, Wp5), unflat(o2, Wp3), unflat(o3, Wp3)], axis=-1)
    return jnp.transpose(out, (0, 3, 1, 2)).astype(jnp.float32)


# --------------------------- parameter creation ------------------------------

def make_basic_conv_params(key, cin, cout, k, pad):
    kw_, kg, kb, km, kv = jax.random.split(key, 5)
    return dict(
        w=0.05 * jax.random.normal(kw_, (k, k, cin, cout), jnp.float32),
        gamma=1.0 + 0.1 * jax.random.normal(kg, (cout,), jnp.float32),
        beta=0.1 * jax.random.normal(kb, (cout,), jnp.float32),
        mean=0.1 * jax.random.normal(km, (cout,), jnp.float32),
        var=1.0 + 0.1 * jax.random.uniform(kv, (cout,), jnp.float32),
        pad=pad,
    )


def make_mixed_5b_params(key):
    ks = jax.random.split(key, 7)
    return {
        "b0":   make_basic_conv_params(ks[0], 192, 96, 1, 0),
        "b1_0": make_basic_conv_params(ks[1], 192, 48, 1, 0),
        "b1_1": make_basic_conv_params(ks[2], 48,  64, 5, 2),
        "b2_0": make_basic_conv_params(ks[3], 192, 64, 1, 0),
        "b2_1": make_basic_conv_params(ks[4], 64,  96, 3, 1),
        "b2_2": make_basic_conv_params(ks[5], 96,  96, 3, 1),
        "b3_1": make_basic_conv_params(ks[6], 192, 64, 1, 0),
    }


# --------------------------- pure-JAX reference ------------------------------

def _conv_bn_relu_ref(x, p):
    y = lax.conv_general_dilated(
        x, p["w"].astype(jnp.float32), (1, 1),
        [(p["pad"], p["pad"]), (p["pad"], p["pad"])],
        dimension_numbers=("NHWC", "HWIO", "NHWC"))
    scale = p["gamma"] / jnp.sqrt(p["var"] + _BN_EPS)
    return jnp.maximum(y * scale + (p["beta"] - p["mean"] * scale), 0.0)


def _avg_pool3_ref(x):
    dims, strides = (1, 3, 3, 1), (1, 1, 1, 1)
    pad = ((0, 0), (1, 1), (1, 1), (0, 0))
    s = lax.reduce_window(x, 0.0, lax.add, dims, strides, pad)
    c = lax.reduce_window(jnp.ones_like(x[..., :1]), 0.0, lax.add, dims, strides, pad)
    return s / c


def mixed_5b_ref(x_nchw, params):
    x = jnp.transpose(x_nchw, (0, 2, 3, 1)).astype(jnp.float32)
    x0 = _conv_bn_relu_ref(x, params["b0"])
    x1 = _conv_bn_relu_ref(_conv_bn_relu_ref(x, params["b1_0"]), params["b1_1"])
    x2 = _conv_bn_relu_ref(
        _conv_bn_relu_ref(_conv_bn_relu_ref(x, params["b2_0"]), params["b2_1"]),
        params["b2_2"])
    x3 = _conv_bn_relu_ref(_avg_pool3_ref(x), params["b3_1"])
    return jnp.transpose(jnp.concatenate([x0, x1, x2, x3], axis=-1), (0, 3, 1, 2))


# ----------------------------------- main ------------------------------------

if __name__ == "__main__":
    key = jax.random.PRNGKey(0)
    kx, kp = jax.random.split(key)
    # Mixed_5b requires 192 input channels; small spatial/batch for the test.
    x = jax.random.normal(kx, (2, 192, 8, 8), jnp.float32)
    params = make_mixed_5b_params(kp)

    fwd = jax.jit(mixed_5b)
    out = jax.block_until_ready(fwd(x, params))

    assert out.shape == (2, 96 + 64 + 96 + 64, 8, 8), out.shape
    assert bool(jnp.all(jnp.isfinite(out)))
    assert bool(jnp.all(out >= 0.0))          # every branch ends in a ReLU

    # Numerical check vs an all-f32 XLA reference (bf16 MXU inputs / bf16
    # outputs -> small diffs).
    ref = jax.block_until_ready(mixed_5b_ref(x, params))
    max_err = float(jnp.max(jnp.abs(out - ref)))
    assert max_err < 0.25, f"max |err| vs reference = {max_err}"

    print("KERNEL_OK")
</pallas_src>

<mosaic_0001>
module attributes {stable_mosaic.version = 11 : i64} {
  func.func @kernel(%arg0: i32, %arg1: memref<1x64x192xbf16, #tpu.memory_space<vmem>>, %arg2: memref<192x512xbf16, #tpu.memory_space<vmem>>, %arg3: memref<1x96xf32, #tpu.memory_space<vmem>>, %arg4: memref<1x48xf32, #tpu.memory_space<vmem>>, %arg5: memref<1x64xf32, #tpu.memory_space<vmem>>, %arg6: memref<5x240x64xbf16, #tpu.memory_space<vmem>>, %arg7: memref<1x64xf32, #tpu.memory_space<vmem>>, %arg8: memref<3x192x96xbf16, #tpu.memory_space<vmem>>, %arg9: memref<1x96xf32, #tpu.memory_space<vmem>>, %arg10: memref<3x288x96xbf16, #tpu.memory_space<vmem>>, %arg11: memref<1x96xf32, #tpu.memory_space<vmem>>, %arg12: memref<3x192x64xbf16, #tpu.memory_space<vmem>>, %arg13: memref<1x64xf32, #tpu.memory_space<vmem>>, %arg14: memref<1x64x96xbf16, #tpu.memory_space<vmem>>, %arg15: memref<1x120x64xbf16, #tpu.memory_space<vmem>>, %arg16: memref<1x120x96xbf16, #tpu.memory_space<vmem>>, %arg17: memref<1x120x64xbf16, #tpu.memory_space<vmem>>, %arg18: memref<184x240xbf16, #tpu.memory_space<vmem>>, %arg19: memref<152x192xbf16, #tpu.memory_space<vmem>>, %arg20: memref<152x288xbf16, #tpu.memory_space<vmem>>) attributes {dimension_semantics = [#tpu.dimension_semantics<parallel>], iteration_bounds = array<i64: 2>, scalar_prefetch = 0 : i64, scratch_operands = 3 : i64, tpu.core_type = #tpu.core_type<tc>, window_params = [{transform_indices = @transform_0, window_bounds = array<i64: 1, 64, 192>}, {pipeline_mode = #tpu.pipeline_mode<synchronous>, transform_indices = @transform_1, window_bounds = array<i64: 192, 512>}, {pipeline_mode = #tpu.pipeline_mode<synchronous>, transform_indices = @transform_2, window_bounds = array<i64: 1, 96>}, {pipeline_mode = #tpu.pipeline_mode<synchronous>, transform_indices = @transform_3, window_bounds = array<i64: 1, 48>}, {pipeline_mode = #tpu.pipeline_mode<synchronous>, transform_indices = @transform_4, window_bounds = array<i64: 1, 64>}, {pipeline_mode = #tpu.pipeline_mode<synchronous>, transform_indices = @transform_5, window_bounds = array<i64: 5, 240, 64>}, {pipeline_mode = #tpu.pipeline_mode<synchronous>, transform_indices = @transform_6, window_bounds = array<i64: 1, 64>}, {pipeline_mode = #tpu.pipeline_mode<synchronous>, transform_indices = @transform_7, window_bounds = array<i64: 3, 192, 96>}, {pipeline_mode = #tpu.pipeline_mode<synchronous>, transform_indices = @transform_8, window_bounds = array<i64: 1, 96>}, {pipeline_mode = #tpu.pipeline_mode<synchronous>, transform_indices = @transform_9, window_bounds = array<i64: 3, 288, 96>}, {pipeline_mode = #tpu.pipeline_mode<synchronous>, transform_indices = @transform_10, window_bounds = array<i64: 1, 96>}, {pipeline_mode = #tpu.pipeline_mode<synchronous>, transform_indices = @transform_11, window_bounds = array<i64: 3, 192, 64>}, {pipeline_mode = #tpu.pipeline_mode<synchronous>, transform_indices = @transform_12, window_bounds = array<i64: 1, 64>}, {transform_indices = @transform_13, window_bounds = array<i64: 1, 64, 96>}, {transform_indices = @transform_14, window_bounds = array<i64: 1, 120, 64>}, {transform_indices = @transform_15, window_bounds = array<i64: 1, 120, 96>}, {transform_indices = @transform_16, window_bounds = array<i64: 1, 120, 64>}]} {
    %cst = arith.constant 0.000000e+00 : bf16
    %0 = vector.broadcast %cst : bf16 to vector<184x240xbf16>
    %c0 = arith.constant 0 : index
    %c0_0 = arith.constant 0 : index
    %1 = vector.load %arg18[%c0, %c0_0] : memref<184x240xbf16, #tpu.memory_space<vmem>>, vector<184x240xbf16>
    tpu.vector_store %arg18[%c0, %c0_0], %0 {strides = array<i32>} : memref<184x240xbf16, #tpu.memory_space<vmem>>, vector<184x240xbf16>,
    %cst_1 = arith.constant 0.000000e+00 : bf16
    %2 = vector.broadcast %cst_1 : bf16 to vector<152x192xbf16>
    %c0_2 = arith.constant 0 : index
    %c0_3 = arith.constant 0 : index
    %3 = vector.load %arg19[%c0_2, %c0_3] : memref<152x192xbf16, #tpu.memory_space<vmem>>, vector<152x192xbf16>
    tpu.vector_store %arg19[%c0_2, %c0_3], %2 {strides = array<i32>} : memref<152x192xbf16, #tpu.memory_space<vmem>>, vector<152x192xbf16>,
    %cst_4 = arith.constant 0.000000e+00 : bf16
    %4 = vector.broadcast %cst_4 : bf16 to vector<152x288xbf16>
    %c0_5 = arith.constant 0 : index
    %c0_6 = arith.constant 0 : index
    %5 = vector.load %arg20[%c0_5, %c0_6] : memref<152x288xbf16, #tpu.memory_space<vmem>>, vector<152x288xbf16>
    tpu.vector_store %arg20[%c0_5, %c0_6], %4 {strides = array<i32>} : memref<152x288xbf16, #tpu.memory_space<vmem>>, vector<152x288xbf16>,
    %c0_7 = arith.constant 0 : index
    %c0_8 = arith.constant 0 : index
    %c0_9 = arith.constant 0 : index
    %6 = vector.load %arg1[%c0_7, %c0_8, %c0_9] : memref<1x64x192xbf16, #tpu.memory_space<vmem>>, vector<1x64x192xbf16>
    %7 = vector.shape_cast %6 : vector<1x64x192xbf16> to vector<64x192xbf16>
    %c0_10 = arith.constant 0 : index
    %c0_11 = arith.constant 0 : index
    %8 = vector.load %arg2[%c0_10, %c0_11] : memref<192x512xbf16, #tpu.memory_space<vmem>>, vector<192x512xbf16>
    %cst_12 = arith.constant dense<0.000000e+00> : vector<64x512xf32>
    %9 = tpu.matmul %7, %8, %cst_12 {dimension_numbers = #tpu.dot_dimension_numbers<[1], [0], [0], [1], [0, 0, 1, 1], [], []>} : vector<64x192xbf16>, vector<192x512xbf16>, vector<64x512xf32> -> vector<64x512xf32>
    %10 = vector.extract_strided_slice %9 {offsets = [0, 0], sizes = [64, 96], strides = [1, 1]} : vector<64x512xf32> to vector<64x96xf32>
    %c0_13 = arith.constant 0 : index
    %c0_14 = arith.constant 0 : index
    %11 = vector.load %arg3[%c0_13, %c0_14] : memref<1x96xf32, #tpu.memory_space<vmem>>, vector<1x96xf32>
    %12 = vector.broadcast %11 : vector<1x96xf32> to vector<64x96xf32>
    %13 = arith.addf %10, %12 : vector<64x96xf32>
    %cst_15 = arith.constant 0.000000e+00 : f32
    %14 = vector.broadcast %cst_15 : f32 to vector<64x96xf32>
    %15 = arith.maximumf %13, %14 : vector<64x96xf32>
    %16 = arith.truncf %15 : vector<64x96xf32> to vector<64x96xbf16>
    %c0_16 = arith.constant 0 : index
    %c0_17 = arith.constant 0 : index
    %c0_18 = arith.constant 0 : index
    %17 = vector.load %arg14[%c0_16, %c0_17, %c0_18] : memref<1x64x96xbf16, #tpu.memory_space<vmem>>, vector<1x64x96xbf16>
    %18 = vector.shape_cast %17 : vector<1x64x96xbf16> to vector<64x96xbf16>
    %19 = vector.shape_cast %16 : vector<64x96xbf16> to vector<1x64x96xbf16>
    tpu.vector_store %arg14[%c0_16, %c0_17, %c0_18], %19 {strides = array<i32>} : memref<1x64x96xbf16, #tpu.memory_space<vmem>>, vector<1x64x96xbf16>,
    %20 = vector.extract_strided_slice %9 {offsets = [0, 128], sizes = [64, 48], strides = [1, 1]} : vector<64x512xf32> to vector<64x48xf32>
    %c0_19 = arith.constant 0 : index
    %c0_20 = arith.constant 0 : index
    %21 = vector.load %arg4[%c0_19, %c0_20] : memref<1x48xf32, #tpu.memory_space<vmem>>, vector<1x48xf32>
    %22 = vector.broadcast %21 : vector<1x48xf32> to vector<64x48xf32>
    %23 = arith.addf %20, %22 : vector<64x48xf32>
    %cst_21 = arith.constant 0.000000e+00 : f32
    %24 = vector.broadcast %cst_21 : f32 to vector<64x48xf32>
    %25 = arith.maximumf %23, %24 : vector<64x48xf32>
    %26 = arith.truncf %25 : vector<64x48xf32> to vector<64x48xbf16>
    %27 = vector.extract_strided_slice %26 {offsets = [0, 0], sizes = [8, 48], strides = [1, 1]} : vector<64x48xbf16> to vector<8x48xbf16>
    %c34 = arith.constant 34 : index
    %c0_22 = arith.constant 0 : index
    %28 = vector.load %arg18[%c34, %c0_22] : memref<184x240xbf16, #tpu.memory_space<vmem>>, vector<8x48xbf16>
    tpu.vector_store %arg18[%c34, %c0_22], %27 {strides = array<i32>} : memref<184x240xbf16, #tpu.memory_space<vmem>>, vector<8x48xbf16>,
    %29 = vector.extract_strided_slice %26 {offsets = [8, 0], sizes = [8, 48], strides = [1, 1]} : vector<64x48xbf16> to vector<8x48xbf16>
    %c50 = arith.constant 50 : index
    %c0_23 = arith.constant 0 : index
    %30 = vector.load %arg18[%c50, %c0_23] : memref<184x240xbf16, #tpu.memory_space<vmem>>, vector<8x48xbf16>
    tpu.vector_store %arg18[%c50, %c0_23], %29 {strides = array<i32>} : memref<184x240xbf16, #tpu.memory_space<vmem>>, vector<8x48xbf16>,
    %31 = vector.extract_strided_slice %26 {offsets = [16, 0], sizes = [8, 48], strides = [1, 1]} : vector<64x48xbf16> to vector<8x48xbf16>
    %c66 = arith.constant 66 : index
    %c0_24 = arith.constant 0 : index
    %32 = vector.load %arg18[%c66, %c0_24] : memref<184x240xbf16, #tpu.memory_space<vmem>>, vector<8x48xbf16>
    tpu.vector_store %arg18[%c66, %c0_24], %31 {strides = array<i32>} : memref<184x240xbf16, #tpu.memory_space<vmem>>, vector<8x48xbf16>,
    %33 = vector.extract_strided_slice %26 {offsets = [24, 0], sizes = [8, 48], strides = [1, 1]} : vector<64x48xbf16> to vector<8x48xbf16>
    %c82 = arith.constant 82 : index
    %c0_25 = arith.constant 0 : index
    %34 = vector.load %arg18[%c82, %c0_25] : memref<184x240xbf16, #tpu.memory_space<vmem>>, vector<8x48xbf16>
    tpu.vector_store %arg18[%c82, %c0_25], %33 {strides = array<i32>} : memref<184x240xbf16, #tpu.memory_space<vmem>>, vector<8x48xbf16>,
    %35 = vector.extract_strided_slice %26 {offsets = [32, 0], sizes = [8, 48], strides = [1, 1]} : vector<64x48xbf16> to vector<8x48xbf16>
    %c98 = arith.constant 98 : index
    %c0_26 = arith.constant 0 : index
    %36 = vector.load %arg18[%c98, %c0_26] : memref<184x240xbf16, #tpu.memory_space<vmem>>, vector<8x48xbf16>
    tpu.vector_store %arg18[%c98, %c0_26], %35 {strides = array<i32>} : memref<184x240xbf16, #tpu.memory_space<vmem>>, vector<8x48xbf16>,
    %37 = vector.extract_strided_slice %26 {offsets = [40, 0], sizes = [8, 48], strides = [1, 1]} : vector<64x48xbf16> to vector<8x48xbf16>
    %c114 = arith.constant 114 : index
    %c0_27 = arith.constant 0 : index
    %38 = vector.load %arg18[%c114, %c0_27] : memref<184x240xbf16, #tpu.memory_space<vmem>>, vector<8x48xbf16>
    tpu.vector_store %arg18[%c114, %c0_27], %37 {strides = array<i32>} : memref<184x240xbf16, #tpu.memory_space<vmem>>, vector<8x48xbf16>,
    %39 = vector.extract_strided_slice %26 {offsets = [48, 0], sizes = [8, 48], strides = [1, 1]} : vector<64x48xbf16> to vector<8x48xbf16>
    %c130 = arith.constant 130 : index
    %c0_28 = arith.constant 0 : index
    %40 = vector.load %arg18[%c130, %c0_28] : memref<184x240xbf16, #tpu.memory_space<vmem>>, vector<8x48xbf16>
    tpu.vector_store %arg18[%c130, %c0_28], %39 {strides = array<i32>} : memref<184x240xbf16, #tpu.memory_space<vmem>>, vector<8x48xbf16>,
    %41 = vector.extract_strided_slice %26 {offsets = [56, 0], sizes = [8, 48], strides = [1, 1]} : vector<64x48xbf16> to vector<8x48xbf16>
    %c146 = arith.constant 146 : index
    %c0_29 = arith.constant 0 : index
    %42 = vector.load %arg18[%c146, %c0_29] : memref<184x240xbf16, #tpu.memory_space<vmem>>, vector<8x48xbf16>
    tpu.vector_store %arg18[%c146, %c0_29], %41 {strides = array<i32>} : memref<184x240xbf16, #tpu.memory_space<vmem>>, vector<8x48xbf16>,
    %43 = vector.extract_strided_slice %26 {offsets = [0, 0], sizes = [8, 48], strides = [1, 1]} : vector<64x48xbf16> to vector<8x48xbf16>
    %c33 = arith.constant 33 : index
    %c48 = arith.constant 48 : index
    %44 = vector.load %arg18[%c33, %c48] : memref<184x240xbf16, #tpu.memory_space<vmem>>, vector<8x48xbf16>
    tpu.vector_store %arg18[%c33, %c48], %43 {strides = array<i32>} : memref<184x240xbf16, #tpu.memory_space<vmem>>, vector<8x48xbf16>,
    %45 = vector.extract_strided_slice %26 {offsets = [8, 0], sizes = [8, 48], strides = [1, 1]} : vector<64x48xbf16> to vector<8x48xbf16>
    %c49 = arith.constant 49 : index
    %c48_30 = arith.constant 48 : index
    %46 = vector.load %arg18[%c49, %c48_30] : memref<184x240xbf16, #tpu.memory_space<vmem>>, vector<8x48xbf16>
    tpu.vector_store %arg18[%c49, %c48_30], %45 {strides = array<i32>} : memref<184x240xbf16, #tpu.memory_space<vmem>>, vector<8x48xbf16>,
    %47 = vector.extract_strided_slice %26 {offsets = [16, 0], sizes = [8, 48], strides = [1, 1]} : vector<64x48xbf16> to vector<8x48xbf16>
    %c65 = arith.constant 65 : index
    %c48_31 = arith.constant 48 : index
    %48 = vector.load %arg18[%c65, %c48_31] : memref<184x240xbf16, #tpu.memory_space<vmem>>, vector<8x48xbf16>
    tpu.vector_store %arg18[%c65, %c48_31], %47 {strides = array<i32>} : memref<184x240xbf16, #tpu.memory_space<vmem>>, vector<8x48xbf16>,
    %49 = vector.extract_strided_slice %26 {offsets = [24, 0], sizes = [8, 48], strides = [1, 1]} : vector<64x48xbf16> to vector<8x48xbf16>
    %c81 = arith.constant 81 : index
    %c48_32 = arith.constant 48 : index
    %50 = vector.load %arg18[%c81, %c48_32] : memref<184x240xbf16, #tpu.memory_space<vmem>>, vector<8x48xbf16>
    tpu.vector_store %arg18[%c81, %c48_32], %49 {strides = array<i32>} : memref<184x240xbf16, #tpu.memory_space<vmem>>, vector<8x48xbf16>,
    %51 = vector.extract_strided_slice %26 {offsets = [32, 0], sizes = [8, 48], strides = [1, 1]} : vector<64x48xbf16> to vector<8x48xbf16>
    %c97 = arith.constant 97 : index
    %c48_33 = arith.constant 48 : index
    %52 = vector.load %arg18[%c97, %c48_33] : memref<184x240xbf16, #tpu.memory_space<vmem>>, vector<8x48xbf16>
    tpu.vector_store %arg18[%c97, %c48_33], %51 {strides = array<i32>} : memref<184x240xbf16, #tpu.memory_space<vmem>>, vector<8x48xbf16>,
    %53 = vector.extract_strided_slice %26 {offsets = [40, 0], sizes = [8, 48], strides = [1, 1]} : vector<64x48xbf16> to vector<8x48xbf16>
    %c113 = arith.constant 113 : index
    %c48_34 = arith.constant 48 : index
    %54 = vector.load %arg18[%c113, %c48_34] : memref<184x240xbf16, #tpu.memory_space<vmem>>, vector<8x48xbf16>
    tpu.vector_store %arg18[%c113, %c48_34], %53 {strides = array<i32>} : memref<184x240xbf16, #tpu.memory_space<vmem>>, vector<8x48xbf16>,
    %55 = vector.extract_strided_slice %26 {offsets = [48, 0], sizes = [8, 48], strides = [1, 1]} : vector<64x48xbf16> to vector<8x48xbf16>
    %c129 = arith.constant 129 : index
    %c48_35 = arith.constant 48 : index
    %56 = vector.load %arg18[%c129, %c48_35] : memref<184x240xbf16, #tpu.memory_space<vmem>>, vector<8x48xbf16>
    tpu.vector_store %arg18[%c129, %c48_35], %55 {strides = array<i32>} : memref<184x240xbf16, #tpu.memory_space<vmem>>, vector<8x48xbf16>,
    %57 = vector.extract_strided_slice %26 {offsets = [56, 0], sizes = [8, 48], strides = [1, 1]} : vector<64x48xbf16> to vector<8x48xbf16>
    %c145 = arith.constant 145 : index
    %c48_36 = arith.constant 48 : index
    %58 = vector.load %arg18[%c145, %c48_36] : memref<184x240xbf16, #tpu.memory_space<vmem>>, vector<8x48xbf16>
    tpu.vector_store %arg18[%c145, %c48_36], %57 {strides = array<i32>} : memref<184x240xbf16, #tpu.memory_space<vmem>>, vector<8x48xbf16>,
    %59 = vector.extract_strided_slice %26 {offsets = [0, 0], sizes = [8, 48], strides = [1, 1]} : vector<64x48xbf16> to vector<8x48xbf16>
    %c32 = arith.constant 32 : index
    %c96 = arith.constant 96 : index
    %60 = vector.load %arg18[%c32, %c96] : memref<184x240xbf16, #tpu.memory_space<vmem>>, vector<8x48xbf16>
    tpu.vector_store %arg18[%c32, %c96], %59 {strides = array<i32>} : memref<184x240xbf16, #tpu.memory_space<vmem>>, vector<8x48xbf16>,
    %61 = vector.extract_strided_slice %26 {offsets = [8, 0], sizes = [8, 48], strides = [1, 1]} : vector<64x48xbf16> to vector<8x48xbf16>
    %c48_37 = arith.constant 48 : index
    %c96_38 = arith.constant 96 : index
    %62 = vector.load %arg18[%c48_37, %c96_38] : memref<184x240xbf16, #tpu.memory_space<vmem>>, vector<8x48xbf16>
    tpu.vector_store %arg18[%c48_37, %c96_38], %61 {strides = array<i32>} : memref<184x240xbf16, #tpu.memory_space<vmem>>, vector<8x48xbf16>,
    %63 = vector.extract_strided_slice %26 {offsets = [16, 0], sizes = [8, 48], strides = [1, 1]} : vector<64x48xbf16> to vector<8x48xbf16>
    %c64 = arith.constant 64 : index
    %c96_39 = arith.constant 96 : index
    %64 = vector.load %arg18[%c64, %c96_39] : memref<184x240xbf16, #tpu.memory_space<vmem>>, vector<8x48xbf16>
    tpu.vector_store %arg18[%c64, %c96_39], %63 {strides = array<i32>} : memref<184x240xbf16, #tpu.memory_space<vmem>>, vector<8x48xbf16>,
    %65 = vector.extract_strided_slice %26 {offsets = [24, 0], sizes = [8, 48], strides = [1, 1]} : vector<64x48xbf16> to vector<8x48xbf16>
    %c80 = arith.constant 80 : index
    %c96_40 = arith.constant 96 : index
    %66 = vector.load %arg18[%c80, %c96_40] : memref<184x240xbf16, #tpu.memory_space<vmem>>, vector<8x48xbf16>
    tpu.vector_store %arg18[%c80, %c96_40], %65 {strides = array<i32>} : memref<184x240xbf16, #tpu.memory_space<vmem>>, vector<8x48xbf16>,
    %67 = vector.extract_strided_slice %26 {offsets = [32, 0], sizes = [8, 48], strides = [1, 1]} : vector<64x48xbf16> to vector<8x48xbf16>
    %c96_41 = arith.constant 96 : index
    %c96_42 = arith.constant 96 : index
    %68 = vector.load %arg18[%c96_41, %c96_42] : memref<184x240xbf16, #tpu.memory_space<vmem>>, vector<8x48xbf16>
    tpu.vector_store %arg18[%c96_41, %c96_42], %67 {strides = array<i32>} : memref<184x240xbf16, #tpu.memory_space<vmem>>, vector<8x48xbf16>,
    %69 = vector.extract_strided_slice %26 {offsets = [40, 0], sizes = [8, 48], strides = [1, 1]} : vector<64x48xbf16> to vector<8x48xbf16>
    %c112 = arith.constant 112 : index
    %c96_43 = arith.constant 96 : index
    %70 = vector.load %arg18[%c112, %c96_43] : memref<184x240xbf16, #tpu.memory_space<vmem>>, vector<8x48xbf16>
    tpu.vector_store %arg18[%c112, %c96_43], %69 {strides = array<i32>} : memref<184x240xbf16, #tpu.memory_space<vmem>>, vector<8x48xbf16>,
    %71 = vector.extract_strided_slice %26 {offsets = [48, 0], sizes = [8, 48], strides = [1, 1]} : vector<64x48xbf16> to vector<8x48xbf16>
    %c128 = arith.constant 128 : index
    %c96_44 = arith.constant 96 : index
    %72 = vector.load %arg18[%c128, %c96_44] : memref<184x240xbf16, #tpu.memory_space<vmem>>, vector<8x48xbf16>
    tpu.vector_store %arg18[%c128, %c96_44], %71 {strides = array<i32>} : memref<184x240xbf16, #tpu.memory_space<vmem>>, vector<8x48xbf16>,
    %73 = vector.extract_strided_slice %26 {offsets = [56, 0], sizes = [8, 48], strides = [1, 1]} : vector<64x48xbf16> to vector<8x48xbf16>
    %c144 = arith.constant 144 : index
    %c96_45 = arith.constant 96 : index
    %74 = vector.load %arg18[%c144, %c96_45] : memref<184x240xbf16, #tpu.memory_space<vmem>>, vector<8x48xbf16>
    tpu.vector_store %arg18[%c144, %c96_45], %73 {strides = array<i32>} : memref<184x240xbf16, #tpu.memory_space<vmem>>, vector<8x48xbf16>,
    %75 = vector.extract_strided_slice %26 {offsets = [0, 0], sizes = [8, 48], strides = [1, 1]} : vector<64x48xbf16> to vector<8x48xbf16>
    %c31 = arith.constant 31 : index
    %c144_46 = arith.constant 144 : index
    %76 = vector.load %arg18[%c31, %c144_46] : memref<184x240xbf16, #tpu.memory_space<vmem>>, vector<8x48xbf16>
    tpu.vector_store %arg18[%c31, %c144_46], %75 {strides = array<i32>} : memref<184x240xbf16, #tpu.memory_space<vmem>>, vector<8x48xbf16>,
    %77 = vector.extract_strided_slice %26 {offsets = [8, 0], sizes = [8, 48], strides = [1, 1]} : vector<64x48xbf16> to vector<8x48xbf16>
    %c47 = arith.constant 47 : index
    %c144_47 = arith.constant 144 : index
    %78 = vector.load %arg18[%c47, %c144_47] : memref<184x240xbf16, #tpu.memory_space<vmem>>, vector<8x48xbf16>
    tpu.vector_store %arg18[%c47, %c144_47], %77 {strides = array<i32>} : memref<184x240xbf16, #tpu.memory_space<vmem>>, vector<8x48xbf16>,
    %79 = vector.extract_strided_slice %26 {offsets = [16, 0], sizes = [8, 48], strides = [1, 1]} : vector<64x48xbf16> to vector<8x48xbf16>
    %c63 = arith.constant 63 : index
    %c144_48 = arith.constant 144 : index
    %80 = vector.load %arg18[%c63, %c144_48] : memref<184x240xbf16, #tpu.memory_space<vmem>>, vector<8x48xbf16>
    tpu.vector_store %arg18[%c63, %c144_48], %79 {strides = array<i32>} : memref<184x240xbf16, #tpu.memory_space<vmem>>, vector<8x48xbf16>,
    %81 = vector.extract_strided_slice %26 {offsets = [24, 0], sizes = [8, 48], strides = [1, 1]} : vector<64x48xbf16> to vector<8x48xbf16>
    %c79 = arith.constant 79 : index
    %c144_49 = arith.constant 144 : index
    %82 = vector.load %arg18[%c79, %c144_49] : memref<184x240xbf16, #tpu.memory_space<vmem>>, vector<8x48xbf16>
    tpu.vector_store %arg18[%c79, %c144_49], %81 {strides = array<i32>} : memref<184x240xbf16, #tpu.memory_space<vmem>>, vector<8x48xbf16>,
    %83 = vector.extract_strided_slice %26 {offsets = [32, 0], sizes = [8, 48], strides = [1, 1]} : vector<64x48xbf16> to vector<8x48xbf16>
    %c95 = arith.constant 95 : index
    %c144_50 = arith.constant 144 : index
    %84 = vector.load %arg18[%c95, %c144_50] : memref<184x240xbf16, #tpu.memory_space<vmem>>, vector<8x48xbf16>
    tpu.vector_store %arg18[%c95, %c144_50], %83 {strides = array<i32>} : memref<184x240xbf16, #tpu.memory_space<vmem>>, vector<8x48xbf16>,
    %85 = vector.extract_strided_slice %26 {offsets = [40, 0], sizes = [8, 48], strides = [1, 1]} : vector<64x48xbf16> to vector<8x48xbf16>
    %c111 = arith.constant 111 : index
    %c144_51 = arith.constant 144 : index
    %86 = vector.load %arg18[%c111, %c144_51] : memref<184x240xbf16, #tpu.memory_space<vmem>>, vector<8x48xbf16>
    tpu.vector_store %arg18[%c111, %c144_51], %85 {strides = array<i32>} : memref<184x240xbf16, #tpu.memory_space<vmem>>, vector<8x48xbf16>,
    %87 = vector.extract_strided_slice %26 {offsets = [48, 0], sizes = [8, 48], strides = [1, 1]} : vector<64x48xbf16> to vector<8x48xbf16>
    %c127 = arith.constant 127 : index
    %c144_52 = arith.constant 144 : index
    %88 = vector.load %arg18[%c127, %c144_52] : memref<184x240xbf16, #tpu.memory_space<vmem>>, vector<8x48xbf16>
    tpu.vector_store %arg18[%c127, %c144_52], %87 {strides = array<i32>} : memref<184x240xbf16, #tpu.memory_space<vmem>>, vector<8x48xbf16>,
    %89 = vector.extract_strided_slice %26 {offsets = [56, 0], sizes = [8, 48], strides = [1, 1]} : vector<64x48xbf16> to vector<8x48xbf16>
    %c143 = arith.constant 143 : index
    %c144_53 = arith.constant 144 : index
    %90 = vector.load %arg18[%c143, %c144_53] : memref<184x240xbf16, #tpu.memory_space<vmem>>, vector<8x48xbf16>
    tpu.vector_store %arg18[%c143, %c144_53], %89 {strides = array<i32>} : memref<184x240xbf16, #tpu.memory_space<vmem>>, vector<8x48xbf16>,
    %91 = vector.extract_strided_slice %26 {offsets = [0, 0], sizes = [8, 48], strides = [1, 1]} : vector<64x48xbf16> to vector<8x48xbf16>
    %c30 = arith.constant 30 : index
    %c192 = arith.constant 192 : index
    %92 = vector.load %arg18[%c30, %c192] : memref<184x240xbf16, #tpu.memory_space<vmem>>, vector<8x48xbf16>
    tpu.vector_store %arg18[%c30, %c192], %91 {strides = array<i32>} : memref<184x240xbf16, #tpu.memory_space<vmem>>, vector<8x48xbf16>,
    %93 = vector.extract_strided_slice %26 {offsets = [8, 0], sizes = [8, 48], strides = [1, 1]} : vector<64x48xbf16> to vector<8x48xbf16>
    %c46 = arith.constant 46 : index
    %c192_54 = arith.constant 192 : index
    %94 = vector.load %arg18[%c46, %c192_54] : memref<184x240xbf16, #tpu.memory_space<vmem>>, vector<8x48xbf16>
    tpu.vector_store %arg18[%c46, %c192_54], %93 {strides = array<i32>} : memref<184x240xbf16, #tpu.memory_space<vmem>>, vector<8x48xbf16>,
    %95 = vector.extract_strided_slice %26 {offsets = [16, 0], sizes = [8, 48], strides = [1, 1]} : vector<64x48xbf16> to vector<8x48xbf16>
    %c62 = arith.constant 62 : index
    %c192_55 = arith.constant 192 : index
    %96 = vector.load %arg18[%c62, %c192_55] : memref<184x240xbf16, #tpu.memory_space<vmem>>, vector<8x48xbf16>
    tpu.vector_store %arg18[%c62, %c192_55], %95 {strides = array<i32>} : memref<184x240xbf16, #tpu.memory_space<vmem>>, vector<8x48xbf16>,
    %97 = vector.extract_strided_slice %26 {offsets = [24, 0], sizes = [8, 48], strides = [1, 1]} : vector<64x48xbf16> to vector<8x48xbf16>
    %c78 = arith.constant 78 : index
    %c192_56 = arith.constant 192 : index
    %98 = vector.load %arg18[%c78, %c192_56] : memref<184x240xbf16, #tpu.memory_space<vmem>>, vector<8x48xbf16>
    tpu.vector_store %arg18[%c78, %c192_56], %97 {strides = array<i32>} : memref<184x240xbf16, #tpu.memory_space<vmem>>, vector<8x48xbf16>,
    %99 = vector.extract_strided_slice %26 {offsets = [32, 0], sizes = [8, 48], strides = [1, 1]} : vector<64x48xbf16> to vector<8x48xbf16>
    %c94 = arith.constant 94 : index
    %c192_57 = arith.constant 192 : index
    %100 = vector.load %arg18[%c94, %c192_57] : memref<184x240xbf16, #tpu.memory_space<vmem>>, vector<8x48xbf16>
    tpu.vector_store %arg18[%c94, %c192_57], %99 {strides = array<i32>} : memref<184x240xbf16, #tpu.memory_space<vmem>>, vector<8x48xbf16>,
    %101 = vector.extract_strided_slice %26 {offsets = [40, 0], sizes = [8, 48], strides = [1, 1]} : vector<64x48xbf16> to vector<8x48xbf16>
    %c110 = arith.constant 110 : index
    %c192_58 = arith.constant 192 : index
    %102 = vector.load %arg18[%c110, %c192_58] : memref<184x240xbf16, #tpu.memory_space<vmem>>, vector<8x48xbf16>
    tpu.vector_store %arg18[%c110, %c192_58], %101 {strides = array<i32>} : memref<184x240xbf16, #tpu.memory_space<vmem>>, vector<8x48xbf16>,
    %103 = vector.extract_strided_slice %26 {offsets = [48, 0], sizes = [8, 48], strides = [1, 1]} : vector<64x48xbf16> to vector<8x48xbf16>
    %c126 = arith.constant 126 : index
    %c192_59 = arith.constant 192 : index
    %104 = vector.load %arg18[%c126, %c192_59] : memref<184x240xbf16, #tpu.memory_space<vmem>>, vector<8x48xbf16>
    tpu.vector_store %arg18[%c126, %c192_59], %103 {strides = array<i32>} : memref<184x240xbf16, #tpu.memory_space<vmem>>, vector<8x48xbf16>,
    %105 = vector.extract_strided_slice %26 {offsets = [56, 0], sizes = [8, 48], strides = [1, 1]} : vector<64x48xbf16> to vector<8x48xbf16>
    %c142 = arith.constant 142 : index
    %c192_60 = arith.constant 192 : index
    %106 = vector.load %arg18[%c142, %c192_60] : memref<184x240xbf16, #tpu.memory_space<vmem>>, vector<8x48xbf16>
    tpu.vector_store %arg18[%c142, %c192_60], %105 {strides = array<i32>} : memref<184x240xbf16, #tpu.memory_space<vmem>>, vector<8x48xbf16>,
    %c0_61 = arith.constant 0 : index
    %c0_62 = arith.constant 0 : index
    %107 = vector.load %arg18[%c0_61, %c0_62] : memref<184x240xbf16, #tpu.memory_space<vmem>>, vector<120x240xbf16>
    %c0_63 = arith.constant 0 : index
    %c0_64 = arith.constant 0 : index
    %c0_65 = arith.constant 0 : index
    %108 = vector.load %arg6[%c0_63, %c0_64, %c0_65] : memref<5x240x64xbf16, #tpu.memory_space<vmem>>, vector<1x240x64xbf16>
    %109 = vector.shape_cast %108 : vector<1x240x64xbf16> to vector<240x64xbf16>
    %cst_66 = arith.constant dense<0.000000e+00> : vector<120x64xf32>
    %110 = tpu.matmul %107, %109, %cst_66 {dimension_numbers = #tpu.dot_dimension_numbers<[1], [0], [0], [1], [0, 0, 1, 1], [], []>} : vector<120x240xbf16>, vector<240x64xbf16>, vector<120x64xf32> -> vector<120x64xf32>
    %c16 = arith.constant 16 : index
    %c0_67 = arith.constant 0 : index
    %111 = vector.load %arg18[%c16, %c0_67] : memref<184x240xbf16, #tpu.memory_space<vmem>>, vector<120x240xbf16>
    %c1 = arith.constant 1 : index
    %c0_68 = arith.constant 0 : index
    %c0_69 = arith.constant 0 : index
    %112 = vector.load %arg6[%c1, %c0_68, %c0_69] : memref<5x240x64xbf16, #tpu.memory_space<vmem>>, vector<1x240x64xbf16>
    %113 = vector.shape_cast %112 : vector<1x240x64xbf16> to vector<240x64xbf16>
    %cst_70 = arith.constant dense<0.000000e+00> : vector<120x64xf32>
    %114 = tpu.matmul %111, %113, %cst_70 {dimension_numbers = #tpu.dot_dimension_numbers<[1], [0], [0], [1], [0, 0, 1, 1], [], []>} : vector<120x240xbf16>, vector<240x64xbf16>, vector<120x64xf32> -> vector<120x64xf32>
    %115 = arith.addf %110, %114 : vector<120x64xf32>
    %c32_71 = arith.constant 32 : index
    %c0_72 = arith.constant 0 : index
    %116 = vector.load %arg18[%c32_71, %c0_72] : memref<184x240xbf16, #tpu.memory_space<vmem>>, vector<120x240xbf16>
    %c2 = arith.constant 2 : index
    %c0_73 = arith.constant 0 : index
    %c0_74 = arith.constant 0 : index
    %117 = vector.load %arg6[%c2, %c0_73, %c0_74] : memref<5x240x64xbf16, #tpu.memory_space<vmem>>, vector<1x240x64xbf16>
    %118 = vector.shape_cast %117 : vector<1x240x64xbf16> to vector<240x64xbf16>
    %cst_75 = arith.constant dense<0.000000e+00> : vector<120x64xf32>
    %119 = tpu.matmul %116, %118, %cst_75 {dimension_numbers = #tpu.dot_dimension_numbers<[1], [0], [0], [1], [0, 0, 1, 1], [], []>} : vector<120x240xbf16>, vector<240x64xbf16>, vector<120x64xf32> -> vector<120x64xf32>
    %120 = arith.addf %115, %119 : vector<120x64xf32>
    %c48_76 = arith.constant 48 : index
    %c0_77 = arith.constant 0 : index
    %121 = vector.load %arg18[%c48_76, %c0_77] : memref<184x240xbf16, #tpu.memory_space<vmem>>, vector<120x240xbf16>
    %c3 = arith.constant 3 : index
    %c0_78 = arith.constant 0 : index
    %c0_79 = arith.constant 0 : index
    %122 = vector.load %arg6[%c3, %c0_78, %c0_79] : memref<5x240x64xbf16, #tpu.memory_space<vmem>>, vector<1x240x64xbf16>
    %123 = vector.shape_cast %122 : vector<1x240x64xbf16> to vector<240x64xbf16>
    %cst_80 = arith.constant dense<0.000000e+00> : vector<120x64xf32>
    %124 = tpu.matmul %121, %123, %cst_80 {dimension_numbers = #tpu.dot_dimension_numbers<[1], [0], [0], [1], [0, 0, 1, 1], [], []>} : vector<120x240xbf16>, vector<240x64xbf16>, vector<120x64xf32> -> vector<120x64xf32>
    %125 = arith.addf %120, %124 : vector<120x64xf32>
    %c64_81 = arith.constant 64 : index
    %c0_82 = arith.constant 0 : index
    %126 = vector.load %arg18[%c64_81, %c0_82] : memref<184x240xbf16, #tpu.memory_space<vmem>>, vector<120x240xbf16>
    %c4 = arith.constant 4 : index
    %c0_83 = arith.constant 0 : index
    %c0_84 = arith.constant 0 : index
    %127 = vector.load %arg6[%c4, %c0_83, %c0_84] : memref<5x240x64xbf16, #tpu.memory_space<vmem>>, vector<1x240x64xbf16>
    %128 = vector.shape_cast %127 : vector<1x240x64xbf16> to vector<240x64xbf16>
    %cst_85 = arith.constant dense<0.000000e+00> : vector<120x64xf32>
    %129 = tpu.matmul %126, %128, %cst_85 {dimension_numbers = #tpu.dot_dimension_numbers<[1], [0], [0], [1], [0, 0, 1, 1], [], []>} : vector<120x240xbf16>, vector<240x64xbf16>, vector<120x64xf32> -> vector<120x64xf32>
    %130 = arith.addf %125, %129 : vector<120x64xf32>
    %c0_86 = arith.constant 0 : index
    %c0_87 = arith.constant 0 : index
    %131 = vector.load %arg7[%c0_86, %c0_87] : memref<1x64xf32, #tpu.memory_space<vmem>>, vector<1x64xf32>
    %132 = vector.broadcast %131 : vector<1x64xf32> to vector<120x64xf32>
    %133 = arith.addf %130, %132 : vector<120x64xf32>
    %cst_88 = arith.constant 0.000000e+00 : f32
    %134 = vector.broadcast %cst_88 : f32 to vector<120x64xf32>
    %135 = arith.maximumf %133, %134 : vector<120x64xf32>
    %136 = arith.truncf %135 : vector<120x64xf32> to vector<120x64xbf16>
    %c0_89 = arith.constant 0 : index
    %c0_90 = arith.constant 0 : index
    %c0_91 = arith.constant 0 : index
    %137 = vector.load %arg15[%c0_89, %c0_90, %c0_91] : memref<1x120x64xbf16, #tpu.memory_space<vmem>>, vector<1x120x64xbf16>
    %138 = vector.shape_cast %137 : vector<1x120x64xbf16> to vector<120x64xbf16>
    %139 = vector.shape_cast %136 : vector<120x64xbf16> to vector<1x120x64xbf16>
    tpu.vector_store %arg15[%c0_89, %c0_90, %c0_91], %139 {strides = array<i32>} : memref<1x120x64xbf16, #tpu.memory_space<vmem>>, vector<1x120x64xbf16>,
    %140 = vector.extract_strided_slice %9 {offsets = [0, 256], sizes = [64, 64], strides = [1, 1]} : vector<64x512xf32> to vector<64x64xf32>
    %c0_92 = arith.constant 0 : index
    %c0_93 = arith.constant 0 : index
    %141 = vector.load %arg5[%c0_92, %c0_93] : memref<1x64xf32, #tpu.memory_space<vmem>>, vector<1x64xf32>
    %142 = vector.broadcast %141 : vector<1x64xf32> to vector<64x64xf32>
    %143 = arith.addf %140, %142 : vector<64x64xf32>
    %cst_94 = arith.constant 0.000000e+00 : f32
    %144 = vector.broadcast %cst_94 : f32 to vector<64x64xf32>
    %145 = arith.maximumf %143, %144 : vector<64x64xf32>
    %146 = arith.truncf %145 : vector<64x64xf32> to vector<64x64xbf16>
    %147 = vector.extract_strided_slice %146 {offsets = [0, 0], sizes = [8, 64], strides = [1, 1]} : vector<64x64xbf16> to vector<8x64xbf16>
    %c17 = arith.constant 17 : index
    %c0_95 = arith.constant 0 : index
    %148 = vector.load %arg19[%c17, %c0_95] : memref<152x192xbf16, #tpu.memory_space<vmem>>, vector<8x64xbf16>
    tpu.vector_store %arg19[%c17, %c0_95], %147 {strides = array<i32>} : memref<152x192xbf16, #tpu.memory_space<vmem>>, vector<8x64xbf16>,
    %149 = vector.extract_strided_slice %146 {offsets = [8, 0], sizes = [8, 64], strides = [1, 1]} : vector<64x64xbf16> to vector<8x64xbf16>
    %c33_96 = arith.constant 33 : index
    %c0_97 = arith.constant 0 : index
    %150 = vector.load %arg19[%c33_96, %c0_97] : memref<152x192xbf16, #tpu.memory_space<vmem>>, vector<8x64xbf16>
    tpu.vector_store %arg19[%c33_96, %c0_97], %149 {strides = array<i32>} : memref<152x192xbf16, #tpu.memory_space<vmem>>, vector<8x64xbf16>,
    %151 = vector.extract_strided_slice %146 {offsets = [16, 0], sizes = [8, 64], strides = [1, 1]} : vector<64x64xbf16> to vector<8x64xbf16>
    %c49_98 = arith.constant 49 : index
    %c0_99 = arith.constant 0 : index
    %152 = vector.load %arg19[%c49_98, %c0_99] : memref<152x192xbf16, #tpu.memory_space<vmem>>, vector<8x64xbf16>
    tpu.vector_store %arg19[%c49_98, %c0_99], %151 {strides = array<i32>} : memref<152x192xbf16, #tpu.memory_space<vmem>>, vector<8x64xbf16>,
    %153 = vector.extract_strided_slice %146 {offsets = [24, 0], sizes = [8, 64], strides = [1, 1]} : vector<64x64xbf16> to vector<8x64xbf16>
    %c65_100 = arith.constant 65 : index
    %c0_101 = arith.constant 0 : index
    %154 = vector.load %arg19[%c65_100, %c0_101] : memref<152x192xbf16, #tpu.memory_space<vmem>>, vector<8x64xbf16>
    tpu.vector_store %arg19[%c65_100, %c0_101], %153 {strides = array<i32>} : memref<152x192xbf16, #tpu.memory_space<vmem>>, vector<8x64xbf16>,
    %155 = vector.extract_strided_slice %146 {offsets = [32, 0], sizes = [8, 64], strides = [1, 1]} : vector<64x64xbf16> to vector<8x64xbf16>
    %c81_102 = arith.constant 81 : index
    %c0_103 = arith.constant 0 : index
    %156 = vector.load %arg19[%c81_102, %c0_103] : memref<152x192xbf16, #tpu.memory_space<vmem>>, vector<8x64xbf16>
    tpu.vector_store %arg19[%c81_102, %c0_103], %155 {strides = array<i32>} : memref<152x192xbf16, #tpu.memory_space<vmem>>, vector<8x64xbf16>,
    %157 = vector.extract_strided_slice %146 {offsets = [40, 0], sizes = [8, 64], strides = [1, 1]} : vector<64x64xbf16> to vector<8x64xbf16>
    %c97_104 = arith.constant 97 : index
    %c0_105 = arith.constant 0 : index
    %158 = vector.load %arg19[%c97_104, %c0_105] : memref<152x192xbf16, #tpu.memory_space<vmem>>, vector<8x64xbf16>
    tpu.vector_store %arg19[%c97_104, %c0_105], %157 {strides = array<i32>} : memref<152x192xbf16, #tpu.memory_space<vmem>>, vector<8x64xbf16>,
    %159 = vector.extract_strided_slice %146 {offsets = [48, 0], sizes = [8, 64], strides = [1, 1]} : vector<64x64xbf16> to vector<8x64xbf16>
    %c113_106 = arith.constant 113 : index
    %c0_107 = arith.constant 0 : index
    %160 = vector.load %arg19[%c113_106, %c0_107] : memref<152x192xbf16, #tpu.memory_space<vmem>>, vector<8x64xbf16>
    tpu.vector_store %arg19[%c113_106, %c0_107], %159 {strides = array<i32>} : memref<152x192xbf16, #tpu.memory_space<vmem>>, vector<8x64xbf16>,
    %161 = vector.extract_strided_slice %146 {offsets = [56, 0], sizes = [8, 64], strides = [1, 1]} : vector<64x64xbf16> to vector<8x64xbf16>
    %c129_108 = arith.constant 129 : index
    %c0_109 = arith.constant 0 : index
    %162 = vector.load %arg19[%c129_108, %c0_109] : memref<152x192xbf16, #tpu.memory_space<vmem>>, vector<8x64xbf16>
    tpu.vector_store %arg19[%c129_108, %c0_109], %161 {strides = array<i32>} : memref<152x192xbf16, #tpu.memory_space<vmem>>, vector<8x64xbf16>,
    %163 = vector.extract_strided_slice %146 {offsets = [0, 0], sizes = [8, 64], strides = [1, 1]} : vector<64x64xbf16> to vector<8x64xbf16>
    %c16_110 = arith.constant 16 : index
    %c64_111 = arith.constant 64 : index
    %164 = vector.load %arg19[%c16_110, %c64_111] : memref<152x192xbf16, #tpu.memory_space<vmem>>, vector<8x64xbf16>
    tpu.vector_store %arg19[%c16_110, %c64_111], %163 {strides = array<i32>} : memref<152x192xbf16, #tpu.memory_space<vmem>>, vector<8x64xbf16>,
    %165 = vector.extract_strided_slice %146 {offsets = [8, 0], sizes = [8, 64], strides = [1, 1]} : vector<64x64xbf16> to vector<8x64xbf16>
    %c32_112 = arith.constant 32 : index
    %c64_113 = arith.constant 64 : index
    %166 = vector.load %arg19[%c32_112, %c64_113] : memref<152x192xbf16, #tpu.memory_space<vmem>>, vector<8x64xbf16>
    tpu.vector_store %arg19[%c32_112, %c64_113], %165 {strides = array<i32>} : memref<152x192xbf16, #tpu.memory_space<vmem>>, vector<8x64xbf16>,
    %167 = vector.extract_strided_slice %146 {offsets = [16, 0], sizes = [8, 64], strides = [1, 1]} : vector<64x64xbf16> to vector<8x64xbf16>
    %c48_114 = arith.constant 48 : index
    %c64_115 = arith.constant 64 : index
    %168 = vector.load %arg19[%c48_114, %c64_115] : memref<152x192xbf16, #tpu.memory_space<vmem>>, vector<8x64xbf16>
    tpu.vector_store %arg19[%c48_114, %c64_115], %167 {strides = array<i32>} : memref<152x192xbf16, #tpu.memory_space<vmem>>, vector<8x64xbf16>,
    %169 = vector.extract_strided_slice %146 {offsets = [24, 0], sizes = [8, 64], strides = [1, 1]} : vector<64x64xbf16> to vector<8x64xbf16>
    %c64_116 = arith.constant 64 : index
    %c64_117 = arith.constant 64 : index
    %170 = vector.load %arg19[%c64_116, %c64_117] : memref<152x192xbf16, #tpu.memory_space<vmem>>, vector<8x64xbf16>
    tpu.vector_store %arg19[%c64_116, %c64_117], %169 {strides = array<i32>} : memref<152x192xbf16, #tpu.memory_space<vmem>>, vector<8x64xbf16>,
    %171 = vector.extract_strided_slice %146 {offsets = [32, 0], sizes = [8, 64], strides = [1, 1]} : vector<64x64xbf16> to vector<8x64xbf16>
    %c80_118 = arith.constant 80 : index
    %c64_119 = arith.constant 64 : index
    %172 = vector.load %arg19[%c80_118, %c64_119] : memref<152x192xbf16, #tpu.memory_space<vmem>>, vector<8x64xbf16>
    tpu.vector_store %arg19[%c80_118, %c64_119], %171 {strides = array<i32>} : memref<152x192xbf16, #tpu.memory_space<vmem>>, vector<8x64xbf16>,
    %173 = vector.extract_strided_slice %146 {offsets = [40, 0], sizes = [8, 64], strides = [1, 1]} : vector<64x64xbf16> to vector<8x64xbf16>
    %c96_120 = arith.constant 96 : index
    %c64_121 = arith.constant 64 : index
    %174 = vector.load %arg19[%c96_120, %c64_121] : memref<152x192xbf16, #tpu.memory_space<vmem>>, vector<8x64xbf16>
    tpu.vector_store %arg19[%c96_120, %c64_121], %173 {strides = array<i32>} : memref<152x192xbf16, #tpu.memory_space<vmem>>, vector<8x64xbf16>,
    %175 = vector.extract_strided_slice %146 {offsets = [48, 0], sizes = [8, 64], strides = [1, 1]} : vector<64x64xbf16> to vector<8x64xbf16>
    %c112_122 = arith.constant 112 : index
    %c64_123 = arith.constant 64 : index
    %176 = vector.load %arg19[%c112_122, %c64_123] : memref<152x192xbf16, #tpu.memory_space<vmem>>, vector<8x64xbf16>
    tpu.vector_store %arg19[%c112_122, %c64_123], %175 {strides = array<i32>} : memref<152x192xbf16, #tpu.memory_space<vmem>>, vector<8x64xbf16>,
    %177 = vector.extract_strided_slice %146 {offsets = [56, 0], sizes = [8, 64], strides = [1, 1]} : vector<64x64xbf16> to vector<8x64xbf16>
    %c128_124 = arith.constant 128 : index
    %c64_125 = arith.constant 64 : index
    %178 = vector.load %arg19[%c128_124, %c64_125] : memref<152x192xbf16, #tpu.memory_space<vmem>>, vector<8x64xbf16>
    tpu.vector_store %arg19[%c128_124, %c64_125], %177 {strides = array<i32>} : memref<152x192xbf16, #tpu.memory_space<vmem>>, vector<8x64xbf16>,
    %179 = vector.extract_strided_slice %146 {offsets = [0, 0], sizes = [8, 64], strides = [1, 1]} : vector<64x64xbf16> to vector<8x64xbf16>
    %c15 = arith.constant 15 : index
    %c128_126 = arith.constant 128 : index
    %180 = vector.load %arg19[%c15, %c128_126] : memref<152x192xbf16, #tpu.memory_space<vmem>>, vector<8x64xbf16>
    tpu.vector_store %arg19[%c15, %c128_126], %179 {strides = array<i32>} : memref<152x192xbf16, #tpu.memory_space<vmem>>, vector<8x64xbf16>,
    %181 = vector.extract_strided_slice %146 {offsets = [8, 0], sizes = [8, 64], strides = [1, 1]} : vector<64x64xbf16> to vector<8x64xbf16>
    %c31_127 = arith.constant 31 : index
    %c128_128 = arith.constant 128 : index
    %182 = vector.load %arg19[%c31_127, %c128_128] : memref<152x192xbf16, #tpu.memory_space<vmem>>, vector<8x64xbf16>
    tpu.vector_store %arg19[%c31_127, %c128_128], %181 {strides = array<i32>} : memref<152x192xbf16, #tpu.memory_space<vmem>>, vector<8x64xbf16>,
    %183 = vector.extract_strided_slice %146 {offsets = [16, 0], sizes = [8, 64], strides = [1, 1]} : vector<64x64xbf16> to vector<8x64xbf16>
    %c47_129 = arith.constant 47 : index
    %c128_130 = arith.constant 128 : index
    %184 = vector.load %arg19[%c47_129, %c128_130] : memref<152x192xbf16, #tpu.memory_space<vmem>>, vector<8x64xbf16>
    tpu.vector_store %arg19[%c47_129, %c128_130], %183 {strides = array<i32>} : memref<152x192xbf16, #tpu.memory_space<vmem>>, vector<8x64xbf16>,
    %185 = vector.extract_strided_slice %146 {offsets = [24, 0], sizes = [8, 64], strides = [1, 1]} : vector<64x64xbf16> to vector<8x64xbf16>
    %c63_131 = arith.constant 63 : index
    %c128_132 = arith.constant 128 : index
    %186 = vector.load %arg19[%c63_131, %c128_132] : memref<152x192xbf16, #tpu.memory_space<vmem>>, vector<8x64xbf16>
    tpu.vector_store %arg19[%c63_131, %c128_132], %185 {strides = array<i32>} : memref<152x192xbf16, #tpu.memory_space<vmem>>, vector<8x64xbf16>,
    %187 = vector.extract_strided_slice %146 {offsets = [32, 0], sizes = [8, 64], strides = [1, 1]} : vector<64x64xbf16> to vector<8x64xbf16>
    %c79_133 = arith.constant 79 : index
    %c128_134 = arith.constant 128 : index
    %188 = vector.load %arg19[%c79_133, %c128_134] : memref<152x192xbf16, #tpu.memory_space<vmem>>, vector<8x64xbf16>
    tpu.vector_store %arg19[%c79_133, %c128_134], %187 {strides = array<i32>} : memref<152x192xbf16, #tpu.memory_space<vmem>>, vector<8x64xbf16>,
    %189 = vector.extract_strided_slice %146 {offsets = [40, 0], sizes = [8, 64], strides = [1, 1]} : vector<64x64xbf16> to vector<8x64xbf16>
    %c95_135 = arith.constant 95 : index
    %c128_136 = arith.constant 128 : index
    %190 = vector.load %arg19[%c95_135, %c128_136] : memref<152x192xbf16, #tpu.memory_space<vmem>>, vector<8x64xbf16>
    tpu.vector_store %arg19[%c95_135, %c128_136], %189 {strides = array<i32>} : memref<152x192xbf16, #tpu.memory_space<vmem>>, vector<8x64xbf16>,
    %191 = vector.extract_strided_slice %146 {offsets = [48, 0], sizes = [8, 64], strides = [1, 1]} : vector<64x64xbf16> to vector<8x64xbf16>
    %c111_137 = arith.constant 111 : index
    %c128_138 = arith.constant 128 : index
    %192 = vector.load %arg19[%c111_137, %c128_138] : memref<152x192xbf16, #tpu.memory_space<vmem>>, vector<8x64xbf16>
    tpu.vector_store %arg19[%c111_137, %c128_138], %191 {strides = array<i32>} : memref<152x192xbf16, #tpu.memory_space<vmem>>, vector<8x64xbf16>,
    %193 = vector.extract_strided_slice %146 {offsets = [56, 0], sizes = [8, 64], strides = [1, 1]} : vector<64x64xbf16> to vector<8x64xbf16>
    %c127_139 = arith.constant 127 : index
    %c128_140 = arith.constant 128 : index
    %194 = vector.load %arg19[%c127_139, %c128_140] : memref<152x192xbf16, #tpu.memory_space<vmem>>, vector<8x64xbf16>
    tpu.vector_store %arg19[%c127_139, %c128_140], %193 {strides = array<i32>} : memref<152x192xbf16, #tpu.memory_space<vmem>>, vector<8x64xbf16>,
    %c0_141 = arith.constant 0 : index
    %c0_142 = arith.constant 0 : index
    %195 = vector.load %arg19[%c0_141, %c0_142] : memref<152x192xbf16, #tpu.memory_space<vmem>>, vector<120x192xbf16>
    %c0_143 = arith.constant 0 : index
    %c0_144 = arith.constant 0 : index
    %c0_145 = arith.constant 0 : index
    %196 = vector.load %arg8[%c0_143, %c0_144, %c0_145] : memref<3x192x96xbf16, #tpu.memory_space<vmem>>, vector<1x192x96xbf16>
    %197 = vector.shape_cast %196 : vector<1x192x96xbf16> to vector<192x96xbf16>
    %cst_146 = arith.constant dense<0.000000e+00> : vector<120x96xf32>
    %198 = tpu.matmul %195, %197, %cst_146 {dimension_numbers = #tpu.dot_dimension_numbers<[1], [0], [0], [1], [0, 0, 1, 1], [], []>} : vector<120x192xbf16>, vector<192x96xbf16>, vector<120x96xf32> -> vector<120x96xf32>
    %c16_147 = arith.constant 16 : index
    %c0_148 = arith.constant 0 : index
    %199 = vector.load %arg19[%c16_147, %c0_148] : memref<152x192xbf16, #tpu.memory_space<vmem>>, vector<120x192xbf16>
    %c1_149 = arith.constant 1 : index
    %c0_150 = arith.constant 0 : index
    %c0_151 = arith.constant 0 : index
    %200 = vector.load %arg8[%c1_149, %c0_150, %c0_151] : memref<3x192x96xbf16, #tpu.memory_space<vmem>>, vector<1x192x96xbf16>
    %201 = vector.shape_cast %200 : vector<1x192x96xbf16> to vector<192x96xbf16>
    %cst_152 = arith.constant dense<0.000000e+00> : vector<120x96xf32>
    %202 = tpu.matmul %199, %201, %cst_152 {dimension_numbers = #tpu.dot_dimension_numbers<[1], [0], [0], [1], [0, 0, 1, 1], [], []>} : vector<120x192xbf16>, vector<192x96xbf16>, vector<120x96xf32> -> vector<120x96xf32>
    %203 = arith.addf %198, %202 : vector<120x96xf32>
    %c32_153 = arith.constant 32 : index
    %c0_154 = arith.constant 0 : index
    %204 = vector.load %arg19[%c32_153, %c0_154] : memref<152x192xbf16, #tpu.memory_space<vmem>>, vector<120x192xbf16>
    %c2_155 = arith.constant 2 : index
    %c0_156 = arith.constant 0 : index
    %c0_157 = arith.constant 0 : index
    %205 = vector.load %arg8[%c2_155, %c0_156, %c0_157] : memref<3x192x96xbf16, #tpu.memory_space<vmem>>, vector<1x192x96xbf16>
    %206 = vector.shape_cast %205 : vector<1x192x96xbf16> to vector<192x96xbf16>
    %cst_158 = arith.constant dense<0.000000e+00> : vector<120x96xf32>
    %207 = tpu.matmul %204, %206, %cst_158 {dimension_numbers = #tpu.dot_dimension_numbers<[1], [0], [0], [1], [0, 0, 1, 1], [], []>} : vector<120x192xbf16>, vector<192x96xbf16>, vector<120x96xf32> -> vector<120x96xf32>
    %208 = arith.addf %203, %207 : vector<120x96xf32>
    %c0_159 = arith.constant 0 : index
    %c0_160 = arith.constant 0 : index
    %209 = vector.load %arg9[%c0_159, %c0_160] : memref<1x96xf32, #tpu.memory_space<vmem>>, vector<1x96xf32>
    %210 = vector.broadcast %209 : vector<1x96xf32> to vector<120x96xf32>
    %211 = arith.addf %208, %210 : vector<120x96xf32>
    %cst_161 = arith.constant 0.000000e+00 : f32
    %212 = vector.broadcast %cst_161 : f32 to vector<120x96xf32>
    %213 = arith.maximumf %211, %212 : vector<120x96xf32>
    %214 = arith.truncf %213 : vector<120x96xf32> to vector<120x96xbf16>
    %215 = vector.extract_strided_slice %214 {offsets = [0, 0], sizes = [8, 96], strides = [1, 1]} : vector<120x96xbf16> to vector<8x96xbf16>
    %c17_162 = arith.constant 17 : index
    %c0_163 = arith.constant 0 : index
    %216 = vector.load %arg20[%c17_162, %c0_163] : memref<152x288xbf16, #tpu.memory_space<vmem>>, vector<8x96xbf16>
    tpu.vector_store %arg20[%c17_162, %c0_163], %215 {strides = array<i32>} : memref<152x288xbf16, #tpu.memory_space<vmem>>, vector<8x96xbf16>,
    %217 = vector.extract_strided_slice %214 {offsets = [16, 0], sizes = [8, 96], strides = [1, 1]} : vector<120x96xbf16> to vector<8x96xbf16>
    %c33_164 = arith.constant 33 : index
    %c0_165 = arith.constant 0 : index
    %218 = vector.load %arg20[%c33_164, %c0_165] : memref<152x288xbf16, #tpu.memory_space<vmem>>, vector<8x96xbf16>
    tpu.vector_store %arg20[%c33_164, %c0_165], %217 {strides = array<i32>} : memref<152x288xbf16, #tpu.memory_space<vmem>>, vector<8x96xbf16>,
    %219 = vector.extract_strided_slice %214 {offsets = [32, 0], sizes = [8, 96], strides = [1, 1]} : vector<120x96xbf16> to vector<8x96xbf16>
    %c49_166 = arith.constant 49 : index
    %c0_167 = arith.constant 0 : index
    %220 = vector.load %arg20[%c49_166, %c0_167] : memref<152x288xbf16, #tpu.memory_space<vmem>>, vector<8x96xbf16>
    tpu.vector_store %arg20[%c49_166, %c0_167], %219 {strides = array<i32>} : memref<152x288xbf16, #tpu.memory_space<vmem>>, vector<8x96xbf16>,
    %221 = vector.extract_strided_slice %214 {offsets = [48, 0], sizes = [8, 96], strides = [1, 1]} : vector<120x96xbf16> to vector<8x96xbf16>
    %c65_168 = arith.constant 65 : index
    %c0_169 = arith.constant 0 : index
    %222 = vector.load %arg20[%c65_168, %c0_169] : memref<152x288xbf16, #tpu.memory_space<vmem>>, vector<8x96xbf16>
    tpu.vector_store %arg20[%c65_168, %c0_169], %221 {strides = array<i32>} : memref<152x288xbf16, #tpu.memory_space<vmem>>, vector<8x96xbf16>,
    %223 = vector.extract_strided_slice %214 {offsets = [64, 0], sizes = [8, 96], strides = [1, 1]} : vector<120x96xbf16> to vector<8x96xbf16>
    %c81_170 = arith.constant 81 : index
    %c0_171 = arith.constant 0 : index
    %224 = vector.load %arg20[%c81_170, %c0_171] : memref<152x288xbf16, #tpu.memory_space<vmem>>, vector<8x96xbf16>
    tpu.vector_store %arg20[%c81_170, %c0_171], %223 {strides = array<i32>} : memref<152x288xbf16, #tpu.memory_space<vmem>>, vector<8x96xbf16>,
    %225 = vector.extract_strided_slice %214 {offsets = [80, 0], sizes = [8, 96], strides = [1, 1]} : vector<120x96xbf16> to vector<8x96xbf16>
    %c97_172 = arith.constant 97 : index
    %c0_173 = arith.constant 0 : index
    %226 = vector.load %arg20[%c97_172, %c0_173] : memref<152x288xbf16, #tpu.memory_space<vmem>>, vector<8x96xbf16>
    tpu.vector_store %arg20[%c97_172, %c0_173], %225 {strides = array<i32>} : memref<152x288xbf16, #tpu.memory_space<vmem>>, vector<8x96xbf16>,
    %227 = vector.extract_strided_slice %214 {offsets = [96, 0], sizes = [8, 96], strides = [1, 1]} : vector<120x96xbf16> to vector<8x96xbf16>
    %c113_174 = arith.constant 113 : index
    %c0_175 = arith.constant 0 : index
    %228 = vector.load %arg20[%c113_174, %c0_175] : memref<152x288xbf16, #tpu.memory_space<vmem>>, vector<8x96xbf16>
    tpu.vector_store %arg20[%c113_174, %c0_175], %227 {strides = array<i32>} : memref<152x288xbf16, #tpu.memory_space<vmem>>, vector<8x96xbf16>,
    %229 = vector.extract_strided_slice %214 {offsets = [112, 0], sizes = [8, 96], strides = [1, 1]} : vector<120x96xbf16> to vector<8x96xbf16>
    %c129_176 = arith.constant 129 : index
    %c0_177 = arith.constant 0 : index
    %230 = vector.load %arg20[%c129_176, %c0_177] : memref<152x288xbf16, #tpu.memory_space<vmem>>, vector<8x96xbf16>
    tpu.vector_store %arg20[%c129_176, %c0_177], %229 {strides = array<i32>} : memref<152x288xbf16, #tpu.memory_space<vmem>>, vector<8x96xbf16>,
    %231 = vector.extract_strided_slice %214 {offsets = [0, 0], sizes = [8, 96], strides = [1, 1]} : vector<120x96xbf16> to vector<8x96xbf16>
    %c16_178 = arith.constant 16 : index
    %c96_179 = arith.constant 96 : index
    %232 = vector.load %arg20[%c16_178, %c96_179] : memref<152x288xbf16, #tpu.memory_space<vmem>>, vector<8x96xbf16>
    tpu.vector_store %arg20[%c16_178, %c96_179], %231 {strides = array<i32>} : memref<152x288xbf16, #tpu.memory_space<vmem>>, vector<8x96xbf16>,
    %233 = vector.extract_strided_slice %214 {offsets = [16, 0], sizes = [8, 96], strides = [1, 1]} : vector<120x96xbf16> to vector<8x96xbf16>
    %c32_180 = arith.constant 32 : index
    %c96_181 = arith.constant 96 : index
    %234 = vector.load %arg20[%c32_180, %c96_181] : memref<152x288xbf16, #tpu.memory_space<vmem>>, vector<8x96xbf16>
    tpu.vector_store %arg20[%c32_180, %c96_181], %233 {strides = array<i32>} : memref<152x288xbf16, #tpu.memory_space<vmem>>, vector<8x96xbf16>,
    %235 = vector.extract_strided_slice %214 {offsets = [32, 0], sizes = [8, 96], strides = [1, 1]} : vector<120x96xbf16> to vector<8x96xbf16>
    %c48_182 = arith.constant 48 : index
    %c96_183 = arith.constant 96 : index
    %236 = vector.load %arg20[%c48_182, %c96_183] : memref<152x288xbf16, #tpu.memory_space<vmem>>, vector<8x96xbf16>
    tpu.vector_store %arg20[%c48_182, %c96_183], %235 {strides = array<i32>} : memref<152x288xbf16, #tpu.memory_space<vmem>>, vector<8x96xbf16>,
    %237 = vector.extract_strided_slice %214 {offsets = [48, 0], sizes = [8, 96], strides = [1, 1]} : vector<120x96xbf16> to vector<8x96xbf16>
    %c64_184 = arith.constant 64 : index
    %c96_185 = arith.constant 96 : index
    %238 = vector.load %arg20[%c64_184, %c96_185] : memref<152x288xbf16, #tpu.memory_space<vmem>>, vector<8x96xbf16>
    tpu.vector_store %arg20[%c64_184, %c96_185], %237 {strides = array<i32>} : memref<152x288xbf16, #tpu.memory_space<vmem>>, vector<8x96xbf16>,
    %239 = vector.extract_strided_slice %214 {offsets = [64, 0], sizes = [8, 96], strides = [1, 1]} : vector<120x96xbf16> to vector<8x96xbf16>
    %c80_186 = arith.constant 80 : index
    %c96_187 = arith.constant 96 : index
    %240 = vector.load %arg20[%c80_186, %c96_187] : memref<152x288xbf16, #tpu.memory_space<vmem>>, vector<8x96xbf16>
    tpu.vector_store %arg20[%c80_186, %c96_187], %239 {strides = array<i32>} : memref<152x288xbf16, #tpu.memory_space<vmem>>, vector<8x96xbf16>,
    %241 = vector.extract_strided_slice %214 {offsets = [80, 0], sizes = [8, 96], strides = [1, 1]} : vector<120x96xbf16> to vector<8x96xbf16>
    %c96_188 = arith.constant 96 : index
    %c96_189 = arith.constant 96 : index
    %242 = vector.load %arg20[%c96_188, %c96_189] : memref<152x288xbf16, #tpu.memory_space<vmem>>, vector<8x96xbf16>
    tpu.vector_store %arg20[%c96_188, %c96_189], %241 {strides = array<i32>} : memref<152x288xbf16, #tpu.memory_space<vmem>>, vector<8x96xbf16>,
    %243 = vector.extract_strided_slice %214 {offsets = [96, 0], sizes = [8, 96], strides = [1, 1]} : vector<120x96xbf16> to vector<8x96xbf16>
    %c112_190 = arith.constant 112 : index
    %c96_191 = arith.constant 96 : index
    %244 = vector.load %arg20[%c112_190, %c96_191] : memref<152x288xbf16, #tpu.memory_space<vmem>>, vector<8x96xbf16>
    tpu.vector_store %arg20[%c112_190, %c96_191], %243 {strides = array<i32>} : memref<152x288xbf16, #tpu.memory_space<vmem>>, vector<8x96xbf16>,
    %245 = vector.extract_strided_slice %214 {offsets = [112, 0], sizes = [8, 96], strides = [1, 1]} : vector<120x96xbf16> to vector<8x96xbf16>
    %c128_192 = arith.constant 128 : index
    %c96_193 = arith.constant 96 : index
    %246 = vector.load %arg20[%c128_192, %c96_193] : memref<152x288xbf16, #tpu.memory_space<vmem>>, vector<8x96xbf16>
    tpu.vector_store %arg20[%c128_192, %c96_193], %245 {strides = array<i32>} : memref<152x288xbf16, #tpu.memory_space<vmem>>, vector<8x96xbf16>,
    %247 = vector.extract_strided_slice %214 {offsets = [0, 0], sizes = [8, 96], strides = [1, 1]} : vector<120x96xbf16> to vector<8x96xbf16>
    %c15_194 = arith.constant 15 : index
    %c192_195 = arith.constant 192 : index
    %248 = vector.load %arg20[%c15_194, %c192_195] : memref<152x288xbf16, #tpu.memory_space<vmem>>, vector<8x96xbf16>
    tpu.vector_store %arg20[%c15_194, %c192_195], %247 {strides = array<i32>} : memref<152x288xbf16, #tpu.memory_space<vmem>>, vector<8x96xbf16>,
    %249 = vector.extract_strided_slice %214 {offsets = [16, 0], sizes = [8, 96], strides = [1, 1]} : vector<120x96xbf16> to vector<8x96xbf16>
    %c31_196 = arith.constant 31 : index
    %c192_197 = arith.constant 192 : index
    %250 = vector.load %arg20[%c31_196, %c192_197] : memref<152x288xbf16, #tpu.memory_space<vmem>>, vector<8x96xbf16>
    tpu.vector_store %arg20[%c31_196, %c192_197], %249 {strides = array<i32>} : memref<152x288xbf16, #tpu.memory_space<vmem>>, vector<8x96xbf16>,
    %251 = vector.extract_strided_slice %214 {offsets = [32, 0], sizes = [8, 96], strides = [1, 1]} : vector<120x96xbf16> to vector<8x96xbf16>
    %c47_198 = arith.constant 47 : index
    %c192_199 = arith.constant 192 : index
    %252 = vector.load %arg20[%c47_198, %c192_199] : memref<152x288xbf16, #tpu.memory_space<vmem>>, vector<8x96xbf16>
    tpu.vector_store %arg20[%c47_198, %c192_199], %251 {strides = array<i32>} : memref<152x288xbf16, #tpu.memory_space<vmem>>, vector<8x96xbf16>,
    %253 = vector.extract_strided_slice %214 {offsets = [48, 0], sizes = [8, 96], strides = [1, 1]} : vector<120x96xbf16> to vector<8x96xbf16>
    %c63_200 = arith.constant 63 : index
    %c192_201 = arith.constant 192 : index
    %254 = vector.load %arg20[%c63_200, %c192_201] : memref<152x288xbf16, #tpu.memory_space<vmem>>, vector<8x96xbf16>
    tpu.vector_store %arg20[%c63_200, %c192_201], %253 {strides = array<i32>} : memref<152x288xbf16, #tpu.memory_space<vmem>>, vector<8x96xbf16>,
    %255 = vector.extract_strided_slice %214 {offsets = [64, 0], sizes = [8, 96], strides = [1, 1]} : vector<120x96xbf16> to vector<8x96xbf16>
    %c79_202 = arith.constant 79 : index
    %c192_203 = arith.constant 192 : index
    %256 = vector.load %arg20[%c79_202, %c192_203] : memref<152x288xbf16, #tpu.memory_space<vmem>>, vector<8x96xbf16>
    tpu.vector_store %arg20[%c79_202, %c192_203], %255 {strides = array<i32>} : memref<152x288xbf16, #tpu.memory_space<vmem>>, vector<8x96xbf16>,
    %257 = vector.extract_strided_slice %214 {offsets = [80, 0], sizes = [8, 96], strides = [1, 1]} : vector<120x96xbf16> to vector<8x96xbf16>
    %c95_204 = arith.constant 95 : index
    %c192_205 = arith.constant 192 : index
    %258 = vector.load %arg20[%c95_204, %c192_205] : memref<152x288xbf16, #tpu.memory_space<vmem>>, vector<8x96xbf16>
    tpu.vector_store %arg20[%c95_204, %c192_205], %257 {strides = array<i32>} : memref<152x288xbf16, #tpu.memory_space<vmem>>, vector<8x96xbf16>,
    %259 = vector.extract_strided_slice %214 {offsets = [96, 0], sizes = [8, 96], strides = [1, 1]} : vector<120x96xbf16> to vector<8x96xbf16>
    %c111_206 = arith.constant 111 : index
    %c192_207 = arith.constant 192 : index
    %260 = vector.load %arg20[%c111_206, %c192_207] : memref<152x288xbf16, #tpu.memory_space<vmem>>, vector<8x96xbf16>
    tpu.vector_store %arg20[%c111_206, %c192_207], %259 {strides = array<i32>} : memref<152x288xbf16, #tpu.memory_space<vmem>>, vector<8x96xbf16>,
    %261 = vector.extract_strided_slice %214 {offsets = [112, 0], sizes = [8, 96], strides = [1, 1]} : vector<120x96xbf16> to vector<8x96xbf16>
    %c127_208 = arith.constant 127 : index
    %c192_209 = arith.constant 192 : index
    %262 = vector.load %arg20[%c127_208, %c192_209] : memref<152x288xbf16, #tpu.memory_space<vmem>>, vector<8x96xbf16>
    tpu.vector_store %arg20[%c127_208, %c192_209], %261 {strides = array<i32>} : memref<152x288xbf16, #tpu.memory_space<vmem>>, vector<8x96xbf16>,
    %c0_210 = arith.constant 0 : index
    %c0_211 = arith.constant 0 : index
    %263 = vector.load %arg20[%c0_210, %c0_211] : memref<152x288xbf16, #tpu.memory_space<vmem>>, vector<120x288xbf16>
    %c0_212 = arith.constant 0 : index
    %c0_213 = arith.constant 0 : index
    %c0_214 = arith.constant 0 : index
    %264 = vector.load %arg10[%c0_212, %c0_213, %c0_214] : memref<3x288x96xbf16, #tpu.memory_space<vmem>>, vector<1x288x96xbf16>
    %265 = vector.shape_cast %264 : vector<1x288x96xbf16> to vector<288x96xbf16>
    %cst_215 = arith.constant dense<0.000000e+00> : vector<120x96xf32>
    %266 = tpu.matmul %263, %265, %cst_215 {dimension_numbers = #tpu.dot_dimension_numbers<[1], [0], [0], [1], [0, 0, 1, 1], [], []>} : vector<120x288xbf16>, vector<288x96xbf16>, vector<120x96xf32> -> vector<120x96xf32>
    %c16_216 = arith.constant 16 : index
    %c0_217 = arith.constant 0 : index
    %267 = vector.load %arg20[%c16_216, %c0_217] : memref<152x288xbf16, #tpu.memory_space<vmem>>, vector<120x288xbf16>
    %c1_218 = arith.constant 1 : index
    %c0_219 = arith.constant 0 : index
    %c0_220 = arith.constant 0 : index
    %268 = vector.load %arg10[%c1_218, %c0_219, %c0_220] : memref<3x288x96xbf16, #tpu.memory_space<vmem>>, vector<1x288x96xbf16>
    %269 = vector.shape_cast %268 : vector<1x288x96xbf16> to vector<288x96xbf16>
    %cst_221 = arith.constant dense<0.000000e+00> : vector<120x96xf32>
    %270 = tpu.matmul %267, %269, %cst_221 {dimension_numbers = #tpu.dot_dimension_numbers<[1], [0], [0], [1], [0, 0, 1, 1], [], []>} : vector<120x288xbf16>, vector<288x96xbf16>, vector<120x96xf32> -> vector<120x96xf32>
    %271 = arith.addf %266, %270 : vector<120x96xf32>
    %c32_222 = arith.constant 32 : index
    %c0_223 = arith.constant 0 : index
    %272 = vector.load %arg20[%c32_222, %c0_223] : memref<152x288xbf16, #tpu.memory_space<vmem>>, vector<120x288xbf16>
    %c2_224 = arith.constant 2 : index
    %c0_225 = arith.constant 0 : index
    %c0_226 = arith.constant 0 : index
    %273 = vector.load %arg10[%c2_224, %c0_225, %c0_226] : memref<3x288x96xbf16, #tpu.memory_space<vmem>>, vector<1x288x96xbf16>
    %274 = vector.shape_cast %273 : vector<1x288x96xbf16> to vector<288x96xbf16>
    %cst_227 = arith.constant dense<0.000000e+00> : vector<120x96xf32>
    %275 = tpu.matmul %272, %274, %cst_227 {dimension_numbers = #tpu.dot_dimension_numbers<[1], [0], [0], [1], [0, 0, 1, 1], [], []>} : vector<120x288xbf16>, vector<288x96xbf16>, vector<120x96xf32> -> vector<120x96xf32>
    %276 = arith.addf %271, %275 : vector<120x96xf32>
    %c0_228 = arith.constant 0 : index
    %c0_229 = arith.constant 0 : index
    %277 = vector.load %arg11[%c0_228, %c0_229] : memref<1x96xf32, #tpu.memory_space<vmem>>, vector<1x96xf32>
    %278 = vector.broadcast %277 : vector<1x96xf32> to vector<120x96xf32>
    %279 = arith.addf %276, %278 : vector<120x96xf32>
    %cst_230 = arith.constant 0.000000e+00 : f32
    %280 = vector.broadcast %cst_230 : f32 to vector<120x96xf32>
    %281 = arith.maximumf %279, %280 : vector<120x96xf32>
    %282 = arith.truncf %281 : vector<120x96xf32> to vector<120x96xbf16>
    %c0_231 = arith.constant 0 : index
    %c0_232 = arith.constant 0 : index
    %c0_233 = arith.constant 0 : index
    %283 = vector.load %arg16[%c0_231, %c0_232, %c0_233] : memref<1x120x96xbf16, #tpu.memory_space<vmem>>, vector<1x120x96xbf16>
    %284 = vector.shape_cast %283 : vector<1x120x96xbf16> to vector<120x96xbf16>
    %285 = vector.shape_cast %282 : vector<120x96xbf16> to vector<1x120x96xbf16>
    tpu.vector_store %arg16[%c0_231, %c0_232, %c0_233], %285 {strides = array<i32>} : memref<1x120x96xbf16, #tpu.memory_space<vmem>>, vector<1x120x96xbf16>,
    %286 = vector.extract_strided_slice %9 {offsets = [0, 384], sizes = [64, 64], strides = [1, 1]} : vector<64x512xf32> to vector<64x64xf32>
    %287 = arith.truncf %286 : vector<64x64xf32> to vector<64x64xbf16>
    %288 = vector.extract_strided_slice %287 {offsets = [0, 0], sizes = [8, 64], strides = [1, 1]} : vector<64x64xbf16> to vector<8x64xbf16>
    %c17_234 = arith.constant 17 : index
    %c0_235 = arith.constant 0 : index
    %289 = vector.load %arg19[%c17_234, %c0_235] : memref<152x192xbf16, #tpu.memory_space<vmem>>, vector<8x64xbf16>
    tpu.vector_store %arg19[%c17_234, %c0_235], %288 {strides = array<i32>} : memref<152x192xbf16, #tpu.memory_space<vmem>>, vector<8x64xbf16>,
    %290 = vector.extract_strided_slice %287 {offsets = [8, 0], sizes = [8, 64], strides = [1, 1]} : vector<64x64xbf16> to vector<8x64xbf16>
    %c33_236 = arith.constant 33 : index
    %c0_237 = arith.constant 0 : index
    %291 = vector.load %arg19[%c33_236, %c0_237] : memref<152x192xbf16, #tpu.memory_space<vmem>>, vector<8x64xbf16>
    tpu.vector_store %arg19[%c33_236, %c0_237], %290 {strides = array<i32>} : memref<152x192xbf16, #tpu.memory_space<vmem>>, vector<8x64xbf16>,
    %292 = vector.extract_strided_slice %287 {offsets = [16, 0], sizes = [8, 64], strides = [1, 1]} : vector<64x64xbf16> to vector<8x64xbf16>
    %c49_238 = arith.constant 49 : index
    %c0_239 = arith.constant 0 : index
    %293 = vector.load %arg19[%c49_238, %c0_239] : memref<152x192xbf16, #tpu.memory_space<vmem>>, vector<8x64xbf16>
    tpu.vector_store %arg19[%c49_238, %c0_239], %292 {strides = array<i32>} : memref<152x192xbf16, #tpu.memory_space<vmem>>, vector<8x64xbf16>,
    %294 = vector.extract_strided_slice %287 {offsets = [24, 0], sizes = [8, 64], strides = [1, 1]} : vector<64x64xbf16> to vector<8x64xbf16>
    %c65_240 = arith.constant 65 : index
    %c0_241 = arith.constant 0 : index
    %295 = vector.load %arg19[%c65_240, %c0_241] : memref<152x192xbf16, #tpu.memory_space<vmem>>, vector<8x64xbf16>
    tpu.vector_store %arg19[%c65_240, %c0_241], %294 {strides = array<i32>} : memref<152x192xbf16, #tpu.memory_space<vmem>>, vector<8x64xbf16>,
    %296 = vector.extract_strided_slice %287 {offsets = [32, 0], sizes = [8, 64], strides = [1, 1]} : vector<64x64xbf16> to vector<8x64xbf16>
    %c81_242 = arith.constant 81 : index
    %c0_243 = arith.constant 0 : index
    %297 = vector.load %arg19[%c81_242, %c0_243] : memref<152x192xbf16, #tpu.memory_space<vmem>>, vector<8x64xbf16>
    tpu.vector_store %arg19[%c81_242, %c0_243], %296 {strides = array<i32>} : memref<152x192xbf16, #tpu.memory_space<vmem>>, vector<8x64xbf16>,
    %298 = vector.extract_strided_slice %287 {offsets = [40, 0], sizes = [8, 64], strides = [1, 1]} : vector<64x64xbf16> to vector<8x64xbf16>
    %c97_244 = arith.constant 97 : index
    %c0_245 = arith.constant 0 : index
    %299 = vector.load %arg19[%c97_244, %c0_245] : memref<152x192xbf16, #tpu.memory_space<vmem>>, vector<8x64xbf16>
    tpu.vector_store %arg19[%c97_244, %c0_245], %298 {strides = array<i32>} : memref<152x192xbf16, #tpu.memory_space<vmem>>, vector<8x64xbf16>,
    %300 = vector.extract_strided_slice %287 {offsets = [48, 0], sizes = [8, 64], strides = [1, 1]} : vector<64x64xbf16> to vector<8x64xbf16>
    %c113_246 = arith.constant 113 : index
    %c0_247 = arith.constant 0 : index
    %301 = vector.load %arg19[%c113_246, %c0_247] : memref<152x192xbf16, #tpu.memory_space<vmem>>, vector<8x64xbf16>
    tpu.vector_store %arg19[%c113_246, %c0_247], %300 {strides = array<i32>} : memref<152x192xbf16, #tpu.memory_space<vmem>>, vector<8x64xbf16>,
    %302 = vector.extract_strided_slice %287 {offsets = [56, 0], sizes = [8, 64], strides = [1, 1]} : vector<64x64xbf16> to vector<8x64xbf16>
    %c129_248 = arith.constant 129 : index
    %c0_249 = arith.constant 0 : index
    %303 = vector.load %arg19[%c129_248, %c0_249] : memref<152x192xbf16, #tpu.memory_space<vmem>>, vector<8x64xbf16>
    tpu.vector_store %arg19[%c129_248, %c0_249], %302 {strides = array<i32>} : memref<152x192xbf16, #tpu.memory_space<vmem>>, vector<8x64xbf16>,
    %304 = vector.extract_strided_slice %287 {offsets = [0, 0], sizes = [8, 64], strides = [1, 1]} : vector<64x64xbf16> to vector<8x64xbf16>
    %c16_250 = arith.constant 16 : index
    %c64_251 = arith.constant 64 : index
    %305 = vector.load %arg19[%c16_250, %c64_251] : memref<152x192xbf16, #tpu.memory_space<vmem>>, vector<8x64xbf16>
    tpu.vector_store %arg19[%c16_250, %c64_251], %304 {strides = array<i32>} : memref<152x192xbf16, #tpu.memory_space<vmem>>, vector<8x64xbf16>,
    %306 = vector.extract_strided_slice %287 {offsets = [8, 0], sizes = [8, 64], strides = [1, 1]} : vector<64x64xbf16> to vector<8x64xbf16>
    %c32_252 = arith.constant 32 : index
    %c64_253 = arith.constant 64 : index
    %307 = vector.load %arg19[%c32_252, %c64_253] : memref<152x192xbf16, #tpu.memory_space<vmem>>, vector<8x64xbf16>
    tpu.vector_store %arg19[%c32_252, %c64_253], %306 {strides = array<i32>} : memref<152x192xbf16, #tpu.memory_space<vmem>>, vector<8x64xbf16>,
    %308 = vector.extract_strided_slice %287 {offsets = [16, 0], sizes = [8, 64], strides = [1, 1]} : vector<64x64xbf16> to vector<8x64xbf16>
    %c48_254 = arith.constant 48 : index
    %c64_255 = arith.constant 64 : index
    %309 = vector.load %arg19[%c48_254, %c64_255] : memref<152x192xbf16, #tpu.memory_space<vmem>>, vector<8x64xbf16>
    tpu.vector_store %arg19[%c48_254, %c64_255], %308 {strides = array<i32>} : memref<152x192xbf16, #tpu.memory_space<vmem>>, vector<8x64xbf16>,
    %310 = vector.extract_strided_slice %287 {offsets = [24, 0], sizes = [8, 64], strides = [1, 1]} : vector<64x64xbf16> to vector<8x64xbf16>
    %c64_256 = arith.constant 64 : index
    %c64_257 = arith.constant 64 : index
    %311 = vector.load %arg19[%c64_256, %c64_257] : memref<152x192xbf16, #tpu.memory_space<vmem>>, vector<8x64xbf16>
    tpu.vector_store %arg19[%c64_256, %c64_257], %310 {strides = array<i32>} : memref<152x192xbf16, #tpu.memory_space<vmem>>, vector<8x64xbf16>,
    %312 = vector.extract_strided_slice %287 {offsets = [32, 0], sizes = [8, 64], strides = [1, 1]} : vector<64x64xbf16> to vector<8x64xbf16>
    %c80_258 = arith.constant 80 : index
    %c64_259 = arith.constant 64 : index
    %313 = vector.load %arg19[%c80_258, %c64_259] : memref<152x192xbf16, #tpu.memory_space<vmem>>, vector<8x64xbf16>
    tpu.vector_store %arg19[%c80_258, %c64_259], %312 {strides = array<i32>} : memref<152x192xbf16, #tpu.memory_space<vmem>>, vector<8x64xbf16>,
    %314 = vector.extract_strided_slice %287 {offsets = [40, 0], sizes = [8, 64], strides = [1, 1]} : vector<64x64xbf16> to vector<8x64xbf16>
    %c96_260 = arith.constant 96 : index
    %c64_261 = arith.constant 64 : index
    %315 = vector.load %arg19[%c96_260, %c64_261] : memref<152x192xbf16, #tpu.memory_space<vmem>>, vector<8x64xbf16>
    tpu.vector_store %arg19[%c96_260, %c64_261], %314 {strides = array<i32>} : memref<152x192xbf16, #tpu.memory_space<vmem>>, vector<8x64xbf16>,
    %316 = vector.extract_strided_slice %287 {offsets = [48, 0], sizes = [8, 64], strides = [1, 1]} : vector<64x64xbf16> to vector<8x64xbf16>
    %c112_262 = arith.constant 112 : index
    %c64_263 = arith.constant 64 : index
    %317 = vector.load %arg19[%c112_262, %c64_263] : memref<152x192xbf16, #tpu.memory_space<vmem>>, vector<8x64xbf16>
    tpu.vector_store %arg19[%c112_262, %c64_263], %316 {strides = array<i32>} : memref<152x192xbf16, #tpu.memory_space<vmem>>, vector<8x64xbf16>,
    %318 = vector.extract_strided_slice %287 {offsets = [56, 0], sizes = [8, 64], strides = [1, 1]} : vector<64x64xbf16> to vector<8x64xbf16>
    %c128_264 = arith.constant 128 : index
    %c64_265 = arith.constant 64 : index
    %319 = vector.load %arg19[%c128_264, %c64_265] : memref<152x192xbf16, #tpu.memory_space<vmem>>, vector<8x64xbf16>
    tpu.vector_store %arg19[%c128_264, %c64_265], %318 {strides = array<i32>} : memref<152x192xbf16, #tpu.memory_space<vmem>>, vector<8x64xbf16>,
    %320 = vector.extract_strided_slice %287 {offsets = [0, 0], sizes = [8, 64], strides = [1, 1]} : vector<64x64xbf16> to vector<8x64xbf16>
    %c15_266 = arith.constant 15 : index
    %c128_267 = arith.constant 128 : index
    %321 = vector.load %arg19[%c15_266, %c128_267] : memref<152x192xbf16, #tpu.memory_space<vmem>>, vector<8x64xbf16>
    tpu.vector_store %arg19[%c15_266, %c128_267], %320 {strides = array<i32>} : memref<152x192xbf16, #tpu.memory_space<vmem>>, vector<8x64xbf16>,
    %322 = vector.extract_strided_slice %287 {offsets = [8, 0], sizes = [8, 64], strides = [1, 1]} : vector<64x64xbf16> to vector<8x64xbf16>
    %c31_268 = arith.constant 31 : index
    %c128_269 = arith.constant 128 : index
    %323 = vector.load %arg19[%c31_268, %c128_269] : memref<152x192xbf16, #tpu.memory_space<vmem>>, vector<8x64xbf16>
    tpu.vector_store %arg19[%c31_268, %c128_269], %322 {strides = array<i32>} : memref<152x192xbf16, #tpu.memory_space<vmem>>, vector<8x64xbf16>,
    %324 = vector.extract_strided_slice %287 {offsets = [16, 0], sizes = [8, 64], strides = [1, 1]} : vector<64x64xbf16> to vector<8x64xbf16>
    %c47_270 = arith.constant 47 : index
    %c128_271 = arith.constant 128 : index
    %325 = vector.load %arg19[%c47_270, %c128_271] : memref<152x192xbf16, #tpu.memory_space<vmem>>, vector<8x64xbf16>
    tpu.vector_store %arg19[%c47_270, %c128_271], %324 {strides = array<i32>} : memref<152x192xbf16, #tpu.memory_space<vmem>>, vector<8x64xbf16>,
    %326 = vector.extract_strided_slice %287 {offsets = [24, 0], sizes = [8, 64], strides = [1, 1]} : vector<64x64xbf16> to vector<8x64xbf16>
    %c63_272 = arith.constant 63 : index
    %c128_273 = arith.constant 128 : index
    %327 = vector.load %arg19[%c63_272, %c128_273] : memref<152x192xbf16, #tpu.memory_space<vmem>>, vector<8x64xbf16>
    tpu.vector_store %arg19[%c63_272, %c128_273], %326 {strides = array<i32>} : memref<152x192xbf16, #tpu.memory_space<vmem>>, vector<8x64xbf16>,
    %328 = vector.extract_strided_slice %287 {offsets = [32, 0], sizes = [8, 64], strides = [1, 1]} : vector<64x64xbf16> to vector<8x64xbf16>
    %c79_274 = arith.constant 79 : index
    %c128_275 = arith.constant 128 : index
    %329 = vector.load %arg19[%c79_274, %c128_275] : memref<152x192xbf16, #tpu.memory_space<vmem>>, vector<8x64xbf16>
    tpu.vector_store %arg19[%c79_274, %c128_275], %328 {strides = array<i32>} : memref<152x192xbf16, #tpu.memory_space<vmem>>, vector<8x64xbf16>,
    %330 = vector.extract_strided_slice %287 {offsets = [40, 0], sizes = [8, 64], strides = [1, 1]} : vector<64x64xbf16> to vector<8x64xbf16>
    %c95_276 = arith.constant 95 : index
    %c128_277 = arith.constant 128 : index
    %331 = vector.load %arg19[%c95_276, %c128_277] : memref<152x192xbf16, #tpu.memory_space<vmem>>, vector<8x64xbf16>
    tpu.vector_store %arg19[%c95_276, %c128_277], %330 {strides = array<i32>} : memref<152x192xbf16, #tpu.memory_space<vmem>>, vector<8x64xbf16>,
    %332 = vector.extract_strided_slice %287 {offsets = [48, 0], sizes = [8, 64], strides = [1, 1]} : vector<64x64xbf16> to vector<8x64xbf16>
    %c111_278 = arith.constant 111 : index
    %c128_279 = arith.constant 128 : index
    %333 = vector.load %arg19[%c111_278, %c128_279] : memref<152x192xbf16, #tpu.memory_space<vmem>>, vector<8x64xbf16>
    tpu.vector_store %arg19[%c111_278, %c128_279], %332 {strides = array<i32>} : memref<152x192xbf16, #tpu.memory_space<vmem>>, vector<8x64xbf16>,
    %334 = vector.extract_strided_slice %287 {offsets = [56, 0], sizes = [8, 64], strides = [1, 1]} : vector<64x64xbf16> to vector<8x64xbf16>
    %c127_280 = arith.constant 127 : index
    %c128_281 = arith.constant 128 : index
    %335 = vector.load %arg19[%c127_280, %c128_281] : memref<152x192xbf16, #tpu.memory_space<vmem>>, vector<8x64xbf16>
    tpu.vector_store %arg19[%c127_280, %c128_281], %334 {strides = array<i32>} : memref<152x192xbf16, #tpu.memory_space<vmem>>, vector<8x64xbf16>,
    %c0_282 = arith.constant 0 : index
    %c0_283 = arith.constant 0 : index
    %336 = vector.load %arg19[%c0_282, %c0_283] : memref<152x192xbf16, #tpu.memory_space<vmem>>, vector<120x192xbf16>
    %c0_284 = arith.constant 0 : index
    %c0_285 = arith.constant 0 : index
    %c0_286 = arith.constant 0 : index
    %337 = vector.load %arg12[%c0_284, %c0_285, %c0_286] : memref<3x192x64xbf16, #tpu.memory_space<vmem>>, vector<1x192x64xbf16>
    %338 = vector.shape_cast %337 : vector<1x192x64xbf16> to vector<192x64xbf16>
    %cst_287 = arith.constant dense<0.000000e+00> : vector<120x64xf32>
    %339 = tpu.matmul %336, %338, %cst_287 {dimension_numbers = #tpu.dot_dimension_numbers<[1], [0], [0], [1], [0, 0, 1, 1], [], []>} : vector<120x192xbf16>, vector<192x64xbf16>, vector<120x64xf32> -> vector<120x64xf32>
    %c16_288 = arith.constant 16 : index
    %c0_289 = arith.constant 0 : index
    %340 = vector.load %arg19[%c16_288, %c0_289] : memref<152x192xbf16, #tpu.memory_space<vmem>>, vector<120x192xbf16>
    %c1_290 = arith.constant 1 : index
    %c0_291 = arith.constant 0 : index
    %c0_292 = arith.constant 0 : index
    %341 = vector.load %arg12[%c1_290, %c0_291, %c0_292] : memref<3x192x64xbf16, #tpu.memory_space<vmem>>, vector<1x192x64xbf16>
    %342 = vector.shape_cast %341 : vector<1x192x64xbf16> to vector<192x64xbf16>
    %cst_293 = arith.constant dense<0.000000e+00> : vector<120x64xf32>
    %343 = tpu.matmul %340, %342, %cst_293 {dimension_numbers = #tpu.dot_dimension_numbers<[1], [0], [0], [1], [0, 0, 1, 1], [], []>} : vector<120x192xbf16>, vector<192x64xbf16>, vector<120x64xf32> -> vector<120x64xf32>
    %344 = arith.addf %339, %343 : vector<120x64xf32>
    %c32_294 = arith.constant 32 : index
    %c0_295 = arith.constant 0 : index
    %345 = vector.load %arg19[%c32_294, %c0_295] : memref<152x192xbf16, #tpu.memory_space<vmem>>, vector<120x192xbf16>
    %c2_296 = arith.constant 2 : index
    %c0_297 = arith.constant 0 : index
    %c0_298 = arith.constant 0 : index
    %346 = vector.load %arg12[%c2_296, %c0_297, %c0_298] : memref<3x192x64xbf16, #tpu.memory_space<vmem>>, vector<1x192x64xbf16>
    %347 = vector.shape_cast %346 : vector<1x192x64xbf16> to vector<192x64xbf16>
    %cst_299 = arith.constant dense<0.000000e+00> : vector<120x64xf32>
    %348 = tpu.matmul %345, %347, %cst_299 {dimension_numbers = #tpu.dot_dimension_numbers<[1], [0], [0], [1], [0, 0, 1, 1], [], []>} : vector<120x192xbf16>, vector<192x64xbf16>, vector<120x64xf32> -> vector<120x64xf32>
    %349 = arith.addf %344, %348 : vector<120x64xf32>
    %350 = tpu.iota {dimensions = array<i32: 0>} : vector<8x1xi32>
    %c0_i32 = arith.constant 0 : i32
    %351 = vector.broadcast %c0_i32 : i32 to vector<8x1xi32>
    %352 = arith.cmpi eq, %350, %351 : vector<8x1xi32>
    %353 = arith.extui %352 : vector<8x1xi1> to vector<8x1xi32>
    %354 = arith.sitofp %353 : vector<8x1xi32> to vector<8x1xf32>
    %cst_300 = arith.constant 3.000000e+00 : f32
    %355 = vector.broadcast %cst_300 : f32 to vector<8x1xf32>
    %356 = arith.subf %355, %354 : vector<8x1xf32>
    %c7_i32 = arith.constant 7 : i32
    %357 = vector.broadcast %c7_i32 : i32 to vector<8x1xi32>
    %358 = arith.cmpi eq, %350, %357 : vector<8x1xi32>
    %359 = arith.extui %358 : vector<8x1xi1> to vector<8x1xi32>
    %360 = arith.sitofp %359 : vector<8x1xi32> to vector<8x1xf32>
    %361 = arith.subf %356, %360 : vector<8x1xf32>
    %362 = tpu.reciprocal %361 {approx = true} : vector<8x1xf32> -> vector<8x1xf32>
    %cst_301 = arith.constant 5.000000e-01 : f32
    %363 = vector.broadcast %cst_301 : f32 to vector<8x1xf32>
    %364 = arith.mulf %362, %363 : vector<8x1xf32>
    %365 = vector.extract_strided_slice %349 {offsets = [0, 0], sizes = [8, 64], strides = [1, 1]} : vector<120x64xf32> to vector<8x64xf32>
    %366 = vector.broadcast %364 : vector<8x1xf32> to vector<8x64xf32>
    %367 = arith.mulf %365, %366 : vector<8x64xf32>
    %c0_302 = arith.constant 0 : index
    %c0_303 = arith.constant 0 : index
    %368 = vector.load %arg13[%c0_302, %c0_303] : memref<1x64xf32, #tpu.memory_space<vmem>>, vector<1x64xf32>
    %369 = vector.broadcast %368 : vector<1x64xf32> to vector<8x64xf32>
    %370 = arith.addf %367, %369 : vector<8x64xf32>
    %cst_304 = arith.constant 0.000000e+00 : f32
    %371 = vector.broadcast %cst_304 : f32 to vector<8x64xf32>
    %372 = arith.maximumf %370, %371 : vector<8x64xf32>
    %373 = arith.truncf %372 : vector<8x64xf32> to vector<8x64xbf16>
    %c0_305 = arith.constant 0 : index
    %c0_306 = arith.constant 0 : index
    %c0_307 = arith.constant 0 : index
    %374 = vector.load %arg17[%c0_305, %c0_306, %c0_307] : memref<1x120x64xbf16, #tpu.memory_space<vmem>>, vector<1x8x64xbf16>
    %375 = vector.shape_cast %374 : vector<1x8x64xbf16> to vector<8x64xbf16>
    %376 = vector.shape_cast %373 : vector<8x64xbf16> to vector<1x8x64xbf16>
    tpu.vector_store %arg17[%c0_305, %c0_306, %c0_307], %376 {strides = array<i32>} : memref<1x120x64xbf16, #tpu.memory_space<vmem>>, vector<1x8x64xbf16>,
    %cst_308 = arith.constant 0.333333343 : f32
    %377 = vector.broadcast %cst_308 : f32 to vector<8x1xf32>
    %378 = arith.mulf %362, %377 : vector<8x1xf32>
    %379 = vector.extract_strided_slice %349 {offsets = [16, 0], sizes = [8, 64], strides = [1, 1]} : vector<120x64xf32> to vector<8x64xf32>
    %380 = vector.broadcast %378 : vector<8x1xf32> to vector<8x64xf32>
    %381 = arith.mulf %379, %380 : vector<8x64xf32>
    %c0_309 = arith.constant 0 : index
    %c0_310 = arith.constant 0 : index
    %382 = vector.load %arg13[%c0_309, %c0_310] : memref<1x64xf32, #tpu.memory_space<vmem>>, vector<1x64xf32>
    %383 = vector.broadcast %382 : vector<1x64xf32> to vector<8x64xf32>
    %384 = arith.addf %381, %383 : vector<8x64xf32>
    %cst_311 = arith.constant 0.000000e+00 : f32
    %385 = vector.broadcast %cst_311 : f32 to vector<8x64xf32>
    %386 = arith.maximumf %384, %385 : vector<8x64xf32>
    %387 = arith.truncf %386 : vector<8x64xf32> to vector<8x64xbf16>
    %c0_312 = arith.constant 0 : index
    %c16_313 = arith.constant 16 : index
    %c0_314 = arith.constant 0 : index
    %388 = vector.load %arg17[%c0_312, %c16_313, %c0_314] : memref<1x120x64xbf16, #tpu.memory_space<vmem>>, vector<1x8x64xbf16>
    %389 = vector.shape_cast %388 : vector<1x8x64xbf16> to vector<8x64xbf16>
    %390 = vector.shape_cast %387 : vector<8x64xbf16> to vector<1x8x64xbf16>
    tpu.vector_store %arg17[%c0_312, %c16_313, %c0_314], %390 {strides = array<i32>} : memref<1x120x64xbf16, #tpu.memory_space<vmem>>, vector<1x8x64xbf16>,
    %391 = vector.extract_strided_slice %349 {offsets = [32, 0], sizes = [8, 64], strides = [1, 1]} : vector<120x64xf32> to vector<8x64xf32>
    %392 = vector.broadcast %378 : vector<8x1xf32> to vector<8x64xf32>
    %393 = arith.mulf %391, %392 : vector<8x64xf32>
    %c0_315 = arith.constant 0 : index
    %c0_316 = arith.constant 0 : index
    %394 = vector.load %arg13[%c0_315, %c0_316] : memref<1x64xf32, #tpu.memory_space<vmem>>, vector<1x64xf32>
    %395 = vector.broadcast %394 : vector<1x64xf32> to vector<8x64xf32>
    %396 = arith.addf %393, %395 : vector<8x64xf32>
    %cst_317 = arith.constant 0.000000e+00 : f32
    %397 = vector.broadcast %cst_317 : f32 to vector<8x64xf32>
    %398 = arith.maximumf %396, %397 : vector<8x64xf32>
    %399 = arith.truncf %398 : vector<8x64xf32> to vector<8x64xbf16>
    %c0_318 = arith.constant 0 : index
    %c32_319 = arith.constant 32 : index
    %c0_320 = arith.constant 0 : index
    %400 = vector.load %arg17[%c0_318, %c32_319, %c0_320] : memref<1x120x64xbf16, #tpu.memory_space<vmem>>, vector<1x8x64xbf16>
    %401 = vector.shape_cast %400 : vector<1x8x64xbf16> to vector<8x64xbf16>
    %402 = vector.shape_cast %399 : vector<8x64xbf16> to vector<1x8x64xbf16>
    tpu.vector_store %arg17[%c0_318, %c32_319, %c0_320], %402 {strides = array<i32>} : memref<1x120x64xbf16, #tpu.memory_space<vmem>>, vector<1x8x64xbf16>,
    %403 = vector.extract_strided_slice %349 {offsets = [48, 0], sizes = [8, 64], strides = [1, 1]} : vector<120x64xf32> to vector<8x64xf32>
    %404 = vector.broadcast %378 : vector<8x1xf32> to vector<8x64xf32>
    %405 = arith.mulf %403, %404 : vector<8x64xf32>
    %c0_321 = arith.constant 0 : index
    %c0_322 = arith.constant 0 : index
    %406 = vector.load %arg13[%c0_321, %c0_322] : memref<1x64xf32, #tpu.memory_space<vmem>>, vector<1x64xf32>
    %407 = vector.broadcast %406 : vector<1x64xf32> to vector<8x64xf32>
    %408 = arith.addf %405, %407 : vector<8x64xf32>
    %cst_323 = arith.constant 0.000000e+00 : f32
    %409 = vector.broadcast %cst_323 : f32 to vector<8x64xf32>
    %410 = arith.maximumf %408, %409 : vector<8x64xf32>
    %411 = arith.truncf %410 : vector<8x64xf32> to vector<8x64xbf16>
    %c0_324 = arith.constant 0 : index
    %c48_325 = arith.constant 48 : index
    %c0_326 = arith.constant 0 : index
    %412 = vector.load %arg17[%c0_324, %c48_325, %c0_326] : memref<1x120x64xbf16, #tpu.memory_space<vmem>>, vector<1x8x64xbf16>
    %413 = vector.shape_cast %412 : vector<1x8x64xbf16> to vector<8x64xbf16>
    %414 = vector.shape_cast %411 : vector<8x64xbf16> to vector<1x8x64xbf16>
    tpu.vector_store %arg17[%c0_324, %c48_325, %c0_326], %414 {strides = array<i32>} : memref<1x120x64xbf16, #tpu.memory_space<vmem>>, vector<1x8x64xbf16>,
    %415 = vector.extract_strided_slice %349 {offsets = [64, 0], sizes = [8, 64], strides = [1, 1]} : vector<120x64xf32> to vector<8x64xf32>
    %416 = vector.broadcast %378 : vector<8x1xf32> to vector<8x64xf32>
    %417 = arith.mulf %415, %416 : vector<8x64xf32>
    %c0_327 = arith.constant 0 : index
    %c0_328 = arith.constant 0 : index
    %418 = vector.load %arg13[%c0_327, %c0_328] : memref<1x64xf32, #tpu.memory_space<vmem>>, vector<1x64xf32>
    %419 = vector.broadcast %418 : vector<1x64xf32> to vector<8x64xf32>
    %420 = arith.addf %417, %419 : vector<8x64xf32>
    %cst_329 = arith.constant 0.000000e+00 : f32
    %421 = vector.broadcast %cst_329 : f32 to vector<8x64xf32>
    %422 = arith.maximumf %420, %421 : vector<8x64xf32>
    %423 = arith.truncf %422 : vector<8x64xf32> to vector<8x64xbf16>
    %c0_330 = arith.constant 0 : index
    %c64_331 = arith.constant 64 : index
    %c0_332 = arith.constant 0 : index
    %424 = vector.load %arg17[%c0_330, %c64_331, %c0_332] : memref<1x120x64xbf16, #tpu.memory_space<vmem>>, vector<1x8x64xbf16>
    %425 = vector.shape_cast %424 : vector<1x8x64xbf16> to vector<8x64xbf16>
    %426 = vector.shape_cast %423 : vector<8x64xbf16> to vector<1x8x64xbf16>
    tpu.vector_store %arg17[%c0_330, %c64_331, %c0_332], %426 {strides = array<i32>} : memref<1x120x64xbf16, #tpu.memory_space<vmem>>, vector<1x8x64xbf16>,
    %427 = vector.extract_strided_slice %349 {offsets = [80, 0], sizes = [8, 64], strides = [1, 1]} : vector<120x64xf32> to vector<8x64xf32>
    %428 = vector.broadcast %378 : vector<8x1xf32> to vector<8x64xf32>
    %429 = arith.mulf %427, %428 : vector<8x64xf32>
    %c0_333 = arith.constant 0 : index
    %c0_334 = arith.constant 0 : index
    %430 = vector.load %arg13[%c0_333, %c0_334] : memref<1x64xf32, #tpu.memory_space<vmem>>, vector<1x64xf32>
    %431 = vector.broadcast %430 : vector<1x64xf32> to vector<8x64xf32>
    %432 = arith.addf %429, %431 : vector<8x64xf32>
    %cst_335 = arith.constant 0.000000e+00 : f32
    %433 = vector.broadcast %cst_335 : f32 to vector<8x64xf32>
    %434 = arith.maximumf %432, %433 : vector<8x64xf32>
    %435 = arith.truncf %434 : vector<8x64xf32> to vector<8x64xbf16>
    %c0_336 = arith.constant 0 : index
    %c80_337 = arith.constant 80 : index
    %c0_338 = arith.constant 0 : index
    %436 = vector.load %arg17[%c0_336, %c80_337, %c0_338] : memref<1x120x64xbf16, #tpu.memory_space<vmem>>, vector<1x8x64xbf16>
    %437 = vector.shape_cast %436 : vector<1x8x64xbf16> to vector<8x64xbf16>
    %438 = vector.shape_cast %435 : vector<8x64xbf16> to vector<1x8x64xbf16>
    tpu.vector_store %arg17[%c0_336, %c80_337, %c0_338], %438 {strides = array<i32>} : memref<1x120x64xbf16, #tpu.memory_space<vmem>>, vector<1x8x64xbf16>,
    %439 = vector.extract_strided_slice %349 {offsets = [96, 0], sizes = [8, 64], strides = [1, 1]} : vector<120x64xf32> to vector<8x64xf32>
    %440 = vector.broadcast %378 : vector<8x1xf32> to vector<8x64xf32>
    %441 = arith.mulf %439, %440 : vector<8x64xf32>
    %c0_339 = arith.constant 0 : index
    %c0_340 = arith.constant 0 : index
    %442 = vector.load %arg13[%c0_339, %c0_340] : memref<1x64xf32, #tpu.memory_space<vmem>>, vector<1x64xf32>
    %443 = vector.broadcast %442 : vector<1x64xf32> to vector<8x64xf32>
    %444 = arith.addf %441, %443 : vector<8x64xf32>
    %cst_341 = arith.constant 0.000000e+00 : f32
    %445 = vector.broadcast %cst_341 : f32 to vector<8x64xf32>
    %446 = arith.maximumf %444, %445 : vector<8x64xf32>
    %447 = arith.truncf %446 : vector<8x64xf32> to vector<8x64xbf16>
    %c0_342 = arith.constant 0 : index
    %c96_343 = arith.constant 96 : index
    %c0_344 = arith.constant 0 : index
    %448 = vector.load %arg17[%c0_342, %c96_343, %c0_344] : memref<1x120x64xbf16, #tpu.memory_space<vmem>>, vector<1x8x64xbf16>
    %449 = vector.shape_cast %448 : vector<1x8x64xbf16> to vector<8x64xbf16>
    %450 = vector.shape_cast %447 : vector<8x64xbf16> to vector<1x8x64xbf16>
    tpu.vector_store %arg17[%c0_342, %c96_343, %c0_344], %450 {strides = array<i32>} : memref<1x120x64xbf16, #tpu.memory_space<vmem>>, vector<1x8x64xbf16>,
    %451 = vector.extract_strided_slice %349 {offsets = [112, 0], sizes = [8, 64], strides = [1, 1]} : vector<120x64xf32> to vector<8x64xf32>
    %452 = vector.broadcast %364 : vector<8x1xf32> to vector<8x64xf32>
    %453 = arith.mulf %451, %452 : vector<8x64xf32>
    %c0_345 = arith.constant 0 : index
    %c0_346 = arith.constant 0 : index
    %454 = vector.load %arg13[%c0_345, %c0_346] : memref<1x64xf32, #tpu.memory_space<vmem>>, vector<1x64xf32>
    %455 = vector.broadcast %454 : vector<1x64xf32> to vector<8x64xf32>
    %456 = arith.addf %453, %455 : vector<8x64xf32>
    %cst_347 = arith.constant 0.000000e+00 : f32
    %457 = vector.broadcast %cst_347 : f32 to vector<8x64xf32>
    %458 = arith.maximumf %456, %457 : vector<8x64xf32>
    %459 = arith.truncf %458 : vector<8x64xf32> to vector<8x64xbf16>
    %c0_348 = arith.constant 0 : index
    %c112_349 = arith.constant 112 : index
    %c0_350 = arith.constant 0 : index
    %460 = vector.load %arg17[%c0_348, %c112_349, %c0_350] : memref<1x120x64xbf16, #tpu.memory_space<vmem>>, vector<1x8x64xbf16>
    %461 = vector.shape_cast %460 : vector<1x8x64xbf16> to vector<8x64xbf16>
    %462 = vector.shape_cast %459 : vector<8x64xbf16> to vector<1x8x64xbf16>
    tpu.vector_store %arg17[%c0_348, %c112_349, %c0_350], %462 {strides = array<i32>} : memref<1x120x64xbf16, #tpu.memory_space<vmem>>, vector<1x8x64xbf16>,
    return
  }
  func.func @transform_0(%arg0: i32) -> (i32, i32, i32) {
    %c0_i32 = arith.constant 0 : i32
    %c0_i32_0 = arith.constant 0 : i32
    %c0_i32_1 = arith.constant 0 : i32
    return %arg0, %c0_i32, %c0_i32_0 : i32, i32, i32
  }
  func.func @transform_1(%arg0: i32) -> (i32, i32) {
    %c0_i32 = arith.constant 0 : i32
    %c0_i32_0 = arith.constant 0 : i32
    %c0_i32_1 = arith.constant 0 : i32
    return %c0_i32, %c0_i32_0 : i32, i32
  }
  func.func @transform_2(%arg0: i32) -> (i32, i32) {
    %c0_i32 = arith.constant 0 : i32
    %c0_i32_0 = arith.constant 0 : i32
    %c0_i32_1 = arith.constant 0 : i32
    return %c0_i32, %c0_i32_0 : i32, i32
  }
  func.func @transform_3(%arg0: i32) -> (i32, i32) {
    %c0_i32 = arith.constant 0 : i32
    %c0_i32_0 = arith.constant 0 : i32
    %c0_i32_1 = arith.constant 0 : i32
    return %c0_i32, %c0_i32_0 : i32, i32
  }
  func.func @transform_4(%arg0: i32) -> (i32, i32) {
    %c0_i32 = arith.constant 0 : i32
    %c0_i32_0 = arith.constant 0 : i32
    %c0_i32_1 = arith.constant 0 : i32
    return %c0_i32, %c0_i32_0 : i32, i32
  }
  func.func @transform_5(%arg0: i32) -> (i32, i32, i32) {
    %c0_i32 = arith.constant 0 : i32
    %c0_i32_0 = arith.constant 0 : i32
    %c0_i32_1 = arith.constant 0 : i32
    %c0_i32_2 = arith.constant 0 : i32
    return %c0_i32, %c0_i32_0, %c0_i32_1 : i32, i32, i32
  }
  func.func @transform_6(%arg0: i32) -> (i32, i32) {
    %c0_i32 = arith.constant 0 : i32
    %c0_i32_0 = arith.constant 0 : i32
    %c0_i32_1 = arith.constant 0 : i32
    return %c0_i32, %c0_i32_0 : i32, i32
  }
  func.func @transform_7(%arg0: i32) -> (i32, i32, i32) {
    %c0_i32 = arith.constant 0 : i32
    %c0_i32_0 = arith.constant 0 : i32
    %c0_i32_1 = arith.constant 0 : i32
    %c0_i32_2 = arith.constant 0 : i32
    return %c0_i32, %c0_i32_0, %c0_i32_1 : i32, i32, i32
  }
  func.func @transform_8(%arg0: i32) -> (i32, i32) {
    %c0_i32 = arith.constant 0 : i32
    %c0_i32_0 = arith.constant 0 : i32
    %c0_i32_1 = arith.constant 0 : i32
    return %c0_i32, %c0_i32_0 : i32, i32
  }
  func.func @transform_9(%arg0: i32) -> (i32, i32, i32) {
    %c0_i32 = arith.constant 0 : i32
    %c0_i32_0 = arith.constant 0 : i32
    %c0_i32_1 = arith.constant 0 : i32
    %c0_i32_2 = arith.constant 0 : i32
    return %c0_i32, %c0_i32_0, %c0_i32_1 : i32, i32, i32
  }
  func.func @transform_10(%arg0: i32) -> (i32, i32) {
    %c0_i32 = arith.constant 0 : i32
    %c0_i32_0 = arith.constant 0 : i32
    %c0_i32_1 = arith.constant 0 : i32
    return %c0_i32, %c0_i32_0 : i32, i32
  }
  func.func @transform_11(%arg0: i32) -> (i32, i32, i32) {
    %c0_i32 = arith.constant 0 : i32
    %c0_i32_0 = arith.constant 0 : i32
    %c0_i32_1 = arith.constant 0 : i32
    %c0_i32_2 = arith.constant 0 : i32
    return %c0_i32, %c0_i32_0, %c0_i32_1 : i32, i32, i32
  }
  func.func @transform_12(%arg0: i32) -> (i32, i32) {
    %c0_i32 = arith.constant 0 : i32
    %c0_i32_0 = arith.constant 0 : i32
    %c0_i32_1 = arith.constant 0 : i32
    return %c0_i32, %c0_i32_0 : i32, i32
  }
  func.func @transform_13(%arg0: i32) -> (i32, i32, i32) {
    %c0_i32 = arith.constant 0 : i32
    %c0_i32_0 = arith.constant 0 : i32
    %c0_i32_1 = arith.constant 0 : i32
    return %arg0, %c0_i32, %c0_i32_0 : i32, i32, i32
  }
  func.func @transform_14(%arg0: i32) -> (i32, i32, i32) {
    %c0_i32 = arith.constant 0 : i32
    %c0_i32_0 = arith.constant 0 : i32
    %c0_i32_1 = arith.constant 0 : i32
    return %arg0, %c0_i32, %c0_i32_0 : i32, i32, i32
  }
  func.func @transform_15(%arg0: i32) -> (i32, i32, i32) {
    %c0_i32 = arith.constant 0 : i32
    %c0_i32_0 = arith.constant 0 : i32
    %c0_i32_1 = arith.constant 0 : i32
    return %arg0, %c0_i32, %c0_i32_0 : i32, i32, i32
  }
  func.func @transform_16(%arg0: i32) -> (i32, i32, i32) {
    %c0_i32 = arith.constant 0 : i32
    %c0_i32_0 = arith.constant 0 : i32
    %c0_i32_1 = arith.constant 0 : i32
    return %arg0, %c0_i32, %c0_i32_0 : i32, i32, i32
  }
}

</mosaic_0001>

<bundles_post_ra>
// kernel: mixed_5b.1
= control target key start
LH: loop header
LB: loop body
LE: loop exit
PB: predicated region body
PF: predicated region fallthrough
CT: control target
= control target key end

     0   :  { %s13790_s0 = inlined_call_operand.hbm [shape: bf16[2,64,192], index: 0, kind: input, shape index: {}]   ;;  %s13791_s1 = inlined_call_operand.hbm [shape: bf16[192,512], index: 1, kind: input, shape index: {}]   ;;  %s13792_s2 = inlined_call_operand.hbm [shape: f32[1,96], index: 2, kind: input, shape index: {}]   ;;  %s13793_s3 = inlined_call_operand.hbm [shape: f32[1,48], index: 3, kind: input, shape index: {}]   ;;  %s13794_s4 = inlined_call_operand.hbm [shape: f32[1,64], index: 4, kind: input, shape index: {}]   ;;  %s13795_s5 = inlined_call_operand.hbm [shape: bf16[5,240,64], index: 5, kind: input, shape index: {}]   ;;  %s13796_s6 = inlined_call_operand.hbm [shape: f32[1,64], index: 6, kind: input, shape index: {}]   ;;  %s13797_s7 = inlined_call_operand.hbm [shape: bf16[3,192,96], index: 7, kind: input, shape index: {}]   ;;  %s13798_s8 = inlined_call_operand.hbm [shape: f32[1,96], index: 8, kind: input, shape index: {}]   ;;  %s13799_s9 = inlined_call_operand.hbm [shape: bf16[3,288,96], index: 9, kind: input, shape index: {}]   ;;  %s13800_s10 = inlined_call_operand.hbm [shape: f32[1,96], index: 10, kind: input, shape index: {}]   ;;  %s13801_s11 = inlined_call_operand.hbm [shape: bf16[3,192,64], index: 11, kind: input, shape index: {}]   ;;  %s13802_s12 = inlined_call_operand.hbm [shape: f32[1,64], index: 12, kind: input, shape index: {}]   ;;  %s13803_s13 = inlined_call_operand.hbm [shape: bf16[2,64,96], index: 13, kind: output, shape index: {0}]   ;;  %s13804_s14 = inlined_call_operand.hbm [shape: bf16[2,120,64], index: 14, kind: output, shape index: {1}]   ;;  %s13805_s15 = inlined_call_operand.hbm [shape: bf16[2,120,96], index: 15, kind: output, shape index: {2}]   ;;  %s13806_s16 = inlined_call_operand.hbm [shape: bf16[2,120,64], index: 16, kind: output, shape index: {3}]  }
   0x1   :  { %13846 = sst [smem:[#allocation57_spill]] %s13790_s0 }
   0x2   :  { %13847 = sst [smem:[#allocation58_spill]] %s13791_s1 }
   0x3   :  { %13848 = sst [smem:[#allocation59_spill]] %s13792_s2 }
   0x4   :  { %13849 = sst [smem:[#allocation60_spill]] %s13793_s3 }
   0x5   :  { %13850 = sst [smem:[#allocation61_spill]] %s13794_s4 }
   0x6   :  { %13851 = sst [smem:[#allocation62_spill]] %s13795_s5 }
   0x7   :  { %13852 = sst [smem:[#allocation63_spill]] %s13796_s6 }
   0x8   :  { %13853 = sst [smem:[#allocation64_spill]] %s13797_s7 }
   0x9   :  { %13854 = sst [smem:[#allocation65_spill]] %s13798_s8 }
   0xa   :  { %13855 = sst [smem:[#allocation66_spill]] %s13803_s13 }
   0xb   :  { %13856 = sst [smem:[#allocation67_spill]] %s13804_s14 }
   0xc   :  { %13857 = sst [smem:[#allocation68_spill]] %s13805_s15 }
   0xd   :  { %13858 = sst [smem:[#allocation69_spill]] %s13806_s16 }
   0xe   :  { %22 = vsyncpa [#allocation6], 0 }
   0xf   :  { %24 = vsyncpa [#allocation6 + $0x1], 0 }
  0x10   :  { %25 = vsyncpa [#allocation9], 0 }
  0x11   :  { %26 = vsyncpa [#allocation12], 0 }
  0x12   :  { %27 = vsyncpa [#allocation15], 0 }
  0x13   :  { %28 = vsyncpa [#allocation18], 0 }
  0x14   :  { %29 = vsyncpa [#allocation21], 0 }
  0x15   :  { %30 = vsyncpa [#allocation24], 0 }
  0x16   :  { %31 = vsyncpa [#allocation7], 0 }
  0x17   :  { %33 = vsyncpa [#allocation7 + $0x1], 0 }
  0x18   :  { %34 = vsyncpa [#allocation28], 0 }
  0x19   :  { %36 = vsyncpa [#allocation28 + $0x1], 0 }
  0x1a   :  { %37 = vsyncpa [#allocation31], 0 }
  0x1b   :  { %39 = vsyncpa [#allocation31 + $0x1], 0  ;;  %s10710_s21 = smov 0   ;;  %s10712_s22 = smov 0  }
  0x1c   :  { %s10714_s23 = smov 0   ;;  %s10716_s24 = smov 0  }
  0x1d LB: > { %13859 = sst [smem:[#allocation42_spill]] %s10581_s21  ;;  %s10595_s25 = smov [#allocation8]   ;;  %s10593_s24 = sphi %s10716_s24, %s14082_s24   ;;  %s10589_s23 = sphi %s10714_s23, %s14081_s23   ;;  %s10585_s22 = sphi %s10712_s22, %s14080_s22   ;;  %s10581_s21 = sphi %s10710_s21, %s14079_s21  }
  0x1e   : > { %s444_s26 = sshll.u32 %s10595_s25, 4  ;;  %s10731_s27 = sadd.s32 4294967295, %s10593_s24   ;;  %s10736_s26 = int_to_ptr.vmem [resolvable:$true] %s444_s26 }
  0x1f   : > { %13860 = sst [smem:[#allocation43_spill]] %s10731_s27  ;;  %p8215_p0 = scmp.ge.s32.totalorder %s10593_s24, 1 }
  0x20   : > { %p13816_p1 = scmp.eq.s32.totalorder %s10731_s27, 0  ;;  %p432_p2 = scmp.lt.s32.totalorder %s10593_s24, 3 }
  0x21   : > { %s10596_s29 = smov [#allocation11]   ;;  %s10597_s17 = smov [#allocation14]  }
  0x22   : > { %p10738_p3 = pnand %p8215_p0, %p432_p2  ;;  %s469_s30 = sshll.u32 %s10596_s29, 4  ;;  %s10751_s30 = int_to_ptr.vmem [resolvable:$true] %s469_s30 }
  0x23   : > { %s490_s18 = sshll.u32 %s10597_s17, 4  ;;  %s13864_s1 = sld [smem:[#allocation58_spill]]  ;;  %s10753_s18 = int_to_ptr.vmem [resolvable:$true] %s490_s18 }
  0x24   : > { %s13861_s28 = scalar_select %p10738_p3, 1, 0 }
  0x25   : > { %p9468_p5 = pneg %p10738_p3 }
  0x26   : > { %13862 = sst [smem:[#allocation44_spill]] %s13861_s28 }
  0x27   : > { %p10747_p6 = pnand %p9468_p5, %p13816_p1 }
  0x29   : > { %s10045_s25 = scalar_lea.hbm %s13864_s1, 6144  ;;  %p10763_p8 = pneg %p10747_p6 }
  0x2a   : > { %p10046_p7 = scmp.ne.s32.totalorder %s13864_s1, %s10045_s25  ;;  %p10052_p11 = scmp.lt.u32.totalorder %s10045_s25, %s13864_s1 }
  0x2c   : > { %p10048_p9 = pnand %p10763_p8, %p10046_p7 }
  0x2e   : > { %p10049_p10 = pneg %p10048_p9 }
  0x30   : > { %p10054_p12 = pnand %p10052_p11, %p10049_p10 }
  0x32   : > { %10057 = shalt.err (!%p10054_p12)
}
  0x33   : > { %s10058_s15 = scalar_lea.vmem %s10736_s26, 6144  ;;  %p10066_p5 = scmp.lt.s32.totalorder %s10736_s26, %s10736_s26 }
  0x34   : > { %p10059_p13 = scmp.ne.s32.totalorder %s10736_s26, %s10058_s15  ;;  %p10067_p4 = scmp.lt.s32.totalorder %s10058_s15, %s10058_s15 }
  0x36   : > { %p10061_p0 = pnand %p10059_p13, %p10763_p8  ;;  %p10068_p7 = por %p10067_p4, %p10066_p5 }
  0x38   : > { %p10062_p2 = pneg %p10061_p0 }
  0x3a   : > { %p10069_p9 = pnand %p10068_p7, %p10062_p2 }
  0x3c   : > { %10072 = shalt.err (!%p10069_p9)
}
  0x3d   : > { %s10598_s16 = smov 256   ;;  %s10599_s13 = smov 16  }
  0x3e   : > { %9471 = dma.hbm_to_vmem [thread:$0]  (!%p10747_p6), %s13864_s1, 6144, %s10736_s26, [#allocation9], %s10598_s16, %s10598_s16, %s10599_s13  }
  0x3f   : > { %s13866_s3 = sld [smem:[#allocation60_spill]] }
  0x45   : > { %s10073_s14 = scalar_lea.hbm %s13866_s3, 16 }
  0x46   : > { %p10074_p4 = scmp.ne.s32.totalorder %s13866_s3, %s10073_s14  ;;  %p10080_p12 = scmp.lt.u32.totalorder %s10073_s14, %s13866_s3 }
  0x48   : > { %p10076_p10 = pnand %p10074_p4, %p10763_p8 }
  0x4a   : > { %p10077_p11 = pneg %p10076_p10 }
  0x4c   : > { %p10082_p13 = pnand %p10080_p12, %p10077_p11 }
  0x4e   : > { %10085 = shalt.err (!%p10082_p13)
}
  0x4f   : > { %s10086_s26 = scalar_lea.vmem %s10751_s30, 16  ;;  %s10093_s27 = scalar_lea.vmem %s10751_s30, 32 }
  0x50   : > { %p10087_p0 = scmp.ne.s32.totalorder %s10751_s30, %s10086_s26  ;;  %p10094_p7 = scmp.lt.s32.totalorder %s10751_s30, %s10751_s30 }
  0x51   : > { %p10095_p9 = scmp.lt.s32.totalorder %s10093_s27, %s10086_s26 }
  0x52   : > { %p10089_p2 = pnand %p10087_p0, %p10763_p8 }
  0x53   : > { %p10096_p4 = por %p10095_p9, %p10094_p7 }
  0x54   : > { %p10090_p5 = pneg %p10089_p2 }
  0x56   : > { %p10097_p10 = pnand %p10096_p4, %p10090_p5 }
  0x58   : > { %10100 = shalt.err (!%p10097_p10)
}
  0x59   : > { %9477 = dma.hbm_to_vmem [thread:$0]  (!%p10747_p6), %s13866_s3, 16, %s10751_s30, [#allocation12]  }
  0x5a   : > { %s13867_s5 = sld [smem:[#allocation62_spill]] }
  0x60   : > { %s10101_s13 = scalar_lea.hbm %s13867_s5, 9600 }
  0x61   : > { %p10102_p11 = scmp.ne.s32.totalorder %s13867_s5, %s10101_s13  ;;  %p10108_p0 = scmp.lt.u32.totalorder %s10101_s13, %s13867_s5 }
  0x63   : > { %p10104_p12 = pnand %p10102_p11, %p10763_p8 }
  0x65   : > { %p10105_p13 = pneg %p10104_p12 }
  0x67   : > { %p10110_p2 = pnand %p10108_p0, %p10105_p13 }
  0x69   : > { %10113 = shalt.err (!%p10110_p2)
}
  0x6a   : > { %s10114_s30 = scalar_lea.vmem %s10753_s18, 9600  ;;  %p10122_p4 = scmp.lt.s32.totalorder %s10753_s18, %s10753_s18 }
  0x6b   : > { %p10115_p5 = scmp.ne.s32.totalorder %s10753_s18, %s10114_s30  ;;  %p10123_p10 = scmp.lt.s32.totalorder %s10114_s30, %s10114_s30 }
  0x6d   : > { %p10117_p7 = pnand %p10115_p5, %p10763_p8  ;;  %p10124_p11 = por %p10123_p10, %p10122_p4 }
  0x6f   : > { %p10118_p9 = pneg %p10117_p7 }
  0x71   : > { %p10125_p12 = pnand %p10124_p11, %p10118_p9 }
  0x73   : > { %10128 = shalt.err (!%p10125_p12)
}
  0x74   : > { %s10600_s15 = smov 64   ;;  %s10601_s26 = smov 4  }
  0x75   : > { %9483 = dma.hbm_to_vmem [thread:$0]  (!%p10747_p6), %s13867_s5, 9600, %s10753_s18, [#allocation15], %s10600_s15, %s10600_s15, %s10601_s26  }
  0x76   : > { %s10602_s21 = smov [#allocation17]   ;;  %s10603_s16 = smov [#allocation20]  }
  0x77   : > { %s514_s28 = sshll.u32 %s10602_s21, 4  ;;  %s538_s13 = sshll.u32 %s10603_s16, 4  ;;  %s515_s28 = int_to_ptr.vmem [resolvable:$true] %s514_s28  ;;  %s539_s13 = int_to_ptr.vmem [resolvable:$true] %s538_s13 }
  0x78   : > { %s13868_s7 = sld [smem:[#allocation64_spill]] }
  0x7e   : > { %s10129_s25 = scalar_lea.hbm %s13868_s7, 4608 }
  0x7f   : > { %p10130_p13 = scmp.ne.s32.totalorder %s13868_s7, %s10129_s25  ;;  %p10136_p5 = scmp.lt.u32.totalorder %s10129_s25, %s13868_s7 }
  0x81   : > { %p10132_p0 = pnand %p10130_p13, %p10763_p8 }
  0x83   : > { %p10133_p2 = pneg %p10132_p0 }
  0x85   : > { %p10138_p7 = pnand %p10136_p5, %p10133_p2 }
  0x87   : > { %10141 = shalt.err (!%p10138_p7)
}
  0x88   : > { %s10142_s18 = scalar_lea.vmem %s515_s28, 4608  ;;  %p10150_p11 = scmp.lt.s32.totalorder %s515_s28, %s515_s28 }
  0x89   : > { %p10143_p9 = scmp.ne.s32.totalorder %s515_s28, %s10142_s18  ;;  %p10151_p12 = scmp.lt.s32.totalorder %s10142_s18, %s10142_s18 }
  0x8b   : > { %p10145_p4 = pnand %p10143_p9, %p10763_p8  ;;  %p10152_p1 = por %p10151_p12, %p10150_p11 }
  0x8d   : > { %p10146_p10 = pneg %p10145_p4 }
  0x8f   : > { %p10153_p3 = pnand %p10152_p1, %p10146_p10 }
  0x91   : > { %10156 = shalt.err (!%p10153_p3)
}
  0x92   : > { %9489 = dma.hbm_to_vmem [thread:$0]  (!%p10747_p6), %s13868_s7, 4608, %s515_s28, [#allocation18], %s10600_s15, %s10600_s15, %s10601_s26  }
  0x93   : > { %s10157_s21 = scalar_lea.hbm %s13799_s9, 6912 }
  0x94   : > { %p10158_p1 = scmp.ne.s32.totalorder %s13799_s9, %s10157_s21  ;;  %p10164_p0 = scmp.lt.u32.totalorder %s10157_s21, %s13799_s9 }
  0x96   : > { %p10160_p3 = pnand %p10158_p1, %p10763_p8 }
  0x98   : > { %p10161_p13 = pneg %p10160_p3 }
  0x9a   : > { %p10166_p2 = pnand %p10164_p0, %p10161_p13 }
  0x9c   : > { %10169 = shalt.err (!%p10166_p2)
}
  0x9d   : > { %s10170_s17 = scalar_lea.vmem %s539_s13, 6912  ;;  %p10178_p4 = scmp.lt.s32.totalorder %s539_s13, %s539_s13 }
  0x9e   : > { %p10171_p5 = scmp.ne.s32.totalorder %s539_s13, %s10170_s17  ;;  %p10179_p10 = scmp.lt.s32.totalorder %s10170_s17, %s10170_s17 }
  0xa0   : > { %p10173_p7 = pnand %p10171_p5, %p10763_p8  ;;  %p10180_p11 = por %p10179_p10, %p10178_p4 }
  0xa2   : > { %p10174_p9 = pneg %p10173_p7 }
  0xa4   : > { %p10181_p12 = pnand %p10180_p11, %p10174_p9 }
  0xa6   : > { %10184 = shalt.err (!%p10181_p12)
}
  0xa7   : > { %9495 = dma.hbm_to_vmem [thread:$0]  (!%p10747_p6), %s13799_s9, 6912, %s539_s13, [#allocation21], %s10600_s15, %s10600_s15, %s10601_s26  }
  0xa8   : > { %s10604_s18 = smov [#allocation23]   ;;  %s10605_s3 = smov [#allocation10]  }
  0xa9   : > { %s562_s1 = sshll.u32 %s10604_s18, 4  ;;  %s458_s27 = sshll.u32 %s10605_s3, 4  ;;  %s563_s1 = int_to_ptr.vmem [resolvable:$true] %s562_s1  ;;  %s459_s27 = int_to_ptr.vmem [resolvable:$true] %s458_s27 }
  0xaa   : > { %s10185_s16 = scalar_lea.hbm %s13801_s11, 4608 }
  0xab   : > { %p10186_p1 = scmp.ne.s32.totalorder %s13801_s11, %s10185_s16  ;;  %p10192_p0 = scmp.lt.u32.totalorder %s10185_s16, %s13801_s11 }
  0xad   : > { %p10188_p3 = pnand %p10186_p1, %p10763_p8 }
  0xaf   : > { %p10189_p13 = pneg %p10188_p3 }
  0xb1   : > { %p10194_p2 = pnand %p10192_p0, %p10189_p13 }
  0xb3   : > { %10197 = shalt.err (!%p10194_p2)
}
  0xb4   : > { %s10198_s13 = scalar_lea.vmem %s563_s1, 4608  ;;  %p10206_p4 = scmp.lt.s32.totalorder %s563_s1, %s563_s1 }
  0xb5   : > { %p10199_p5 = scmp.ne.s32.totalorder %s563_s1, %s10198_s13  ;;  %p10207_p10 = scmp.lt.s32.totalorder %s10198_s13, %s10198_s13 }
  0xb7   : > { %p10201_p7 = pnand %p10199_p5, %p10763_p8  ;;  %p10208_p11 = por %p10207_p10, %p10206_p4 }
  0xb9   : > { %p10202_p9 = pneg %p10201_p7 }
  0xbb   : > { %p10209_p12 = pnand %p10208_p11, %p10202_p9 }
  0xbd   : > { %10212 = shalt.err (!%p10209_p12)
}
  0xbe   : > { %9501 = dma.hbm_to_vmem [thread:$0]  (!%p10747_p6), %s13801_s11, 4608, %s563_s1, [#allocation24], %s10600_s15, %s10600_s15, %s10601_s26  }
  0xbf   : > { %s13869_s2 = sld [smem:[#allocation59_spill]] }
  0xc5   : > { %s10213_s14 = scalar_lea.hbm %s13869_s2, 16 }
  0xc6   : > { %p10214_p1 = scmp.ne.s32.totalorder %s13869_s2, %s10213_s14  ;;  %p10220_p0 = scmp.lt.u32.totalorder %s10213_s14, %s13869_s2 }
  0xc8   : > { %p10216_p3 = pnand %p10214_p1, %p10763_p8 }
  0xca   : > { %p10217_p13 = pneg %p10216_p3 }
  0xcc   : > { %p10222_p2 = pnand %p10220_p0, %p10217_p13 }
  0xce   : > { %10225 = shalt.err (!%p10222_p2)
}
  0xcf   : > { %s10226_s25 = scalar_lea.vmem %s459_s27, 16  ;;  %s10233_s15 = scalar_lea.vmem %s459_s27, 32 }
  0xd0   : > { %p10227_p5 = scmp.ne.s32.totalorder %s459_s27, %s10226_s25  ;;  %p10234_p4 = scmp.lt.s32.totalorder %s459_s27, %s459_s27 }
  0xd1   : > { %p10235_p10 = scmp.lt.s32.totalorder %s10233_s15, %s10226_s25 }
  0xd2   : > { %p10229_p7 = pnand %p10227_p5, %p10763_p8 }
  0xd3   : > { %p10236_p11 = por %p10235_p10, %p10234_p4 }
  0xd4   : > { %p10230_p9 = pneg %p10229_p7 }
  0xd6   : > { %p10237_p12 = pnand %p10236_p11, %p10230_p9 }
  0xd8   : > { %10240 = shalt.err (!%p10237_p12)
}
  0xd9   : > { %9474 = dma.hbm_to_vmem [thread:$0]  (!%p10747_p6), %s13869_s2, 16, %s459_s27, [#allocation9]  }
  0xda   : > { %s10606_s17 = smov [#allocation13]   ;;  %s10607_s28 = smov [#allocation16]  }
  0xdb   : > { %s480_s13 = sshll.u32 %s10606_s17, 4  ;;  %s504_s30 = sshll.u32 %s10607_s28, 4  ;;  %s481_s13 = int_to_ptr.vmem [resolvable:$true] %s480_s13  ;;  %s505_s30 = int_to_ptr.vmem [resolvable:$true] %s504_s30 }
  0xdc   : > { %s13870_s4 = sld [smem:[#allocation61_spill]] }
  0xe2   : > { %s10241_s14 = scalar_lea.hbm %s13870_s4, 16 }
  0xe3   : > { %p10242_p1 = scmp.ne.s32.totalorder %s13870_s4, %s10241_s14  ;;  %p10248_p0 = scmp.lt.u32.totalorder %s10241_s14, %s13870_s4 }
  0xe5   : > { %p10244_p3 = pnand %p10242_p1, %p10763_p8 }
  0xe7   : > { %p10245_p13 = pneg %p10244_p3 }
  0xe9   : > { %p10250_p2 = pnand %p10248_p0, %p10245_p13 }
  0xeb   : > { %10253 = shalt.err (!%p10250_p2)
}
  0xec   : > { %s10254_s27 = scalar_lea.vmem %s481_s13, 16  ;;  %s10261_s25 = scalar_lea.vmem %s481_s13, 32 }
  0xed   : > { %p10255_p5 = scmp.ne.s32.totalorder %s481_s13, %s10254_s27  ;;  %p10262_p4 = scmp.lt.s32.totalorder %s481_s13, %s481_s13 }
  0xee   : > { %p10263_p10 = scmp.lt.s32.totalorder %s10261_s25, %s10254_s27 }
  0xef   : > { %p10257_p7 = pnand %p10255_p5, %p10763_p8 }
  0xf0   : > { %p10264_p11 = por %p10263_p10, %p10262_p4 }
  0xf1   : > { %p10258_p9 = pneg %p10257_p7 }
  0xf3   : > { %p10265_p12 = pnand %p10264_p11, %p10258_p9 }
  0xf5   : > { %10268 = shalt.err (!%p10265_p12)
}
  0xf6   : > { %9480 = dma.hbm_to_vmem [thread:$0]  (!%p10747_p6), %s13870_s4, 16, %s481_s13, [#allocation12]  }
  0xf7   : > { %s13871_s6 = sld [smem:[#allocation63_spill]] }
  0xfd   : > { %s10269_s28 = scalar_lea.hbm %s13871_s6, 16 }
  0xfe   : > { %p10270_p1 = scmp.ne.s32.totalorder %s13871_s6, %s10269_s28  ;;  %p10276_p0 = scmp.lt.u32.totalorder %s10269_s28, %s13871_s6 }
 0x100   : > { %p10272_p3 = pnand %p10270_p1, %p10763_p8 }
 0x102   : > { %p10273_p13 = pneg %p10272_p3 }
 0x104   : > { %p10278_p2 = pnand %p10276_p0, %p10273_p13 }
 0x106   : > { %10281 = shalt.err (!%p10278_p2)
}
 0x107   : > { %s10282_s16 = scalar_lea.vmem %s505_s30, 16  ;;  %s10289_s13 = scalar_lea.vmem %s505_s30, 32 }
 0x108   : > { %p10283_p5 = scmp.ne.s32.totalorder %s505_s30, %s10282_s16  ;;  %p10290_p4 = scmp.lt.s32.totalorder %s505_s30, %s505_s30 }
 0x109   : > { %p10291_p10 = scmp.lt.s32.totalorder %s10289_s13, %s10282_s16 }
 0x10a   : > { %p10285_p7 = pnand %p10283_p5, %p10763_p8 }
 0x10b   : > { %p10292_p11 = por %p10291_p10, %p10290_p4 }
 0x10c   : > { %p10286_p9 = pneg %p10285_p7 }
 0x10e   : > { %p10293_p12 = pnand %p10292_p11, %p10286_p9 }
 0x110   : > { %10296 = shalt.err (!%p10293_p12)
}
 0x111   : > { %9486 = dma.hbm_to_vmem [thread:$0]  (!%p10747_p6), %s13871_s6, 16, %s505_s30, [#allocation15]  }
 0x112   : > { %s10608_s27 = smov [#allocation19]   ;;  %s10609_s15 = smov [#allocation22]  }
 0x113   : > { %s528_s25 = sshll.u32 %s10608_s27, 4  ;;  %s552_s26 = sshll.u32 %s10609_s15, 4  ;;  %s529_s25 = int_to_ptr.vmem [resolvable:$true] %s528_s25  ;;  %s553_s26 = int_to_ptr.vmem [resolvable:$true] %s552_s26 }
 0x114   : > { %s13872_s8 = sld [smem:[#allocation65_spill]] }
 0x11a   : > { %s10297_s28 = scalar_lea.hbm %s13872_s8, 16 }
 0x11b   : > { %p10298_p1 = scmp.ne.s32.totalorder %s13872_s8, %s10297_s28  ;;  %p10304_p0 = scmp.lt.u32.totalorder %s10297_s28, %s13872_s8 }
 0x11d   : > { %p10300_p3 = pnand %p10298_p1, %p10763_p8 }
 0x11f   : > { %p10301_p13 = pneg %p10300_p3 }
 0x121   : > { %p10306_p2 = pnand %p10304_p0, %p10301_p13 }
 0x123   : > { %10309 = shalt.err (!%p10306_p2)
}
 0x124   : > { %s10310_s30 = scalar_lea.vmem %s529_s25, 16  ;;  %s10317_s16 = scalar_lea.vmem %s529_s25, 32 }
 0x125   : > { %p10311_p5 = scmp.ne.s32.totalorder %s529_s25, %s10310_s30  ;;  %p10318_p4 = scmp.lt.s32.totalorder %s529_s25, %s529_s25 }
 0x126   : > { %p10319_p10 = scmp.lt.s32.totalorder %s10317_s16, %s10310_s30 }
 0x127   : > { %p10313_p7 = pnand %p10311_p5, %p10763_p8 }
 0x128   : > { %p10320_p11 = por %p10319_p10, %p10318_p4 }
 0x129   : > { %p10314_p9 = pneg %p10313_p7 }
 0x12b   : > { %p10321_p12 = pnand %p10320_p11, %p10314_p9 }
 0x12d   : > { %10324 = shalt.err (!%p10321_p12)
}
 0x12e   : > { %9492 = dma.hbm_to_vmem [thread:$0]  (!%p10747_p6), %s13872_s8, 16, %s529_s25, [#allocation18]  }
 0x12f   : > { %s10325_s15 = scalar_lea.hbm %s13800_s10, 16 }
 0x130   : > { %p10326_p1 = scmp.ne.s32.totalorder %s13800_s10, %s10325_s15  ;;  %p10332_p0 = scmp.lt.u32.totalorder %s10325_s15, %s13800_s10 }
 0x132   : > { %p10328_p3 = pnand %p10326_p1, %p10763_p8 }
 0x134   : > { %p10329_p13 = pneg %p10328_p3 }
 0x136   : > { %p10334_p2 = pnand %p10332_p0, %p10329_p13 }
 0x138   : > { %10337 = shalt.err (!%p10334_p2)
}
 0x139   : > { %s10338_s3 = scalar_lea.vmem %s553_s26, 16  ;;  %s10345_s25 = scalar_lea.vmem %s553_s26, 32 }
 0x13a   : > { %p10339_p5 = scmp.ne.s32.totalorder %s553_s26, %s10338_s3  ;;  %p10346_p4 = scmp.lt.s32.totalorder %s553_s26, %s553_s26 }
 0x13b   : > { %p10347_p10 = scmp.lt.s32.totalorder %s10345_s25, %s10338_s3 }
 0x13c   : > { %p10341_p7 = pnand %p10339_p5, %p10763_p8 }
 0x13d   : > { %p10348_p11 = por %p10347_p10, %p10346_p4 }
 0x13e   : > { %p10342_p9 = pneg %p10341_p7 }
 0x140   : > { %p10349_p12 = pnand %p10348_p11, %p10342_p9 }
 0x142   : > { %10352 = shalt.err (!%p10349_p12)
}
 0x143   : > { %9498 = dma.hbm_to_vmem [thread:$0]  (!%p10747_p6), %s13800_s10, 16, %s553_s26, [#allocation21]  }
 0x144   : > { %s10610_s30 = smov [#allocation25]   ;;  %s10353_s20 = scalar_lea.hbm %s13802_s12, 16 }
 0x145   : > { %s576_s16 = sshll.u32 %s10610_s30, 4  ;;  %p10354_p1 = scmp.ne.s32.totalorder %s13802_s12, %s10353_s20  ;;  %s577_s16 = int_to_ptr.vmem [resolvable:$true] %s576_s16 }
 0x146   : > { %p10360_p0 = scmp.lt.u32.totalorder %s10353_s20, %s13802_s12 }
 0x147   : > { %p10356_p3 = pnand %p10354_p1, %p10763_p8 }
 0x149   : > { %p10357_p13 = pneg %p10356_p3 }
 0x14b   : > { %p10362_p2 = pnand %p10360_p0, %p10357_p13 }
 0x14d   : > { %10365 = shalt.err (!%p10362_p2)
}
 0x14e   : > { %s10366_s26 = scalar_lea.vmem %s577_s16, 16  ;;  %s10373_s28 = scalar_lea.vmem %s577_s16, 32 }
 0x14f   : > { %p10367_p5 = scmp.ne.s32.totalorder %s577_s16, %s10366_s26  ;;  %p10374_p4 = scmp.lt.s32.totalorder %s577_s16, %s577_s16 }
 0x150   : > { %p10375_p10 = scmp.lt.s32.totalorder %s10373_s28, %s10366_s26 }
 0x151   : > { %p10369_p7 = pnand %p10367_p5, %p10763_p8 }
 0x152   : > { %p10376_p11 = por %p10375_p10, %p10374_p4 }
 0x153   : > { %p10370_p9 = pneg %p10369_p7 }
 0x155   : > { %p10377_p12 = pnand %p10376_p11, %p10370_p9 }
 0x157   : > { %10380 = shalt.err (!%p10377_p12)
}
 0x158   : > { %s13873_s29 = sld [smem:[#allocation42_spill]]  ;;  %s13874_s25 = sld [smem:[#allocation43_spill]] }
 0x159   : > { %9504 = dma.hbm_to_vmem [thread:$0]  (!%p10747_p6), %s13802_s12, 16, %s577_s16, [#allocation24]  }
 0x15a   : > { %s13843_s0 = sadd.s32 4294967294, %s10593_s24   ;;  %s11007_s14 = sadd.s32 1, %s10593_s24  }
 0x15b   : > { %s49_s21 = ssub.s32 %s10593_s24, %s11007_s14  ;;  %s52_s30 = sadd.s32 1, %s10589_s23 }
 0x15c   : > { %p50_p8 = scmp.eq.s32.totalorder %s49_s21, 0  ;;  %p59_p1 = scmp.ne.s32.totalorder %s10589_s23, %s10585_s22 }
 0x15d   : > { %p60_p3 = scmp.eq.s32.totalorder %s10593_s24, 0  ;;  %p347_p7 = scmp.eq.s32.totalorder %s13843_s0, 1 }
 0x15e   : > { %p65_p13 = scmp.ne.s32.totalorder %s10585_s22, %s13873_s29  ;;  %p13876_p2 = scmp.eq.s32.totalorder %s13874_s25, 0 }
 0x15f   : > { %s11018_s13 = scalar_select %p50_p8, %s10589_s23, %s52_s30  }
 0x160   : > { %p11020_p0 = por %p60_p3, %p59_p1  ;;  %p11026_p6 = por %p13876_p2, %p65_p13 }
 0x161   : > { %p341_p5 = scmp.eq.s32.totalorder %s13874_s25, 1  ;;  %p9534_p9 = scmp.lt.s32.totalorder %s10593_s24, 2 }
 0x162   : > { %s587_s20 = sand.u32 1, %s10589_s23   ;;  %p11039_p10 = por %p347_p7, %p65_p13 }
 0x163   : > { %p11035_p4 = por %p341_p5, %p59_p1  ;;  %s8229_s1 = sshll.u32 %s587_s20, 6 }
 0x164   : > { %s13879_s15 = scalar_select %p11039_p10, 1, 0 }
 0x165   : > { %s13878_s27 = scalar_select %p11035_p4, 1, 0 }
 0x166   : > { %s8912_s17 = sshll.u32 %s10593_s24, 10  ;;  %s13880_s18 = sld [smem:[#allocation57_spill]] }
 0x167   : > { %s591_s29 = scalar_lea.vmem [#allocation5], %s8229_s1  ;;  %p11053_p11 = pnand %p9534_p9, %p11020_p0 }
 0x168   : > { %s598_s25 = sshll.u32 %s591_s29, 4  ;;  %s11057_s30 = scalar_lea.sflag [#allocation6], %s587_s20  ;;  %s11049_s25 = int_to_ptr.vmem [resolvable:$true] %s598_s25 }
 0x169   : > { %p10383_p8 = pneg %p11053_p11 }
 0x16c   : > { %s11047_s3 = scalar_lea.hbm %s13880_s18, %s8912_s17  ;;  %s10386_s19 = scalar_lea.hbm %s13880_s18, 2048 }
 0x16d   : > { %s10381_s26 = scalar_lea.hbm %s11047_s3, 1024  ;;  %p10387_p13 = scmp.lt.u32.totalorder %s11047_s3, %s13880_s18 }
 0x16e   : > { %p10382_p12 = scmp.ne.s32.totalorder %s11047_s3, %s10381_s26  ;;  %p10388_p0 = scmp.lt.u32.totalorder %s10386_s19, %s10381_s26 }
 0x16f   : > { %p10390_p5 = scmp.lt.u32.totalorder %s10381_s26, %s11047_s3 }
 0x170   : > { %p10384_p1 = pnand %p10383_p8, %p10382_p12  ;;  %p10389_p2 = por %p10388_p0, %p10387_p13 }
 0x172   : > { %p10385_p3 = pneg %p10384_p1  ;;  %p10391_p7 = por %p10390_p5, %p10389_p2 }
 0x174   : > { %p10392_p9 = pnand %p10391_p7, %p10385_p3 }
 0x176   : > { %10395 = shalt.err (!%p10392_p9)
}
 0x177   : > { %s10396_s20 = scalar_lea.vmem %s11049_s25, 1024  ;;  %s10611_s1 = smov [#allocation5]  }
 0x178   : > { %p10397_p12 = scmp.ne.s32.totalorder %s11049_s25, %s10396_s20  ;;  %s10401_s17 = sshll.u32 %s10611_s1, 4  ;;  %s10402_s17 = int_to_ptr.vmem [resolvable:$false] %s10401_s17 }
 0x179   : > { %s10403_s28 = scalar_lea.vmem %s10402_s17, 2048  ;;  %p10404_p4 = scmp.lt.s32.totalorder %s11049_s25, %s10402_s17 }
 0x17a   : > { %p10399_p1 = pnand %p10397_p12, %p10383_p8  ;;  %p10405_p13 = scmp.lt.s32.totalorder %s10403_s28, %s10396_s20 }
 0x17c   : > { %p10400_p10 = pneg %p10399_p1  ;;  %p10406_p0 = por %p10405_p13, %p10404_p4 }
 0x17e   : > { %p10407_p2 = pnand %p10406_p0, %p10400_p10 }
 0x180   : > { %10410 = shalt.err (!%p10407_p2)
}
 0x181   : > { %s10612_s26 = smov 128   ;;  %s10613_s19 = smov 8  }
 0x182   : > { %9508 = dma.hbm_to_vmem [thread:$0]  (!%p11053_p11), %s11047_s3, 1024, %s11049_s25, %s11057_s30, %s10612_s26, %s10612_s26, %s10613_s19  }
 0x183   : > { %s13882_s29 = sld [smem:[#allocation44_spill]] }
 0x189   : > { %p13883_p8 = scmp.ne.s32.totalorder %s13882_s29, 0 }
 0x18b   : > { %610 = sbr.rel (%p13883_p8) target bundleno = 2009 (0x7d9), region = 72 }
 0x192   : > { %s11088_s1 = sand.u32 1, %s10585_s22  }
 0x193   : > { %s8233_s20 = sshll.u32 %s11088_s1, 6  ;;  %s613_s17 = scalar_lea.sflag [#allocation6], %s11088_s1 }
 0x194   : > { %s11092_s28 = scalar_lea.vmem [#allocation5], %s8233_s20 }
 0x195   : > { %10540 = dma.done.wait (%p11026_p6), %s613_s17, 1024  }
 0x196   : > { %10542 = vsyncadd (%p11026_p6), %s613_s17, 4294966272  ;;  %s13884_s21 = sld [smem:[#allocation43_spill]] }
 0x19c   : > { %p13885_p4 = scmp.eq.s32.totalorder %s13884_s21, 0 }
 0x19e   : > { %10544 = dma.done.wait (%p13885_p4), [#allocation9], 6160   ;;  %p13886_p10 = pmov %p13885_p4 }
 0x19f   : > { %p13887_p11 = pmov %p13885_p4 }
 0x1a0   : > { %10546 = vsyncadd (%p13886_p10), [#allocation9], 4294961136 }
 0x1a1   : > { %10548 = dma.done.wait (%p13887_p11), [#allocation12], 32   ;;  %p13888_p3 = pmov %p13885_p4 }
 0x1a3   : > { %10550 = vsyncadd (%p13888_p3), [#allocation12], 4294967264  ;;  %p13889_p5 = pmov %p13888_p3 }
 0x1a4   : > { %p13890_p7 = pmov %p13888_p3 }
 0x1a5   : > { %10552 = dma.done.wait (%p13889_p5), [#allocation15], 9616  }
 0x1a6   : > { %10554 = vsyncadd (%p13890_p7), [#allocation15], 4294957680  ;;  %p13891_p6 = pmov %p13888_p3 }
 0x1a7   : > { %p13892_p9 = pmov %p13888_p3 }
 0x1a8   : > { %10556 = dma.done.wait (%p13891_p6), [#allocation18], 4624  }
 0x1a9   : > { %10558 = vsyncadd (%p13892_p9), [#allocation18], 4294962672  ;;  %p13893_p12 = pmov %p13888_p3 }
 0x1aa   : > { %p13894_p1 = pmov %p13888_p3 }
 0x1ab   : > { %10560 = dma.done.wait (%p13893_p12), [#allocation21], 6928  }
 0x1ac   : > { %10562 = vsyncadd (%p13894_p1), [#allocation21], 4294960368  ;;  %p13895_p13 = pmov %p13894_p1 }
 0x1ad   : > { %p13896_p0 = pmov %p13894_p1 }
 0x1ae   : > { %10564 = dma.done.wait (%p13895_p13), [#allocation24], 4624  }
 0x1af   : > { %10566 = vsyncadd (%p13896_p0), [#allocation24], 4294962672  ;;  %v9620_v0 = vld [vmem:[#allocation8 + $0x4] ss:$16 sps:$4 sm:$0xff]   ;;  %v9622_v1 = vld [vmem:[#allocation8] ss:$16 sps:$4 sm:$0xff]  }
 0x1b0   : > { %1160 = vmatprep.subr.bf16.mxu0 %v9620_v0  ;;  %v9623_v2 = vld [vmem:[#allocation8 + $0x24] ss:$16 sps:$4 sm:$0xff]   ;;  %v9625_v3 = vld [vmem:[#allocation8 + $0x20] ss:$16 sps:$4 sm:$0xff]   ;;  %vm13823_vm0 = vcmask 523264   ;;  %vm729_vm1 = vcmask 1043456  }
 0x1b1   : > { %1161 = vmatpush1.bf16.msra.mxu0 %v9622_v1  ;;  %v9626_v4 = vld [vmem:[#allocation8 + $0x44] ss:$16 sps:$4 sm:$0xff]   ;;  %v9628_v5 = vld [vmem:[#allocation8 + $0x40] ss:$16 sps:$4 sm:$0xff]   ;;  %v9665_v14 = vld [vmem:[#allocation8 + $0xc] ss:$16 sps:$4 sm:$0xff]  }
 0x1b2   : > { %1162 = vmatprep.subr.bf16.mxu0 %v9623_v2  ;;  %v9629_v6 = vld [vmem:[#allocation8 + $0x64] ss:$16 sps:$4 sm:$0xff]   ;;  %v9631_v7 = vld [vmem:[#allocation8 + $0x60] ss:$16 sps:$4 sm:$0xff]   ;;  %v9667_v15 = vld [vmem:[#allocation8 + $0x8] ss:$16 sps:$4 sm:$0xff]   ;;  %1233 = vmatprep.subr.bf16.mxu1 %v9665_v14 }
 0x1b3   : > { %v9632_v8 = vld [vmem:[#allocation8 + $0x84] ss:$16 sps:$4 sm:$0xff]   ;;  %v9634_v9 = vld [vmem:[#allocation8 + $0x80] ss:$16 sps:$4 sm:$0xff]   ;;  %v9668_v17 = vld [vmem:[#allocation8 + $0x2c] ss:$16 sps:$4 sm:$0xff]   ;;  %1234 = vmatpush1.bf16.msra.mxu1 %v9667_v15 }
 0x1b4   : > { %v9635_v10 = vld [vmem:[#allocation8 + $0xa4] ss:$16 sps:$4 sm:$0xff]   ;;  %v9637_v12 = vld [vmem:[#allocation8 + $0xa0] ss:$16 sps:$4 sm:$0xff]   ;;  %v9670_v19 = vld [vmem:[#allocation8 + $0x28] ss:$16 sps:$4 sm:$0xff]   ;;  %1235 = vmatprep.subr.bf16.mxu1 %v9668_v17 }
 0x1b5   : > { %1163 = vmatpush1.bf16.msra.mxu0 %v9625_v3  ;;  %v9658_v11 = vld [vmem:[%s11092_s28 + $0x4] ss:$8 sps:$4 sm:$0xff]   ;;  %v9640_v16 = vld [vmem:[#allocation8 + $0xc0] ss:$16 sps:$4 sm:$0xff]   ;;  %v9676_v23 = vld [vmem:[#allocation8 + $0x48] ss:$16 sps:$4 sm:$0xff]  }
 0x1b6   : > { %1164 = vmatprep.subr.bf16.mxu0 %v9626_v4  ;;  %v9638_v13 = vld [vmem:[#allocation8 + $0xc4] ss:$16 sps:$4 sm:$0xff]   ;;  %8303 = vmatprep.mubr.msk.bf16.mxu0 %vm13823_vm0, %v9658_v11  ;;  %v9674_v20 = vld [vmem:[#allocation8 + $0x4c] ss:$16 sps:$4 sm:$0xff]   ;;  %v9643_v21 = vld [vmem:[#allocation8 + $0xe0] ss:$16 sps:$4 sm:$0xff]  }
 0x1b7   : > { %8307 = vmatprep.mubr.msk.bf16.mxu1 %vm13823_vm0, %v9658_v11  ;;  %v9641_v18 = vld [vmem:[#allocation8 + $0xe4] ss:$16 sps:$4 sm:$0xff]   ;;  %1236 = vmatpush1.bf16.msra.mxu1 %v9670_v19  ;;  %v9677_v24 = vld [vmem:[#allocation8 + $0x6c] ss:$16 sps:$4 sm:$0xff]   ;;  %v9646_v25 = vld [vmem:[#allocation8 + $0x100] ss:$16 sps:$4 sm:$0xff]  }
 0x1b8   : > { %v9644_v22 = vld [vmem:[#allocation8 + $0x104] ss:$16 sps:$4 sm:$0xff]   ;;  %1237 = vmatprep.subr.bf16.mxu1 %v9674_v20  ;;  %v9679_v27 = vld [vmem:[#allocation8 + $0x68] ss:$16 sps:$4 sm:$0xff]   ;;  %v9680_v28 = vld [vmem:[#allocation8 + $0x8c] ss:$16 sps:$4 sm:$0xff]  }
 0x1b9   : > { %1165 = vmatpush1.bf16.msra.mxu0 %v9628_v5  ;;  %v9647_v26 = vld [vmem:[#allocation8 + $0x124] ss:$16 sps:$4 sm:$0xff]   ;;  %v9649_v29 = vld [vmem:[#allocation8 + $0x120] ss:$16 sps:$4 sm:$0xff]   ;;  %v9682_v31 = vld [vmem:[#allocation8 + $0x88] ss:$16 sps:$4 sm:$0xff]  }
 0x1ba   : > { %1166 = vmatprep.subr.bf16.mxu0 %v9629_v6  ;;  %v9650_v30 = vld [vmem:[#allocation8 + $0x144] ss:$16 sps:$4 sm:$0xff]   ;;  %v9683_v32 = vld [vmem:[#allocation8 + $0xac] ss:$16 sps:$4 sm:$0xff]   ;;  %v9652_v33 = vld [vmem:[#allocation8 + $0x140] ss:$16 sps:$4 sm:$0xff]  }
 0x1bb   : > { %1238 = vmatpush1.bf16.msra.mxu1 %v9676_v23  ;;  %v9685_v34 = vld [vmem:[#allocation8 + $0xa8] ss:$16 sps:$4 sm:$0xff]   ;;  %v9653_v35 = vld [vmem:[#allocation8 + $0x164] ss:$16 sps:$4 sm:$0xff]   ;;  %v9686_v36 = vld [vmem:[#allocation8 + $0xcc] ss:$16 sps:$4 sm:$0xff]  }
 0x1bc   : > { %1239 = vmatprep.subr.bf16.mxu1 %v9677_v24  ;;  %v9655_v37 = vld [vmem:[#allocation8 + $0x160] ss:$16 sps:$4 sm:$0xff]   ;;  %v9688_v38 = vld [vmem:[#allocation8 + $0xc8] ss:$16 sps:$4 sm:$0xff]   ;;  %v9689_v39 = vld [vmem:[#allocation8 + $0xec] ss:$16 sps:$4 sm:$0xff]  }
 0x1bd   : > { %1167 = vmatpush1.bf16.msra.mxu0 %v9631_v7  ;;  %v9656_v40 = vld [vmem:[%s11092_s28] ss:$8 sps:$4 sm:$0xff]   ;;  %v9659_v41 = vld [vmem:[%s11092_s28 + $0x14] ss:$8 sps:$4 sm:$0xff]   ;;  %v9661_v46 = vld [vmem:[%s11092_s28 + $0x10] ss:$8 sps:$4 sm:$0xff]  }
 0x1be   : > { %1168 = vmatprep.subr.bf16.mxu0 %v9632_v8  ;;  %v9691_v42 = vld [vmem:[#allocation8 + $0xe8] ss:$16 sps:$4 sm:$0xff]   ;;  %v9692_v43 = vld [vmem:[#allocation8 + $0x10c] ss:$16 sps:$4 sm:$0xff]   ;;  %vm730_vm2 = vcmask 916484   ;;  %v10614_v57 = vmov 0  }
 0x1bf   : > { %1240 = vmatpush1.bf16.msra.mxu1 %v9679_v27  ;;  %v9694_v44 = vld [vmem:[#allocation8 + $0x108] ss:$16 sps:$4 sm:$0xff]   ;;  %v9695_v45 = vld [vmem:[#allocation8 + $0x12c] ss:$16 sps:$4 sm:$0xff]   ;;  %vm11139_vm3 = vmor %vm730_vm2, %vm729_vm1  ;;  %776 = vst [vmem:[#allocation4] sm:$0xff] %v10614_v57  ;;  %vm13819_vm4 = vcmask 523268  }
 0x1c0   : > { %1241 = vmatprep.subr.bf16.mxu1 %v9680_v28  ;;  %v9662_v47 = vld [vmem:[%s11092_s28 + $0x24] ss:$8 sps:$4 sm:$0xff]   ;;  %v9697_v48 = vld [vmem:[#allocation8 + $0x128] ss:$16 sps:$4 sm:$0xff]   ;;  %v9671_v53 = vld [vmem:[%s11092_s28 + $0x34] ss:$8 sps:$4 sm:$0xff]  }
 0x1c1   : > { %1169 = vmatpush1.bf16.msra.mxu0 %v9634_v9  ;;  %v9698_v49 = vld [vmem:[#allocation8 + $0x14c] ss:$16 sps:$4 sm:$0xff]   ;;  %v9700_v50 = vld [vmem:[#allocation8 + $0x148] ss:$16 sps:$4 sm:$0xff]   ;;  %779 = vst [vmem:[#allocation4 + $0xc] sm:$0xff] %v10614_v57  ;;  %781 = vst [vmem:[#allocation4 + $0x18] sm:$0xff] %v10614_v57 }
 0x1c2   : > { %1170 = vmatprep.subr.bf16.mxu0 %v9635_v10  ;;  %v9701_v51 = vld [vmem:[#allocation8 + $0x16c] ss:$16 sps:$4 sm:$0xff]   ;;  %v9664_v52 = vld [vmem:[%s11092_s28 + $0x20] ss:$8 sps:$4 sm:$0xff]   ;;  %v9673_v55 = vld [vmem:[%s11092_s28 + $0x30] ss:$8 sps:$4 sm:$0xff]  }
 0x1c3   : > { %1242 = vmatpush1.bf16.msra.mxu1 %v9682_v31  ;;  %v9703_v54 = vld [vmem:[#allocation8 + $0x168] ss:$16 sps:$4 sm:$0xff]   ;;  %783 = vst [vmem:[#allocation4 + $0x24] sm:$0xff] %v10614_v57  ;;  %785 = vst [vmem:[#allocation4 + $0x30] sm:$0xff] %v10614_v57  ;;  %v9704_v58 = vld [vmem:[#allocation14 + $0x78] sm:$0xff]   ;;  %s8246_s16 = sshll.u32 %s11088_s1, 5 }
 0x1c4   : > { %1243 = vmatprep.subr.bf16.mxu1 %v9683_v32  ;;  %787 = vst [vmem:[#allocation4 + $0x3c] sm:$0xff] %v10614_v57  ;;  %789 = vst [vmem:[#allocation4 + $0x48] sm:$0xff] %v10614_v57  ;;  %v9705_v59 = vld [vmem:[#allocation14 + $0x80] sm:$0xff]   ;;  %v9706_v60 = vld [vmem:[#allocation14 + $0x88] sm:$0xff]   ;;  %vm13820_vm6 = vcmask 781312   ;;  %s11325_s3 = scalar_lea.vmem [#allocation26], %s8246_s16 }
 0x1c5   : > { %1171 = vmatpush1.bf16.msra.mxu0 %v9637_v12  ;;  %791 = vst [vmem:[#allocation4 + $0x54] sm:$0xff] %v10614_v57  ;;  %793 = vst [vmem:[#allocation4 + $0x60] sm:$0xff] %v10614_v57  ;;  %v9707_v61 = vld [vmem:[#allocation14 + $0xf0] sm:$0xff]   ;;  %v9709_v63 = vld [vmem:[#allocation14 + $0xf8] sm:$0xff]   ;;  %vm1404_vm7 = vcmask 388097   ;;  %s10615_s25 = smov 96  }
 0x1c6   : > { %1172 = vmatprep.subr.bf16.mxu0 %v9638_v13  ;;  %795 = vst [vmem:[#allocation4 + $0x6c] sm:$0xff] %v10614_v57  ;;  %797 = vst [vmem:[#allocation4 + $0x78] sm:$0xff] %v10614_v57  ;;  %v9708_v62 = vld [vmem:[#allocation14 + $0x90] sm:$0xff]   ;;  %v9710_v0 = vld [vmem:[#allocation14 + $0x98] sm:$0xff]   ;;  %vm1406_vm8 = vcmask 385024   ;;  %s13844_s30 = smov 64  }
 0x1c7   : > { %1244 = vmatpush1.bf16.msra.mxu1 %v9685_v34  ;;  %799 = vst [vmem:[#allocation4 + $0x84] sm:$0xff] %v10614_v57  ;;  %801 = vst [vmem:[#allocation4 + $0x90] sm:$0xff] %v10614_v57  ;;  %v9711_v2 = vld [vmem:[#allocation14 + $0x100] sm:$0xff]   ;;  %v9713_v4 = vld [vmem:[#allocation14 + $0x108] sm:$0xff]   ;;  %s10617_s26 = smov 16   ;;  %s10618_s19 = smov 48  }
 0x1c8   : > { %1245 = vmatprep.subr.bf16.mxu1 %v9686_v36  ;;  %803 = vst [vmem:[#allocation4 + $0x9c] sm:$0xff] %v10614_v57  ;;  %805 = vst [vmem:[#allocation4 + $0xa8] sm:$0xff] %v10614_v57  ;;  %v9712_v3 = vld [vmem:[#allocation14 + $0xa0] sm:$0xff]   ;;  %v9714_v5 = vld [vmem:[#allocation14 + $0xa8] sm:$0xff]   ;;  %vm3815_vm9 = vcmask 519171   ;;  %vm3642_vm12 = vcmask 516096  }
 0x1c9   : > { %1173 = vmatpush1.bf16.msra.mxu0 %v9640_v16  ;;  %807 = vst [vmem:[#allocation4 + $0xb4] sm:$0xff] %v10614_v57  ;;  %809 = vst [vmem:[#allocation4 + $0xc0] sm:$0xff] %v10614_v57  ;;  %v9715_v6 = vld [vmem:[#allocation14 + $0x110] sm:$0xff]   ;;  %v9717_v8 = vld [vmem:[#allocation14 + $0x118] sm:$0xff]   ;;  %vm13825_vm10 = vsmask.f32 256 }
 0x1ca   : > { %1174 = vmatprep.subr.bf16.mxu0 %v9641_v18  ;;  %811 = vst [vmem:[#allocation4 + $0xcc] sm:$0xff] %v10614_v57  ;;  %735 = vst.msk [vmem:[#allocation2 + $0x18] sm:$0xff] %vm11139_vm3, %v10614_v57  ;;  %v9716_v7 = vld [vmem:[#allocation14 + $0xb0] sm:$0xff]   ;;  %v9718_v9 = vld [vmem:[#allocation14 + $0xb8] sm:$0xff]   ;;  %vm13822_vm11 = vsmask.f32 7950 }
 0x1cb   : > { %1246 = vmatpush1.bf16.msra.mxu1 %v9688_v38  ;;  %737 = vst.msk [vmem:[#allocation2 + $0x28] sm:$0xff] %vm11139_vm3, %v10614_v57  ;;  %732 = vst.msk [vmem:[#allocation2] sm:$0xff] %vm11139_vm3, %v10614_v57  ;;  %v9719_v10 = vld [vmem:[#allocation14 + $0x120] sm:$0xff]   ;;  %v11310_v12 = vld [vmem:[#allocation10] ss:$0 sm:$0xff]  ;;  %vm13821_vm13 = vcmask 519168  }
 0x1cc   : > { %1247 = vmatprep.subr.bf16.mxu1 %v9689_v39  ;;  %733 = vst.msk [vmem:[#allocation2 + $0x8] sm:$0xff] %vm11139_vm3, %v10614_v57  ;;  %734 = vst.msk [vmem:[#allocation2 + $0x10] sm:$0xff] %vm11139_vm3, %v10614_v57  ;;  %v9720_v11 = vld [vmem:[#allocation14 + $0xc0] sm:$0xff]   ;;  %v11312_v13 = vld [vmem:[#allocation11] ss:$0 sm:$0xff]  ;;  %s12742_s29 = smul.u32 60, %s11088_s1 }
 0x1cd   : > { %1175 = vmatpush1.bf16.msra.mxu0 %v9643_v21  ;;  %736 = vst.msk [vmem:[#allocation2 + $0x20] sm:$0xff] %vm11139_vm3, %v10614_v57  ;;  %738 = vst.msk [vmem:[#allocation2 + $0x30] sm:$0xff] %vm11139_vm3, %v10614_v57  ;;  %v9721_v17 = vld [vmem:[#allocation14 + $0x128] sm:$0xff]   ;;  %v9723_v24 = vld [vmem:[#allocation14 + $0x130] sm:$0xff]   ;;  %vm1702_vm15 = vsmask.f32 3328 }
 0x1ce   : > { %1176 = vmatprep.subr.bf16.mxu0 %v9644_v22  ;;  %739 = vst.msk [vmem:[#allocation2 + $0x38] sm:$0xff] %vm11139_vm3, %v10614_v57  ;;  %740 = vst.msk [vmem:[#allocation2 + $0x40] sm:$0xff] %vm11139_vm3, %v10614_v57  ;;  %v9722_v18 = vld [vmem:[#allocation14 + $0xc8] sm:$0xff]   ;;  %v9724_v39 = vld [vmem:[#allocation14 + $0xd0] sm:$0xff]   ;;  %s12751_s20 = scalar_lea.vmem [#allocation27], %s12742_s29  ;;  %s7862_s17 = sand.u32 1, %s13884_s21  }
 0x1cf   : > { %1248 = vmatpush1.bf16.msra.mxu1 %v9691_v42  ;;  %741 = vst.msk [vmem:[#allocation2 + $0x48] sm:$0xff] %vm11139_vm3, %v10614_v57  ;;  %742 = vst.msk [vmem:[#allocation2 + $0x50] sm:$0xff] %vm11139_vm3, %v10614_v57  ;;  %s13516_s28 = smul.u32 960, %s13884_s21  ;;  %s7902_s16 = sshll.u32 %s12751_s20, 4  ;;  %s13525_s16 = int_to_ptr.vmem [resolvable:$true] %s7902_s16 }
 0x1d0   : > { %1249 = vmatprep.subr.bf16.mxu1 %v9692_v43  ;;  %743 = vst.msk [vmem:[#allocation2 + $0x58] sm:$0xff] %vm11139_vm3, %v10614_v57  ;;  %744 = vst.msk [vmem:[#allocation2 + $0x60] sm:$0xff] %vm11139_vm3, %v10614_v57  ;;  %s10411_s2 = scalar_lea.vmem %s13525_s16, 960  ;;  %p14047_p8 = scmp.ne.s32.totalorder %s13878_s27, 0 }
 0x1d1   : > { %1177 = vmatpush1.bf16.msra.mxu0 %v9646_v25  ;;  %745 = vst.msk [vmem:[#allocation2 + $0x68] sm:$0xff] %vm11139_vm3, %v10614_v57  ;;  %746 = vst.msk [vmem:[#allocation2 + $0x70] sm:$0xff] %vm11139_vm3, %v10614_v57  ;;  %p10412_p2 = scmp.ne.s32.totalorder %s13525_s16, %s10411_s2  ;;  %s10619_s4 = smov [#allocation27]  }
 0x1d2   : > { %1178 = vmatprep.subr.bf16.mxu0 %v9647_v26  ;;  %747 = vst.msk [vmem:[#allocation2 + $0x78] sm:$0xff] %vm11139_vm3, %v10614_v57  ;;  %748 = vst.msk [vmem:[#allocation2 + $0x80] sm:$0xff] %vm11139_vm3, %v10614_v57  ;;  %s10415_s5 = sshll.u32 %s10619_s4, 4  ;;  %s10416_s5 = int_to_ptr.vmem [resolvable:$false] %s10415_s5 }
 0x1d3   : > { %1250 = vmatpush1.bf16.msra.mxu1 %v9694_v44  ;;  %749 = vst.msk [vmem:[#allocation2 + $0x88] sm:$0xff] %vm11139_vm3, %v10614_v57  ;;  %750 = vst.msk [vmem:[#allocation2 + $0x90] sm:$0xff] %vm11139_vm3, %v10614_v57  ;;  %v9725_v44 = vld [vmem:[#allocation14 + $0x138] sm:$0xff]   ;;  %p10413_p4 = pnand %p10412_p2, %p14047_p8  ;;  %p10418_p11 = scmp.lt.s32.totalorder %s13525_s16, %s10416_s5 }
 0x1d4   : > { %1251 = vmatprep.subr.bf16.mxu1 %v9695_v45  ;;  %751 = vst.msk [vmem:[#allocation2 + $0x98] sm:$0xff] %vm11139_vm3, %v10614_v57  ;;  %752 = vst.msk [vmem:[#allocation2 + $0xa0] sm:$0xff] %vm11139_vm3, %v10614_v57 }
 0x1d5   : > { %1179 = vmatpush1.bf16.msra.mxu0 %v9649_v29  ;;  %753 = vst.msk [vmem:[#allocation2 + $0xa8] sm:$0xff] %vm11139_vm3, %v10614_v57  ;;  %754 = vst.msk [vmem:[#allocation2 + $0xb0] sm:$0xff] %vm11139_vm3, %v10614_v57  ;;  %vm1482_vm3 = vsmask.f32 7938  ;;  %p10414_p10 = pneg %p10413_p4 }
 0x1d6   : > { %1180 = vmatprep.subr.bf16.mxu0 %v9650_v30  ;;  %vm11240_vm5 = vmor %vm13819_vm4, %vm729_vm1  ;;  %vm13824_vm4 = vcmask 1044224  }
 0x1d7   : > { %1252 = vmatpush1.bf16.msra.mxu1 %v9697_v48  ;;  %758 = vst.msk [vmem:[#allocation3 + $0x8] sm:$0xff] %vm11240_vm5, %v10614_v57  ;;  %759 = vst.msk [vmem:[#allocation3 + $0x10] sm:$0xff] %vm11240_vm5, %v10614_v57 }
 0x1d8   : > { %1253 = vmatprep.subr.bf16.mxu1 %v9698_v49  ;;  %760 = vst.msk [vmem:[#allocation3 + $0x18] sm:$0xff] %vm11240_vm5, %v10614_v57  ;;  %757 = vst.msk [vmem:[#allocation3] sm:$0xff] %vm11240_vm5, %v10614_v57 }
 0x1d9   : > { %1181 = vmatpush1.bf16.msra.mxu0 %v9652_v33  ;;  %761 = vst.msk [vmem:[#allocation3 + $0x20] sm:$0xff] %vm11240_vm5, %v10614_v57  ;;  %762 = vst.msk [vmem:[#allocation3 + $0x28] sm:$0xff] %vm11240_vm5, %v10614_v57 }
 0x1da   : > { %1182 = vmatprep.subr.bf16.mxu0 %v9653_v35  ;;  %763 = vst.msk [vmem:[#allocation3 + $0x30] sm:$0xff] %vm11240_vm5, %v10614_v57  ;;  %764 = vst.msk [vmem:[#allocation3 + $0x38] sm:$0xff] %vm11240_vm5, %v10614_v57 }
 0x1db   : > { %1254 = vmatpush1.bf16.msra.mxu1 %v9700_v50  ;;  %765 = vst.msk [vmem:[#allocation3 + $0x40] sm:$0xff] %vm11240_vm5, %v10614_v57  ;;  %766 = vst.msk [vmem:[#allocation3 + $0x48] sm:$0xff] %vm11240_vm5, %v10614_v57  ;;  %v9726_v50 = vld [vmem:[#allocation14 + $0xd8] sm:$0xff]  }
 0x1dc   : > { %1255 = vmatprep.subr.bf16.mxu1 %v9701_v51  ;;  %767 = vst.msk [vmem:[#allocation3 + $0x50] sm:$0xff] %vm11240_vm5, %v10614_v57  ;;  %768 = vst.msk [vmem:[#allocation3 + $0x58] sm:$0xff] %vm11240_vm5, %v10614_v57 }
 0x1dd   : > { %1183 = vmatpush1.bf16.msra.mxu0 %v9655_v37  ;;  %769 = vst.msk [vmem:[#allocation3 + $0x60] sm:$0xff] %vm11240_vm5, %v10614_v57  ;;  %770 = vst.msk [vmem:[#allocation3 + $0x68] sm:$0xff] %vm11240_vm5, %v10614_v57 }
 0x1de   : > { %2692 = vmatprep.subr.bf16.mxu0 %v10614_v57  ;;  %771 = vst.msk [vmem:[#allocation3 + $0x70] sm:$0xff] %vm11240_vm5, %v10614_v57  ;;  %772 = vst.msk [vmem:[#allocation3 + $0x78] sm:$0xff] %vm11240_vm5, %v10614_v57 }
 0x1df   : > { %1256 = vmatpush1.bf16.msra.mxu1 %v9703_v54  ;;  %773 = vst.msk [vmem:[#allocation3 + $0x80] sm:$0xff] %vm11240_vm5, %v10614_v57  ;;  %774 = vst.msk [vmem:[#allocation3 + $0x88] sm:$0xff] %vm11240_vm5, %v10614_v57 }
 0x1e0   : > { %1193 = vmatmul.mubr.bf16.vlgmr.msra.gmra.mrb[0].mxu0 %v9656_v40  ;;  %2163 = vmatprep.subr.bf16.mxu1 %v10614_v57  ;;  %775 = vst.msk [vmem:[#allocation3 + $0x90] sm:$0xff] %vm11240_vm5, %v10614_v57  ;;  %vm11528_vm14 = vmand %vm3815_vm9, %vm13822_vm11  ;;  %vm1487_vm9 = vcmask 778624  }
 0x1e1   : > { %8304 = vmatprep.mubr.msk.bf16.mxu0 %vm13823_vm0, %v9659_v41  ;;  %2693 = vmatpush1.bf16.msra.mxu0 %v9707_v61  ;;  %vm11540_vm1 = vmand %vm3642_vm12, %vm13825_vm10 }
 0x1e2   : > { %1266 = vmatmul.mubr.bf16.vlgmr.msra.gmra.mrb[0].mxu1 %v9656_v40  ;;  %2694 = vmatprep.subr.bf16.mxu0 %v10614_v57  ;;  %vm11553_vm2 = vmand %vm13821_vm13, %vm1702_vm15 }
 0x1e3   : > { %8308 = vmatprep.mubr.msk.bf16.mxu1 %vm13823_vm0, %v9659_v41  ;;  %2164 = vmatpush1.bf16.msra.mxu1 %v9704_v58  ;;  %vm11726_vm5 = vmand %vm13821_vm13, %vm1482_vm3 }
 0x1e4   : > { %2165 = vmatprep.subr.bf16.mxu1 %v10614_v57 }
 0x1e5   : > { %2695 = vmatpush1.bf16.msra.mxu0 %v9709_v63 }
 0x1e6   : > { %2696 = vmatprep.subr.bf16.mxu0 %v10614_v57 }
 0x1e7   : > { %2166 = vmatpush1.bf16.msra.mxu1 %v9705_v59 }
 0x1e8   : > { %1203 = vmatmul.mubr.bf16.gmra.mrb[4].mxu0 %v9661_v46  ;;  %2167 = vmatprep.subr.bf16.mxu1 %v10614_v57 }
 0x1e9   : > { %8305 = vmatprep.mubr.msk.bf16.mxu0 %vm13823_vm0, %v9662_v47  ;;  %2697 = vmatpush1.bf16.msra.mxu0 %v9711_v2 }
 0x1ea   : > { %1276 = vmatmul.mubr.bf16.gmra.mrb[4].mxu1 %v9661_v46  ;;  %2698 = vmatprep.subr.bf16.mxu0 %v10614_v57 }
 0x1eb   : > { %8309 = vmatprep.mubr.msk.bf16.mxu1 %vm13823_vm0, %v9662_v47  ;;  %2168 = vmatpush1.bf16.msra.mxu1 %v9706_v60 }
 0x1ec   : > { %2169 = vmatprep.subr.bf16.mxu1 %v10614_v57 }
 0x1ed   : > { %2699 = vmatpush1.bf16.msra.mxu0 %v9713_v4 }
 0x1ee   : > { %2700 = vmatprep.subr.bf16.mxu0 %v10614_v57 }
 0x1ef   : > { %2170 = vmatpush1.bf16.msra.mxu1 %v9708_v62 }
 0x1f0   : > { %1213 = vmatmul.mubr.bf16.gmra.mrb[8].mxu0 %v9664_v52  ;;  %2171 = vmatprep.subr.bf16.mxu1 %v10614_v57 }
 0x1f1   : > { %8306 = vmatprep.mubr.msk.bf16.mxu0 %vm13823_vm0, %v9671_v53  ;;  %2701 = vmatpush1.bf16.msra.mxu0 %v9715_v6  ;;  %v9728_v6 = vld [vmem:[#allocation14 + $0xe0] sm:$0xff]  }
 0x1f2   : > { %1286 = vmatmul.mubr.bf16.gmra.mrb[8].mxu1 %v9664_v52  ;;  %2702 = vmatprep.subr.bf16.mxu0 %v10614_v57 }
 0x1f3   : > { %8310 = vmatprep.mubr.msk.bf16.mxu1 %vm13823_vm0, %v9671_v53  ;;  %2172 = vmatpush1.bf16.msra.mxu1 %v9710_v0  ;;  %v9727_v0 = vld [vmem:[#allocation14 + $0x140] sm:$0xff]   ;;  %vm1827_vm0 = vcmask 912899  }
 0x1f4   : > { %2173 = vmatprep.subr.bf16.mxu1 %v10614_v57 }
 0x1f5   : > { %2703 = vmatpush1.bf16.msra.mxu0 %v9717_v8 }
 0x1f6   : > { %2704 = vmatprep.subr.bf16.mxu0 %v10614_v57 }
 0x1f7   : > { %2174 = vmatpush1.bf16.msra.mxu1 %v9712_v3 }
 0x1f8   : > { %1223 = vmatmul.mubr.bf16.gmra.mrb[12].mxu0 %v9673_v55  ;;  %2175 = vmatprep.subr.bf16.mxu1 %v10614_v57 }
 0x1f9   : > { %2705 = vmatpush1.bf16.msra.mxu0 %v9719_v10 }
 0x1fa   : > { %1296 = vmatmul.mubr.bf16.gmra.mrb[12].mxu1 %v9673_v55  ;;  %2706 = vmatprep.subr.bf16.mxu0 %v10614_v57 }
 0x1fb   : > { %2176 = vmatpush1.bf16.msra.mxu1 %v9714_v5 }
 0x1fc   : > { %2177 = vmatprep.subr.bf16.mxu1 %v10614_v57 }
 0x1fd   : > { %2707 = vmatpush1.bf16.msra.mxu0 %v9721_v17 }
 0x1fe   : > { %2708 = vmatprep.subr.bf16.mxu0 %v10614_v57 }
 0x1ff   : > { %2178 = vmatpush1.bf16.msra.mxu1 %v9716_v7 }
 0x200   : > { %2179 = vmatprep.subr.bf16.mxu1 %v10614_v57 }
 0x201   : > { %2709 = vmatpush1.bf16.msra.mxu0 %v9723_v24  ;;  %v9730_v24 = vld [vmem:[#allocation14 + $0xe8] sm:$0xff]  }
 0x202   : > { %2710 = vmatprep.subr.bf16.mxu0 %v10614_v57 }
 0x203   : > { %2180 = vmatpush1.bf16.msra.mxu1 %v9718_v9 }
 0x204   : > { %2181 = vmatprep.subr.bf16.mxu1 %v10614_v57 }
 0x205   : > { %2711 = vmatpush1.bf16.msra.mxu0 %v9725_v44 }
 0x206   : > { %2712 = vmatprep.subr.bf16.mxu0 %v10614_v57 }
 0x207   : > { %2182 = vmatpush1.bf16.msra.mxu1 %v9720_v11 }
 0x208   : > { %2183 = vmatprep.subr.bf16.mxu1 %v10614_v57 }
 0x209   : > { %2713 = vmatpush1.bf16.msra.mxu0 %v9727_v0 }
 0x20a   : > { %2714 = vmatprep.subr.bf16.mxu0 %v10614_v57 }
 0x20b   : > { %2184 = vmatpush1.bf16.msra.mxu1 %v9722_v18 }
 0x20c   : > { %2185 = vmatprep.subr.bf16.mxu1 %v10614_v57 }
 0x20f   : > { %2186 = vmatpush1.bf16.msra.mxu1 %v9724_v39 }
 0x210   : > { %2187 = vmatprep.subr.bf16.mxu1 %v10614_v57 }
 0x213   : > { %2188 = vmatpush1.bf16.msra.mxu1 %v9726_v50 }
 0x214   : > { %2189 = vmatprep.subr.bf16.mxu1 %v10614_v57 }
 0x217   : > { %2190 = vmatpush1.bf16.msra.mxu1 %v9728_v6  ;;  %v9736_v6 = vld [vmem:[#allocation14 + $0x160] sm:$0xff]  }
 0x218   : > { %2191 = vmatprep.subr.bf16.mxu1 %v10614_v57 }
 0x21b   : > { %2192 = vmatpush1.bf16.msra.mxu1 %v9730_v24 }
 0x21c   : > { %2367 = vmatprep.subr.bf16.mxu1 %v10614_v57 }
 0x2b3   : > { %v1194_v14 = vpop.f32.mrb[0].mxu0 }
 0x2b4   : > { %v1313_v15 = vadd.f32 %v11310_v12, %v1194_v14  ;;  %v1196_v16 = vpop.f32.mrb[1].mxu0 }
 0x2b5   : > { %v1377_v19 = vadd.f32 %v11312_v13, %v1196_v16  ;;  %v1198_v20 = vpop.f32.mrb[2].mxu0  ;;  %v9729_v16 = vld [vmem:[#allocation14 + $0x148] sm:$0xff]  }
 0x2b6   : > { %v1321_v21 = vmax.f32 %v1313_v15, 0.0  ;;  %v1314_v22 = vadd.f32 %v11310_v12, %v1198_v20  ;;  %v1200_v23 = vpop.f32.mrb[3].mxu0  ;;  %2715 = vmatpush1.bf16.msra.mxu0 %v9729_v16 }
 0x2b7   : > { %v1385_v25 = vmax.f32 %v1377_v19, 0.0  ;;  %v1378_v26 = vadd.f32 %v11312_v13, %v1200_v23  ;;  %v11387_v23 = vpop.f32.mrb[0].mxu1  ;;  %2716 = vmatprep.subr.bf16.mxu0 %v10614_v57 }
 0x2b8   : > { %v8913_v27 = vpack.c.bf16 %v1321_v21, %v1321_v21  ;;  %v1322_v28 = vmax.f32 %v1314_v22, 0.0 }
 0x2b9   : > { %v11323_v29 = vpack.c.bf16 %v1385_v25, %v1385_v25  ;;  %v1386_v30 = vmax.f32 %v1378_v26, 0.0 }
 0x2ba   : > { %1362 = vst.msk [vmem:[%s11325_s3] sm:$0xf] %vm13820_vm6, %v8913_v27  ;;  %v8914_v31 = vpack.c.bf16 %v1322_v28, %v1322_v28  ;;  %v11391_v27 = vpop.f32.mrb[1].mxu1  ;;  %v9734_v28 = vld [vmem:[#allocation14 + $0x150] sm:$0xff]  }
 0x2bb   : > { %v1400_v32 = vrot.slane %v11323_v29, 7  ;;  %v11330_v33 = vpack.c.bf16 %v1386_v30, %v1386_v30  ;;  %1633 = vrot.lane.b32.xlu0 %v11323_v29, %s10615_s25  ;;  %v1819_v34 = vrot.slane %v11323_v29, 5  ;;  %v1204_v35 = vpop.f32.mrb[4].mxu0  ;;  %v1471_v36 = vshll.u32 %v11323_v29, 16  ;;  %2717 = vmatpush1.bf16.msra.mxu0 %v9734_v28 }
 0x2bc   : > { %1363 = vst.msk [vmem:[%s11325_s3 + $0x4] sm:$0xf] %vm13820_vm6, %v8914_v31  ;;  %v1315_v37 = vadd.f32 %v11310_v12, %v1204_v35  ;;  %v1206_v38 = vpop.f32.mrb[5].mxu0  ;;  %v1468_v43 = vshrl.u32 %v11323_v29, 16  ;;  %2718 = vmatprep.subr.bf16.mxu0 %v10614_v57 }
 0x2bd   : > { %v1401_v40 = vrot.slane %v1400_v32, 4  ;;  %v1410_v41 = vrot.slane %v11330_v33, 7  ;;  %1821 = vrot.lane.b32.xlu1 %v1819_v34, %s13844_s30  ;;  %v1208_v42 = vpop.f32.mrb[6].mxu0  ;;  %1405 = vst.msk [vmem:[#allocation2 + $0x20] sm:$0xe] %vm1404_vm7, %v1400_v32  ;;  %v1379_v46 = vadd.f32 %v11312_v13, %v1206_v38  ;;  %v1497_v48 = vshll.u32 %v11330_v33, 16 }
 0x2be   : > { %v1323_v45 = vmax.f32 %v1315_v37, 0.0  ;;  %v1316_v47 = vadd.f32 %v11310_v12, %v1208_v42  ;;  %v1210_v49 = vpop.f32.mrb[7].mxu0  ;;  %v1831_v52 = vrot.slane %v11330_v33, 5  ;;  %v11350_v53 = vrot.slane %v1471_v36, 5 }
 0x2bf   : > { %v1411_v51 = vrot.slane %v1410_v41, 4  ;;  %1643 = vrot.lane.b32.xlu0 %v11330_v33, %s10615_s25  ;;  %v1380_v54 = vadd.f32 %v11312_v13, %v1210_v49  ;;  %1414 = vst.msk [vmem:[#allocation2 + $0x30] sm:$0xe] %vm1404_vm7, %v1410_v41  ;;  %v1387_v56 = vmax.f32 %v1379_v46, 0.0  ;;  %v11357_v59 = vrot.slane %v1497_v48, 5 }
 0x2c0   : > { %1407 = vst.msk [vmem:[#allocation2 + $0x28] sm:$0x1] %vm1406_vm8, %v1401_v40  ;;  %v8915_v55 = vpack.c.bf16 %v1323_v45, %v1323_v45  ;;  %v1324_v58 = vmax.f32 %v1316_v47, 0.0  ;;  %v1820_v60 = vrot.slane %v1819_v34, 4  ;;  %v1470_v62 = vrot.slane %v1468_v43, 7  ;;  %v11403_v34 = vpop.f32.mrb[2].mxu1 }
 0x2c1   : > { %1833 = vrot.lane.b32.xlu1 %v1831_v52, %s13844_s30  ;;  %v1388_v61 = vmax.f32 %v1380_v54, 0.0  ;;  %v1686_v63 = vrot.slane %v1468_v43, 4  ;;  %1415 = vst.msk [vmem:[#allocation2 + $0x38] sm:$0x1] %vm1406_vm8, %v1411_v51  ;;  %v11367_v1 = vpack.c.bf16 %v1387_v56, %v1387_v56  ;;  %v9605_v3 = vpack.i.bf16 %v11357_v59, %v11350_v53  ;;  %v11407_v38 = vpop.f32.mrb[3].mxu1 }
 0x2c2   : > { %1364 = vst.msk [vmem:[%s11325_s3 + $0x8] sm:$0xf] %vm13820_vm6, %v8915_v55  ;;  %v8916_v2 = vpack.c.bf16 %v1324_v58, %v1324_v58  ;;  %v1473_v10 = vor.u32 %v1471_v36, %v1470_v62  ;;  %v1474_v21 = vrot.slane %v1470_v62, 4  ;;  %v1494_v22 = vshrl.u32 %v11330_v33, 16  ;;  %v11436_v62 = vpop.f32.mrb[4].mxu1 }
 0x2c3   : > { %1823 = vrot.lane.b32.xlu0 %v1820_v60, %s13844_s30  ;;  %v11372_v4 = vpack.c.bf16 %v1388_v61, %v1388_v61  ;;  %v1214_v5 = vpop.f32.mrb[8].mxu0  ;;  %v1419_v7 = vrot.slane %v11367_v1, 7  ;;  %v1687_v11 = vor.u32 %v1686_v63, %v11350_v53  ;;  %v1517_v14 = vshll.u32 %v11367_v1, 16  ;;  %v9735_v53 = vld [vmem:[#allocation14 + $0x158] sm:$0xff]  }
 0x2c4   : > { %1365 = vst.msk [vmem:[%s11325_s3 + $0xc] sm:$0xf] %vm13820_vm6, %v8916_v2  ;;  %v1216_v8 = vpop.f32.mrb[9].mxu0  ;;  %v1317_v18 = vadd.f32 %v11310_v12, %v1214_v5  ;;  %v1832_v39 = vrot.slane %v1831_v52, 4  ;;  %v1496_v40 = vrot.slane %v1494_v22, 7  ;;  %v1708_v49 = vrot.slane %v1494_v22, 4  ;;  %2719 = vmatpush1.bf16.msra.mxu0 %v9735_v53 }
 0x2c5   : > { %9606 = vrot.lane.b32.xlu1 %v9605_v3, %s10617_s26  ;;  %v1427_v9 = vrot.slane %v11372_v4, 7  ;;  %v1218_v15 = vpop.f32.mrb[10].mxu0  ;;  %v1420_v17 = vrot.slane %v1419_v7, 4  ;;  %1423 = vst.msk [vmem:[#allocation2 + $0x40] sm:$0xe] %vm1404_vm7, %v1419_v7  ;;  %v1381_v26 = vadd.f32 %v11312_v13, %v1216_v8  ;;  %v1688_v29 = vrot.slane %v1687_v11, 4  ;;  %2720 = vmatprep.subr.bf16.mxu0 %v10614_v57 }
 0x2c6   : > { %v1220_v19 = vpop.f32.mrb[11].mxu0  ;;  %v1325_v25 = vmax.f32 %v1317_v18, 0.0  ;;  %v1318_v30 = vadd.f32 %v11310_v12, %v1218_v15  ;;  %v1537_v31 = vshll.u32 %v11372_v4, 16  ;;  %v11401_v32 = vrot.slane %v1517_v14, 5  ;;  %v11439_v2 = vpop.f32.mrb[5].mxu1 }
 0x2c7   : > { %v1428_v20 = vrot.slane %v1427_v9, 4  ;;  %1475 = vrot.lane.b32.xlu0 %v1473_v10, %s10618_s19  ;;  %1431 = vst.msk [vmem:[#allocation2 + $0x50] sm:$0xe] %vm1404_vm7, %v1427_v9  ;;  %v1389_v36 = vmax.f32 %v1381_v26, 0.0  ;;  %v1382_v37 = vadd.f32 %v11312_v13, %v1220_v19  ;;  %v1499_v60 = vor.u32 %v1497_v48, %v1496_v40  ;;  %v11445_v5 = vpop.f32.mrb[6].mxu1 }
 0x2c8   : > { %1424 = vst.msk [vmem:[#allocation2 + $0x48] sm:$0x1] %vm1406_vm8, %v1420_v17  ;;  %v8917_v35 = vpack.c.bf16 %v1325_v25, %v1325_v25  ;;  %v1326_v41 = vmax.f32 %v1318_v30, 0.0  ;;  %v11414_v42 = vrot.slane %v1537_v31, 5  ;;  %v1500_v33 = vrot.slane %v1496_v40, 4  ;;  %v11450_v11 = vpop.f32.mrb[7].mxu1  ;;  %2721 = vmatpush1.bf16.msra.mxu0 %v9736_v6 }
 0x2c9   : > { %1477 = vrot.lane.b32.xlu1 %v1474_v21, %s10618_s19  ;;  %1432 = vst.msk [vmem:[#allocation2 + $0x58] sm:$0x1] %vm1406_vm8, %v1428_v20  ;;  %v11418_v44 = vpack.c.bf16 %v1389_v36, %v1389_v36  ;;  %v1390_v45 = vmax.f32 %v1382_v37, 0.0  ;;  %v1709_v48 = vor.u32 %v1708_v49, %v11357_v59  ;;  %v1841_v59 = vrot.slane %v11367_v1, 5  ;;  %3372 = vmatprep.subr.bf16.mxu0 %v10614_v57 }
 0x2ca   : > { %1366 = vst.msk [vmem:[%s11325_s3 + $0x10] sm:$0xf] %vm13820_vm6, %v8917_v35  ;;  %v8918_v50 = vpack.c.bf16 %v1326_v41, %v1326_v41  ;;  %v9610_v51 = vpack.i.bf16 %v11414_v42, %v11401_v32  ;;  %v1514_v15 = vshrl.u32 %v11367_v1, 16 }
 0x2cb   : > { %1691 = vrot.lane.b32.xlu0 %v1688_v29, %s10617_s26  ;;  %v1224_v43 = vpop.f32.mrb[12].mxu0  ;;  %v1436_v54 = vrot.slane %v11418_v44, 7  ;;  %v11427_v55 = vpack.c.bf16 %v1390_v45, %v1390_v45  ;;  %v1557_v8 = vshll.u32 %v11418_v44, 16  ;;  %v1710_v20 = vrot.slane %v1709_v48, 4  ;;  %v11480_v29 = vpop.f32.mrb[8].mxu1 }
 0x2cc   : > { %v1319_v46 = vadd.f32 %v11310_v12, %v1224_v43  ;;  %v1226_v47 = vpop.f32.mrb[13].mxu0  ;;  %1367 = vst.msk [vmem:[%s11325_s3 + $0x14] sm:$0xf] %vm13820_vm6, %v8918_v50  ;;  %v1842_v25 = vrot.slane %v1841_v59, 4  ;;  %v1516_v26 = vrot.slane %v1514_v15, 7  ;;  %v11485_v35 = vpop.f32.mrb[9].mxu1 }
 0x2cd   : > { %1835 = vrot.lane.b32.xlu1 %v1832_v39, %s13844_s30  ;;  %v1228_v52 = vpop.f32.mrb[14].mxu0  ;;  %v1383_v56 = vadd.f32 %v11312_v13, %v1226_v47  ;;  %v1437_v63 = vrot.slane %v1436_v54, 4  ;;  %v1444_v0 = vrot.slane %v11427_v55, 7  ;;  %1440 = vst.msk [vmem:[#allocation2 + $0x60] sm:$0xe] %vm1404_vm7, %v1436_v54  ;;  %v1577_v17 = vshll.u32 %v11427_v55, 16 }
 0x2ce   : > { %v1230_v58 = vpop.f32.mrb[15].mxu0  ;;  %v1327_v61 = vmax.f32 %v1319_v46, 0.0  ;;  %v1320_v10 = vadd.f32 %v11310_v12, %v1228_v52  ;;  %v11464_v19 = vrot.slane %v1557_v8, 5  ;;  %v11489_v37 = vpop.f32.mrb[10].mxu1  ;;  %v11491_v39 = vld [vmem:[#allocation13] ss:$0 sm:$0xff]  ;;  %v1519_v41 = vor.u32 %v1517_v14, %v1516_v26 }
 0x2cf   : > { %1649 = vrot.lane.b32.xlu0 %v11367_v1, %s10615_s25  ;;  %v1445_v7 = vrot.slane %v1444_v0, 4  ;;  %v1391_v9 = vmax.f32 %v1383_v56, 0.0  ;;  %1448 = vst.msk [vmem:[#allocation2 + $0x70] sm:$0xe] %vm1404_vm7, %v1444_v0  ;;  %v1384_v16 = vadd.f32 %v11312_v13, %v1230_v58  ;;  %v11472_v21 = vrot.slane %v1577_v17, 5  ;;  %v11494_v40 = vpop.f32.mrb[11].mxu1 }
 0x2d0   : > { %v8919_v3 = vpack.c.bf16 %v1327_v61, %v1327_v61  ;;  %1441 = vst.msk [vmem:[#allocation2 + $0x68] sm:$0x1] %vm1406_vm8, %v1437_v63  ;;  %v1328_v18 = vmax.f32 %v1320_v10, 0.0  ;;  %v1724_v43 = vrot.slane %v1514_v15, 4  ;;  %v1851_v46 = vrot.slane %v11372_v4, 5  ;;  %v11509_v50 = vpop.f32.mrb[12].mxu1 }
 0x2d1   : > { %1501 = vrot.lane.b32.xlu1 %v1499_v60, %s10618_s19  ;;  %v11460_v12 = vpack.c.bf16 %v1391_v9, %v1391_v9  ;;  %1449 = vst.msk [vmem:[#allocation2 + $0x78] sm:$0x1] %vm1406_vm8, %v1445_v7  ;;  %v1392_v13 = vmax.f32 %v1384_v16, 0.0  ;;  %v9615_v57 = vpack.i.bf16 %v11472_v21, %v11464_v19  ;;  %v3604_v47 = vadd.f32 %v11491_v39, %v11387_v23  ;;  %v11512_v54 = vpop.f32.mrb[13].mxu1 }
 0x2d2   : > { %1368 = vst.msk [vmem:[%s11325_s3 + $0x18] sm:$0xf] %vm13820_vm6, %v8919_v3  ;;  %v8920_v24 = vpack.c.bf16 %v1328_v18, %v1328_v18  ;;  %v3605_v49 = vadd.f32 %v11491_v39, %v11403_v34  ;;  %v1725_v1 = vor.u32 %v1724_v43, %v11401_v32  ;;  %v1534_v52 = vshrl.u32 %v11372_v4, 16  ;;  %v11520_v34 = vpop.f32.mrb[14].mxu1 }
 0x2d3   : > { %1503 = vrot.lane.b32.xlu0 %v1500_v33, %s10618_s19  ;;  %v1453_v22 = vrot.slane %v11460_v12, 7  ;;  %v11476_v28 = vpack.c.bf16 %v1392_v13, %v1392_v13  ;;  %v3612_v14 = vmax.f32 %v3604_v47, 0.0  ;;  %v1520_v23 = vrot.slane %v1516_v26, 4  ;;  %v3817_v33 = vld [vmem:[#allocation3 + $0xc] sm:$0x8] }
 0x2d4   : > { %1369 = vst.msk [vmem:[%s11325_s3 + $0x1c] sm:$0xf] %vm13820_vm6, %v8920_v24  ;;  %v3613_v53 = vmax.f32 %v3605_v49, 0.0  ;;  %v1726_v58 = vrot.slane %v1725_v1, 4  ;;  %v1852_v32 = vrot.slane %v1851_v46, 4  ;;  %v1740_v9 = vrot.slane %v1534_v52, 4 }
 0x2d5   : > { %1655 = vrot.lane.b32.xlu1 %v11372_v4, %s10615_s25  ;;  %v1454_v30 = vrot.slane %v1453_v22, 4  ;;  %1457 = vst.msk [vmem:[#allocation2 + $0x80] sm:$0xe] %vm1404_vm7, %v1453_v22  ;;  %v1461_v36 = vrot.slane %v11476_v28, 7  ;;  %v11518_v56 = vpack.c.bf16 %v3612_v14, %v3612_v14  ;;  %v3830_v13 = vld [vmem:[#allocation3 + $0x1c] sm:$0x8]  ;;  %v3606_v22 = vadd.f32 %v11491_v39, %v11436_v62 }
 0x2d6   : > { %v11525_v63 = vpack.c.bf16 %v3613_v53, %v3613_v53  ;;  %v1741_v14 = vor.u32 %v1740_v9, %v11414_v42  ;;  %v1554_v53 = vshrl.u32 %v11418_v44, 16  ;;  %v1861_v42 = vrot.slane %v11418_v44, 5 }
 0x2d7   : > { %1713 = vrot.lane.b32.xlu0 %v1710_v20, %s10617_s26  ;;  %1458 = vst.msk [vmem:[#allocation2 + $0x88] sm:$0x1] %vm1406_vm8, %v1454_v30  ;;  %v1462_v45 = vrot.slane %v1461_v36, 4  ;;  %v3628_v60 = vshrl.u32 %v11518_v56, 16  ;;  %v3631_v61 = vshll.u32 %v11518_v56, 16  ;;  %vm1640_vm6 = vcmask 130052  }
 0x2d8   : > { %1465 = vst.msk [vmem:[#allocation2 + $0x90] sm:$0xe] %vm1404_vm7, %v1461_v36  ;;  %v3650_v7 = vshrl.u32 %v11525_v63, 16  ;;  %v3653_v15 = vshll.u32 %v11525_v63, 16  ;;  %vm1695_vm7 = vcmask 519299  }
 0x2d9   : > { %1845 = vrot.lane.b32.xlu1 %v1842_v25, %s13844_s30  ;;  %1466 = vst.msk [vmem:[#allocation2 + $0x98] sm:$0x1] %vm1406_vm8, %v1462_v45  ;;  %v11533_v48 = vrot.slane %v3628_v60, 7  ;;  %v3809_v3 = vrot.slane %v3631_v61, 5  ;;  %v3810_v6 = vrot.slane %v3628_v60, 4  ;;  %v3607_v60 = vadd.f32 %v11491_v39, %v11445_v5  ;;  %vm11803_vm12 = vmand %vm1695_vm7, %vm13822_vm11 }
 0x2da   : > { %v3821_v25 = vld [vmem:[#allocation3 + $0x14] sm:$0xf]  ;;  %v11557_v26 = vrot.slane %v3650_v7, 7  ;;  %v3824_v30 = vrot.slane %v3653_v15, 5  ;;  %v3825_v36 = vrot.slane %v3650_v7, 4  ;;  %v1556_v7 = vrot.slane %v1554_v53, 7  ;;  %vm11818_vm11 = vmand %vm1487_vm9, %vm13825_vm10 }
 0x2db   : > { %1843 = vrot.lane.b32.xlu0 %v1841_v59, %s13844_s30  ;;  %v3644_v59 = vld [vmem:[#allocation3 + $0x18] sm:$0x1]  ;;  %v3634_v16 = vrot.slane %v11533_v48, 4  ;;  %v3811_v18 = vor.u32 %v3810_v6, %v3809_v3  ;;  %v3818_v20 = vsel %vm11528_vm14, %v3809_v3, %v3817_v33  ;;  %v3662_v45 = vld [vmem:[#allocation3 + $0x28] sm:$0x1]  ;;  %v3615_v33 = vmax.f32 %v3607_v60, 0.0 }
 0x2dc   : > { %3819 = vst [vmem:[#allocation3 + $0xc] sm:$0x8] %v3818_v20  ;;  %v3826_v47 = vor.u32 %v3825_v36, %v3824_v30  ;;  %v3831_v49 = vsel %vm11528_vm14, %v3824_v30, %v3830_v13  ;;  %v1742_v3 = vrot.slane %v1741_v14, 4  ;;  %v3842_v13 = vld [vmem:[#allocation3 + $0x2c] sm:$0x8]  ;;  %v3608_v60 = vadd.f32 %v11491_v39, %v11480_v29 }
 0x2dd   : > { %1521 = vrot.lane.b32.xlu1 %v1519_v41, %s10618_s19  ;;  %v3645_v41 = vsel %vm11540_vm1, %v3634_v16, %v3644_v59  ;;  %v3812_v43 = vrot.slane %v3811_v18, 4  ;;  %3832 = vst [vmem:[#allocation3 + $0x1c] sm:$0x8] %v3831_v49  ;;  %v11589_v9 = vpack.c.bf16 %v3615_v33, %v3615_v33  ;;  %v1862_v59 = vrot.slane %v1861_v42, 4  ;;  %v3699_v14 = vld [vmem:[#allocation3 + $0x48] sm:$0x1] }
 0x2de   : > { %3646 = vst [vmem:[#allocation3 + $0x18] sm:$0x1] %v3645_v41  ;;  %v1560_v29 = vrot.slane %v1556_v7, 4  ;;  %vm1481_vm8 = vcmask 781696   ;;  %vm1636_vm7 = vcmask 785408   ;;  %vm2138_vm10 = vcmask 916480  }
 0x2df   : > { %1853 = vrot.lane.b32.xlu0 %v1851_v46, %s13844_s30  ;;  %v3656_v46 = vrot.slane %v11557_v26, 4  ;;  %v3822_v4 = vsel %vm11553_vm2, %v3812_v43, %v3821_v25  ;;  %v3687_v25 = vshrl.u32 %v11589_v9, 16  ;;  %v3845_v43 = vld [vmem:[#allocation3 + $0x34] sm:$0xf]  ;;  %vm11812_vm13 = vmand %vm1481_vm8, %vm1482_vm3 }
 0x2e0   : > { %3823 = vst [vmem:[#allocation3 + $0x14] sm:$0xf] %v3822_v4  ;;  %v3854_v4 = vld [vmem:[#allocation3 + $0x3c] sm:$0x8]  ;;  %vm11824_vm8 = vmor %vm1640_vm6, %vm13824_vm4  ;;  %vm1701_vm6 = vcmask 519296   ;;  %vm1829_vm4 = vcmask 911872  }
 0x2e1   : > { %9611 = vrot.lane.b32.xlu1 %v9610_v51, %s10617_s26  ;;  %v1536_v51 = vrot.slane %v1534_v52, 7  ;;  %v3614_v52 = vmax.f32 %v3606_v22, 0.0  ;;  %v3681_v22 = vld [vmem:[#allocation3 + $0x38] sm:$0x1]  ;;  %vm11845_vm9 = vmand %vm1701_vm6, %vm1702_vm15 }
 0x2e3   : > { %1523 = vrot.lane.b32.xlu0 %v1520_v23, %s10618_s19  ;;  %v1539_v62 = vor.u32 %v1537_v31, %v1536_v51  ;;  %v1540_v1 = vrot.slane %v1536_v51, 4  ;;  %v3833_v31 = vld [vmem:[#allocation3 + $0x24] sm:$0xf]  ;;  %v3663_v23 = vsel %vm11540_vm1, %v3656_v46, %v3662_v45  ;;  %v11603_v45 = vrot.slane %v3687_v25, 7 }
 0x2e4   : > { %3664 = vst [vmem:[#allocation3 + $0x28] sm:$0x1] %v3663_v23  ;;  %v1756_v46 = vrot.slane %v1554_v53, 4 }
 0x2e5   : > { %1729 = vrot.lane.b32.xlu1 %v1726_v58, %s10617_s26  ;;  %v3827_v58 = vrot.slane %v3826_v47, 4 }
 0x2e7   : > { %1855 = vrot.lane.b32.xlu0 %v1852_v32, %s13844_s30  ;;  %v11581_v32 = vpack.c.bf16 %v3614_v52, %v3614_v52  ;;  %v3834_v51 = vsel %vm11553_vm2, %v3827_v58, %v3833_v31  ;;  %v1871_v31 = vrot.slane %v11427_v55, 5  ;;  %v1574_v52 = vshrl.u32 %v11427_v55, 16 }
 0x2e8   : > { %3835 = vst [vmem:[#allocation3 + $0x24] sm:$0xf] %v3834_v51 }
 0x2e9   : > { %1661 = vrot.lane.b32.xlu1 %v11418_v44, %s10615_s25  ;;  %v3669_v6 = vshrl.u32 %v11581_v32, 16  ;;  %v3672_v5 = vshll.u32 %v11581_v32, 16  ;;  %v3693_v44 = vrot.slane %v11603_v45, 4 }
 0x2eb   : > { %1541 = vrot.lane.b32.xlu0 %v1539_v62, %s10618_s19  ;;  %v11592_v16 = vrot.slane %v3669_v6, 7  ;;  %v3836_v18 = vrot.slane %v3672_v5, 5  ;;  %v3837_v20 = vrot.slane %v3669_v6, 4  ;;  %v1559_v62 = vor.u32 %v1557_v8, %v1556_v7  ;;  %v3857_v6 = vld [vmem:[#allocation3 + $0x44] sm:$0xf] }
 0x2ec   : > { %v3849_v8 = vrot.slane %v3687_v25, 4  ;;  %v3700_v58 = vsel %vm11540_vm1, %v3693_v44, %v3699_v14  ;;  %v1594_v7 = vshrl.u32 %v11460_v12, 16  ;;  %v1772_v44 = vrot.slane %v1574_v52, 4 }
 0x2ed   : > { %1543 = vrot.lane.b32.xlu1 %v1540_v1, %s10618_s19  ;;  %v3675_v30 = vrot.slane %v11592_v16, 4  ;;  %v3838_v36 = vor.u32 %v3837_v20, %v3836_v18  ;;  %v3843_v41 = vsel %vm11528_vm14, %v3836_v18, %v3842_v13  ;;  %v3690_v1 = vshll.u32 %v11589_v9, 16  ;;  %3701 = vst [vmem:[#allocation3 + $0x48] sm:$0x1] %v3700_v58 }
 0x2ee   : > { %3844 = vst [vmem:[#allocation3 + $0x2c] sm:$0x8] %v3843_v41  ;;  %v1576_v18 = vrot.slane %v1574_v52, 7  ;;  %v11657_v58 = vrot.slane %v1594_v7, 7 }
 0x2ef   : > { %1667 = vrot.lane.b32.xlu0 %v11427_v55, %s10615_s25  ;;  %v3682_v47 = vsel %vm11540_vm1, %v3675_v30, %v3681_v22  ;;  %v3839_v49 = vrot.slane %v3838_v36, 4  ;;  %v3848_v23 = vrot.slane %v3690_v1, 5  ;;  %v1597_v30 = vshll.u32 %v11460_v12, 16  ;;  %v3755_v55 = vld [vmem:[#allocation3 + $0x78] sm:$0x1] }
 0x2f0   : > { %3683 = vst [vmem:[#allocation3 + $0x38] sm:$0x1] %v3682_v47 }
 0x2f1   : > { %1745 = vrot.lane.b32.xlu1 %v1742_v3, %s10617_s26  ;;  %v3846_v53 = vsel %vm11553_vm2, %v3839_v49, %v3845_v43  ;;  %v3850_v51 = vor.u32 %v3849_v8, %v3848_v23  ;;  %v3855_v33 = vsel %vm11528_vm14, %v3848_v23, %v3854_v4  ;;  %v3609_v3 = vadd.f32 %v11491_v39, %v11489_v37  ;;  %v3866_v49 = vld [vmem:[#allocation3 + $0x4c] sm:$0x8]  ;;  %v3878_v23 = vld [vmem:[#allocation3 + $0x5c] sm:$0x8] }
 0x2f2   : > { %3847 = vst [vmem:[#allocation3 + $0x34] sm:$0xf] %v3846_v53  ;;  %3856 = vst [vmem:[#allocation3 + $0x3c] sm:$0x8] %v3855_v33  ;;  %v1787_v14 = vrot.slane %v1597_v30, 5  ;;  %v1580_v33 = vrot.slane %v1576_v18, 4 }
 0x2f3   : > { %1865 = vrot.lane.b32.xlu0 %v1862_v59, %s13844_s30  ;;  %v3616_v59 = vmax.f32 %v3608_v60, 0.0  ;;  %v3851_v20 = vrot.slane %v3850_v51, 4  ;;  %v3617_v13 = vmax.f32 %v3609_v3, 0.0 }
 0x2f5   : > { %1863 = vrot.lane.b32.xlu1 %v1861_v42, %s13844_s30  ;;  %v1757_v42 = vor.u32 %v1756_v46, %v11464_v19  ;;  %v11633_v22 = vpack.c.bf16 %v3616_v59, %v3616_v59  ;;  %v3858_v37 = vsel %vm11553_vm2, %v3851_v20, %v3857_v6  ;;  %v11645_v41 = vpack.c.bf16 %v3617_v13, %v3617_v13  ;;  %v3736_v59 = vld [vmem:[#allocation3 + $0x68] sm:$0x1] }
 0x2f6   : > { %3859 = vst [vmem:[#allocation3 + $0x44] sm:$0xf] %v3858_v37  ;;  %v1773_v20 = vor.u32 %v1772_v44, %v11472_v21 }
 0x2f7   : > { %1561 = vrot.lane.b32.xlu0 %v1559_v62, %s10618_s19  ;;  %v1758_v25 = vrot.slane %v1757_v42, 4  ;;  %v3706_v36 = vshrl.u32 %v11633_v22, 16  ;;  %v3709_v19 = vshll.u32 %v11633_v22, 16  ;;  %v3718_v62 = vld [vmem:[#allocation3 + $0x58] sm:$0x1]  ;;  %v3724_v8 = vshrl.u32 %v11645_v41, 16 }
 0x2f8   : > { %v3869_v42 = vld [vmem:[#allocation3 + $0x54] sm:$0xf]  ;;  %v1774_v44 = vrot.slane %v1773_v20, 4 }
 0x2f9   : > { %1873 = vrot.lane.b32.xlu1 %v1871_v31, %s13844_s30  ;;  %v11647_v43 = vrot.slane %v3706_v36, 7  ;;  %v3860_v46 = vrot.slane %v3709_v19, 5  ;;  %v3861_v47 = vrot.slane %v3706_v36, 4  ;;  %v11661_v51 = vrot.slane %v3724_v8, 7 }
 0x2fb   : > { %9616 = vrot.lane.b32.xlu0 %v9615_v57, %s10617_s26  ;;  %v1579_v57 = vor.u32 %v1577_v17, %v1576_v18  ;;  %v3727_v17 = vshll.u32 %v11645_v41, 16  ;;  %v3712_v4 = vrot.slane %v11647_v43, 4  ;;  %v3862_v53 = vor.u32 %v3861_v47, %v3860_v46 }
 0x2fc   : > { %v3867_v60 = vsel %vm11528_vm14, %v3860_v46, %v3866_v49  ;;  %v3730_v13 = vrot.slane %v11661_v51, 4  ;;  %v3610_v18 = vadd.f32 %v11491_v39, %v11509_v50  ;;  %v3881_v46 = vld [vmem:[#allocation3 + $0x64] sm:$0xf]  ;;  %v3611_v50 = vadd.f32 %v11491_v39, %v11520_v34  ;;  %v3890_v34 = vld [vmem:[#allocation3 + $0x6c] sm:$0x8] }
 0x2fd   : > { %1563 = vrot.lane.b32.xlu1 %v1560_v29, %s10618_s19  ;;  %v3872_v52 = vrot.slane %v3727_v17, 5  ;;  %v3719_v3 = vsel %vm11540_vm1, %v3712_v4, %v3718_v62  ;;  %v3863_v6 = vrot.slane %v3862_v53, 4  ;;  %3868 = vst [vmem:[#allocation3 + $0x4c] sm:$0x8] %v3867_v60  ;;  %v3873_v29 = vrot.slane %v3724_v8, 4 }
 0x2fe   : > { %3720 = vst [vmem:[#allocation3 + $0x58] sm:$0x1] %v3719_v3  ;;  %v1788_v62 = vrot.slane %v1594_v7, 4  ;;  %v3737_v21 = vsel %vm11540_vm1, %v3730_v13, %v3736_v59  ;;  %v3618_v47 = vmax.f32 %v3610_v18, 0.0  ;;  %v3619_v7 = vmax.f32 %v3611_v50, 0.0 }
 0x2ff   : > { %1761 = vrot.lane.b32.xlu0 %v1758_v25, %s10617_s26  ;;  %v3879_v25 = vsel %vm11528_vm14, %v3872_v52, %v3878_v23  ;;  %v3870_v37 = vsel %vm11553_vm2, %v3863_v6, %v3869_v42  ;;  %v3874_v36 = vor.u32 %v3873_v29, %v3872_v52  ;;  %3738 = vst [vmem:[#allocation3 + $0x68] sm:$0x1] %v3737_v21  ;;  %v1872_v4 = vrot.slane %v1871_v31, 4 }
 0x300   : > { %3880 = vst [vmem:[#allocation3 + $0x5c] sm:$0x8] %v3879_v25  ;;  %3871 = vst [vmem:[#allocation3 + $0x54] sm:$0xf] %v3870_v37  ;;  %v11683_v8 = vpack.c.bf16 %v3618_v47, %v3618_v47  ;;  %v1789_v53 = vor.u32 %v1788_v62, %v1787_v14  ;;  %v1881_v60 = vrot.slane %v11460_v12, 5  ;;  %v1614_v42 = vshrl.u32 %v11476_v28, 16 }
 0x301   : > { %1581 = vrot.lane.b32.xlu1 %v1579_v57, %s10618_s19  ;;  %v1599_v57 = vor.u32 %v1597_v30, %v11657_v58  ;;  %v3875_v49 = vrot.slane %v3874_v36, 4  ;;  %v3893_v37 = vld [vmem:[#allocation3 + $0x74] sm:$0xf]  ;;  %v3773_v47 = vld [vmem:[#allocation3 + $0x88] sm:$0x1] }
 0x302   : > { %v3743_v23 = vshrl.u32 %v11683_v8, 16  ;;  %v3746_v39 = vshll.u32 %v11683_v8, 16  ;;  %v1790_v3 = vrot.slane %v1789_v53, 4  ;;  %v1882_v13 = vrot.slane %v1881_v60, 4 }
 0x303   : > { %1673 = vrot.lane.b32.xlu0 %v11460_v12, %s10615_s25  ;;  %v3882_v30 = vsel %vm11553_vm2, %v3875_v49, %v3881_v46  ;;  %v1617_v12 = vshll.u32 %v11476_v28, 16  ;;  %v1616_v25 = vrot.slane %v1614_v42, 7  ;;  %v3902_v46 = vld [vmem:[#allocation3 + $0x7c] sm:$0x8]  ;;  %v1804_v53 = vrot.slane %v1614_v42, 4 }
 0x304   : > { %3883 = vst [vmem:[#allocation3 + $0x64] sm:$0xf] %v3882_v30  ;;  %v11695_v52 = vrot.slane %v3743_v23, 7  ;;  %v3885_v31 = vrot.slane %v3743_v23, 4  ;;  %v3905_v42 = vld [vmem:[#allocation3 + $0x84] sm:$0xf] }
 0x305   : > { %1791 = vrot.lane.b32.xlu1 %v1787_v14, %s10617_s26  ;;  %v11699_v14 = vpack.c.bf16 %v3619_v7, %v3619_v7  ;;  %v1803_v50 = vrot.slane %v1617_v12, 5  ;;  %v9794_v23 = vld [vmem:[#allocation14 + $0x1a0] sm:$0xff]  }
 0x306   : > { %v3749_v6 = vrot.slane %v11695_v52, 4 }
 0x307   : > { %1583 = vrot.lane.b32.xlu0 %v1580_v33, %s10618_s19  ;;  %v3884_v33 = vrot.slane %v3746_v39, 5  ;;  %v3761_v20 = vshrl.u32 %v11699_v14, 16  ;;  %v3764_v36 = vshll.u32 %v11699_v14, 16 }
 0x308   : > { %v3756_v18 = vsel %vm11540_vm1, %v3749_v6, %v3755_v55  ;;  %v3639_v55 = vld [vmem:[#allocation3 + $0x10] sm:$0xf]  ;;  %v1805_v6 = vor.u32 %v1804_v53, %v1803_v50 }
 0x309   : > { %1601 = vrot.lane.b32.xlu1 %v1599_v57, %s10618_s19  ;;  %v3891_v59 = vsel %vm11528_vm14, %v3884_v33, %v3890_v34  ;;  %v3886_v29 = vor.u32 %v3885_v31, %v3884_v33  ;;  %3757 = vst [vmem:[#allocation3 + $0x78] sm:$0x1] %v3756_v18  ;;  %v11711_v62 = vrot.slane %v3761_v20, 7  ;;  %v3897_v21 = vrot.slane %v3761_v20, 4  ;;  %v6857_v18 = vld [vmem:[#allocation3 + $0xc] sm:$0x8] }
 0x30a   : > { %3892 = vst [vmem:[#allocation3 + $0x6c] sm:$0x8] %v3891_v59  ;;  %v3896_v49 = vrot.slane %v3764_v36, 5  ;;  %v11746_v59 = vpack.c.bf16 %v11391_v27, %v11391_v27  ;;  %v1806_v20 = vrot.slane %v1805_v6, 4  ;;  %v1490_v6 = vld [vmem:[#allocation2 + $0x28] sm:$0x1] }
 0x30b   : > { %1777 = vrot.lane.b32.xlu0 %v1774_v44, %s10617_s26  ;;  %v3887_v57 = vrot.slane %v3886_v29, 4  ;;  %v3633_v44 = vor.u32 %v3631_v61, %v11533_v48  ;;  %v3767_v7 = vrot.slane %v11711_v62, 4  ;;  %v3655_v48 = vor.u32 %v3653_v15, %v11557_v26  ;;  %v3659_v26 = vld [vmem:[#allocation3 + $0x20] sm:$0xf] }
 0x30c   : > { %v3898_v34 = vor.u32 %v3897_v21, %v3896_v49  ;;  %v3903_v61 = vsel %vm11528_vm14, %v3896_v49, %v3902_v46  ;;  %13909 = vst [vmem:[#allocation45_spill] sm:$0xff] %v11746_v59  ;;  %v1891_v29 = vrot.slane %v11476_v28, 5  ;;  %v3678_v21 = vld [vmem:[#allocation3 + $0x30] sm:$0xf]  ;;  %v3696_v46 = vld [vmem:[#allocation3 + $0x40] sm:$0xf] }
 0x30d   : > { %1875 = vrot.lane.b32.xlu1 %v1872_v4, %s13844_s30  ;;  %v3894_v30 = vsel %vm11553_vm2, %v3887_v57, %v3893_v37  ;;  %v1619_v4 = vor.u32 %v1617_v12, %v1616_v25  ;;  %3904 = vst [vmem:[#allocation3 + $0x7c] sm:$0x8] %v3903_v61  ;;  %v3640_v31 = vsel %vm11726_vm5, %v3633_v44, %v3639_v55  ;;  %v3733_v44 = vld [vmem:[#allocation3 + $0x60] sm:$0xf] }
 0x30e   : > { %3895 = vst [vmem:[#allocation3 + $0x74] sm:$0xf] %v3894_v30  ;;  %v3899_v33 = vrot.slane %v3898_v34, 4  ;;  %3641 = vst [vmem:[#allocation3 + $0x10] sm:$0xf] %v3640_v31  ;;  %v3660_v12 = vsel %vm11726_vm5, %v3655_v48, %v3659_v26  ;;  %v1892_v37 = vrot.slane %v1891_v29, 4  ;;  %v3692_v57 = vor.u32 %v3690_v1, %v11603_v45 }
 0x30f   : > { %1883 = vrot.lane.b32.xlu0 %v1881_v60, %s13844_s30  ;;  %v3774_v60 = vsel %vm11540_vm1, %v3767_v7, %v3773_v47  ;;  %3661 = vst [vmem:[#allocation3 + $0x20] sm:$0xf] %v3660_v12  ;;  %v1484_v48 = vld [vmem:[#allocation2 + $0x20] sm:$0xf]  ;;  %v12112_v30 = vpack.c.bf16 %v11439_v2, %v11439_v2 }
 0x310   : > { %3775 = vst [vmem:[#allocation3 + $0x88] sm:$0x1] %v3774_v60  ;;  %v3906_v15 = vsel %vm11553_vm2, %v3899_v33, %v3905_v42 }
 0x311   : > { %1793 = vrot.lane.b32.xlu1 %v1790_v3, %s10617_s26  ;;  %v1600_v3 = vrot.slane %v11657_v58, 4  ;;  %3907 = vst [vmem:[#allocation3 + $0x84] sm:$0xf] %v3906_v15  ;;  %v6678_v58 = vshll.u32 %v11746_v59, 16  ;;  %13927 = vst [vmem:[#allocation53_spill] sm:$0xff] %v12112_v30 }
 0x313   : > { %1885 = vrot.lane.b32.xlu0 %v1882_v13, %s13844_s30  ;;  %v1620_v13 = vrot.slane %v1616_v25, 4  ;;  %v11757_v27 = vrot.slane %v6678_v58, 5 }
 0x315   : > { %1679 = vrot.lane.b32.xlu1 %v11476_v28, %s10615_s25  ;;  %v3674_v28 = vor.u32 %v3672_v5, %v11592_v16  ;;  %v6858_v25 = vsel %vm11528_vm14, %v11757_v27, %v6857_v18  ;;  %v3697_v5 = vsel %vm11726_vm5, %v3692_v57, %v3696_v46  ;;  %v11776_v16 = vld [vmem:[#allocation3] ss:$8 sps:$4 sm:$0xff]   ;;  %v1507_v18 = vld [vmem:[#allocation2 + $0x30] sm:$0xf] }
 0x316   : > { %13910 = vst [vmem:[#allocation46_spill] sm:$0xff] %v11776_v16  ;;  %3698 = vst [vmem:[#allocation3 + $0x40] sm:$0xf] %v3697_v5  ;;  %v11851_v57 = vld [vmem:[#allocation2 + $0x10] ss:$8 sps:$4 sm:$0xff]  }
 0x317   : > { %1621 = vrot.lane.b32.xlu0 %v1619_v4, %s10618_s19  ;;  %v3679_v47 = vsel %vm11726_vm5, %v3674_v28, %v3678_v21  ;;  %6859 = vst [vmem:[#allocation3 + $0xc] sm:$0x8] %v6858_v25  ;;  %v3748_v25 = vor.u32 %v3746_v39, %v11695_v52  ;;  %v3766_v21 = vor.u32 %v3764_v36, %v11711_v62  ;;  %v1510_v39 = vld [vmem:[#allocation2 + $0x38] sm:$0x1]  ;;  %v6724_v16 = vld [vmem:[#allocation3 + $0x38] sm:$0x1] }
 0x318   : > { %3680 = vst [vmem:[#allocation3 + $0x30] sm:$0xf] %v3679_v47  ;;  %v11869_v52 = vpack.c.bf16 %v11512_v54, %v11512_v54  ;;  %v6944_v10 = vld [vmem:[#allocation3 + $0x84] sm:$0xf] }
 0x319   : > { %1807 = vrot.lane.b32.xlu1 %v1803_v50, %s10617_s26  ;;  %v3715_v50 = vld [vmem:[#allocation3 + $0x50] sm:$0xf] }
 0x31a   : > { %v13941_v0 = vshll.u32 %v11869_v52, 16 }
 0x31b   : > { %1603 = vrot.lane.b32.xlu0 %v1600_v3, %s10618_s19 }
 0x31d   : > { %1893 = vrot.lane.b32.xlu1 %v1891_v29, %s13844_s30 }
 0x31f   : > { %1809 = vrot.lane.b32.xlu0 %v1806_v20, %s10617_s26 }
 0x321   : > { %1623 = vrot.lane.b32.xlu1 %v1620_v13, %s10618_s19  ;;  %s14046_s19 = sld [smem:[#allocation67_spill]] }
 0x323   : > { %1895 = vrot.lane.b32.xlu0 %v1892_v37, %s13844_s30 }
 0x325   : > { %3776 = vrot.lane.b32.xlu1 %v11518_v56, %s13844_s30 }
 0x327   : > { %3781 = vrot.lane.b32.xlu0 %v11525_v63, %s13844_s30  ;;  %v3711_v63 = vor.u32 %v3709_v19, %v11647_v43  ;;  %s13523_s0 = scalar_lea.hbm %s14046_s19, %s13516_s28 }
 0x329   : > { %3785 = vrot.lane.b32.xlu1 %v11581_v32, %s13844_s30  ;;  %v3729_v32 = vor.u32 %v3727_v17, %v11661_v51  ;;  %v1698_v17 = vld [vmem:[#allocation2 + $0x1c] sm:$0x8]  ;;  %v1717_v51 = vld [vmem:[#allocation2 + $0x2c] sm:$0x8] }
 0x32b   : > { %3789 = vrot.lane.b32.xlu0 %v11589_v9, %s13844_s30  ;;  %v3734_v19 = vsel %vm11726_vm5, %v3729_v32, %v3733_v44  ;;  %v13826_v32 = vshrl.u32 %v11869_v52, 16 }
 0x32c   : > { %3735 = vst [vmem:[#allocation3 + $0x60] sm:$0xf] %v3734_v19 }
 0x32d   : > { %v1634_v56 = vpop.permute.xlu0 %1633  ;;  %3793 = vrot.lane.b32.xlu1 %v11633_v22, %s13844_s30  ;;  %v3716_v22 = vsel %vm11726_vm5, %v3711_v63, %v3715_v50  ;;  %v3770_v63 = vld [vmem:[#allocation3 + $0x80] sm:$0xf]  ;;  %v9743_v50 = vld [vmem:[#allocation14 + $0x8] sm:$0xff]  }
 0x32e   : > { %3717 = vst [vmem:[#allocation3 + $0x50] sm:$0xf] %v3716_v22 }
 0x32f   : > { %v1822_v45 = vpop.permute.xlu1 %1821  ;;  %3797 = vrot.lane.b32.xlu0 %v11645_v41, %s13844_s30  ;;  %v1635_v41 = vrot.slane %v1634_v56, 4 }
 0x331   : > { %v11788_v1 = vpop.permute.xlu0 %1643  ;;  %3801 = vrot.lane.b32.xlu1 %v11683_v8, %s13844_s30  ;;  %v1637_v31 = vsel %vm1636_vm7, %v1635_v41, %v1634_v56  ;;  %v9740_v56 = vld [vmem:[#allocation14] sm:$0xff]   ;;  %v11891_v41 = vld [vmem:[#allocation4] sm:$0xff] }
 0x332   : > { %v1645_v29 = vrot.slane %v11788_v1, 4 }
 0x333   : > { %v1834_v9 = vpop.permute.xlu1 %1833  ;;  %3805 = vrot.lane.b32.xlu0 %v11699_v14, %s13844_s30  ;;  %v1303_v14 = vpop.f32.mrb[15].mxu1 }
 0x334   : > { %v11879_v62 = vpack.c.bf16 %v1303_v14, %v1303_v14 }
 0x335   : > { %v11800_v49 = vpop.permute.xlu0 %1823 }
 0x336   : > { %13921 = vst [vmem:[#allocation47_spill] sm:$0xff] %v11879_v62  ;;  %v6804_v44 = vshrl.u32 %v11879_v62, 16  ;;  %v6807_v22 = vshll.u32 %v11879_v62, 16  ;;  %v9782_v62 = vld [vmem:[#allocation14 + $0x168] sm:$0xff]  }
 0x337   : > { %v9607_v43 = vpop.permute.xlu1 %9606 }
 0x338   : > { %v9609_v4 = vunpack.i.h.bf16 %v9607_v43  ;;  %v9608_v53 = vunpack.i.l.bf16 %v9607_v43  ;;  %v6806_v43 = vrot.slane %v6804_v44, 7 }
 0x339   : > { %v1476_v61 = vpop.permute.xlu0 %1475 }
 0x33a   : > { %v1699_v42 = vsel %vm11803_vm12, %v9608_v53, %v1698_v17  ;;  %v1718_v33 = vsel %vm11803_vm12, %v9609_v4, %v1717_v51  ;;  %v1485_v55 = vsel %vm11812_vm13, %v1476_v61, %v1484_v48  ;;  %v11894_v17 = vrot.slane %v6807_v22, 5  ;;  %v9746_v61 = vld [vmem:[#allocation14 + $0x10] sm:$0xff]   ;;  %v9749_v48 = vld [vmem:[#allocation14 + $0x1e0] sm:$0xff]  }
 0x33b   : > { %1700 = vst [vmem:[#allocation2 + $0x1c] sm:$0x8] %v1699_v42  ;;  %1719 = vst [vmem:[#allocation2 + $0x2c] sm:$0x8] %v1718_v33  ;;  %v1478_v3 = vpop.permute.xlu1 %1477  ;;  %v11896_v51 = vrot.slane %v6804_v44, 4  ;;  %v11902_v53 = vrot.slane %v13826_v32, 7  ;;  %v11904_v42 = vor.u32 %v6807_v22, %v6806_v43 }
 0x33c   : > { %1486 = vst [vmem:[#allocation2 + $0x20] sm:$0xf] %v1485_v55  ;;  %1828 = vst.msk [vmem:[#allocation2 + $0x1c] sm:$0x8] %vm1827_vm0, %v1822_v45  ;;  %v1491_v15 = vsel %vm11818_vm11, %v1478_v3, %v1490_v6  ;;  %v1646_v45 = vsel %vm1636_vm7, %v1645_v29, %v11788_v1  ;;  %v3752_v1 = vld [vmem:[#allocation3 + $0x70] sm:$0xf] }
 0x33d   : > { %1839 = vst.msk [vmem:[#allocation2 + $0x2c] sm:$0x8] %vm1827_vm0, %v1834_v9  ;;  %1492 = vst [vmem:[#allocation2 + $0x28] sm:$0x1] %v1491_v15  ;;  %v1692_v26 = vpop.permute.xlu0 %1691  ;;  %v3753_v9 = vsel %vm11726_vm5, %v3748_v25, %v3752_v1  ;;  %v6792_v29 = vrot.slane %v11902_v53, 4  ;;  %v9748_v44 = vld [vmem:[#allocation14 + $0x20] sm:$0xff]  }
 0x33e   : > { %1642 = vst.msk [vmem:[#allocation2 + $0x20] sm:$0xff] %vm11824_vm8, %v1637_v31  ;;  %3754 = vst [vmem:[#allocation3 + $0x70] sm:$0xf] %v3753_v9  ;;  %v9753_v22 = vld [vmem:[#allocation14 + $0x1f0] sm:$0xff]  }
 0x33f   : > { %v11841_v12 = vpop.permute.xlu1 %1835 }
 0x341   : > { %v11849_v13 = vpop.permute.xlu0 %1649 }
 0x342   : > { %v1651_v55 = vrot.slane %v11849_v13, 4 }
 0x343   : > { %v1502_v28 = vpop.permute.xlu1 %1501  ;;  %v11863_v5 = vld [vmem:[#allocation2 + $0x14] ss:$8 sps:$4 sm:$0xff]  }
 0x344   : > { %v1508_v47 = vsel %vm11812_vm13, %v1502_v28, %v1507_v18  ;;  %8360 = vmatprep.mubr.msk.bf16.mxu1 %vm2138_vm10, %v11863_v5  ;;  %v6798_v28 = vld [vmem:[#allocation3 + $0x78] sm:$0x1] }
 0x345   : > { %v1704_v37 = vld [vmem:[#allocation2 + $0x24] sm:$0xf]  ;;  %1509 = vst [vmem:[#allocation2 + $0x30] sm:$0xf] %v1508_v47  ;;  %v1504_v8 = vpop.permute.xlu0 %1503  ;;  %2196 = vmatmul.mubr.bf16.vlgmr.msra.gmra.mrb[16].mxu1 %v11851_v57 }
 0x346   : > { %v1705_v46 = vsel %vm11845_vm9, %v1692_v26, %v1704_v37  ;;  %1648 = vst.msk [vmem:[#allocation2 + $0x30] sm:$0xff] %vm11824_vm8, %v1646_v45  ;;  %v1511_v36 = vsel %vm11818_vm11, %v1504_v8, %v1510_v39  ;;  %2368 = vmatpush1.bf16.msra.mxu1 %v9740_v56  ;;  %v11914_v26 = vld [vmem:[#allocation2 + $0x20] ss:$8 sps:$4 sm:$0xff]   ;;  %v9747_v56 = vld [vmem:[#allocation14 + $0x18] sm:$0xff]   ;;  %v6810_v8 = vrot.slane %v6806_v43, 4  ;;  %v6799_v39 = vsel %vm11540_vm1, %v6792_v29, %v6798_v28 }
 0x347   : > { %1706 = vst [vmem:[#allocation2 + $0x24] sm:$0xf] %v1705_v46  ;;  %1512 = vst [vmem:[#allocation2 + $0x38] sm:$0x1] %v1511_v36  ;;  %v11881_v54 = vpop.permute.xlu1 %1655  ;;  %2369 = vmatprep.subr.bf16.mxu1 %v11891_v41  ;;  %v1527_v37 = vld [vmem:[#allocation2 + $0x40] sm:$0xf]  ;;  %v1652_v46 = vsel %vm1636_vm7, %v1651_v55, %v11849_v13 }
 0x348   : > { %1830 = vst.msk [vmem:[#allocation2 + $0x24] sm:$0x7] %vm1829_vm4, %v11800_v49  ;;  %v3771_v49 = vsel %vm11726_vm5, %v3766_v21, %v3770_v63  ;;  %v6941_v21 = vld [vmem:[#allocation3 + $0x7c] sm:$0x8]  ;;  %v9751_v45 = vld [vmem:[#allocation14 + $0x1e8] sm:$0xff]  }
 0x349   : > { %3772 = vst [vmem:[#allocation3 + $0x80] sm:$0xf] %v3771_v49  ;;  %v1714_v19 = vpop.permute.xlu0 %1713  ;;  %v1733_v13 = vld [vmem:[#allocation2 + $0x3c] sm:$0x8]  ;;  %v1749_v36 = vld [vmem:[#allocation2 + $0x4c] sm:$0x8]  ;;  %v6942_v1 = vsel %vm11528_vm14, %v11894_v17, %v6941_v21 }
 0x34a   : > { %2370 = vmatpush1.bf16.msra.mxu1 %v9743_v50  ;;  %v1530_v49 = vld [vmem:[#allocation2 + $0x48] sm:$0x1]  ;;  %v11940_v43 = vld [vmem:[#allocation3 + $0x78] sm:$0xff] }
 0x34b   : > { %v11898_v4 = vpop.permute.xlu1 %1845  ;;  %2371 = vmatprep.subr.bf16.mxu1 %v11891_v41  ;;  %13922 = vst [vmem:[#allocation48_spill] sm:$0xff] %v11940_v43  ;;  %6800 = vst [vmem:[#allocation3 + $0x78] sm:$0x1] %v6799_v39  ;;  %v9757_v28 = vld [vmem:[#allocation14 + $0x1f8] sm:$0xff]  }
 0x34c   : > { %6943 = vst [vmem:[#allocation3 + $0x7c] sm:$0x8] %v6942_v1 }
 0x34d   : > { %v1720_v31 = vld [vmem:[#allocation2 + $0x34] sm:$0xf]  ;;  %v1844_v3 = vpop.permute.xlu0 %1843 }
 0x34e   : > { %v1721_v15 = vsel %vm11845_vm9, %v1714_v19, %v1720_v31  ;;  %2372 = vmatpush1.bf16.msra.mxu1 %v9746_v61 }
 0x34f   : > { %v11909_v6 = vld [vmem:[#allocation2 + $0x24] ss:$8 sps:$4 sm:$0xff]   ;;  %1722 = vst [vmem:[#allocation2 + $0x34] sm:$0xf] %v1721_v15  ;;  %v1522_v18 = vpop.permute.xlu1 %1521  ;;  %2373 = vmatprep.subr.bf16.mxu1 %v11891_v41 }
 0x350   : > { %8361 = vmatprep.mubr.msk.bf16.mxu1 %vm2138_vm10, %v11909_v6  ;;  %8426 = vmatprep.mubr.msk.bf16.mxu0 %vm2138_vm10, %v11909_v6  ;;  %1840 = vst.msk [vmem:[#allocation2 + $0x34] sm:$0x7] %vm1829_vm4, %v11841_v12  ;;  %v1528_v25 = vsel %vm11812_vm13, %v1522_v18, %v1527_v37  ;;  %v6816_v12 = vld [vmem:[#allocation3 + $0x88] sm:$0x1]  ;;  %v9750_v37 = vld [vmem:[#allocation14 + $0x28] sm:$0xff]  }
 0x351   : > { %2204 = vmatmul.mubr.bf16.gmra.mrb[20].mxu1 %v11914_v26  ;;  %2725 = vmatmul.mubr.bf16.vlgmr.msra.gmra.mrb[16].mxu0 %v11914_v26  ;;  %1529 = vst [vmem:[#allocation2 + $0x40] sm:$0xf] %v1528_v25  ;;  %v1854_v47 = vpop.permute.xlu0 %1853  ;;  %v6817_v19 = vsel %vm11540_vm1, %v6810_v8, %v6816_v12  ;;  %v11952_v15 = vld [vmem:[#allocation3 + $0x88] sm:$0xff]  ;;  %v9752_v8 = vld [vmem:[#allocation14 + $0x30] sm:$0xff]  }
 0x352   : > { %3373 = vmatpush1.bf16.msra.mxu0 %v9749_v48  ;;  %1654 = vst.msk [vmem:[#allocation2 + $0x40] sm:$0xff] %vm11824_vm8, %v1652_v46  ;;  %2374 = vmatpush1.bf16.msra.mxu1 %v9747_v56  ;;  %13923 = vst [vmem:[#allocation49_spill] sm:$0xff] %v11952_v15  ;;  %v9762_v12 = vld [vmem:[#allocation14 + $0x200] sm:$0xff]  }
 0x353   : > { %3374 = vmatprep.subr.bf16.mxu0 %v11891_v41  ;;  %v9612_v14 = vpop.permute.xlu1 %9611  ;;  %2375 = vmatprep.subr.bf16.mxu1 %v11891_v41  ;;  %6818 = vst [vmem:[#allocation3 + $0x88] sm:$0x1] %v6817_v19 }
 0x354   : > { %v9614_v63 = vunpack.i.h.bf16 %v9612_v14  ;;  %v9613_v9 = vunpack.i.l.bf16 %v9612_v14 }
 0x355   : > { %v1524_v50 = vpop.permute.xlu0 %1523 }
 0x356   : > { %3375 = vmatpush1.bf16.msra.mxu0 %v9751_v45  ;;  %v1734_v61 = vsel %vm11803_vm12, %v9613_v9, %v1733_v13  ;;  %v1750_v48 = vsel %vm11803_vm12, %v9614_v63, %v1749_v36  ;;  %v1531_v55 = vsel %vm11818_vm11, %v1524_v50, %v1530_v49  ;;  %2376 = vmatpush1.bf16.msra.mxu1 %v9748_v44  ;;  %v1550_v45 = vld [vmem:[#allocation2 + $0x58] sm:$0x1]  ;;  %v9764_v44 = vld [vmem:[#allocation14 + $0x208] sm:$0xff]  }
 0x357   : > { %3376 = vmatprep.subr.bf16.mxu0 %v11891_v41  ;;  %1735 = vst [vmem:[#allocation2 + $0x3c] sm:$0x8] %v1734_v61  ;;  %1751 = vst [vmem:[#allocation2 + $0x4c] sm:$0x8] %v1750_v48  ;;  %v1730_v31 = vpop.permute.xlu1 %1729  ;;  %2377 = vmatprep.subr.bf16.mxu1 %v11891_v41  ;;  %v9761_v61 = vld [vmem:[#allocation14 + $0x40] sm:$0xff]  }
 0x358   : > { %1532 = vst [vmem:[#allocation2 + $0x48] sm:$0x1] %v1531_v55  ;;  %1849 = vst.msk [vmem:[#allocation2 + $0x3c] sm:$0x8] %vm1827_vm0, %v1844_v3  ;;  %v1657_v3 = vrot.slane %v11881_v54, 4 }
 0x359   : > { %1859 = vst.msk [vmem:[#allocation2 + $0x4c] sm:$0x8] %vm1827_vm0, %v1854_v47  ;;  %v1736_v29 = vld [vmem:[#allocation2 + $0x44] sm:$0xf]  ;;  %v11954_v18 = vpop.permute.xlu0 %1855  ;;  %v1547_v47 = vld [vmem:[#allocation2 + $0x50] sm:$0xf] }
 0x35a   : > { %3377 = vmatpush1.bf16.msra.mxu0 %v9753_v22  ;;  %v1737_v25 = vsel %vm11845_vm9, %v1730_v31, %v1736_v29  ;;  %2378 = vmatpush1.bf16.msra.mxu1 %v9750_v37  ;;  %v1658_v39 = vsel %vm1636_vm7, %v1657_v3, %v11881_v54  ;;  %v9754_v54 = vld [vmem:[#allocation14 + $0x38] sm:$0xff]   ;;  %v9766_v37 = vld [vmem:[#allocation14 + $0x210] sm:$0xff]  }
 0x35b   : > { %3378 = vmatprep.subr.bf16.mxu0 %v11891_v41  ;;  %1738 = vst [vmem:[#allocation2 + $0x44] sm:$0xf] %v1737_v25  ;;  %v1662_v21 = vpop.permute.xlu1 %1661  ;;  %2379 = vmatprep.subr.bf16.mxu1 %v11891_v41 }
 0x35c   : > { %1850 = vst.msk [vmem:[#allocation2 + $0x44] sm:$0x7] %vm1829_vm4, %v11898_v4  ;;  %v1907_v4 = vld [vmem:[#allocation2 + $0x30] sm:$0xff]  ;;  %v1663_v48 = vrot.slane %v1662_v21, 4 }
 0x35d   : > { %v1542_v46 = vpop.permute.xlu0 %1541 }
 0x35e   : > { %3379 = vmatpush1.bf16.msra.mxu0 %v9757_v28  ;;  %v1548_v56 = vsel %vm11812_vm13, %v1542_v46, %v1547_v47  ;;  %2380 = vmatpush1.bf16.msra.mxu1 %v9752_v8  ;;  %v1567_v46 = vld [vmem:[#allocation2 + $0x60] sm:$0xf] }
 0x35f   : > { %3380 = vmatprep.subr.bf16.mxu0 %v11891_v41  ;;  %1549 = vst [vmem:[#allocation2 + $0x50] sm:$0xf] %v1548_v56  ;;  %v1544_v14 = vpop.permute.xlu1 %1543  ;;  %v1908_v13 = vld [vmem:[#allocation2 + $0x38] sm:$0xff]  ;;  %2381 = vmatprep.subr.bf16.mxu1 %v11891_v41  ;;  %v1664_v56 = vsel %vm1636_vm7, %v1663_v48, %v1662_v21  ;;  %v9763_v8 = vld [vmem:[#allocation14 + $0x48] sm:$0xff]  }
 0x360   : > { %v11969_v36 = vld [vmem:[#allocation2 + $0x34] ss:$8 sps:$4 sm:$0xff]   ;;  %1660 = vst.msk [vmem:[#allocation2 + $0x50] sm:$0xff] %vm11824_vm8, %v1658_v39  ;;  %v1551_v1 = vsel %vm11818_vm11, %v1544_v14, %v1550_v45  ;;  %v11975_v63 = vcombine.low %v1907_v4, %v1908_v13  ;;  %v1910_v31 = vld [vmem:[#allocation2 + $0x48] sm:$0xff] }
 0x361   : > { %1552 = vst [vmem:[#allocation2 + $0x58] sm:$0x1] %v1551_v1  ;;  %v11977_v9 = vpop.permute.xlu0 %1667  ;;  %8362 = vmatprep.mubr.msk.bf16.mxu1 %vm2138_vm10, %v11969_v36  ;;  %8427 = vmatprep.mubr.msk.bf16.mxu0 %vm2138_vm10, %v11969_v36  ;;  %v1765_v39 = vld [vmem:[#allocation2 + $0x5c] sm:$0x8]  ;;  %v1781_v14 = vld [vmem:[#allocation2 + $0x6c] sm:$0x8] }
 0x362   : > { %2212 = vmatmul.mubr.bf16.gmra.mrb[24].mxu1 %v11975_v63  ;;  %2733 = vmatmul.mubr.bf16.gmra.mrb[20].mxu0 %v11975_v63  ;;  %v1570_v21 = vld [vmem:[#allocation2 + $0x68] sm:$0x1]  ;;  %v1669_v48 = vrot.slane %v11977_v9, 4 }
 0x363   : > { %v1746_v49 = vpop.permute.xlu1 %1745  ;;  %v11985_v50 = vld [vmem:[#allocation2 + $0x44] ss:$8 sps:$4 sm:$0xff]   ;;  %3381 = vmatpush1.bf16.msra.mxu0 %v9762_v12  ;;  %2382 = vmatpush1.bf16.msra.mxu1 %v9754_v54  ;;  %v9769_v12 = vld [vmem:[#allocation14 + $0x218] sm:$0xff]  }
 0x364   : > { %3382 = vmatprep.subr.bf16.mxu0 %v11891_v41  ;;  %v1909_v19 = vld [vmem:[#allocation2 + $0x40] sm:$0xff]  ;;  %8363 = vmatprep.mubr.msk.bf16.mxu1 %vm2138_vm10, %v11985_v50  ;;  %v9765_v54 = vld [vmem:[#allocation14 + $0x50] sm:$0xff]  }
 0x365   : > { %v11989_v22 = vpop.permute.xlu0 %1865  ;;  %8428 = vmatprep.mubr.msk.bf16.mxu0 %vm2138_vm10, %v11985_v50  ;;  %v11997_v25 = vcombine.low %v1909_v19, %v1910_v31  ;;  %2383 = vmatprep.subr.bf16.mxu1 %v11891_v41  ;;  %v1587_v31 = vld [vmem:[#allocation2 + $0x70] sm:$0xf] }
 0x367   : > { %v1752_v55 = vld [vmem:[#allocation2 + $0x54] sm:$0xf]  ;;  %v1864_v29 = vpop.permute.xlu1 %1863  ;;  %3383 = vmatpush1.bf16.msra.mxu0 %v9764_v44  ;;  %2384 = vmatpush1.bf16.msra.mxu1 %v9761_v61 }
 0x368   : > { %v1753_v28 = vsel %vm11845_vm9, %v1746_v49, %v1752_v55  ;;  %3384 = vmatprep.subr.bf16.mxu0 %v11891_v41  ;;  %2385 = vmatprep.subr.bf16.mxu1 %v11891_v41  ;;  %v9771_v49 = vld [vmem:[#allocation14 + $0x220] sm:$0xff]  }
 0x369   : > { %1754 = vst [vmem:[#allocation2 + $0x54] sm:$0xf] %v1753_v28  ;;  %v1562_v3 = vpop.permute.xlu0 %1561 }
 0x36a   : > { %1860 = vst.msk [vmem:[#allocation2 + $0x54] sm:$0x7] %vm1829_vm4, %v11954_v18  ;;  %v1568_v47 = vsel %vm11812_vm13, %v1562_v3, %v1567_v46  ;;  %2220 = vmatmul.mubr.bf16.gmra.mrb[28].mxu1 %v11997_v25  ;;  %2741 = vmatmul.mubr.bf16.gmra.mrb[24].mxu0 %v11997_v25  ;;  %v9768_v3 = vld [vmem:[#allocation14 + $0x58] sm:$0xff]   ;;  %v9774_v46 = vld [vmem:[#allocation14 + $0x228] sm:$0xff]  }
 0x36b   : > { %1569 = vst [vmem:[#allocation2 + $0x60] sm:$0xf] %v1568_v47  ;;  %v1874_v45 = vpop.permute.xlu1 %1873  ;;  %3385 = vmatpush1.bf16.msra.mxu0 %v9766_v37  ;;  %2386 = vmatpush1.bf16.msra.mxu1 %v9763_v8  ;;  %v1797_v8 = vld [vmem:[#allocation2 + $0x7c] sm:$0x8] }
 0x36c   : > { %1666 = vst.msk [vmem:[#allocation2 + $0x60] sm:$0xff] %vm11824_vm8, %v1664_v56  ;;  %3386 = vmatprep.subr.bf16.mxu0 %v11891_v41  ;;  %2387 = vmatprep.subr.bf16.mxu1 %v11891_v41 }
 0x36d   : > { %v9617_v18 = vpop.permute.xlu0 %9616 }
 0x36e   : > { %v9619_v4 = vunpack.i.h.bf16 %v9617_v18  ;;  %v9618_v13 = vunpack.i.l.bf16 %v9617_v18 }
 0x36f   : > { %v1564_v1 = vpop.permute.xlu1 %1563  ;;  %3387 = vmatpush1.bf16.msra.mxu0 %v9769_v12  ;;  %2388 = vmatpush1.bf16.msra.mxu1 %v9765_v54 }
 0x370   : > { %v1766_v44 = vsel %vm11803_vm12, %v9618_v13, %v1765_v39  ;;  %v1782_v19 = vsel %vm11803_vm12, %v9619_v4, %v1781_v14  ;;  %v1571_v61 = vsel %vm11818_vm11, %v1564_v1, %v1570_v21  ;;  %3388 = vmatprep.subr.bf16.mxu0 %v11891_v41  ;;  %2389 = vmatprep.subr.bf16.mxu1 %v11891_v41  ;;  %v1590_v39 = vld [vmem:[#allocation2 + $0x78] sm:$0x1]  ;;  %v9776_v14 = vld [vmem:[#allocation14 + $0x230] sm:$0xff]  }
 0x371   : > { %1767 = vst [vmem:[#allocation2 + $0x5c] sm:$0x8] %v1766_v44  ;;  %1783 = vst [vmem:[#allocation2 + $0x6c] sm:$0x8] %v1782_v19  ;;  %v1762_v55 = vpop.permute.xlu0 %1761  ;;  %v12041_v1 = vld [vmem:[#allocation2 + $0x50] ss:$8 sps:$4 sm:$0xff]  }
 0x372   : > { %1572 = vst [vmem:[#allocation2 + $0x68] sm:$0x1] %v1571_v61  ;;  %1869 = vst.msk [vmem:[#allocation2 + $0x5c] sm:$0x8] %vm1827_vm0, %v1864_v29  ;;  %v1670_v29 = vsel %vm1636_vm7, %v1669_v48, %v11977_v9  ;;  %v9772_v9 = vld [vmem:[#allocation14 + $0x60] sm:$0xff]   ;;  %v9775_v19 = vld [vmem:[#allocation14 + $0x68] sm:$0xff]  }
 0x373   : > { %1879 = vst.msk [vmem:[#allocation2 + $0x6c] sm:$0x8] %vm1827_vm0, %v1874_v45  ;;  %v1768_v37 = vld [vmem:[#allocation2 + $0x64] sm:$0xf]  ;;  %v1582_v28 = vpop.permute.xlu1 %1581  ;;  %3389 = vmatpush1.bf16.msra.mxu0 %v9771_v49  ;;  %2390 = vmatpush1.bf16.msra.mxu1 %v9768_v3  ;;  %v1607_v49 = vld [vmem:[#allocation2 + $0x80] sm:$0xf] }
 0x374   : > { %v1769_v47 = vsel %vm11845_vm9, %v1762_v55, %v1768_v37  ;;  %v1588_v56 = vsel %vm11812_vm13, %v1582_v28, %v1587_v31  ;;  %3390 = vmatprep.subr.bf16.mxu0 %v11891_v41  ;;  %2391 = vmatprep.subr.bf16.mxu1 %v11891_v41  ;;  %v9781_v37 = vld [vmem:[#allocation14 + $0x238] sm:$0xff]  }
 0x375   : > { %1770 = vst [vmem:[#allocation2 + $0x64] sm:$0xf] %v1769_v47  ;;  %1589 = vst [vmem:[#allocation2 + $0x70] sm:$0xf] %v1588_v56  ;;  %v1674_v45 = vpop.permute.xlu0 %1673 }
 0x376   : > { %1870 = vst.msk [vmem:[#allocation2 + $0x64] sm:$0x7] %vm1829_vm4, %v11989_v22  ;;  %v1675_v4 = vrot.slane %v1674_v45, 4 }
 0x377   : > { %1672 = vst.msk [vmem:[#allocation2 + $0x70] sm:$0xff] %vm11824_vm8, %v1670_v29  ;;  %v1792_v12 = vpop.permute.xlu1 %1791  ;;  %3391 = vmatpush1.bf16.msra.mxu0 %v9774_v46  ;;  %2392 = vmatpush1.bf16.msra.mxu1 %v9772_v9  ;;  %v9777_v29 = vld [vmem:[#allocation14 + $0x70] sm:$0xff]   ;;  %v9787_v9 = vld [vmem:[#allocation14 + $0x248] sm:$0xff]  }
 0x378   : > { %v1798_v18 = vsel %vm11803_vm12, %v1792_v12, %v1797_v8  ;;  %3392 = vmatprep.subr.bf16.mxu0 %v11891_v41  ;;  %v1676_v61 = vsel %vm1636_vm7, %v1675_v4, %v1674_v45  ;;  %2393 = vmatprep.subr.bf16.mxu1 %v11891_v41  ;;  %v9784_v45 = vld [vmem:[#allocation14 + $0x240] sm:$0xff]  }
 0x379   : > { %1799 = vst [vmem:[#allocation2 + $0x7c] sm:$0x8] %v1798_v18  ;;  %v1584_v13 = vpop.permute.xlu0 %1583  ;;  %v12039_v22 = vld [vmem:[#allocation2 + $0x54] ss:$8 sps:$4 sm:$0xff]  }
 0x37a   : > { %v1591_v21 = vsel %vm11818_vm11, %v1584_v13, %v1590_v39  ;;  %8364 = vmatprep.mubr.msk.bf16.mxu1 %vm2138_vm10, %v12039_v22  ;;  %8429 = vmatprep.mubr.msk.bf16.mxu0 %vm2138_vm10, %v12039_v22  ;;  %v1914_v47 = vld [vmem:[#allocation2 + $0x68] sm:$0xff] }
 0x37b   : > { %1592 = vst [vmem:[#allocation2 + $0x78] sm:$0x1] %v1591_v21  ;;  %v1602_v54 = vpop.permute.xlu1 %1601  ;;  %2228 = vmatmul.mubr.bf16.gmra.mrb[32].mxu1 %v12041_v1  ;;  %2749 = vmatmul.mubr.bf16.gmra.mrb[28].mxu0 %v12041_v1  ;;  %v1627_v21 = vld [vmem:[#allocation2 + $0x90] sm:$0xf] }
 0x37c   : > { %v1608_v44 = vsel %vm11812_vm13, %v1602_v54, %v1607_v49  ;;  %3393 = vmatpush1.bf16.msra.mxu0 %v9776_v14  ;;  %2394 = vmatpush1.bf16.msra.mxu1 %v9775_v19  ;;  %v6675_v54 = vshrl.u32 %v11746_v59, 16  ;;  %v12082_v49 = vpack.c.bf16 %v11407_v38, %v11407_v38  ;;  %v1813_v19 = vld [vmem:[#allocation2 + $0x8c] sm:$0x8] }
 0x37d   : > { %1609 = vst [vmem:[#allocation2 + $0x80] sm:$0xf] %v1608_v44  ;;  %v1778_v48 = vpop.permute.xlu0 %1777  ;;  %v12054_v31 = vld [vmem:[#allocation2 + $0x64] ss:$8 sps:$4 sm:$0xff]   ;;  %3394 = vmatprep.subr.bf16.mxu0 %v11891_v41  ;;  %2395 = vmatprep.subr.bf16.mxu1 %v11891_v41 }
 0x37e   : > { %v1784_v55 = vld [vmem:[#allocation2 + $0x74] sm:$0xf]  ;;  %1678 = vst.msk [vmem:[#allocation2 + $0x80] sm:$0xff] %vm11824_vm8, %v1676_v61  ;;  %v1913_v46 = vld [vmem:[#allocation2 + $0x60] sm:$0xff]  ;;  %8365 = vmatprep.mubr.msk.bf16.mxu1 %vm2138_vm10, %v12054_v31  ;;  %8430 = vmatprep.mubr.msk.bf16.mxu0 %vm2138_vm10, %v12054_v31  ;;  %13924 = vst [vmem:[#allocation50_spill] sm:$0xff] %v12082_v49  ;;  %v12108_v60 = vrot.slane %v6675_v54, 7 }
 0x37f   : > { %v1785_v28 = vsel %vm11845_vm9, %v1778_v48, %v1784_v55  ;;  %v1876_v3 = vpop.permute.xlu1 %1875  ;;  %v12068_v8 = vcombine.low %v1913_v46, %v1914_v47  ;;  %v9789_v38 = vld [vmem:[#allocation14 + $0x250] sm:$0xff]   ;;  %v6696_v46 = vshll.u32 %v12082_v49, 16 }
 0x380   : > { %1786 = vst [vmem:[#allocation2 + $0x74] sm:$0xf] %v1785_v28  ;;  %3395 = vmatpush1.bf16.msra.mxu0 %v9781_v37  ;;  %2396 = vmatpush1.bf16.msra.mxu1 %v9777_v29  ;;  %v6693_v29 = vshrl.u32 %v12082_v49, 16 }
 0x381   : > { %1880 = vst.msk [vmem:[#allocation2 + $0x74] sm:$0x7] %vm1829_vm4, %v1876_v3  ;;  %v1884_v56 = vpop.permute.xlu0 %1883  ;;  %3396 = vmatprep.subr.bf16.mxu0 %v11891_v41  ;;  %3032 = vmatprep.subr.bf16.mxu1 %v11891_v41 }
 0x382   : > { %1889 = vst.msk [vmem:[#allocation2 + $0x7c] sm:$0x8] %vm1827_vm0, %v1884_v56  ;;  %v6852_v56 = vrot.slane %v6675_v54, 4 }
 0x383   : > { %v1794_v12 = vpop.permute.xlu1 %1793  ;;  %2236 = vmatmul.mubr.bf16.gmra.mrb[36].mxu1 %v12068_v8  ;;  %2757 = vmatmul.mubr.bf16.gmra.mrb[32].mxu0 %v12068_v8 }
 0x384   : > { %3397 = vmatpush1.bf16.msra.mxu0 %v9784_v45 }
 0x385   : > { %v1800_v18 = vld [vmem:[#allocation2 + $0x84] sm:$0xf]  ;;  %v1886_v39 = vpop.permute.xlu0 %1885  ;;  %3398 = vmatprep.subr.bf16.mxu0 %v11891_v41 }
 0x386   : > { %v1801_v14 = vsel %vm11845_vm9, %v1794_v12, %v1800_v18  ;;  %v1610_v12 = vld [vmem:[#allocation2 + $0x88] sm:$0x1] }
 0x387   : > { %1802 = vst [vmem:[#allocation2 + $0x84] sm:$0xf] %v1801_v14  ;;  %v1680_v4 = vpop.permute.xlu1 %1679 }
 0x388   : > { %1890 = vst.msk [vmem:[#allocation2 + $0x84] sm:$0x7] %vm1829_vm4, %v1886_v39  ;;  %v1681_v13 = vrot.slane %v1680_v4, 4  ;;  %v12084_v61 = vld [vmem:[#allocation2 + $0x70] sm:$0xff]  ;;  %3399 = vmatpush1.bf16.msra.mxu0 %v9787_v9  ;;  %v12118_v39 = vrot.slane %v6696_v46, 5  ;;  %v6864_v9 = vrot.slane %v6693_v29, 4 }
 0x389   : > { %v1622_v44 = vpop.permute.xlu0 %1621  ;;  %13925 = vst [vmem:[#allocation51_spill] sm:$0xff] %v12084_v61  ;;  %v1946_v48 = vld [vmem:[#allocation2 + $0x78] sm:$0xff]  ;;  %3400 = vmatprep.subr.bf16.mxu0 %v11891_v41 }
 0x38a   : > { %v1682_v55 = vsel %vm1636_vm7, %v1681_v13, %v1680_v4  ;;  %v1628_v37 = vsel %vm11812_vm13, %v1622_v44, %v1627_v21  ;;  %v12090_v28 = vcombine.high %v12084_v61, %v1946_v48  ;;  %v12093_v3 = vcombine.low %v12084_v61, %v1946_v48  ;;  %v6881_v61 = vld [vmem:[#allocation3 + $0x2c] sm:$0x8] }
 0x38b   : > { %1629 = vst [vmem:[#allocation2 + $0x90] sm:$0xf] %v1628_v37  ;;  %v1808_v47 = vpop.permute.xlu1 %1807  ;;  %v12123_v13 = vpack.c.bf16 %v11450_v11, %v11450_v11  ;;  %v6853_v21 = vor.u32 %v6852_v56, %v11757_v27  ;;  %v6715_v48 = vshll.u32 %v12112_v30, 16  ;;  %v9780_v37 = vld [vmem:[#allocation2 + $0x4] ss:$8 sps:$4 sm:$0xff]   ;;  %v6865_v11 = vor.u32 %v6864_v9, %v12118_v39 }
 0x38c   : > { %13926 = vst [vmem:[#allocation52_spill] sm:$0xff] %v12093_v3  ;;  %1684 = vst.msk [vmem:[#allocation2 + $0x90] sm:$0xff] %vm11824_vm8, %v1682_v55  ;;  %v1814_v7 = vsel %vm11803_vm12, %v1808_v47, %v1813_v19  ;;  %8366 = vmatprep.mubr.msk.bf16.mxu1 %vm2138_vm10, %v12090_v28  ;;  %8431 = vmatprep.mubr.msk.bf16.mxu0 %vm2138_vm10, %v12090_v28  ;;  %v6712_v19 = vshrl.u32 %v12112_v30, 16  ;;  %v12137_v47 = vpack.c.bf16 %v11485_v35, %v11485_v35  ;;  %v1630_v56 = vld [vmem:[#allocation2 + $0x98] sm:$0x1] }
 0x38d   : > { %1815 = vst [vmem:[#allocation2 + $0x8c] sm:$0x8] %v1814_v7  ;;  %v1604_v45 = vpop.permute.xlu0 %1603  ;;  %2244 = vmatmul.mubr.bf16.gmra.mrb[40].mxu1 %v12093_v3  ;;  %2765 = vmatmul.mubr.bf16.gmra.mrb[36].mxu0 %v12093_v3  ;;  %v13827_v55 = vshll.u32 %v12123_v13, 16  ;;  %v12149_v35 = vpack.c.bf16 %v11494_v40, %v11494_v40  ;;  %v12153_v20 = vrot.slane %v6715_v48, 5  ;;  %v12161_v40 = vrot.slane %v6865_v11, 4 }
 0x38e   : > { %v1611_v18 = vsel %vm11818_vm11, %v1604_v45, %v1610_v12  ;;  %3401 = vmatpush1.bf16.msra.mxu0 %v9789_v38  ;;  %v12132_v38 = vrot.slane %v6693_v29, 7  ;;  %v6876_v12 = vrot.slane %v6712_v19, 4  ;;  %v12151_v32 = vrot.slane %v6712_v19, 7  ;;  %v6860_v19 = vld [vmem:[#allocation3 + $0x14] sm:$0xf] }
 0x38f   : > { %1612 = vst [vmem:[#allocation2 + $0x88] sm:$0x1] %v1611_v18  ;;  %v1894_v14 = vpop.permute.xlu1 %1893  ;;  %v1947_v4 = vld [vmem:[#allocation2 + $0x80] sm:$0xff]  ;;  %4325 = vmatprep.subr.bf16.mxu0 %v11891_v41  ;;  %v6730_v18 = vshrl.u32 %v12123_v13, 16  ;;  %v12157_v34 = vrot.slane %v13827_v55, 5  ;;  %v12177_v11 = vor.u32 %v6678_v58, %v12108_v60  ;;  %v6767_v44 = vshrl.u32 %v12149_v35, 16 }
 0x390   : > { %1899 = vst.msk [vmem:[#allocation2 + $0x8c] sm:$0x8] %vm1827_vm0, %v1894_v14  ;;  %v8344_v2 = vcombine.high %v1947_v4, %v1947_v4  ;;  %v8343_v45 = vcombine.low %v1947_v4, %v1947_v4  ;;  %vm3779_vm0 = vcmask 1043968   ;;  %v12179_v55 = vld [vmem:[#allocation3 + $0x1c] sm:$0x8]  ;;  %v6718_v58 = vrot.slane %v12151_v32, 4 }
 0x391   : > { %v1810_v54 = vpop.permute.xlu0 %1809  ;;  %v12197_v30 = vld [vmem:[#allocation3 + $0x24] sm:$0xf]  ;;  %v13930_v49 = vshll.u32 %v12137_v47, 16  ;;  %v13931_v59 = vshll.u32 %v12149_v35, 16  ;;  %v12207_v15 = vrot.slane %v6767_v44, 4 }
 0x392   : > { %8367 = vmatprep.mubr.msk.bf16.mxu1 %vm2138_vm10, %v8344_v2  ;;  %v12144_v2 = vrot.slane %v6853_v21, 4  ;;  %v6888_v21 = vrot.slane %v6730_v18, 4  ;;  %v12248_v3 = vld [vmem:[#allocation3 + $0x3c] sm:$0x8] }
 0x393   : > { %v1816_v27 = vld [vmem:[#allocation2 + $0x94] sm:$0xf]  ;;  %v1624_v7 = vpop.permute.xlu1 %1623 }
 0x394   : > { %v1817_v14 = vsel %vm11845_vm9, %v1810_v54, %v1816_v27  ;;  %v1631_v29 = vsel %vm11818_vm11, %v1624_v7, %v1630_v56  ;;  %v6749_v54 = vshrl.u32 %v12137_v47, 16  ;;  %v6889_v27 = vor.u32 %v6888_v21, %v12157_v34 }
 0x395   : > { %1818 = vst [vmem:[#allocation2 + $0x94] sm:$0xf] %v1817_v14  ;;  %1632 = vst [vmem:[#allocation2 + $0x98] sm:$0x1] %v1631_v29  ;;  %v1896_v33 = vpop.permute.xlu0 %1895  ;;  %2252 = vmatmul.mubr.bf16.gmra.mrb[44].mxu1 %v8343_v45  ;;  %v6687_v45 = vld [vmem:[#allocation3 + $0x18] sm:$0x1]  ;;  %v6877_v14 = vor.u32 %v6876_v12, %v12153_v20 }
 0x396   : > { %1900 = vst.msk [vmem:[#allocation2 + $0x94] sm:$0x7] %vm1829_vm4, %v1896_v33  ;;  %8387 = vmatprep.mubr.msk.bf16.mxu1 %vm2138_vm10, %v9780_v37  ;;  %v12167_v29 = vrot.slane %v6730_v18, 7  ;;  %v12181_v9 = vrot.slane %v6749_v54, 4  ;;  %v9778_v18 = vld [vmem:[#allocation2] ss:$8 sps:$4 sm:$0xff]  }
 0x397   : > { %v3777_v7 = vpop.permute.xlu1 %3776  ;;  %v2476_v56 = vld [vmem:[#allocation2 + $0x88] sm:$0xff]  ;;  %vm13946_vm4 = vcmask 523264  }
 0x398   : > { %3780 = vst.msk [vmem:[#allocation3 + $0x10] sm:$0xf] %vm3779_vm0, %v3777_v7  ;;  %v12170_v33 = vcombine.high %v1947_v4, %v2476_v56  ;;  %v12172_v37 = vcombine.low %v1947_v4, %v2476_v56  ;;  %v12187_v7 = vor.u32 %v6696_v46, %v12132_v38  ;;  %v6705_v4 = vld [vmem:[#allocation3 + $0x28] sm:$0x1]  ;;  %v12190_v56 = vor.u32 %v6715_v48, %v12151_v32  ;;  %v12227_v32 = vld [vmem:[#allocation3 + $0x34] sm:$0xf]  ;;  %vm13949_vm11 = vmmov %vm13946_vm4 }
 0x399   : > { %v3782_v12 = vpop.permute.xlu0 %3781  ;;  %v12201_v46 = vrot.slane %v13930_v49, 5  ;;  %v12205_v48 = vrot.slane %v13931_v59, 5  ;;  %v6870_v49 = vsel %vm11528_vm14, %v12118_v39, %v12179_v55  ;;  %v12219_v59 = vrot.slane %v6877_v14, 4  ;;  %vm13950_vm13 = vmmov %vm13946_vm4 }
 0x39a   : > { %13928 = vst [vmem:[#allocation54_spill] sm:$0xff] %v12170_v33  ;;  %13929 = vst [vmem:[#allocation55_spill] sm:$0xff] %v12172_v37  ;;  %8432 = vmatprep.mubr.msk.bf16.mxu0 %vm2138_vm10, %v12170_v33  ;;  %v12221_v33 = vrot.slane %v6749_v54, 7  ;;  %v13933_v39 = vshrl.u32 %v11869_v52, 16 }
 0x39b   : > { %3784 = vst.msk [vmem:[#allocation3 + $0x20] sm:$0xf] %vm3779_vm0, %v3782_v12  ;;  %2773 = vmatmul.mubr.bf16.gmra.mrb[40].mxu0 %v12172_v37  ;;  %v3786_v21 = vpop.permute.xlu1 %3785  ;;  %v13932_v12 = vrot.slane %v12108_v60, 4  ;;  %v6861_v60 = vsel %vm11553_vm2, %v12144_v2, %v6860_v19  ;;  %v6873_v19 = vsel %vm11553_vm2, %v12161_v40, %v12197_v30  ;;  %v6742_v37 = vld [vmem:[#allocation3 + $0x48] sm:$0x1]  ;;  %v6725_v30 = vsel %vm11540_vm1, %v6718_v58, %v6724_v16 }
 0x39c   : > { %3788 = vst.msk [vmem:[#allocation3 + $0x30] sm:$0xf] %vm3779_vm0, %v3786_v21  ;;  %v12234_v55 = vrot.slane %v13933_v39, 4  ;;  %v13934_v21 = vrot.slane %v12132_v38, 4  ;;  %v12250_v39 = vld [vmem:[#allocation3 + $0x44] sm:$0xf]  ;;  %v6882_v40 = vsel %vm11528_vm14, %v12153_v20, %v6881_v61  ;;  %v6885_v16 = vsel %vm11553_vm2, %v12219_v59, %v12227_v32 }
 0x39d   : > { %v6688_v43 = vsel %vm11540_vm1, %v13932_v12, %v6687_v45  ;;  %v6736_v45 = vrot.slane %v12167_v29, 4  ;;  %v6901_v12 = vor.u32 %v12181_v9, %v12201_v46  ;;  %2400 = vmatmul.mubr.bf16.vlgmr.msra.gmra.mrb[48].mxu1 %v9778_v18  ;;  %v12236_v54 = vld [vmem:[#allocation2 + $0x90] sm:$0xff]  ;;  %v3790_v14 = vpop.permute.xlu0 %3789  ;;  %v12246_v9 = vrot.slane %v6889_v27, 4  ;;  %v12276_v58 = vld [vmem:[#allocation3 + $0x4c] sm:$0x8] }
 0x39e   : > { %v6706_v2 = vsel %vm11540_vm1, %v13934_v21, %v6705_v4  ;;  %3033 = vmatpush1.bf16.msra.mxu1 %v9782_v62  ;;  %8388 = vmatprep.mubr.msk.bf16.mxu1 %vm2138_vm10, %v11863_v5  ;;  %v8410_v38 = vcombine.high %v12236_v54, %v12236_v54  ;;  %v9785_v18 = vld [vmem:[#allocation14 + $0x170] sm:$0xff]   ;;  %3792 = vst.msk [vmem:[#allocation3 + $0x40] sm:$0xf] %vm3779_vm0, %v3790_v14  ;;  %v13935_v62 = vshll.u32 %v11869_v52, 16  ;;  %v6755_v61 = vrot.slane %v12221_v33, 4 }
 0x39f   : > { %v6913_v27 = vor.u32 %v12207_v15, %v12205_v48  ;;  %3034 = vmatprep.subr.bf16.mxu1 %v11891_v41  ;;  %v3794_v5 = vpop.permute.xlu1 %3793  ;;  %v12269_v21 = vld [vmem:[#allocation3 + $0x14] ss:$8 sps:$4 sm:$0xff]   ;;  %v6684_v14 = vld [vmem:[#allocation3 + $0x10] sm:$0xf]  ;;  %v6761_v20 = vld [vmem:[#allocation3 + $0x58] sm:$0x1]  ;;  %v6894_v32 = vsel %vm11528_vm14, %v12157_v34, %v12248_v3 }
 0x3a0   : > { %v12266_v4 = vrot.slane %v13935_v62, 5  ;;  %13936 = vst [vmem:[#allocation56_spill] sm:$0xff] %v12269_v21  ;;  %v12278_v15 = vrot.slane %v6767_v44, 7  ;;  %8433 = vmatprep.mubr.msk.bf16.mxu0 %vm2138_vm10, %v8410_v38  ;;  %3796 = vst.msk [vmem:[#allocation3 + $0x50] sm:$0xf] %vm3779_vm0, %v3794_v5  ;;  %v6685_v62 = vsel %vm11726_vm5, %v12177_v11, %v6684_v14  ;;  %v12289_v59 = vrot.slane %v6901_v12, 4 }
 0x3a1   : > { %6689 = vst [vmem:[#allocation3 + $0x18] sm:$0x1] %v6688_v43  ;;  %6862 = vst [vmem:[#allocation3 + $0x14] sm:$0xf] %v6861_v60  ;;  %v8409_v5 = vcombine.low %v12236_v54, %v12236_v54  ;;  %v3798_v21 = vpop.permute.xlu0 %3797  ;;  %v12295_v11 = vld [vmem:[#allocation3 + $0x24] ss:$8 sps:$4 sm:$0xff]   ;;  %v6743_v14 = vsel %vm11540_vm1, %v6736_v45, %v6742_v37 }
 0x3a2   : > { %6871 = vst [vmem:[#allocation3 + $0x1c] sm:$0x8] %v6870_v49  ;;  %v6925_v44 = vor.u32 %v12234_v55, %v12266_v4  ;;  %v6702_v38 = vld [vmem:[#allocation3 + $0x20] sm:$0xf]  ;;  %6686 = vst [vmem:[#allocation3 + $0x10] sm:$0xf] %v6685_v62  ;;  %3035 = vmatpush1.bf16.msra.mxu1 %v9785_v18  ;;  %v6906_v18 = vsel %vm11528_vm14, %v12201_v46, %v12276_v58 }
 0x3a3   : > { %v13937_v43 = vshll.u32 %v12123_v13, 16  ;;  %v6908_v60 = vld [vmem:[#allocation3 + $0x54] sm:$0xf]  ;;  %v6773_v3 = vrot.slane %v12278_v15, 4  ;;  %v6917_v34 = vld [vmem:[#allocation3 + $0x5c] sm:$0x8]  ;;  %v6703_v55 = vsel %vm11726_vm5, %v12187_v7, %v6702_v38  ;;  %2781 = vmatmul.mubr.bf16.gmra.mrb[44].mxu0 %v8409_v5  ;;  %3036 = vmatprep.subr.bf16.mxu1 %v11891_v41 }
 0x3a4   : > { %v9788_v12 = vld [vmem:[#allocation14 + $0x178] sm:$0xff]   ;;  %3800 = vst.msk [vmem:[#allocation3 + $0x60] sm:$0xf] %vm3779_vm0, %v3798_v21  ;;  %6707 = vst [vmem:[#allocation3 + $0x28] sm:$0x1] %v6706_v2  ;;  %v6914_v21 = vrot.slane %v6913_v27, 4  ;;  %v3802_v2 = vpop.permute.xlu1 %3801  ;;  %8504 = vmatprep.mubr.msk.bf16.mxu0 %vm2138_vm10, %v11985_v50  ;;  %v6762_v27 = vsel %vm11540_vm1, %v6755_v61, %v6761_v20  ;;  %v6918_v58 = vsel %vm11528_vm14, %v12205_v48, %v6917_v34 }
 0x3a5   : > { %v6735_v49 = vor.u32 %v13937_v43, %v12167_v29  ;;  %6874 = vst [vmem:[#allocation3 + $0x24] sm:$0xf] %v6873_v19  ;;  %6883 = vst [vmem:[#allocation3 + $0x2c] sm:$0x8] %v6882_v40  ;;  %v6897_v29 = vsel %vm11553_vm2, %v12246_v9, %v12250_v39  ;;  %v6721_v7 = vld [vmem:[#allocation3 + $0x30] sm:$0xf]  ;;  %2408 = vmatmul.mubr.bf16.gmra.mrb[52].mxu1 %v11851_v57  ;;  %v3806_v5 = vpop.permute.xlu0 %3805 }
 0x3a6   : > { %v12316_v19 = vld [vmem:[#allocation3 + $0x34] ss:$8 sps:$4 sm:$0xff]   ;;  %6704 = vst [vmem:[#allocation3 + $0x20] sm:$0xf] %v6703_v55  ;;  %v13938_v37 = vshll.u32 %v12137_v47, 16  ;;  %v6722_v46 = vsel %vm11726_vm5, %v12190_v56, %v6721_v7  ;;  %v6926_v62 = vrot.slane %v6925_v44, 4  ;;  %8389 = vmatprep.mubr.msk.bf16.mxu1 %vm2138_vm10, %v11909_v6  ;;  %3037 = vmatpush1.bf16.msra.mxu1 %v9788_v12 }
 0x3a7   : > { %v6779_v40 = vld [vmem:[#allocation3 + $0x68] sm:$0x1]  ;;  %v6920_v9 = vld [vmem:[#allocation3 + $0x64] sm:$0xf]  ;;  %v6929_v39 = vld [vmem:[#allocation3 + $0x6c] sm:$0x8]  ;;  %3038 = vmatprep.subr.bf16.mxu1 %v11891_v41 }
 0x3a8   : > { %v6754_v45 = vor.u32 %v13938_v37, %v12221_v33  ;;  %3804 = vst.msk [vmem:[#allocation3 + $0x70] sm:$0xf] %vm3779_vm0, %v3802_v2  ;;  %6726 = vst [vmem:[#allocation3 + $0x38] sm:$0x1] %v6725_v30  ;;  %v6909_v33 = vsel %vm11553_vm2, %v12289_v59, %v6908_v60  ;;  %v6739_v38 = vld [vmem:[#allocation3 + $0x40] sm:$0xf]  ;;  %v6780_v48 = vsel %vm11540_vm1, %v6773_v3, %v6779_v40 }
 0x3a9   : > { %6886 = vst [vmem:[#allocation3 + $0x34] sm:$0xf] %v6885_v16  ;;  %6895 = vst [vmem:[#allocation3 + $0x3c] sm:$0x8] %v6894_v32  ;;  %v12336_v56 = vld [vmem:[#allocation3 + $0x44] ss:$8 sps:$4 sm:$0xff]   ;;  %v6740_v57 = vsel %vm11726_vm5, %v6735_v49, %v6739_v38  ;;  %v6930_v6 = vsel %vm11528_vm14, %v12266_v4, %v6929_v39  ;;  %v13940_v59 = vor.u32 %v11896_v51, %v11894_v17 }
 0x3aa   : > { %6723 = vst [vmem:[#allocation3 + $0x30] sm:$0xf] %v6722_v46  ;;  %v13939_v30 = vshll.u32 %v12149_v35, 16  ;;  %v6932_v61 = vld [vmem:[#allocation3 + $0x74] sm:$0xf]  ;;  %v9790_v20 = vld [vmem:[#allocation14 + $0x180] sm:$0xff]   ;;  %v6791_v4 = vor.u32 %v13941_v0, %v11902_v53  ;;  %vm13951_vm14 = vmmov %vm13946_vm4 }
 0x3ab   : > { %3808 = vst.msk [vmem:[#allocation3 + $0x80] sm:$0xf] %vm3779_vm0, %v3806_v5  ;;  %6744 = vst [vmem:[#allocation3 + $0x48] sm:$0x1] %v6743_v14  ;;  %v6758_v32 = vld [vmem:[#allocation3 + $0x50] sm:$0xf]  ;;  %v6933_v3 = vsel %vm11553_vm2, %v6926_v62, %v6932_v61  ;;  %3039 = vmatpush1.bf16.msra.mxu1 %v9790_v20  ;;  %3405 = vmatmul.mubr.bf16.vlgmr.msra.gmra.mrb[48].mxu0 %v11997_v25 }
 0x3ac   : > { %v6772_v16 = vor.u32 %v13939_v30, %v12278_v15  ;;  %6898 = vst [vmem:[#allocation3 + $0x44] sm:$0xf] %v6897_v29  ;;  %6907 = vst [vmem:[#allocation3 + $0x4c] sm:$0x8] %v6906_v18  ;;  %v6921_v15 = vsel %vm11553_vm2, %v6914_v21, %v6920_v9  ;;  %v6938_v44 = vrot.slane %v13940_v59, 4  ;;  %v9795_v49 = vld [vmem:[#allocation17] sm:$0xff]   ;;  %v6759_v60 = vsel %vm11726_vm5, %v6754_v45, %v6758_v32 }
 0x3ad   : > { %v12357_v43 = vld [vmem:[#allocation3 + $0x54] ss:$8 sps:$4 sm:$0xff]   ;;  %6741 = vst [vmem:[#allocation3 + $0x40] sm:$0xf] %v6740_v57  ;;  %6763 = vst [vmem:[#allocation3 + $0x58] sm:$0x1] %v6762_v27  ;;  %3040 = vmatprep.subr.bf16.mxu1 %v11891_v41  ;;  %8505 = vmatprep.mubr.msk.bf16.mxu0 %vm2138_vm10, %v12039_v22 }
 0x3ae   : > { %6910 = vst [vmem:[#allocation3 + $0x54] sm:$0xf] %v6909_v33  ;;  %6919 = vst [vmem:[#allocation3 + $0x5c] sm:$0x8] %v6918_v58  ;;  %v6776_v17 = vld [vmem:[#allocation3 + $0x60] sm:$0xf]  ;;  %v6945_v53 = vsel %vm11553_vm2, %v6938_v44, %v6944_v10  ;;  %4326 = vmatpush1.bf16.msra.mxu0 %v9795_v49  ;;  %2416 = vmatmul.mubr.bf16.gmra.mrb[56].mxu1 %v11914_v26 }
 0x3af   : > { %v12366_v51 = vld [vmem:[#allocation3 + $0x64] ss:$8 sps:$4 sm:$0xff]   ;;  %6760 = vst [vmem:[#allocation3 + $0x50] sm:$0xf] %v6759_v60  ;;  %v6777_v12 = vsel %vm11726_vm5, %v6772_v16, %v6776_v17  ;;  %6781 = vst [vmem:[#allocation3 + $0x68] sm:$0x1] %v6780_v48  ;;  %8390 = vmatprep.mubr.msk.bf16.mxu1 %vm2138_vm10, %v11969_v36 }
 0x3b0   : > { %v9791_v34 = vld [vmem:[#allocation14 + $0x188] sm:$0xff]   ;;  %6922 = vst [vmem:[#allocation3 + $0x64] sm:$0xf] %v6921_v15  ;;  %6931 = vst [vmem:[#allocation3 + $0x6c] sm:$0x8] %v6930_v6  ;;  %v12379_v18 = vld [vmem:[#allocation4] sm:$0xff] }
 0x3b1   : > { %v6795_v55 = vld [vmem:[#allocation3 + $0x70] sm:$0xf]  ;;  %6778 = vst [vmem:[#allocation3 + $0x60] sm:$0xf] %v6777_v12  ;;  %v9797_v29 = vld [vmem:[#allocation17 + $0x8] sm:$0xff]   ;;  %4327 = vmatprep.subr.bf16.mxu0 %v12379_v18  ;;  %3041 = vmatpush1.bf16.msra.mxu1 %v9791_v34  ;;  %v9793_v37 = vld [vmem:[#allocation14 + $0x198] sm:$0xff]  }
 0x3b2   : > { %v12374_v14 = vld [vmem:[#allocation3 + $0x70] sm:$0xff]  ;;  %v6813_v41 = vld [vmem:[#allocation3 + $0x80] sm:$0xf]  ;;  %v6796_v24 = vsel %vm11726_vm5, %v6791_v4, %v6795_v55  ;;  %3042 = vmatprep.subr.bf16.mxu1 %v12379_v18  ;;  %4328 = vmatpush1.bf16.msra.mxu0 %v9797_v29  ;;  %v9819_v61 = vld [vmem:[#allocation17 + $0x48] sm:$0xff]  }
 0x3b3   : > { %6934 = vst [vmem:[#allocation3 + $0x74] sm:$0xf] %v6933_v3  ;;  %v12382_v21 = vld [vmem:[#allocation3 + $0x80] sm:$0xff]  ;;  %v9792_v7 = vld [vmem:[#allocation14 + $0x190] sm:$0xff]   ;;  %6797 = vst [vmem:[#allocation3 + $0x70] sm:$0xf] %v6796_v24  ;;  %v6814_v26 = vsel %vm11726_vm5, %v11904_v42, %v6813_v41  ;;  %4329 = vmatprep.subr.bf16.mxu0 %v12379_v18  ;;  %3413 = vmatmul.mubr.bf16.gmra.mrb[52].mxu0 %v12041_v1 }
 0x3b4   : > { %6946 = vst [vmem:[#allocation3 + $0x84] sm:$0xf] %v6945_v53  ;;  %v9799_v2 = vld [vmem:[#allocation17 + $0x10] sm:$0xff]   ;;  %6815 = vst [vmem:[#allocation3 + $0x80] sm:$0xf] %v6814_v26  ;;  %8506 = vmatprep.mubr.msk.bf16.mxu0 %vm2138_vm10, %v12054_v31  ;;  %v9801_v36 = vld [vmem:[#allocation17 + $0x18] sm:$0xff]  }
 0x3b5   : > { %3043 = vmatpush1.bf16.msra.mxu1 %v9792_v7  ;;  %v9803_v42 = vld [vmem:[#allocation17 + $0x20] sm:$0xff]   ;;  %v9796_v45 = vld [vmem:[#allocation14 + $0x1a8] sm:$0xff]   ;;  %v13942_v39 = vld [vmem:[#allocation52_spill] sm:$0xff] }
 0x3b6   : > { %3044 = vmatprep.subr.bf16.mxu1 %v12379_v18  ;;  %4330 = vmatpush1.bf16.msra.mxu0 %v9799_v2  ;;  %v9806_v40 = vld [vmem:[#allocation17 + $0x30] sm:$0xff]   ;;  %v9800_v9 = vld [vmem:[#allocation14 + $0x1b8] sm:$0xff]   ;;  %v9802_v27 = vld [vmem:[#allocation14 + $0x1c0] sm:$0xff]  }
 0x3b7   : > { %2424 = vmatmul.mubr.bf16.gmra.mrb[60].mxu1 %v11975_v63  ;;  %4331 = vmatprep.subr.bf16.mxu0 %v12379_v18  ;;  %v9804_v63 = vld [vmem:[#allocation17 + $0x28] sm:$0xff]   ;;  %v9811_v46 = vld [vmem:[#allocation17 + $0x38] sm:$0xff]   ;;  %v9815_v58 = vld [vmem:[#allocation17 + $0x40] sm:$0xff]  }
 0x3b8   : > { %8391 = vmatprep.mubr.msk.bf16.mxu1 %vm2138_vm10, %v11985_v50  ;;  %v9798_v50 = vld [vmem:[#allocation14 + $0x1b0] sm:$0xff]   ;;  %v3154_v33 = vld [vmem:[#allocation2 + $0x98] sm:$0xff]  ;;  %v9805_v38 = vld [vmem:[#allocation14 + $0x1c8] sm:$0xff]  }
 0x3b9   : > { %3045 = vmatpush1.bf16.msra.mxu1 %v9793_v37  ;;  %v12424_v62 = vcombine.high %v12236_v54, %v3154_v33  ;;  %v13944_v5 = vld [vmem:[#allocation55_spill] sm:$0xff]  ;;  %v9807_v48 = vld [vmem:[#allocation14 + $0x1d0] sm:$0xff]   ;;  %v12440_v32 = vcombine.low %v12236_v54, %v3154_v33  ;;  %v9812_v59 = vld [vmem:[#allocation14 + $0x1d8] sm:$0xff]  }
 0x3ba   : > { %3046 = vmatprep.subr.bf16.mxu1 %v12379_v18  ;;  %4332 = vmatpush1.bf16.msra.mxu0 %v9801_v36  ;;  %v13945_v30 = vld [vmem:[#allocation51_spill] sm:$0xff]  ;;  %v9810_v49 = vld [vmem:[#allocation2 + $0x34] ss:$8 sps:$4 sm:$0xff]   ;;  %v9829_v10 = vld [vmem:[#allocation17 + $0x58] sm:$0xff]  }
 0x3bb   : > { %4333 = vmatprep.subr.bf16.mxu0 %v12379_v18  ;;  %3421 = vmatmul.mubr.bf16.gmra.mrb[56].mxu0 %v12068_v8  ;;  %v8371_v16 = vcombine.high %v13945_v30, %v13945_v30  ;;  %v12433_v20 = vld [vmem:[#allocation2 + $0xa0] sm:$0xff]  ;;  %v3156_v57 = vld [vmem:[#allocation2 + $0xa8] sm:$0xff]  ;;  %v8370_v44 = vcombine.low %v13945_v30, %v13945_v30  ;;  %v3157_v60 = vld [vmem:[#allocation2 + $0xb0] sm:$0xff]  ;;  %v8575_v30 = vcombine.low %v12374_v14, %v12374_v14 }
 0x3bc   : > { %8507 = vmatprep.mubr.msk.bf16.mxu0 %vm2138_vm10, %v12090_v28  ;;  %v8486_v15 = vcombine.high %v12433_v20, %v3156_v57  ;;  %v9823_v6 = vld [vmem:[#allocation17 + $0x50] sm:$0xff]   ;;  %v8485_v54 = vcombine.low %v12433_v20, %v3156_v57  ;;  %v8488_v0 = vcombine.high %v3157_v60, %v3157_v60  ;;  %v9816_v4 = vld [vmem:[#allocation17 + $0x60] sm:$0xff]   ;;  %v9822_v34 = vld [vmem:[#allocation17 + $0x68] sm:$0xff]   ;;  %v8487_v12 = vcombine.low %v3157_v60, %v3157_v60 }
 0x3bd   : > { %3047 = vmatpush1.bf16.msra.mxu1 %v9794_v23  ;;  %v9808_v3 = vld [vmem:[#allocation2 + $0x30] ss:$8 sps:$4 sm:$0xff]   ;;  %v9817_v17 = vld [vmem:[#allocation2 + $0x44] ss:$8 sps:$4 sm:$0xff]   ;;  %v9827_v29 = vld [vmem:[#allocation2 + $0x40] ss:$8 sps:$4 sm:$0xff]  }
 0x3be   : > { %3048 = vmatprep.subr.bf16.mxu1 %v12379_v18  ;;  %4334 = vmatpush1.bf16.msra.mxu0 %v9803_v42  ;;  %v9826_v53 = vld [vmem:[#allocation3 + $0x4] ss:$8 sps:$4 sm:$0xff]   ;;  %v9832_v41 = vld [vmem:[#allocation17 + $0x78] sm:$0xff]   ;;  %v9833_v24 = vld [vmem:[#allocation17 + $0x80] sm:$0xff]  }
 0x3bf   : > { %2432 = vmatmul.mubr.bf16.gmra.mrb[64].mxu1 %v11997_v25  ;;  %4335 = vmatprep.subr.bf16.mxu0 %v12379_v18  ;;  %v13943_v25 = vld [vmem:[#allocation54_spill] sm:$0xff]  ;;  %v9828_v55 = vld [vmem:[#allocation17 + $0x70] sm:$0xff]   ;;  %v3911_v37 = vld [vmem:[#allocation3 + $0x18] sm:$0xff] }
 0x3c0   : > { %8392 = vmatprep.mubr.msk.bf16.mxu1 %vm2138_vm10, %v12039_v22  ;;  %v13947_v7 = vld [vmem:[#allocation46_spill] sm:$0xff]  ;;  %v13948_v26 = vld [vmem:[#allocation56_spill] sm:$0xff]  ;;  %vm13952_vm1 = vmmov %vm13946_vm4 }
 0x3c1   : > { %3049 = vmatpush1.bf16.msra.mxu1 %v9796_v45  ;;  %v3910_v2 = vld [vmem:[#allocation3 + $0x10] sm:$0xff]  ;;  %v9845_v42 = vld [vmem:[#allocation17 + $0xa0] sm:$0xff]   ;;  %vm13953_vm2 = vmmov %vm13952_vm1 }
 0x3c2   : > { %3050 = vmatprep.subr.bf16.mxu1 %v12379_v18  ;;  %4336 = vmatpush1.bf16.msra.mxu0 %v9804_v63  ;;  %v8537_v36 = vcombine.low %v3910_v2, %v3911_v37  ;;  %v9840_v23 = vld [vmem:[#allocation17 + $0x90] sm:$0xff]   ;;  %v9856_v63 = vld [vmem:[#allocation17 + $0xb8] sm:$0xff]   ;;  %vm13954_vm5 = vmmov %vm13952_vm1 }
 0x3c3   : > { %4337 = vmatprep.subr.bf16.mxu0 %v12379_v18  ;;  %3429 = vmatmul.mubr.bf16.gmra.mrb[60].mxu0 %v13942_v39  ;;  %v9850_v45 = vld [vmem:[#allocation17 + $0xb0] sm:$0xff]   ;;  %vm13955_vm12 = vmmov %vm13952_vm1  ;;  %v9859_v33 = vld [vmem:[#allocation17 + $0xc0] sm:$0xff]  }
 0x3c4   : > { %8508 = vmatprep.mubr.msk.bf16.mxu0 %vm2138_vm10, %v13943_v25  ;;  %vm13957_vm8 = vmmov %vm13952_vm1  ;;  %v9866_v60 = vld [vmem:[#allocation17 + $0xf0] sm:$0xff]   ;;  %v9871_v2 = vld [vmem:[#allocation17 + $0x108] sm:$0xff]  }
 0x3c5   : > { %3051 = vmatpush1.bf16.msra.mxu1 %v9798_v50  ;;  %v12495_v50 = vld [vmem:[#allocation3 + $0x40] ss:$8 sps:$4 sm:$0xff]   ;;  %vm13958_vm6 = vmmov %vm13952_vm1 }
 0x3c6   : > { %3052 = vmatprep.subr.bf16.mxu1 %v12379_v18  ;;  %4338 = vmatpush1.bf16.msra.mxu0 %v9806_v40  ;;  %v8449_v40 = vcombine.high %v12433_v20, %v12433_v20  ;;  %vm13959_vm9 = vmmov %vm13952_vm1 }
 0x3c7   : > { %2440 = vmatmul.mubr.bf16.gmra.mrb[68].mxu1 %v12041_v1  ;;  %4339 = vmatprep.subr.bf16.mxu0 %v12379_v18 }
 0x3c8   : > { %8393 = vmatprep.mubr.msk.bf16.mxu1 %vm2138_vm10, %v12054_v31 }
 0x3c9   : > { %3053 = vmatpush1.bf16.msra.mxu1 %v9800_v9  ;;  %v12505_v9 = vld [vmem:[#allocation3 + $0x50] ss:$8 sps:$4 sm:$0xff]  }
 0x3ca   : > { %3054 = vmatprep.subr.bf16.mxu1 %v12379_v18  ;;  %4340 = vmatpush1.bf16.msra.mxu0 %v9811_v46 }
 0x3cb   : > { %4341 = vmatprep.subr.bf16.mxu0 %v12379_v18  ;;  %3437 = vmatmul.mubr.bf16.gmra.mrb[64].mxu0 %v13944_v5 }
 0x3cc   : > { %8509 = vmatprep.mubr.msk.bf16.mxu0 %vm2138_vm10, %v12424_v62 }
 0x3cd   : > { %3055 = vmatpush1.bf16.msra.mxu1 %v9802_v27  ;;  %v8576_v27 = vcombine.high %v12374_v14, %v12374_v14 }
 0x3ce   : > { %3056 = vmatprep.subr.bf16.mxu1 %v12379_v18  ;;  %4342 = vmatpush1.bf16.msra.mxu0 %v9815_v58 }
 0x3cf   : > { %2448 = vmatmul.mubr.bf16.gmra.mrb[72].mxu1 %v12068_v8  ;;  %4343 = vmatprep.subr.bf16.mxu0 %v12379_v18 }
 0x3d0   : > { %8394 = vmatprep.mubr.msk.bf16.mxu1 %vm2138_vm10, %v8371_v16  ;;  %v9862_v16 = vld [vmem:[#allocation17 + $0xd0] sm:$0xff]  }
 0x3d1   : > { %3057 = vmatpush1.bf16.msra.mxu1 %v9805_v38 }
 0x3d2   : > { %3058 = vmatprep.subr.bf16.mxu1 %v12379_v18  ;;  %4344 = vmatpush1.bf16.msra.mxu0 %v9819_v61 }
 0x3d3   : > { %4345 = vmatprep.subr.bf16.mxu0 %v12379_v18  ;;  %3445 = vmatmul.mubr.bf16.gmra.mrb[68].mxu0 %v12440_v32 }
 0x3d4   : > { %8510 = vmatprep.mubr.msk.bf16.mxu0 %vm2138_vm10, %v8486_v15 }
 0x3d5   : > { %3059 = vmatpush1.bf16.msra.mxu1 %v9807_v48 }
 0x3d6   : > { %3060 = vmatprep.subr.bf16.mxu1 %v12379_v18  ;;  %4346 = vmatpush1.bf16.msra.mxu0 %v9823_v6 }
 0x3d7   : > { %2456 = vmatmul.mubr.bf16.gmra.mrb[76].mxu1 %v8370_v44  ;;  %4347 = vmatprep.subr.bf16.mxu0 %v12379_v18  ;;  %v9863_v44 = vld [vmem:[#allocation17 + $0xd8] sm:$0xff]  }
 0x3d8   : > { %8465 = vmatprep.mubr.msk.bf16.mxu1 %vm2138_vm10, %v9810_v49  ;;  %v9864_v49 = vld [vmem:[#allocation17 + $0xe0] sm:$0xff]  }
 0x3d9   : > { %3061 = vmatpush1.bf16.msra.mxu1 %v9812_v59 }
 0x3da   : > { %4139 = vmatprep.subr.bf16.mxu1 %v12379_v18  ;;  %4348 = vmatpush1.bf16.msra.mxu0 %v9829_v10  ;;  %v9865_v10 = vld [vmem:[#allocation17 + $0xe8] sm:$0xff]  }
 0x3db   : > { %3453 = vmatmul.mubr.bf16.gmra.mrb[72].mxu0 %v8485_v54 }
 0x3dc   : > { %8511 = vmatprep.mubr.msk.bf16.mxu0 %vm2138_vm10, %v8488_v0 }
 0x3df   : > { %3065 = vmatmul.mubr.bf16.vlgmr.msra.gmra.mrb[80].mxu1 %v9808_v3 }
 0x3e0   : > { %4140 = vmatpush1.bf16.msra.mxu1 %v9816_v4  ;;  %8466 = vmatprep.mubr.msk.bf16.mxu1 %vm2138_vm10, %v9817_v17  ;;  %v9867_v17 = vld [vmem:[#allocation17 + $0xf8] sm:$0xff]  }
 0x3e1   : > { %4141 = vmatprep.subr.bf16.mxu1 %v12379_v18 }
 0x3e3   : > { %3461 = vmatmul.mubr.bf16.gmra.mrb[76].mxu0 %v8487_v12 }
 0x3e4   : > { %4142 = vmatpush1.bf16.msra.mxu1 %v9822_v34  ;;  %8589 = vmatprep.mubr.msk.bf16.mxu0 %vm13946_vm4, %v9826_v53  ;;  %vm13960_vm4 = vmmov %vm13952_vm1 }
 0x3e5   : > { %4143 = vmatprep.subr.bf16.mxu1 %v12379_v18 }
 0x3e7   : > { %3073 = vmatmul.mubr.bf16.gmra.mrb[84].mxu1 %v9827_v29  ;;  %v9869_v29 = vld [vmem:[#allocation17 + $0x100] sm:$0xff]  }
 0x3e8   : > { %8467 = vmatprep.mubr.msk.bf16.mxu1 %vm2138_vm10, %v12039_v22  ;;  %4144 = vmatpush1.bf16.msra.mxu1 %v9828_v55  ;;  %v9836_v22 = vld [vmem:[#allocation17 + $0x88] sm:$0xff]  }
 0x3e9   : > { %4145 = vmatprep.subr.bf16.mxu1 %v12379_v18 }
 0x3eb   : > { %4358 = vmatmul.mubr.bf16.vlgmr.msra.gmra.mrb[80].mxu0 %v13947_v7 }
 0x3ec   : > { %4146 = vmatpush1.bf16.msra.mxu1 %v9832_v41  ;;  %8590 = vmatprep.mubr.msk.bf16.mxu0 %vm13949_vm11, %v13948_v26  ;;  %vm13961_vm11 = vmmov %vm13952_vm1 }
 0x3ed   : > { %4147 = vmatprep.subr.bf16.mxu1 %v12379_v18 }
 0x3ef   : > { %3081 = vmatmul.mubr.bf16.gmra.mrb[88].mxu1 %v12041_v1  ;;  %v9841_v1 = vld [vmem:[#allocation17 + $0x98] sm:$0xff]  }
 0x3f0   : > { %8468 = vmatprep.mubr.msk.bf16.mxu1 %vm2138_vm10, %v12054_v31  ;;  %4148 = vmatpush1.bf16.msra.mxu1 %v9833_v24  ;;  %v12475_v31 = vld [vmem:[#allocation3 + $0x20] ss:$8 sps:$4 sm:$0xff]  }
 0x3f1   : > { %4149 = vmatprep.subr.bf16.mxu1 %v12379_v18 }
 0x3f3   : > { %4366 = vmatmul.mubr.bf16.gmra.mrb[84].mxu0 %v8537_v36 }
 0x3f4   : > { %4150 = vmatpush1.bf16.msra.mxu1 %v9836_v22  ;;  %8591 = vmatprep.mubr.msk.bf16.mxu0 %vm13950_vm13, %v12295_v11  ;;  %vm13963_vm13 = vmmov %vm13952_vm1 }
 0x3f5   : > { %4151 = vmatprep.subr.bf16.mxu1 %v12379_v18 }
 0x3f7   : > { %3089 = vmatmul.mubr.bf16.gmra.mrb[92].mxu1 %v12068_v8  ;;  %v9849_v8 = vld [vmem:[#allocation17 + $0xa8] sm:$0xff]  }
 0x3f8   : > { %8469 = vmatprep.mubr.msk.bf16.mxu1 %vm2138_vm10, %v12090_v28  ;;  %4152 = vmatpush1.bf16.msra.mxu1 %v9840_v23  ;;  %v12485_v28 = vld [vmem:[#allocation3 + $0x30] ss:$8 sps:$4 sm:$0xff]  }
 0x3f9   : > { %4153 = vmatprep.subr.bf16.mxu1 %v12379_v18 }
 0x3fb   : > { %4374 = vmatmul.mubr.bf16.gmra.mrb[88].mxu0 %v12475_v31 }
 0x3fc   : > { %4154 = vmatpush1.bf16.msra.mxu1 %v9841_v1  ;;  %8592 = vmatprep.mubr.msk.bf16.mxu0 %vm13951_vm14, %v12316_v19  ;;  %v9873_v1 = vld [vmem:[#allocation17 + $0x110] sm:$0xff]   ;;  %vm13964_vm14 = vmmov %vm13952_vm1 }
 0x3fd   : > { %4155 = vmatprep.subr.bf16.mxu1 %v12379_v18 }
 0x3ff   : > { %3097 = vmatmul.mubr.bf16.gmra.mrb[96].mxu1 %v13942_v39  ;;  %v8448_v39 = vcombine.low %v12433_v20, %v12433_v20 }
 0x400   : > { %8470 = vmatprep.mubr.msk.bf16.mxu1 %vm2138_vm10, %v13943_v25  ;;  %4156 = vmatpush1.bf16.msra.mxu1 %v9845_v42  ;;  %v12514_v25 = vld [vmem:[#allocation3 + $0x60] ss:$8 sps:$4 sm:$0xff]   ;;  %v13962_v42 = vld [vmem:[#allocation48_spill] sm:$0xff] }
 0x401   : > { %4157 = vmatprep.subr.bf16.mxu1 %v12379_v18 }
 0x403   : > { %4382 = vmatmul.mubr.bf16.gmra.mrb[92].mxu0 %v12485_v28 }
 0x404   : > { %4158 = vmatpush1.bf16.msra.mxu1 %v9849_v8  ;;  %8593 = vmatprep.mubr.msk.bf16.mxu0 %vm13952_vm1, %v12336_v56  ;;  %v12576_v8 = vcombine.high %v12374_v14, %v13962_v42 }
 0x405   : > { %4159 = vmatprep.subr.bf16.mxu1 %v12379_v18 }
 0x407   : > { %3105 = vmatmul.mubr.bf16.gmra.mrb[100].mxu1 %v13944_v5  ;;  %v9861_v5 = vld [vmem:[#allocation17 + $0xc8] sm:$0xff]  }
 0x408   : > { %8471 = vmatprep.mubr.msk.bf16.mxu1 %vm2138_vm10, %v12424_v62  ;;  %4160 = vmatpush1.bf16.msra.mxu1 %v9850_v45  ;;  %v9875_v45 = vld [vmem:[#allocation17 + $0x118] sm:$0xff]  }
 0x409   : > { %4161 = vmatprep.subr.bf16.mxu1 %v12379_v18 }
 0x40b   : > { %4390 = vmatmul.mubr.bf16.gmra.mrb[96].mxu0 %v12495_v50 }
 0x40c   : > { %4162 = vmatpush1.bf16.msra.mxu1 %v9856_v63  ;;  %8594 = vmatprep.mubr.msk.bf16.mxu0 %vm13953_vm2, %v12357_v43  ;;  %v12584_v63 = vcombine.low %v12374_v14, %v13962_v42  ;;  %vm13965_vm2 = vmmov %vm13952_vm1 }
 0x40d   : > { %4626 = vmatprep.subr.bf16.mxu1 %v12379_v18 }
 0x40f   : > { %3113 = vmatmul.mubr.bf16.gmra.mrb[104].mxu1 %v12440_v32 }
 0x410   : > { %8472 = vmatprep.mubr.msk.bf16.mxu1 %vm2138_vm10, %v8449_v40  ;;  %vm13956_vm10 = vmmov %vm13952_vm1  ;;  %v8552_v40 = vcombine.high %v12382_v21, %v12382_v21 }
 0x413   : > { %4398 = vmatmul.mubr.bf16.gmra.mrb[100].mxu0 %v12505_v9 }
 0x414   : > { %8595 = vmatprep.mubr.msk.bf16.mxu0 %vm13954_vm5, %v12366_v51  ;;  %vm13966_vm5 = vmmov %vm13952_vm1 }
 0x417   : > { %3121 = vmatmul.mubr.bf16.gmra.mrb[108].mxu1 %v8448_v39 }
 0x418   : > { %8565 = vmatprep.mubr.msk.bf16.mxu1 %vm13955_vm12, %v13948_v26  ;;  %v12516_v46 = vpop.f32.mrb[16].mxu1  ;;  %vm13967_vm12 = vmmov %vm13952_vm1 }
 0x419   : > { %v2199_v58 = vpop.f32.mrb[17].mxu1 }
 0x41a   : > { %v12521_v62 = vpop.f32.mrb[18].mxu1 }
 0x41b   : > { %4406 = vmatmul.mubr.bf16.gmra.mrb[104].mxu0 %v12514_v25  ;;  %v2202_v38 = vpop.f32.mrb[19].mxu1 }
 0x41c   : > { %8596 = vmatprep.mubr.msk.bf16.mxu0 %vm13956_vm10, %v8576_v27  ;;  %vm13968_vm10 = vmmov %vm13952_vm1 }
 0x41f   : > { %4172 = vmatmul.mubr.bf16.vlgmr.msra.gmra.mrb[112].mxu1 %v8537_v36 }
 0x420   : > { %4627 = vmatpush1.bf16.msra.mxu1 %v9859_v33  ;;  %8566 = vmatprep.mubr.msk.bf16.mxu1 %vm13957_vm8, %v12295_v11  ;;  %vm13969_vm8 = vmmov %vm13952_vm1 }
 0x421   : > { %4628 = vmatprep.subr.bf16.mxu1 %v12379_v18 }
 0x423   : > { %4414 = vmatmul.mubr.bf16.gmra.mrb[108].mxu0 %v8575_v30  ;;  %v8551_v30 = vcombine.low %v12382_v21, %v12382_v21 }
 0x424   : > { %4629 = vmatpush1.bf16.msra.mxu1 %v9861_v5  ;;  %v12529_v61 = vpop.f32.mrb[20].mxu1  ;;  %v12531_v20 = vpop.f32.mrb[16].mxu0 }
 0x425   : > { %4630 = vmatprep.subr.bf16.mxu1 %v12379_v18  ;;  %v2207_v57 = vpop.f32.mrb[21].mxu1  ;;  %v2728_v48 = vpop.f32.mrb[17].mxu0 }
 0x426   : > { %v12535_v15 = vpop.f32.mrb[22].mxu1  ;;  %v12537_v6 = vpop.f32.mrb[18].mxu0 }
 0x427   : > { %4180 = vmatmul.mubr.bf16.gmra.mrb[116].mxu1 %v12475_v31  ;;  %v2210_v32 = vpop.f32.mrb[23].mxu1  ;;  %v2731_v59 = vpop.f32.mrb[19].mxu0 }
 0x428   : > { %8567 = vmatprep.mubr.msk.bf16.mxu1 %vm13958_vm6, %v12316_v19  ;;  %4631 = vmatpush1.bf16.msra.mxu1 %v9862_v16  ;;  %vm13971_vm6 = vmmov %vm13952_vm1 }
 0x429   : > { %4632 = vmatprep.subr.bf16.mxu1 %v12379_v18 }
 0x42c   : > { %4633 = vmatpush1.bf16.msra.mxu1 %v9863_v44 }
 0x42d   : > { %4634 = vmatprep.subr.bf16.mxu1 %v12379_v18 }
 0x42f   : > { %4188 = vmatmul.mubr.bf16.gmra.mrb[120].mxu1 %v12485_v28 }
 0x430   : > { %8568 = vmatprep.mubr.msk.bf16.mxu1 %vm13959_vm9, %v12336_v56  ;;  %4635 = vmatpush1.bf16.msra.mxu1 %v9864_v49  ;;  %vm13972_vm9 = vmmov %vm13952_vm1 }
 0x431   : > { %4636 = vmatprep.subr.bf16.mxu1 %v12379_v18 }
 0x434   : > { %4637 = vmatpush1.bf16.msra.mxu1 %v9865_v10 }
 0x435   : > { %4638 = vmatprep.subr.bf16.mxu1 %v12379_v18  ;;  %v12549_v54 = vpop.f32.mrb[24].mxu1  ;;  %v12551_v0 = vpop.f32.mrb[20].mxu0 }
 0x436   : > { %v2215_v4 = vpop.f32.mrb[25].mxu1  ;;  %v2736_v3 = vpop.f32.mrb[21].mxu0 }
 0x437   : > { %4196 = vmatmul.mubr.bf16.gmra.mrb[124].mxu1 %v12495_v50  ;;  %v12555_v34 = vpop.f32.mrb[26].mxu1  ;;  %v12557_v12 = vpop.f32.mrb[22].mxu0 }
 0x438   : > { %8569 = vmatprep.mubr.msk.bf16.mxu1 %vm13960_vm4, %v12357_v43  ;;  %4639 = vmatpush1.bf16.msra.mxu1 %v9866_v60  ;;  %v2218_v53 = vpop.f32.mrb[27].mxu1  ;;  %v2739_v55 = vpop.f32.mrb[23].mxu0  ;;  %vm13973_vm4 = vcmask 519168  }
 0x439   : > { %4640 = vmatprep.subr.bf16.mxu1 %v12379_v18 }
 0x43c   : > { %4641 = vmatpush1.bf16.msra.mxu1 %v9867_v17 }
 0x43d   : > { %4642 = vmatprep.subr.bf16.mxu1 %v12379_v18  ;;  %v12562_v41 = vpop.f32.mrb[28].mxu1  ;;  %v12564_v24 = vpop.f32.mrb[24].mxu0 }
 0x43e   : > { %v2223_v7 = vpop.f32.mrb[29].mxu1  ;;  %v2744_v26 = vpop.f32.mrb[25].mxu0 }
 0x43f   : > { %4204 = vmatmul.mubr.bf16.gmra.mrb[128].mxu1 %v12505_v9  ;;  %v12568_v37 = vpop.f32.mrb[30].mxu1  ;;  %v12570_v22 = vpop.f32.mrb[26].mxu0 }
 0x440   : > { %8570 = vmatprep.mubr.msk.bf16.mxu1 %vm13961_vm11, %v12366_v51  ;;  %4643 = vmatpush1.bf16.msra.mxu1 %v9869_v29  ;;  %v2226_v36 = vpop.f32.mrb[31].mxu1  ;;  %v2747_v23 = vpop.f32.mrb[27].mxu0  ;;  %vm13974_vm11 = vmmov %vm13973_vm4 }
 0x441   : > { %4644 = vmatprep.subr.bf16.mxu1 %v12379_v18 }
 0x444   : > { %4645 = vmatpush1.bf16.msra.mxu1 %v9871_v2 }
 0x445   : > { %4646 = vmatprep.subr.bf16.mxu1 %v12379_v18 }
 0x447   : > { %4212 = vmatmul.mubr.bf16.gmra.mrb[132].mxu1 %v12514_v25 }
 0x448   : > { %8571 = vmatprep.mubr.msk.bf16.mxu1 %vm13963_vm13, %v12576_v8  ;;  %4647 = vmatpush1.bf16.msra.mxu1 %v9873_v1  ;;  %vm13975_vm13 = vmmov %vm13973_vm4 }
 0x449   : > { %4648 = vmatprep.subr.bf16.mxu1 %v12379_v18 }
 0x44c   : > { %4649 = vmatpush1.bf16.msra.mxu1 %v9875_v45 }
 0x44e   : > { %v12590_v39 = vpop.f32.mrb[32].mxu1  ;;  %v12592_v27 = vpop.f32.mrb[28].mxu0 }
 0x44f   : > { %4220 = vmatmul.mubr.bf16.gmra.mrb[136].mxu1 %v12584_v63  ;;  %v2231_v33 = vpop.f32.mrb[33].mxu1  ;;  %v2752_v58 = vpop.f32.mrb[29].mxu0 }
 0x450   : > { %8572 = vmatprep.mubr.msk.bf16.mxu1 %vm13964_vm14, %v8552_v40  ;;  %v12594_v38 = vpop.f32.mrb[34].mxu1  ;;  %v12596_v18 = vpop.f32.mrb[30].mxu0  ;;  %vm13976_vm14 = vmmov %vm13973_vm4 }
 0x451   : > { %v2234_v5 = vpop.f32.mrb[35].mxu1  ;;  %v2755_v14 = vpop.f32.mrb[31].mxu0 }
 0x456   : > { %v12602_v16 = vpop.f32.mrb[36].mxu1  ;;  %v12604_v57 = vpop.f32.mrb[32].mxu0 }
 0x457   : > { %4228 = vmatmul.mubr.bf16.gmra.mrb[140].mxu1 %v8551_v30  ;;  %v2239_v48 = vpop.f32.mrb[37].mxu1  ;;  %v2760_v32 = vpop.f32.mrb[33].mxu0 }
 0x458   : > { %8625 = vmatprep.mubr.msk.bf16.mxu1 %vm13952_vm1, %v12295_v11  ;;  %v12606_v59 = vpop.f32.mrb[38].mxu1  ;;  %v12608_v44 = vpop.f32.mrb[34].mxu0  ;;  %vm13977_vm1 = vmmov %vm13973_vm4 }
 0x459   : > { %v2242_v49 = vpop.f32.mrb[39].mxu1  ;;  %v2763_v10 = vpop.f32.mrb[35].mxu0 }
 0x45f   : > { %4659 = vmatmul.mubr.bf16.vlgmr.msra.gmra.mrb[144].mxu1 %v12475_v31 }
 0x460   : > { %8626 = vmatprep.mubr.msk.bf16.mxu1 %vm13965_vm2, %v12316_v19  ;;  %v12613_v60 = vpop.f32.mrb[40].mxu1  ;;  %v12615_v11 = vpop.f32.mrb[36].mxu0  ;;  %vm13978_vm2 = vmmov %vm13977_vm1 }
 0x461   : > { %v2247_v4 = vpop.f32.mrb[41].mxu1  ;;  %v2768_v3 = vpop.f32.mrb[37].mxu0 }
 0x462   : > { %v12617_v17 = vpop.f32.mrb[42].mxu1  ;;  %v12619_v53 = vpop.f32.mrb[38].mxu0 }
 0x463   : > { %v2250_v55 = vpop.f32.mrb[43].mxu1  ;;  %v2771_v29 = vpop.f32.mrb[39].mxu0 }
 0x467   : > { %4667 = vmatmul.mubr.bf16.gmra.mrb[148].mxu1 %v12485_v28 }
 0x468   : > { %8627 = vmatprep.mubr.msk.bf16.mxu1 %vm13966_vm5, %v12336_v56  ;;  %v12624_v31 = vpop.f32.mrb[44].mxu1  ;;  %vm13979_vm5 = vmmov %vm13977_vm1 }
 0x469   : > { %v2255_v19 = vpop.f32.mrb[45].mxu1 }
 0x46a   : > { %v2256_v7 = vpop.f32.mrb[46].mxu1  ;;  %v13970_v19 = vld [vmem:[#allocation49_spill] sm:$0xff] }
 0x46b   : > { %v2257_v26 = vpop.f32.mrb[47].mxu1  ;;  %v8610_v7 = vcombine.high %v12382_v21, %v13970_v19 }
 0x46e   : > { %v12627_v2 = vpop.f32.mrb[40].mxu0 }
 0x46f   : > { %4675 = vmatmul.mubr.bf16.gmra.mrb[152].mxu1 %v12495_v50  ;;  %v2776_v36 = vpop.f32.mrb[41].mxu0 }
 0x470   : > { %8628 = vmatprep.mubr.msk.bf16.mxu1 %vm13967_vm12, %v12357_v43  ;;  %v2401_v23 = vpop.f32.mrb[48].mxu1  ;;  %v12631_v1 = vpop.f32.mrb[42].mxu0  ;;  %v4435_v36 = vld [vmem:[#allocation3 + $0x90] sm:$0xff]  ;;  %vm13980_vm12 = vmmov %vm13977_vm1 }
 0x471   : > { %v2402_v28 = vadd.f32 %v2401_v23, %v12516_v46  ;;  %v2403_v42 = vpop.f32.mrb[49].mxu1  ;;  %v2779_v56 = vpop.f32.mrb[43].mxu0 }
 0x472   : > { %v2404_v45 = vpop.f32.mrb[50].mxu1 }
 0x473   : > { %v2405_v40 = vadd.f32 %v2404_v45, %v12521_v62  ;;  %v2406_v33 = vpop.f32.mrb[51].mxu1  ;;  %v12636_v58 = vadd.f32 %v12531_v20, %v2402_v28  ;;  %v8612_v45 = vcombine.high %v4435_v36, %v4435_v36 }
 0x475   : > { %v12640_v50 = vadd.f32 %v12537_v6, %v2405_v40 }
 0x476   : > { %v12642_v43 = vpop.f32.mrb[44].mxu0 }
 0x477   : > { %4683 = vmatmul.mubr.bf16.gmra.mrb[156].mxu1 %v12505_v9  ;;  %v2784_v46 = vpop.f32.mrb[45].mxu0 }
 0x478   : > { %8629 = vmatprep.mubr.msk.bf16.mxu1 %vm13968_vm10, %v12366_v51  ;;  %v2409_v5 = vpop.f32.mrb[52].mxu1  ;;  %v2785_v14 = vpop.f32.mrb[46].mxu0  ;;  %vm13981_vm10 = vmmov %vm13977_vm1 }
 0x479   : > { %v2410_v30 = vadd.f32 %v2409_v5, %v12529_v61  ;;  %v2411_v62 = vpop.f32.mrb[53].mxu1  ;;  %v2786_v48 = vpop.f32.mrb[47].mxu0 }
 0x47a   : > { %v2412_v32 = vpop.f32.mrb[54].mxu1 }
 0x47b   : > { %v2413_v20 = vadd.f32 %v2412_v32, %v12535_v15  ;;  %v2414_v49 = vpop.f32.mrb[55].mxu1  ;;  %v12649_v9 = vadd.f32 %v12551_v0, %v2410_v30 }
 0x47d   : > { %v12653_v6 = vadd.f32 %v12557_v12, %v2413_v20 }
 0x47e   : > { %v12655_v51 = vpop.f32.mrb[48].mxu0 }
 0x47f   : > { %4691 = vmatmul.mubr.bf16.gmra.mrb[160].mxu1 %v12514_v25  ;;  %v3408_v61 = vpop.f32.mrb[49].mxu0 }
 0x480   : > { %8630 = vmatprep.mubr.msk.bf16.mxu1 %vm13969_vm8, %v12576_v8  ;;  %v12659_v4 = vpop.f32.mrb[50].mxu0  ;;  %vm13982_vm8 = vmmov %vm13977_vm1 }
 0x481   : > { %v2417_v10 = vpop.f32.mrb[56].mxu1  ;;  %v3411_v55 = vpop.f32.mrb[51].mxu0 }
 0x482   : > { %v2418_v15 = vadd.f32 %v2417_v10, %v12549_v54  ;;  %v2419_v3 = vpop.f32.mrb[57].mxu1 }
 0x483   : > { %v2420_v0 = vpop.f32.mrb[58].mxu1 }
 0x484   : > { %v2421_v29 = vadd.f32 %v2420_v0, %v12555_v34  ;;  %v2422_v25 = vpop.f32.mrb[59].mxu1  ;;  %v12664_v12 = vadd.f32 %v12564_v24, %v2418_v15 }
 0x486   : > { %v12670_v8 = vadd.f32 %v12570_v22, %v2421_v29  ;;  %v12672_v26 = vpop.f32.mrb[52].mxu0  ;;  %v8609_v22 = vcombine.low %v12382_v21, %v13970_v19  ;;  %v8611_v21 = vcombine.low %v4435_v36, %v4435_v36 }
 0x487   : > { %4699 = vmatmul.mubr.bf16.gmra.mrb[164].mxu1 %v12584_v63  ;;  %v3416_v54 = vpop.f32.mrb[53].mxu0 }
 0x488   : > { %8631 = vmatprep.mubr.msk.bf16.mxu1 %vm13971_vm6, %v8610_v7  ;;  %v12675_v34 = vpop.f32.mrb[54].mxu0  ;;  %vm13983_vm6 = vmmov %vm13977_vm1 }
 0x489   : > { %v3419_v42 = vpop.f32.mrb[55].mxu0 }
 0x48a   : > { %v2425_v23 = vpop.f32.mrb[60].mxu1 }
 0x48b   : > { %v2426_v24 = vadd.f32 %v2425_v23, %v12562_v41  ;;  %v2427_v28 = vpop.f32.mrb[61].mxu1 }
 0x48c   : > { %v2428_v56 = vpop.f32.mrb[62].mxu1 }
 0x48d   : > { %v2429_v63 = vadd.f32 %v2428_v56, %v12568_v37  ;;  %v2430_v40 = vpop.f32.mrb[63].mxu1  ;;  %v12682_v33 = vadd.f32 %v12592_v27, %v2426_v24 }
 0x48e   : > { %v12687_v5 = vpop.f32.mrb[56].mxu0 }
 0x48f   : > { %4707 = vmatmul.mubr.bf16.gmra.mrb[168].mxu1 %v8609_v22  ;;  %v12685_v46 = vadd.f32 %v12596_v18, %v2429_v63  ;;  %v3424_v41 = vpop.f32.mrb[57].mxu0 }
 0x490   : > { %8632 = vmatprep.mubr.msk.bf16.mxu1 %vm13972_vm9, %v8612_v45  ;;  %v12690_v30 = vpop.f32.mrb[58].mxu0  ;;  %vm13984_vm9 = vmmov %vm13977_vm1 }
 0x491   : > { %v3427_v48 = vpop.f32.mrb[59].mxu0 }
 0x492   : > { %v2433_v14 = vpop.f32.mrb[64].mxu1 }
 0x493   : > { %v2434_v37 = vadd.f32 %v2433_v14, %v12590_v39  ;;  %v2435_v62 = vpop.f32.mrb[65].mxu1 }
 0x494   : > { %v2436_v32 = vpop.f32.mrb[66].mxu1 }
 0x495   : > { %v2437_v27 = vadd.f32 %v2436_v32, %v12594_v38  ;;  %v2438_v20 = vpop.f32.mrb[67].mxu1  ;;  %v12695_v18 = vadd.f32 %v12604_v57, %v2434_v37 }
 0x496   : > { %v12700_v61 = vpop.f32.mrb[60].mxu0  ;;  %v12737_v20 = vld [vmem:[#allocation16] ss:$0 sm:$0xff] }
 0x497   : > { %4715 = vmatmul.mubr.bf16.gmra.mrb[172].mxu1 %v8611_v21  ;;  %v12698_v49 = vadd.f32 %v12608_v44, %v2437_v27  ;;  %v3432_v10 = vpop.f32.mrb[61].mxu0 }
 0x498   : > { %v12702_v3 = vpop.f32.mrb[62].mxu0 }
 0x499   : > { %v3435_v0 = vpop.f32.mrb[63].mxu0 }
 0x49a   : > { %v2441_v15 = vpop.f32.mrb[68].mxu1 }
 0x49b   : > { %v2442_v39 = vadd.f32 %v2441_v15, %v12602_v16  ;;  %v2443_v55 = vpop.f32.mrb[69].mxu1 }
 0x49c   : > { %v2444_v29 = vpop.f32.mrb[70].mxu1 }
 0x49d   : > { %v2445_v38 = vadd.f32 %v2444_v29, %v12606_v59  ;;  %v2446_v25 = vpop.f32.mrb[71].mxu1  ;;  %v12707_v57 = vadd.f32 %v12615_v11, %v2442_v39 }
 0x49e   : > { %v12712_v19 = vpop.f32.mrb[64].mxu0 }
 0x49f   : > { %v12710_v44 = vadd.f32 %v12619_v53, %v2445_v38  ;;  %v3440_v7 = vpop.f32.mrb[65].mxu0 }
 0x4a0   : > { %v12714_v36 = vpop.f32.mrb[66].mxu0 }
 0x4a1   : > { %v3443_v24 = vpop.f32.mrb[67].mxu0 }
 0x4a2   : > { %v2449_v54 = vpop.f32.mrb[72].mxu1 }
 0x4a3   : > { %v2450_v16 = vadd.f32 %v2449_v54, %v12613_v60  ;;  %v2451_v23 = vpop.f32.mrb[73].mxu1 }
 0x4a4   : > { %v2452_v28 = vpop.f32.mrb[74].mxu1 }
 0x4a5   : > { %v2453_v59 = vadd.f32 %v2452_v28, %v12617_v17  ;;  %v2454_v42 = vpop.f32.mrb[75].mxu1  ;;  %v12719_v11 = vadd.f32 %v12627_v2, %v2450_v16 }
 0x4a6   : > { %v12724_v56 = vpop.f32.mrb[68].mxu0 }
 0x4a7   : > { %v12722_v53 = vadd.f32 %v12631_v1, %v2453_v59  ;;  %v3448_v45 = vpop.f32.mrb[69].mxu0 }
 0x4a8   : > { %v12726_v40 = vpop.f32.mrb[70].mxu0 }
 0x4a9   : > { %v3451_v41 = vpop.f32.mrb[71].mxu0 }
 0x4aa   : > { %v2457_v63 = vpop.f32.mrb[76].mxu1 }
 0x4ab   : > { %v2458_v60 = vadd.f32 %v2457_v63, %v12624_v31  ;;  %v2459_v22 = vpop.f32.mrb[77].mxu1 }
 0x4ac   : > { %v2460_v14 = vpop.f32.mrb[78].mxu1 }
 0x4ad   : > { %v2461_v17 = vpop.f32.mrb[79].mxu1  ;;  %v12730_v37 = vadd.f32 %v12642_v43, %v2458_v60 }
 0x4ae   : > { %v12732_v2 = vpop.f32.mrb[72].mxu0 }
 0x4af   : > { %v3456_v1 = vpop.f32.mrb[73].mxu0 }
 0x4b0   : > { %v12734_v48 = vpop.f32.mrb[74].mxu0 }
 0x4b1   : > { %v3459_v27 = vpop.f32.mrb[75].mxu0 }
 0x4b2   : > { %v3066_v62 = vpop.f32.mrb[80].mxu1 }
 0x4b3   : > { %v3128_v21 = vadd.f32 %v3066_v62, %v12636_v58  ;;  %v3068_v32 = vpop.f32.mrb[81].mxu1 }
 0x4b4   : > { %v3069_v31 = vpop.f32.mrb[82].mxu1 }
 0x4b5   : > { %v3468_v10 = vadd.f32 %v12655_v51, %v3128_v21  ;;  %v3129_v15 = vadd.f32 %v3069_v31, %v12640_v50  ;;  %v3071_v39 = vpop.f32.mrb[83].mxu1 }
 0x4b6   : > { %v12746_v0 = vpop.f32.mrb[76].mxu0 }
 0x4b7   : > { %v3490_v43 = vadd.f32 %v12737_v20, %v3468_v10  ;;  %v3469_v55 = vadd.f32 %v12659_v4, %v3129_v15  ;;  %v3464_v38 = vpop.f32.mrb[77].mxu0 }
 0x4b8   : > { %v3465_v7 = vpop.f32.mrb[78].mxu0 }
 0x4b9   : > { %v3505_v58 = vmax.f32 %v3490_v43, 0.0  ;;  %v3491_v29 = vadd.f32 %v12737_v20, %v3469_v55  ;;  %v3466_v23 = vpop.f32.mrb[79].mxu0 }
 0x4ba   : > { %v3074_v25 = vpop.f32.mrb[84].mxu1 }
 0x4bb   : > { %v8929_v54 = vpack.c.bf16 %v3505_v58, %v3505_v58  ;;  %v3506_v51 = vmax.f32 %v3491_v29, 0.0  ;;  %v3130_v50 = vadd.f32 %v3074_v25, %v12649_v9  ;;  %v3076_v16 = vpop.f32.mrb[85].mxu1 }
 0x4bc   : > { %v3077_v24 = vpop.f32.mrb[86].mxu1 }
 0x4bd   : > { %3582 = vst.msk [vmem:[%s12751_s20] sm:$0xf] %vm13973_vm4, %v8929_v54  ;;  %v8930_v4 = vpack.c.bf16 %v3506_v51, %v3506_v51  ;;  %v3470_v28 = vadd.f32 %v12672_v26, %v3130_v50  ;;  %v3131_v59 = vadd.f32 %v3077_v24, %v12653_v6  ;;  %v3079_v42 = vpop.f32.mrb[87].mxu1  ;;  %vm13985_vm4 = vmmov %vm13977_vm1 }
 0x4be   : > { %v12761_v63 = vpop.f32.mrb[80].mxu0 }
 0x4bf   : > { %3583 = vst.msk [vmem:[%s12751_s20 + $0x4] sm:$0xf] %vm13974_vm11, %v8930_v4  ;;  %v3492_v9 = vadd.f32 %v12737_v20, %v3470_v28  ;;  %v3471_v45 = vadd.f32 %v12675_v34, %v3131_v59  ;;  %v4361_v41 = vpop.f32.mrb[81].mxu0  ;;  %vm13986_vm11 = vmmov %vm13977_vm1 }
 0x4c0   : > { %v4362_v17 = vpop.f32.mrb[82].mxu0 }
 0x4c1   : > { %v3507_v60 = vmax.f32 %v3492_v9, 0.0  ;;  %v3493_v22 = vadd.f32 %v12737_v20, %v3471_v45  ;;  %v4364_v21 = vpop.f32.mrb[83].mxu0 }
 0x4c2   : > { %v3082_v14 = vpop.f32.mrb[88].mxu1 }
 0x4c3   : > { %v8931_v26 = vpack.c.bf16 %v3507_v60, %v3507_v60  ;;  %v3508_v1 = vmax.f32 %v3493_v22, 0.0  ;;  %v3132_v6 = vadd.f32 %v3082_v14, %v12664_v12  ;;  %v3084_v62 = vpop.f32.mrb[89].mxu1 }
 0x4c4   : > { %v3085_v32 = vpop.f32.mrb[90].mxu1 }
 0x4c5   : > { %3584 = vst.msk [vmem:[%s12751_s20 + $0x8] sm:$0xf] %vm13975_vm13, %v8931_v26  ;;  %v8932_v27 = vpack.c.bf16 %v3508_v1, %v3508_v1  ;;  %v3472_v34 = vadd.f32 %v12687_v5, %v3132_v6  ;;  %v3133_v31 = vadd.f32 %v3085_v32, %v12670_v8  ;;  %v3087_v10 = vpop.f32.mrb[91].mxu1  ;;  %vm13987_vm13 = vmmov %vm13977_vm1 }
 0x4c6   : > { %v12773_v43 = vpop.f32.mrb[84].mxu0 }
 0x4c7   : > { %3585 = vst.msk [vmem:[%s12751_s20 + $0xc] sm:$0xf] %vm13976_vm14, %v8932_v27  ;;  %v3494_v15 = vadd.f32 %v12737_v20, %v3472_v34  ;;  %v3473_v39 = vadd.f32 %v12690_v30, %v3133_v31  ;;  %v4369_v58 = vpop.f32.mrb[85].mxu0  ;;  %vm777_vm14 = vcmask 257024  }
 0x4c8   : > { %v4370_v38 = vpop.f32.mrb[86].mxu0 }
 0x4c9   : > { %v3509_v12 = vmax.f32 %v3494_v15, 0.0  ;;  %v3495_v55 = vadd.f32 %v12737_v20, %v3473_v39  ;;  %v4372_v54 = vpop.f32.mrb[87].mxu0 }
 0x4ca   : > { %v3090_v29 = vpop.f32.mrb[92].mxu1 }
 0x4cb   : > { %v8933_v5 = vpack.c.bf16 %v3509_v12, %v3509_v12  ;;  %v3510_v25 = vmax.f32 %v3495_v55, 0.0  ;;  %v3134_v8 = vadd.f32 %v3090_v29, %v12682_v33  ;;  %v3092_v7 = vpop.f32.mrb[93].mxu1 }
 0x4cc   : > { %v3093_v51 = vpop.f32.mrb[94].mxu1 }
 0x4cd   : > { %3586 = vst.msk [vmem:[%s12751_s20 + $0x10] sm:$0xf] %vm13977_vm1, %v8933_v5  ;;  %v8934_v50 = vpack.c.bf16 %v3510_v25, %v3510_v25  ;;  %v3474_v30 = vadd.f32 %v12700_v61, %v3134_v8  ;;  %v3135_v16 = vadd.f32 %v3093_v51, %v12685_v46  ;;  %v3095_v23 = vpop.f32.mrb[95].mxu1  ;;  %vm4800_vm1 = vcmask 778240  }
 0x4ce   : > { %v12785_v28 = vpop.f32.mrb[88].mxu0 }
 0x4cf   : > { %3587 = vst.msk [vmem:[%s12751_s20 + $0x14] sm:$0xf] %vm13978_vm2, %v8934_v50  ;;  %v3496_v24 = vadd.f32 %v12737_v20, %v3474_v30  ;;  %v3475_v4 = vadd.f32 %v12702_v3, %v3135_v16  ;;  %v4377_v42 = vpop.f32.mrb[89].mxu0  ;;  %vm13988_vm2 = vcmask 781312  }
 0x4d0   : > { %v4378_v45 = vpop.f32.mrb[90].mxu0 }
 0x4d1   : > { %v3511_v33 = vmax.f32 %v3496_v24, 0.0  ;;  %v3497_v59 = vadd.f32 %v12737_v20, %v3475_v4  ;;  %v4380_v41 = vpop.f32.mrb[91].mxu0 }
 0x4d2   : > { %v3098_v9 = vpop.f32.mrb[96].mxu1 }
 0x4d3   : > { %v8935_v61 = vpack.c.bf16 %v3511_v33, %v3511_v33  ;;  %v3512_v60 = vmax.f32 %v3497_v59, 0.0  ;;  %v3136_v46 = vadd.f32 %v3098_v9, %v12695_v18  ;;  %v3100_v22 = vpop.f32.mrb[97].mxu1 }
 0x4d4   : > { %v3101_v14 = vpop.f32.mrb[98].mxu1 }
 0x4d5   : > { %3588 = vst.msk [vmem:[%s12751_s20 + $0x18] sm:$0xf] %vm13979_vm5, %v8935_v61  ;;  %v8936_v17 = vpack.c.bf16 %v3512_v60, %v3512_v60  ;;  %v3476_v3 = vadd.f32 %v12712_v19, %v3136_v46  ;;  %v3137_v26 = vadd.f32 %v3101_v14, %v12698_v49  ;;  %v3103_v1 = vpop.f32.mrb[99].mxu1  ;;  %vm12909_vm5 = vmand %vm13988_vm2, %vm1482_vm3  ;;  %vm13998_vm3 = vcmask 1044224  }
 0x4d6   : > { %v12797_v21 = vpop.f32.mrb[92].mxu0  ;;  %vm5005_vm2 = vsmask.f32 7966 }
 0x4d7   : > { %3589 = vst.msk [vmem:[%s12751_s20 + $0x1c] sm:$0xf] %vm13980_vm12, %v8936_v17  ;;  %v3498_v6 = vadd.f32 %v12737_v20, %v3476_v3  ;;  %v3477_v62 = vadd.f32 %v12714_v36, %v3137_v26  ;;  %v4385_v27 = vpop.f32.mrb[93].mxu0  ;;  %vm13991_vm12 = vsmask.f32 256 }
 0x4d8   : > { %v4386_v31 = vpop.f32.mrb[94].mxu0 }
 0x4d9   : > { %v3513_v18 = vmax.f32 %v3498_v6, 0.0  ;;  %v3499_v32 = vadd.f32 %v12737_v20, %v3477_v62  ;;  %v4388_v39 = vpop.f32.mrb[95].mxu0 }
 0x4da   : > { %v3106_v34 = vpop.f32.mrb[100].mxu1 }
 0x4db   : > { %v8937_v19 = vpack.c.bf16 %v3513_v18, %v3513_v18  ;;  %v3514_v10 = vmax.f32 %v3499_v32, 0.0  ;;  %v3138_v49 = vadd.f32 %v3106_v34, %v12707_v57  ;;  %v3108_v15 = vpop.f32.mrb[101].mxu1 }
 0x4dc   : > { %v3109_v12 = vpop.f32.mrb[102].mxu1 }
 0x4dd   : > { %3590 = vst.msk [vmem:[%s12751_s20 + $0x20] sm:$0xf] %vm13981_vm10, %v8937_v19  ;;  %v8938_v55 = vpack.c.bf16 %v3514_v10, %v3514_v10  ;;  %v3478_v36 = vadd.f32 %v12724_v56, %v3138_v49  ;;  %v3139_v58 = vadd.f32 %v3109_v12, %v12710_v44  ;;  %v3111_v29 = vpop.f32.mrb[103].mxu1  ;;  %vm12918_vm10 = vmand %vm4800_vm1, %vm13991_vm12  ;;  %vm5004_vm1 = vcmask 261127  }
 0x4de   : > { %v12809_v25 = vpop.f32.mrb[96].mxu0  ;;  %vm14004_vm12 = vsmask.f32 7950 }
 0x4df   : > { %3591 = vst.msk [vmem:[%s12751_s20 + $0x24] sm:$0xf] %vm13982_vm8, %v8938_v55  ;;  %v3500_v38 = vadd.f32 %v12737_v20, %v3478_v36  ;;  %v3479_v5 = vadd.f32 %v12726_v40, %v3139_v58  ;;  %v4393_v7 = vpop.f32.mrb[97].mxu0  ;;  %vm13999_vm8 = vcmask 523268  }
 0x4e0   : > { %v4394_v51 = vpop.f32.mrb[98].mxu0  ;;  %v9879_v7 = vld [vmem:[#allocation20 + $0xd0] sm:$0xff]  }
 0x4e1   : > { %v3515_v57 = vmax.f32 %v3500_v38, 0.0  ;;  %v3501_v8 = vadd.f32 %v12737_v20, %v3479_v5  ;;  %v4396_v16 = vpop.f32.mrb[99].mxu0  ;;  %8984 = vmatprep.subr.bf16.mxu0 %v9879_v7  ;;  %9266 = vmatprep.subr.bf16.mxu1 %v9879_v7 }
 0x4e2   : > { %v3114_v54 = vpop.f32.mrb[104].mxu1 }
 0x4e3   : > { %v8939_v56 = vpack.c.bf16 %v3515_v57, %v3515_v57  ;;  %v3516_v50 = vmax.f32 %v3501_v8, 0.0  ;;  %v3140_v44 = vadd.f32 %v3114_v54, %v12719_v11  ;;  %v3116_v30 = vpop.f32.mrb[105].mxu1  ;;  %v9880_v54 = vld [vmem:[#allocation20 + $0x90] sm:$0xff]  }
 0x4e4   : > { %v3117_v23 = vpop.f32.mrb[106].mxu1  ;;  %8985 = vmatpush3.bf16.msra.mxu0 %v9880_v54  ;;  %9274 = vmatpush3.bf16.msra.mxu1 %v9880_v54  ;;  %v9883_v30 = vld [vmem:[#allocation20 + $0xe0] sm:$0xff]  }
 0x4e5   : > { %3592 = vst.msk [vmem:[%s12751_s20 + $0x28] sm:$0xf] %vm13983_vm6, %v8939_v56  ;;  %v8940_v24 = vpack.c.bf16 %v3516_v50, %v3516_v50  ;;  %v3480_v40 = vadd.f32 %v12732_v2, %v3140_v44  ;;  %v3141_v4 = vadd.f32 %v3117_v23, %v12722_v53  ;;  %v3119_v33 = vpop.f32.mrb[107].mxu1  ;;  %v9881_v50 = vld [vmem:[#allocation20 + $0xd8] sm:$0xff]   ;;  %v9884_v23 = vld [vmem:[#allocation20 + $0xa0] sm:$0xff]   ;;  %vm13012_vm6 = vmor %vm13999_vm8, %vm13998_vm3  ;;  %vm14005_vm8 = vcmask 523264  }
 0x4e6   : > { %v12821_v9 = vpop.f32.mrb[100].mxu0  ;;  %v9882_v44 = vld [vmem:[#allocation20 + $0x98] sm:$0xff]   ;;  %8986 = vmatprep.subr.bf16.mxu0 %v9881_v50  ;;  %9267 = vmatprep.subr.bf16.mxu1 %v9881_v50  ;;  %vm5006_vm3 = vmand %vm5004_vm1, %vm5005_vm2 }
 0x4e7   : > { %3593 = vst.msk [vmem:[%s12751_s20 + $0x2c] sm:$0xf] %vm13984_vm9, %v8940_v24  ;;  %v3502_v59 = vadd.f32 %v12737_v20, %v3480_v40  ;;  %v3481_v42 = vadd.f32 %v12734_v48, %v3141_v4  ;;  %v4401_v61 = vpop.f32.mrb[101].mxu0  ;;  %v9885_v24 = vld [vmem:[#allocation20 + $0xe8] sm:$0xff]   ;;  %v4802_v50 = vld [vmem:[#allocation4 + $0x24] sm:$0x1] }
 0x4e8   : > { %v4402_v46 = vpop.f32.mrb[102].mxu0  ;;  %8987 = vmatpush3.bf16.msra.mxu0 %v9882_v44  ;;  %9275 = vmatpush3.bf16.msra.mxu1 %v9882_v44  ;;  %v9886_v4 = vld [vmem:[#allocation20 + $0xa8] sm:$0xff]   ;;  %vm5013_vm9 = vcmask 261124  }
 0x4e9   : > { %v3517_v11 = vmax.f32 %v3502_v59, 0.0  ;;  %v3503_v45 = vadd.f32 %v12737_v20, %v3481_v42  ;;  %v4404_v14 = vpop.f32.mrb[103].mxu0  ;;  %8988 = vmatprep.subr.bf16.mxu0 %v9883_v30  ;;  %9268 = vmatprep.subr.bf16.mxu1 %v9883_v30  ;;  %v9887_v59 = vld [vmem:[#allocation20 + $0xf0] sm:$0xff]  }
 0x4ea   : > { %v3122_v60 = vpop.f32.mrb[108].mxu1 }
 0x4eb   : > { %v8941_v2 = vpack.c.bf16 %v3517_v11, %v3517_v11  ;;  %v3518_v22 = vmax.f32 %v3503_v45, 0.0  ;;  %v3142_v53 = vadd.f32 %v3122_v60, %v12730_v37  ;;  %v3124_v41 = vpop.f32.mrb[109].mxu1  ;;  %v9888_v45 = vld [vmem:[#allocation20 + $0xb0] sm:$0xff]  }
 0x4ec   : > { %v3125_v17 = vpop.f32.mrb[110].mxu1  ;;  %8989 = vmatpush3.bf16.msra.mxu0 %v9884_v23  ;;  %9276 = vmatpush3.bf16.msra.mxu1 %v9884_v23 }
 0x4ed   : > { %3594 = vst.msk [vmem:[%s12751_s20 + $0x30] sm:$0xf] %vm13985_vm4, %v8941_v2  ;;  %v8942_v48 = vpack.c.bf16 %v3518_v22, %v3518_v22  ;;  %v3482_v3 = vadd.f32 %v12746_v0, %v3142_v53  ;;  %v3126_v26 = vpop.f32.mrb[111].mxu1  ;;  %8990 = vmatprep.subr.bf16.mxu0 %v9885_v24  ;;  %9269 = vmatprep.subr.bf16.mxu1 %v9885_v24  ;;  %vm5014_vm4 = vsmask.f32 7424 }
 0x4ee   : > { %v12831_v6 = vpop.f32.mrb[104].mxu0 }
 0x4ef   : > { %3595 = vst.msk [vmem:[%s12751_s20 + $0x34] sm:$0xf] %vm13986_vm11, %v8942_v48  ;;  %v3504_v1 = vadd.f32 %v12737_v20, %v3482_v3  ;;  %v4409_v18 = vpop.f32.mrb[105].mxu0  ;;  %vm5012_vm11 = vmand %vm3779_vm0, %vm1702_vm15 }
 0x4f0   : > { %v4410_v37 = vpop.f32.mrb[106].mxu0  ;;  %8991 = vmatpush3.bf16.msra.mxu0 %v9886_v4  ;;  %9277 = vmatpush3.bf16.msra.mxu1 %v9886_v4  ;;  %v9889_v18 = vld [vmem:[#allocation20 + $0xf8] sm:$0xff]  }
 0x4f1   : > { %v3519_v62 = vmax.f32 %v3504_v1, 0.0  ;;  %v4412_v19 = vpop.f32.mrb[107].mxu0  ;;  %8992 = vmatprep.subr.bf16.mxu0 %v9887_v59  ;;  %9270 = vmatprep.subr.bf16.mxu1 %v9887_v59  ;;  %v12861_v37 = vld [vmem:[#allocation19] ss:$0 sm:$0xff]  ;;  %v9893_v59 = vld [vmem:[#allocation20 + $0x108] sm:$0xff]  }
 0x4f2   : > { %v4173_v32 = vpop.f32.mrb[112].mxu1 }
 0x4f3   : > { %v8943_v27 = vpack.c.bf16 %v3519_v62, %v3519_v62  ;;  %v12834_v34 = vadd.f32 %v12761_v63, %v4173_v32  ;;  %v4175_v31 = vpop.f32.mrb[113].mxu1 }
 0x4f4   : > { %v4176_v10 = vpop.f32.mrb[114].mxu1  ;;  %8993 = vmatpush3.bf16.msra.mxu0 %v9888_v45  ;;  %9278 = vmatpush3.bf16.msra.mxu1 %v9888_v45 }
 0x4f5   : > { %3596 = vst.msk [vmem:[%s12751_s20 + $0x38] sm:$0xf] %vm13987_vm13, %v8943_v27  ;;  %v4178_v0 = vpop.f32.mrb[115].mxu1  ;;  %v12863_v27 = vld [vmem:[#allocation4] sm:$0xff]  ;;  %8994 = vmatprep.subr.bf16.mxu0 %v9889_v18  ;;  %9271 = vmatprep.subr.bf16.mxu1 %v9889_v18  ;;  %vm5015_vm13 = vmand %vm5013_vm9, %vm5014_vm4  ;;  %s10417_s20 = scalar_lea.vmem %s10416_s5, 1920 }
 0x4f6   : > { %v12838_v49 = vpop.f32.mrb[108].mxu0  ;;  %782 = vst.msk [vmem:[#allocation4 + $0x20] sm:$0xf] %vm777_vm14, %v12863_v27  ;;  %778 = vst.msk [vmem:[#allocation4 + $0x8] sm:$0xf] %vm777_vm14, %v12863_v27  ;;  %p10419_p3 = scmp.lt.s32.totalorder %s10417_s20, %s10411_s2 }
 0x4f7   : > { %v4417_v15 = vpop.f32.mrb[109].mxu0  ;;  %780 = vst.msk [vmem:[#allocation4 + $0x14] sm:$0xf] %vm777_vm14, %v12863_v27  ;;  %784 = vst.msk [vmem:[#allocation4 + $0x2c] sm:$0xf] %vm777_vm14, %v12863_v27 }
 0x4f8   : > { %v4418_v39 = vpop.f32.mrb[110].mxu0  ;;  %786 = vst.msk [vmem:[#allocation4 + $0x38] sm:$0xf] %vm777_vm14, %v12863_v27  ;;  %788 = vst.msk [vmem:[#allocation4 + $0x44] sm:$0xf] %vm777_vm14, %v12863_v27  ;;  %p10420_p5 = por %p10419_p3, %p10418_p11 }
 0x4f9   : > { %v4419_v36 = vpop.f32.mrb[111].mxu0  ;;  %790 = vst.msk [vmem:[#allocation4 + $0x50] sm:$0xf] %vm777_vm14, %v12863_v27  ;;  %792 = vst.msk [vmem:[#allocation4 + $0x5c] sm:$0xf] %vm777_vm14, %v12863_v27  ;;  %v9891_v39 = vld [vmem:[#allocation20 + $0x100] sm:$0xff]  }
 0x4fa   : > { %v4181_v20 = vpop.f32.mrb[116].mxu1  ;;  %794 = vst.msk [vmem:[#allocation4 + $0x68] sm:$0xf] %vm777_vm14, %v12863_v27  ;;  %796 = vst.msk [vmem:[#allocation4 + $0x74] sm:$0xf] %vm777_vm14, %v12863_v27  ;;  %p10421_p7 = pnand %p10420_p5, %p10414_p10 }
 0x4fb   : > { %v12841_v12 = vadd.f32 %v12773_v43, %v4181_v20  ;;  %v4183_v55 = vpop.f32.mrb[117].mxu1  ;;  %798 = vst.msk [vmem:[#allocation4 + $0x80] sm:$0xf] %vm777_vm14, %v12863_v27  ;;  %800 = vst.msk [vmem:[#allocation4 + $0x8c] sm:$0xf] %vm777_vm14, %v12863_v27 }
 0x4fc   : > { %v4184_v58 = vpop.f32.mrb[118].mxu1  ;;  %802 = vst.msk [vmem:[#allocation4 + $0x98] sm:$0xf] %vm777_vm14, %v12863_v27  ;;  %804 = vst.msk [vmem:[#allocation4 + $0xa4] sm:$0xf] %vm777_vm14, %v12863_v27  ;;  %v9892_v55 = vld [vmem:[#allocation20 + $0xc0] sm:$0xff]  }
 0x4fd   : > { %v4186_v29 = vpop.f32.mrb[119].mxu1  ;;  %806 = vst.msk [vmem:[#allocation4 + $0xb0] sm:$0xf] %vm777_vm14, %v12863_v27  ;;  %808 = vst.msk [vmem:[#allocation4 + $0xbc] sm:$0xf] %vm777_vm14, %v12863_v27 }
 0x4fe   : > { %810 = vst.msk [vmem:[#allocation4 + $0xc8] sm:$0xf] %vm777_vm14, %v12863_v27  ;;  %812 = vst.msk [vmem:[#allocation4 + $0xd4] sm:$0xf] %vm777_vm14, %v12863_v27 }
 0x4ff   : > { %814 = vst.msk [vmem:[#allocation4 + $0xe0] sm:$0xf] %vm777_vm14, %v12863_v27  ;;  %vm5002_vm14 = vcmask 1043971   ;;  %vm14008_vm9 = vmmov %vm14005_vm8 }
 0x500   : > { %vm14009_vm4 = vmmov %vm14005_vm8 }
 0x501   : > { %vm14013_vm1 = vmmov %vm14009_vm4 }
 0x502   : > { %v4189_v63 = vpop.f32.mrb[120].mxu1  ;;  %vm14014_vm2 = vmmov %vm14013_vm1 }
 0x503   : > { %v12844_v38 = vadd.f32 %v12785_v28, %v4189_v63  ;;  %v4191_v5 = vpop.f32.mrb[121].mxu1 }
 0x504   : > { %v4192_v57 = vpop.f32.mrb[122].mxu1  ;;  %v13997_v5 = vld [vmem:[#allocation47_spill] sm:$0xff] }
 0x505   : > { %v4194_v8 = vpop.f32.mrb[123].mxu1 }
 0x50a   : > { %v4197_v51 = vpop.f32.mrb[124].mxu1 }
 0x50b   : > { %v12847_v43 = vadd.f32 %v12797_v21, %v4197_v51  ;;  %v4199_v56 = vpop.f32.mrb[125].mxu1 }
 0x50c   : > { %v4200_v16 = vpop.f32.mrb[126].mxu1 }
 0x50d   : > { %v4202_v28 = vpop.f32.mrb[127].mxu1 }
 0x512   : > { %v4205_v40 = vpop.f32.mrb[128].mxu1 }
 0x513   : > { %v12850_v21 = vadd.f32 %v12809_v25, %v4205_v40  ;;  %v4207_v33 = vpop.f32.mrb[129].mxu1 }
 0x514   : > { %v4208_v42 = vpop.f32.mrb[130].mxu1 }
 0x515   : > { %v4210_v11 = vpop.f32.mrb[131].mxu1  ;;  %v9894_v42 = vld [vmem:[#allocation20 + $0xc8] sm:$0xff]  }
 0x51a   : > { %v4213_v61 = vpop.f32.mrb[132].mxu1 }
 0x51b   : > { %v12853_v60 = vadd.f32 %v12821_v9, %v4213_v61  ;;  %v4215_v46 = vpop.f32.mrb[133].mxu1  ;;  %v9890_v9 = vld [vmem:[#allocation20 + $0xb8] sm:$0xff]  }
 0x51c   : > { %v4216_v25 = vpop.f32.mrb[134].mxu1  ;;  %8995 = vmatpush3.bf16.msra.mxu0 %v9890_v9  ;;  %9279 = vmatpush3.bf16.msra.mxu1 %v9890_v9 }
 0x51d   : > { %v4218_v2 = vpop.f32.mrb[135].mxu1  ;;  %8996 = vmatprep.subr.bf16.mxu0 %v9891_v39  ;;  %9272 = vmatprep.subr.bf16.mxu1 %v9891_v39 }
 0x520   : > { %8997 = vmatpush3.bf16.msra.mxu0 %v9892_v55  ;;  %9280 = vmatpush3.bf16.msra.mxu1 %v9892_v55 }
 0x521   : > { %8998 = vmatprep.subr.bf16.mxu0 %v9893_v59  ;;  %9273 = vmatprep.subr.bf16.mxu1 %v9893_v59 }
 0x522   : > { %v4221_v22 = vpop.f32.mrb[136].mxu1 }
 0x523   : > { %v12856_v53 = vadd.f32 %v12831_v6, %v4221_v22  ;;  %v4223_v41 = vpop.f32.mrb[137].mxu1 }
 0x524   : > { %v4224_v14 = vpop.f32.mrb[138].mxu1  ;;  %8999 = vmatpush3.bf16.msra.mxu0 %v9894_v42  ;;  %9281 = vmatpush3.bf16.msra.mxu1 %v9894_v42 }
 0x525   : > { %v4226_v17 = vpop.f32.mrb[139].mxu1 }
 0x52a   : > { %v4229_v48 = vpop.f32.mrb[140].mxu1 }
 0x52b   : > { %v12859_v3 = vadd.f32 %v12838_v49, %v4229_v48  ;;  %v4231_v26 = vpop.f32.mrb[141].mxu1  ;;  %v4818_v48 = vld [vmem:[#allocation4 + $0x30] sm:$0xf] }
 0x52c   : > { %v4232_v1 = vpop.f32.mrb[142].mxu1  ;;  %v4821_v26 = vld [vmem:[#allocation4 + $0x3c] sm:$0x1] }
 0x52d   : > { %v4233_v62 = vpop.f32.mrb[143].mxu1 }
 0x532   : > { %v4660_v32 = vpop.f32.mrb[144].mxu1 }
 0x533   : > { %v4722_v6 = vadd.f32 %v4660_v32, %v12834_v34  ;;  %v4662_v31 = vpop.f32.mrb[145].mxu1 }
 0x534   : > { %v4663_v19 = vpop.f32.mrb[146].mxu1 }
 0x535   : > { %v4744_v10 = vadd.f32 %v12861_v37, %v4722_v6  ;;  %v4665_v0 = vpop.f32.mrb[147].mxu1 }
 0x537   : > { %v4759_v49 = vmax.f32 %v4744_v10, 0.0  ;;  %v9898_v10 = vld [vmem:[#allocation20 + $0x160] sm:$0xff]  }
 0x538   : > { %9132 = vmatprep.subr.bf16.mxu0 %v9898_v10 }
 0x539   : > { %v8952_v15 = vpack.c.bf16 %v4759_v49, %v4759_v49 }
 0x53a   : > { %v4668_v20 = vpop.f32.mrb[148].mxu1 }
 0x53b   : > { %v4786_v36 = vshrl.u32 %v8952_v15, 16  ;;  %v4789_v58 = vshll.u32 %v8952_v15, 16  ;;  %v4724_v29 = vadd.f32 %v4668_v20, %v12841_v12  ;;  %4938 = vrot.lane.b32.xlu1 %v8952_v15, %s10615_s25  ;;  %v4670_v34 = vpop.f32.mrb[149].mxu1  ;;  %v4797_v12 = vld [vmem:[#allocation4 + $0x18] sm:$0xf] }
 0x53c   : > { %v4671_v63 = vpop.f32.mrb[150].mxu1 }
 0x53d   : > { %v4788_v57 = vrot.slane %v4786_v36, 7  ;;  %v4746_v8 = vadd.f32 %v12861_v37, %v4724_v29  ;;  %v4673_v7 = vpop.f32.mrb[151].mxu1  ;;  %v12914_v54 = vrot.slane %v4789_v58, 5  ;;  %v4988_v51 = vrot.slane %v4786_v36, 4  ;;  %v4837_v63 = vld [vmem:[#allocation4 + $0x48] sm:$0xf] }
 0x53f   : > { %v4791_v44 = vor.u32 %v4789_v58, %v4788_v57  ;;  %v4792_v30 = vrot.slane %v4788_v57, 4  ;;  %v4761_v16 = vmax.f32 %v4746_v8, 0.0  ;;  %v4989_v28 = vor.u32 %v4988_v51, %v12914_v54  ;;  %v4840_v57 = vld [vmem:[#allocation4 + $0x54] sm:$0x1] }
 0x541   : > { %v4798_v23 = vsel %vm12909_vm5, %v4791_v44, %v4797_v12  ;;  %v4803_v24 = vsel %vm12918_vm10, %v4792_v30, %v4802_v50  ;;  %v8953_v40 = vpack.c.bf16 %v4761_v16, %v4761_v16  ;;  %v4990_v4 = vrot.slane %v4989_v28, 4 }
 0x542   : > { %4799 = vst [vmem:[#allocation4 + $0x18] sm:$0xf] %v4798_v23  ;;  %4804 = vst [vmem:[#allocation4 + $0x24] sm:$0x1] %v4803_v24  ;;  %v4676_v33 = vpop.f32.mrb[152].mxu1 }
 0x543   : > { %v4809_v11 = vshrl.u32 %v8953_v40, 16  ;;  %v4726_v45 = vadd.f32 %v4676_v33, %v12844_v38  ;;  %4993 = vrot.lane.b32.xlu1 %v4990_v4, %s13844_s30  ;;  %4945 = vrot.lane.b32.xlu0 %v8953_v40, %s10615_s25  ;;  %v4678_v61 = vpop.f32.mrb[153].mxu1  ;;  %v4812_v46 = vshll.u32 %v8953_v40, 16 }
 0x544   : > { %v4679_v25 = vpop.f32.mrb[154].mxu1  ;;  %v4856_v61 = vld [vmem:[#allocation4 + $0x60] sm:$0xf] }
 0x545   : > { %v4748_v2 = vadd.f32 %v12861_v37, %v4726_v45  ;;  %v4681_v22 = vpop.f32.mrb[155].mxu1  ;;  %v5020_v41 = vrot.slane %v4812_v46, 5  ;;  %v4811_v14 = vrot.slane %v4809_v11, 7  ;;  %v5021_v17 = vrot.slane %v4809_v11, 4 }
 0x547   : > { %v4763_v38 = vmax.f32 %v4748_v2, 0.0  ;;  %5024 = vrot.lane.b32.xlu0 %v5020_v41, %s13844_s30  ;;  %v4814_v1 = vor.u32 %v4812_v46, %v4811_v14  ;;  %v4815_v62 = vrot.slane %v4811_v14, 4  ;;  %v5022_v18 = vor.u32 %v5021_v17, %v5020_v41  ;;  %v4859_v46 = vld [vmem:[#allocation4 + $0x6c] sm:$0x1] }
 0x549   : > { %v8954_v9 = vpack.c.bf16 %v4763_v38, %v4763_v38  ;;  %v4819_v32 = vsel %vm12909_vm5, %v4814_v1, %v4818_v48  ;;  %v4822_v6 = vsel %vm12918_vm10, %v4815_v62, %v4821_v26  ;;  %v5023_v31 = vrot.slane %v5022_v18, 4 }
 0x54a   : > { %4820 = vst [vmem:[#allocation4 + $0x30] sm:$0xf] %v4819_v32  ;;  %4823 = vst [vmem:[#allocation4 + $0x3c] sm:$0x1] %v4822_v6  ;;  %v4684_v19 = vpop.f32.mrb[156].mxu1 }
 0x54b   : > { %v4828_v0 = vshrl.u32 %v8954_v9, 16  ;;  %v4728_v49 = vadd.f32 %v4684_v19, %v12847_v43  ;;  %5026 = vrot.lane.b32.xlu0 %v5023_v31, %s13844_s30  ;;  %4951 = vrot.lane.b32.xlu1 %v8954_v9, %s10615_s25  ;;  %v4686_v15 = vpop.f32.mrb[157].mxu1  ;;  %v4831_v20 = vshll.u32 %v8954_v9, 16 }
 0x54c   : > { %v4687_v39 = vpop.f32.mrb[158].mxu1 }
 0x54d   : > { %v4750_v55 = vadd.f32 %v12861_v37, %v4728_v49  ;;  %v4689_v36 = vpop.f32.mrb[159].mxu1  ;;  %v5040_v58 = vrot.slane %v4831_v20, 5  ;;  %v4830_v29 = vrot.slane %v4828_v0, 7  ;;  %v5041_v34 = vrot.slane %v4828_v0, 4  ;;  %v4875_v0 = vld [vmem:[#allocation4 + $0x78] sm:$0xf] }
 0x54e   : > { %v4878_v49 = vld [vmem:[#allocation4 + $0x84] sm:$0x1] }
 0x54f   : > { %v4765_v8 = vmax.f32 %v4750_v55, 0.0  ;;  %5044 = vrot.lane.b32.xlu1 %v5040_v58, %s13844_s30  ;;  %v4833_v43 = vor.u32 %v4831_v20, %v4830_v29  ;;  %v4834_v7 = vrot.slane %v4830_v29, 4  ;;  %v5042_v51 = vor.u32 %v5041_v34, %v5040_v58 }
 0x551   : > { %v8955_v12 = vpack.c.bf16 %v4765_v8, %v4765_v8  ;;  %v4838_v50 = vsel %vm12909_vm5, %v4833_v43, %v4837_v63  ;;  %v4841_v44 = vsel %vm12918_vm10, %v4834_v7, %v4840_v57  ;;  %v5043_v30 = vrot.slane %v5042_v51, 4 }
 0x552   : > { %4839 = vst [vmem:[#allocation4 + $0x48] sm:$0xf] %v4838_v50  ;;  %4842 = vst [vmem:[#allocation4 + $0x54] sm:$0x1] %v4841_v44  ;;  %v4692_v16 = vpop.f32.mrb[160].mxu1 }
 0x553   : > { %v4847_v28 = vshrl.u32 %v8955_v12, 16  ;;  %v4730_v23 = vadd.f32 %v4692_v16, %v12850_v21  ;;  %5046 = vrot.lane.b32.xlu1 %v5043_v30, %s13844_s30  ;;  %4957 = vrot.lane.b32.xlu0 %v8955_v12, %s10615_s25  ;;  %v4694_v24 = vpop.f32.mrb[161].mxu1  ;;  %v4850_v40 = vshll.u32 %v8955_v12, 16  ;;  %v4894_v16 = vld [vmem:[#allocation4 + $0x90] sm:$0xf] }
 0x554   : > { %v4695_v4 = vpop.f32.mrb[162].mxu1 }
 0x555   : > { %v4752_v33 = vadd.f32 %v12861_v37, %v4730_v23  ;;  %v4697_v59 = vpop.f32.mrb[163].mxu1  ;;  %v5060_v42 = vrot.slane %v4850_v40, 5  ;;  %v4849_v11 = vrot.slane %v4847_v28, 7  ;;  %v5061_v45 = vrot.slane %v4847_v28, 4  ;;  %v4897_v28 = vld [vmem:[#allocation4 + $0x9c] sm:$0x1] }
 0x557   : > { %v4767_v25 = vmax.f32 %v4752_v33, 0.0  ;;  %5064 = vrot.lane.b32.xlu0 %v5060_v42, %s13844_s30  ;;  %v4852_v2 = vor.u32 %v4850_v40, %v4849_v11  ;;  %v4853_v21 = vrot.slane %v4849_v11, 4  ;;  %v5062_v22 = vor.u32 %v5061_v45, %v5060_v42 }
 0x559   : > { %v8956_v41 = vpack.c.bf16 %v4767_v25, %v4767_v25  ;;  %v4857_v14 = vsel %vm12909_vm5, %v4852_v2, %v4856_v61  ;;  %v4860_v17 = vsel %vm12918_vm10, %v4853_v21, %v4859_v46  ;;  %v5063_v48 = vrot.slane %v5062_v22, 4 }
 0x55a   : > { %4858 = vst [vmem:[#allocation4 + $0x60] sm:$0xf] %v4857_v14  ;;  %4861 = vst [vmem:[#allocation4 + $0x6c] sm:$0x1] %v4860_v17  ;;  %v4700_v26 = vpop.f32.mrb[164].mxu1 }
 0x55b   : > { %v4866_v38 = vshrl.u32 %v8956_v41, 16  ;;  %v4732_v1 = vadd.f32 %v4700_v26, %v12853_v60  ;;  %5066 = vrot.lane.b32.xlu0 %v5063_v48, %s13844_s30  ;;  %4963 = vrot.lane.b32.xlu1 %v8956_v41, %s10615_s25  ;;  %v4702_v62 = vpop.f32.mrb[165].mxu1  ;;  %v4869_v18 = vshll.u32 %v8956_v41, 16  ;;  %v4913_v48 = vld [vmem:[#allocation4 + $0xa8] sm:$0xf] }
 0x55c   : > { %v4703_v9 = vpop.f32.mrb[166].mxu1  ;;  %v4916_v26 = vld [vmem:[#allocation4 + $0xb4] sm:$0x1] }
 0x55d   : > { %v4754_v32 = vadd.f32 %v12861_v37, %v4732_v1  ;;  %v4705_v6 = vpop.f32.mrb[167].mxu1  ;;  %v5080_v31 = vrot.slane %v4869_v18, 5  ;;  %v4868_v19 = vrot.slane %v4866_v38, 7  ;;  %v5081_v10 = vrot.slane %v4866_v38, 4 }
 0x55f   : > { %v4769_v15 = vmax.f32 %v4754_v32, 0.0  ;;  %5084 = vrot.lane.b32.xlu1 %v5080_v31, %s13844_s30  ;;  %v4871_v20 = vor.u32 %v4869_v18, %v4868_v19  ;;  %v4872_v60 = vrot.slane %v4868_v19, 4  ;;  %v5082_v39 = vor.u32 %v5081_v10, %v5080_v31 }
 0x561   : > { %v8957_v55 = vpack.c.bf16 %v4769_v15, %v4769_v15  ;;  %v4876_v36 = vsel %vm12909_vm5, %v4871_v20, %v4875_v0  ;;  %v4879_v58 = vsel %vm12918_vm10, %v4872_v60, %v4878_v49  ;;  %v5083_v29 = vrot.slane %v5082_v39, 4  ;;  %v4932_v49 = vld [vmem:[#allocation4 + $0xc0] sm:$0xf]  ;;  %v4935_v15 = vld [vmem:[#allocation4 + $0xcc] sm:$0x1] }
 0x562   : > { %4877 = vst [vmem:[#allocation4 + $0x78] sm:$0xf] %v4876_v36  ;;  %4880 = vst [vmem:[#allocation4 + $0x84] sm:$0x1] %v4879_v58  ;;  %v4708_v34 = vpop.f32.mrb[168].mxu1 }
 0x563   : > { %v4885_v63 = vshrl.u32 %v8957_v55, 16  ;;  %v4734_v57 = vadd.f32 %v4708_v34, %v12856_v53  ;;  %5086 = vrot.lane.b32.xlu1 %v5083_v29, %s13844_s30  ;;  %4969 = vrot.lane.b32.xlu0 %v8957_v55, %s10615_s25  ;;  %v4710_v8 = vpop.f32.mrb[169].mxu1  ;;  %v4888_v43 = vshll.u32 %v8957_v55, 16  ;;  %v13994_v29 = vld [vmem:[#allocation45_spill] sm:$0xff] }
 0x564   : > { %v4711_v7 = vpop.f32.mrb[170].mxu1  ;;  %v13995_v34 = vld [vmem:[#allocation53_spill] sm:$0xff] }
 0x565   : > { %v4756_v51 = vadd.f32 %v12861_v37, %v4734_v57  ;;  %v4713_v12 = vpop.f32.mrb[171].mxu1  ;;  %v5100_v50 = vrot.slane %v4888_v43, 5  ;;  %v4887_v44 = vrot.slane %v4885_v63, 7  ;;  %v5101_v30 = vrot.slane %v4885_v63, 4  ;;  %v13996_v63 = vld [vmem:[#allocation50_spill] sm:$0xff]  ;;  %v12995_v57 = vld [vmem:[#allocation20 + $0x110] sm:$0xff]  }
 0x566   : > { %9206 = vmatprep.subr.bf16.mxu1 %v12995_v57 }
 0x567   : > { %v4771_v23 = vmax.f32 %v4756_v51, 0.0  ;;  %5104 = vrot.lane.b32.xlu0 %v5100_v50, %s13844_s30  ;;  %v4890_v24 = vor.u32 %v4888_v43, %v4887_v44  ;;  %v4891_v53 = vrot.slane %v4887_v44, 4  ;;  %v5102_v40 = vor.u32 %v5101_v30, %v5100_v50 }
 0x569   : > { %v8958_v4 = vpack.c.bf16 %v4771_v23, %v4771_v23  ;;  %v4895_v33 = vsel %vm12909_vm5, %v4890_v24, %v4894_v16  ;;  %v4898_v59 = vsel %vm12918_vm10, %v4891_v53, %v4897_v28  ;;  %v5103_v42 = vrot.slane %v5102_v40, 4  ;;  %v5034_v28 = vld [vmem:[#allocation4 + $0x28] sm:$0x88]  ;;  %v9945_v16 = vld [vmem:[#allocation23 + $0x80] sm:$0xff]  }
 0x56a   : > { %4896 = vst [vmem:[#allocation4 + $0x90] sm:$0xf] %v4895_v33  ;;  %4899 = vst [vmem:[#allocation4 + $0x9c] sm:$0x1] %v4898_v59  ;;  %v4716_v11 = vpop.f32.mrb[172].mxu1 }
 0x56b   : > { %v4904_v45 = vshrl.u32 %v8958_v4, 16  ;;  %v4736_v61 = vadd.f32 %v4716_v11, %v12859_v3  ;;  %5106 = vrot.lane.b32.xlu1 %v5103_v42, %s13844_s30  ;;  %v4907_v46 = vshll.u32 %v8958_v4, 16  ;;  %v4718_v25 = vpop.f32.mrb[173].mxu1 }
 0x56c   : > { %v4719_v2 = vpop.f32.mrb[174].mxu1  ;;  %v5054_v25 = vld [vmem:[#allocation4 + $0x40] sm:$0x88] }
 0x56d   : > { %v4758_v21 = vadd.f32 %v12861_v37, %v4736_v61  ;;  %v5120_v22 = vrot.slane %v4907_v46, 5  ;;  %v4906_v41 = vrot.slane %v4904_v45, 7  ;;  %v5121_v14 = vrot.slane %v4904_v45, 4  ;;  %v4720_v17 = vpop.f32.mrb[175].mxu1 }
 0x56f   : > { %v4773_v38 = vmax.f32 %v4758_v21, 0.0  ;;  %4975 = vrot.lane.b32.xlu1 %v8958_v4, %s10615_s25  ;;  %5124 = vrot.lane.b32.xlu0 %v5120_v22, %s13844_s30  ;;  %v4909_v1 = vor.u32 %v4907_v46, %v4906_v41  ;;  %v4910_v3 = vrot.slane %v4906_v41, 4  ;;  %v5122_v62 = vor.u32 %v5121_v14, %v5120_v22  ;;  %v9899_v22 = vld [vmem:[#allocation20 + $0x120] sm:$0xff]  }
 0x571   : > { %v8959_v18 = vpack.c.bf16 %v4773_v38, %v4773_v38  ;;  %v4914_v9 = vsel %vm12909_vm5, %v4909_v1, %v4913_v48  ;;  %v4917_v37 = vsel %vm12918_vm10, %v4910_v3, %v4916_v26  ;;  %v5123_v32 = vrot.slane %v5122_v62, 4  ;;  %v9900_v3 = vld [vmem:[#allocation20 + $0x168] sm:$0xff]  }
 0x572   : > { %4915 = vst [vmem:[#allocation4 + $0xa8] sm:$0xf] %v4914_v9  ;;  %4918 = vst [vmem:[#allocation4 + $0xb4] sm:$0x1] %v4917_v37 }
 0x573   : > { %v4923_v6 = vshrl.u32 %v8959_v18, 16  ;;  %5126 = vrot.lane.b32.xlu1 %v5123_v32, %s13844_s30  ;;  %4981 = vrot.lane.b32.xlu0 %v8959_v18, %s10615_s25  ;;  %v4926_v31 = vshll.u32 %v8959_v18, 16 }
 0x575   : > { %v5140_v19 = vrot.slane %v4926_v31, 5  ;;  %v4925_v10 = vrot.slane %v4923_v6, 7  ;;  %v5141_v0 = vrot.slane %v4923_v6, 4  ;;  %v9901_v6 = vld [vmem:[#allocation20 + $0x128] sm:$0xff]  }
 0x577   : > { %5144 = vrot.lane.b32.xlu0 %v5140_v19, %s13844_s30  ;;  %v4928_v20 = vor.u32 %v4926_v31, %v4925_v10  ;;  %v4929_v60 = vrot.slane %v4925_v10, 4  ;;  %v5142_v39 = vor.u32 %v5141_v0, %v5140_v19  ;;  %v5074_v31 = vld [vmem:[#allocation4 + $0x58] sm:$0x88] }
 0x578   : > { %v9905_v10 = vld [vmem:[#allocation20 + $0x170] sm:$0xff]  }
 0x579   : > { %v4933_v55 = vsel %vm12909_vm5, %v4928_v20, %v4932_v49  ;;  %v4936_v36 = vsel %vm12918_vm10, %v4929_v60, %v4935_v15  ;;  %v5143_v58 = vrot.slane %v5142_v39, 4  ;;  %vm13021_vm5 = vmor %vm5015_vm13, %vm5012_vm11  ;;  %v9906_v49 = vld [vmem:[#allocation20 + $0x130] sm:$0xff]  }
 0x57a   : > { %4934 = vst [vmem:[#allocation4 + $0xc0] sm:$0xf] %v4933_v55  ;;  %4937 = vst [vmem:[#allocation4 + $0xcc] sm:$0x1] %v4936_v36 }
 0x57b   : > { %6819 = vrot.lane.b32.xlu0 %v13994_v29, %s13844_s30  ;;  %5146 = vrot.lane.b32.xlu1 %v5143_v58, %s13844_s30  ;;  %vm5003_vm10 = vmand %vm5002_vm14, %vm14004_vm12  ;;  %v9910_v29 = vld [vmem:[#allocation20 + $0x178] sm:$0xff]  }
 0x57c   : > { %vm13032_vm15 = vmor %vm5006_vm3, %vm5003_vm10 }
 0x57d   : > { %vm14010_vm11 = vmmov %vm14009_vm4 }
 0x57e   : > { %vm14011_vm13 = vmmov %vm14009_vm4 }
 0x57f   : > { %6827 = vrot.lane.b32.xlu0 %v13995_v34, %s13844_s30  ;;  %6823 = vrot.lane.b32.xlu1 %v13996_v63, %s13844_s30  ;;  %vm14012_vm14 = vmmov %vm14009_vm4 }
 0x580   : > { %vm14015_vm12 = vmmov %vm14013_vm1 }
 0x581   : > { %vm14016_vm10 = vmmov %vm14013_vm1 }
 0x582   : > { %vm14017_vm3 = vmmov %vm14013_vm1 }
 0x583   : > { %6835 = vrot.lane.b32.xlu0 %v12137_v47, %s13844_s30  ;;  %6831 = vrot.lane.b32.xlu1 %v12123_v13, %s13844_s30 }
 0x587   : > { %6843 = vrot.lane.b32.xlu0 %v11869_v52, %s13844_s30  ;;  %6839 = vrot.lane.b32.xlu1 %v12149_v35, %s13844_s30 }
 0x58b   : > { %6847 = vrot.lane.b32.xlu0 %v13997_v5, %s13844_s30  ;;  %4991 = vrot.lane.b32.xlu1 %v12914_v54, %s13844_s30  ;;  %s13527_s30 = scalar_lea.sflag [#allocation28], %s7862_s17 }
 0x5ad   : > { %v4939_v56 = vpop.permute.xlu1 %4938 }
 0x5ae   : > { %v4940_v13 = vrot.slane %v4939_v56, 4 }
 0x5b0   : > { %v4941_v52 = vsel %vm1636_vm7, %v4940_v13, %v4939_v56  ;;  %v9911_v56 = vld [vmem:[#allocation20 + $0x138] sm:$0xff]  }
 0x5b1   : > { %4944 = vst.msk [vmem:[#allocation4 + $0x18] sm:$0xff] %vm13012_vm6, %v4941_v52 }
 0x5b5   : > { %v4994_v54 = vpop.permute.xlu1 %4993  ;;  %v4946_v8 = vpop.permute.xlu0 %4945 }
 0x5b6   : > { %v4996_v43 = vrot.slane %v4994_v54, 4  ;;  %v4947_v7 = vrot.slane %v4946_v8, 4 }
 0x5b8   : > { %v4999_v51 = vsel %vm14005_vm8, %v4996_v43, %v4994_v54  ;;  %v5017_v12 = vld [vmem:[#allocation4 + $0x1c] sm:$0xff]  ;;  %v4948_v50 = vsel %vm1636_vm7, %v4947_v7, %v4946_v8  ;;  %v13048_v48 = vld [vmem:[#allocation4 + $0x18] ss:$12 sps:$4 sm:$0xff]   ;;  %v5094_v54 = vld [vmem:[#allocation4 + $0x70] sm:$0x88] }
 0x5b9   : > { %v5018_v44 = vsel %vm13021_vm5, %v4999_v51, %v5017_v12  ;;  %4950 = vst.msk [vmem:[#allocation4 + $0x30] sm:$0xff] %vm13012_vm6, %v4948_v50  ;;  %v5025_v30 = vpop.permute.xlu0 %5024  ;;  %v9914_v43 = vld [vmem:[#allocation20 + $0x180] sm:$0xff]   ;;  %vm14018_vm8 = vmmov %vm14013_vm1 }
 0x5ba   : > { %5019 = vst [vmem:[#allocation4 + $0x1c] sm:$0xff] %v5018_v44  ;;  %v5028_v23 = vrot.slane %v5025_v30, 4  ;;  %v9916_v51 = vld [vmem:[#allocation20 + $0x140] sm:$0xff]  }
 0x5bc   : > { %v5030_v24 = vsel %vm14008_vm9, %v5028_v23, %v5025_v30  ;;  %vm14019_vm9 = vmmov %vm14013_vm1 }
 0x5bd   : > { %v5035_v53 = vsel %vm13032_vm15, %v5030_v24, %v5034_v28  ;;  %v5027_v40 = vpop.permute.xlu0 %5026  ;;  %v4952_v4 = vpop.permute.xlu1 %4951 }
 0x5be   : > { %5036 = vst [vmem:[#allocation4 + $0x28] sm:$0x88] %v5035_v53  ;;  %v5029_v33 = vrot.slane %v5027_v40, 4  ;;  %v4953_v59 = vrot.slane %v4952_v4, 4  ;;  %v9917_v53 = vld [vmem:[#allocation20 + $0x188] sm:$0xff]  }
 0x5c0   : > { %v5031_v42 = vsel %vm14009_vm4, %v5029_v33, %v5027_v40  ;;  %v5037_v11 = vld [vmem:[#allocation4 + $0x34] sm:$0xff]  ;;  %v4954_v45 = vsel %vm1636_vm7, %v4953_v59, %v4952_v4  ;;  %v13065_v55 = vld [vmem:[#allocation4 + $0x30] ss:$12 sps:$4 sm:$0xff]   ;;  %vm14020_vm4 = vmmov %vm14013_vm1 }
 0x5c1   : > { %v5038_v61 = vsel %vm13021_vm5, %v5031_v42, %v5037_v11  ;;  %4956 = vst.msk [vmem:[#allocation4 + $0x48] sm:$0xff] %vm13012_vm6, %v4954_v45  ;;  %v5045_v46 = vpop.permute.xlu1 %5044  ;;  %v9918_v11 = vld [vmem:[#allocation20 + $0x148] sm:$0xff]  }
 0x5c2   : > { %5039 = vst [vmem:[#allocation4 + $0x34] sm:$0xff] %v5038_v61  ;;  %v5048_v2 = vrot.slane %v5045_v46, 4  ;;  %v5114_v45 = vld [vmem:[#allocation4 + $0x88] sm:$0x88] }
 0x5c4   : > { %v5050_v21 = vsel %vm14010_vm11, %v5048_v2, %v5045_v46  ;;  %v9922_v46 = vld [vmem:[#allocation20 + $0x190] sm:$0xff]  }
 0x5c5   : > { %v5055_v41 = vsel %vm13032_vm15, %v5050_v21, %v5054_v25  ;;  %v5047_v14 = vpop.permute.xlu1 %5046  ;;  %v4958_v17 = vpop.permute.xlu0 %4957  ;;  %v13050_v26 = vld [vmem:[#allocation4 + $0x1c] ss:$12 sps:$4 sm:$0xff]  }
 0x5c6   : > { %5056 = vst [vmem:[#allocation4 + $0x40] sm:$0x88] %v5055_v41  ;;  %v5049_v38 = vrot.slane %v5047_v14, 4  ;;  %v4959_v1 = vrot.slane %v4958_v17, 4  ;;  %5547 = vmatprep.mubr.bf16.mxu0 %v13050_v26  ;;  %v9923_v2 = vld [vmem:[#allocation20 + $0x150] sm:$0xff]  }
 0x5c7   : > { %5548 = vmatmul.mubr.bf16.vlgmr.msra.gmra.mrb[112].mxu0 %v13048_v48 }
 0x5c8   : > { %v5051_v62 = vsel %vm14011_vm13, %v5049_v38, %v5047_v14  ;;  %v5057_v18 = vld [vmem:[#allocation4 + $0x4c] sm:$0xff]  ;;  %v4960_v9 = vsel %vm1636_vm7, %v4959_v1, %v4958_v17  ;;  %9133 = vmatpush3.bf16.msra.mxu0 %v9899_v22  ;;  %v13080_v28 = vld [vmem:[#allocation4 + $0x48] ss:$12 sps:$4 sm:$0xff]   ;;  %v9927_v38 = vld [vmem:[#allocation20 + $0x198] sm:$0xff]  }
 0x5c9   : > { %v5058_v37 = vsel %vm13021_vm5, %v5051_v62, %v5057_v18  ;;  %4962 = vst.msk [vmem:[#allocation4 + $0x60] sm:$0xff] %vm13012_vm6, %v4960_v9  ;;  %v5065_v32 = vpop.permute.xlu0 %5064  ;;  %9134 = vmatprep.subr.bf16.mxu0 %v9900_v3 }
 0x5ca   : > { %5059 = vst [vmem:[#allocation4 + $0x4c] sm:$0xff] %v5058_v37  ;;  %v5068_v19 = vrot.slane %v5065_v32, 4  ;;  %v9928_v37 = vld [vmem:[#allocation20 + $0x158] sm:$0xff]  }
 0x5cc   : > { %v5070_v0 = vsel %vm14012_vm14, %v5068_v19, %v5065_v32  ;;  %9135 = vmatpush3.bf16.msra.mxu0 %v9901_v6  ;;  %v5134_v6 = vld [vmem:[#allocation4 + $0xa0] sm:$0x88] }
 0x5cd   : > { %v5075_v15 = vsel %vm13032_vm15, %v5070_v0, %v5074_v31  ;;  %v5067_v20 = vpop.permute.xlu0 %5066  ;;  %v4964_v60 = vpop.permute.xlu1 %4963  ;;  %v13063_v39 = vld [vmem:[#allocation4 + $0x34] ss:$12 sps:$4 sm:$0xff]   ;;  %9136 = vmatprep.subr.bf16.mxu0 %v9905_v10 }
 0x5ce   : > { %5076 = vst [vmem:[#allocation4 + $0x58] sm:$0x88] %v5075_v15  ;;  %v5069_v36 = vrot.slane %v5067_v20, 4  ;;  %v4965_v58 = vrot.slane %v4964_v60, 4  ;;  %5555 = vmatprep.mubr.bf16.mxu0 %v13063_v39 }
 0x5cf   : > { %5556 = vmatmul.mubr.bf16.gmra.mrb[116].mxu0 %v13065_v55 }
 0x5d0   : > { %v5071_v34 = vsel %vm14013_vm1, %v5069_v36, %v5067_v20  ;;  %v5077_v63 = vld [vmem:[#allocation4 + $0x64] sm:$0xff]  ;;  %v4966_v5 = vsel %vm1636_vm7, %v4965_v58, %v4964_v60  ;;  %9137 = vmatpush3.bf16.msra.mxu0 %v9906_v49  ;;  %v13095_v14 = vld [vmem:[#allocation4 + $0x60] ss:$12 sps:$4 sm:$0xff]  }
 0x5d1   : > { %v5078_v13 = vsel %vm13021_vm5, %v5071_v34, %v5077_v63  ;;  %4968 = vst.msk [vmem:[#allocation4 + $0x78] sm:$0xff] %vm13012_vm6, %v4966_v5  ;;  %v5085_v52 = vpop.permute.xlu1 %5084  ;;  %9138 = vmatprep.subr.bf16.mxu0 %v9910_v29  ;;  %v5154_v63 = vld [vmem:[#allocation4 + $0xb8] sm:$0x88] }
 0x5d2   : > { %5079 = vst [vmem:[#allocation4 + $0x64] sm:$0xff] %v5078_v13  ;;  %v5088_v8 = vrot.slane %v5085_v52, 4 }
 0x5d4   : > { %v5090_v7 = vsel %vm14014_vm2, %v5088_v8, %v5085_v52  ;;  %9139 = vmatpush3.bf16.msra.mxu0 %v9911_v56 }
 0x5d5   : > { %v5095_v12 = vsel %vm13032_vm15, %v5090_v7, %v5094_v54  ;;  %v5087_v50 = vpop.permute.xlu1 %5086  ;;  %v4970_v44 = vpop.permute.xlu0 %4969  ;;  %v13078_v30 = vld [vmem:[#allocation4 + $0x4c] ss:$12 sps:$4 sm:$0xff]   ;;  %9140 = vmatprep.subr.bf16.mxu0 %v9914_v43 }
 0x5d6   : > { %5096 = vst [vmem:[#allocation4 + $0x70] sm:$0x88] %v5095_v12  ;;  %v5089_v23 = vrot.slane %v5087_v50, 4  ;;  %v4971_v24 = vrot.slane %v4970_v44, 4  ;;  %5563 = vmatprep.mubr.bf16.mxu0 %v13078_v30 }
 0x5d7   : > { %5564 = vmatmul.mubr.bf16.gmra.mrb[120].mxu0 %v13080_v28 }
 0x5d8   : > { %v5091_v40 = vsel %vm14015_vm12, %v5089_v23, %v5087_v50  ;;  %v5097_v4 = vld [vmem:[#allocation4 + $0x7c] sm:$0xff]  ;;  %v4972_v33 = vsel %vm1636_vm7, %v4971_v24, %v4970_v44  ;;  %9141 = vmatpush3.bf16.msra.mxu0 %v9916_v51  ;;  %v13110_v60 = vld [vmem:[#allocation4 + $0x78] ss:$12 sps:$4 sm:$0xff]  }
 0x5d9   : > { %v5098_v59 = vsel %vm13021_vm5, %v5091_v40, %v5097_v4  ;;  %4974 = vst.msk [vmem:[#allocation4 + $0x90] sm:$0xff] %vm13012_vm6, %v4972_v33  ;;  %v5105_v42 = vpop.permute.xlu0 %5104  ;;  %9142 = vmatprep.subr.bf16.mxu0 %v9917_v53 }
 0x5da   : > { %5099 = vst [vmem:[#allocation4 + $0x7c] sm:$0xff] %v5098_v59  ;;  %v5108_v61 = vrot.slane %v5105_v42, 4  ;;  %v9931_v59 = vld [vmem:[#allocation23 + $0x60] sm:$0xff]  }
 0x5dc   : > { %v5110_v25 = vsel %vm14016_vm10, %v5108_v61, %v5105_v42  ;;  %9143 = vmatpush3.bf16.msra.mxu0 %v9918_v11  ;;  %v9937_v11 = vld [vmem:[#allocation20 + $0x118] sm:$0xff]  }
 0x5dd   : > { %v5115_v21 = vsel %vm13032_vm15, %v5110_v25, %v5114_v45  ;;  %v5107_v22 = vpop.permute.xlu1 %5106  ;;  %v13093_v41 = vld [vmem:[#allocation4 + $0x64] ss:$12 sps:$4 sm:$0xff]   ;;  %9144 = vmatprep.subr.bf16.mxu0 %v9922_v46 }
 0x5de   : > { %5116 = vst [vmem:[#allocation4 + $0x88] sm:$0x88] %v5115_v21  ;;  %v5109_v17 = vrot.slane %v5107_v22, 4  ;;  %5571 = vmatprep.mubr.bf16.mxu0 %v13093_v41  ;;  %v9933_v25 = vld [vmem:[#allocation23 + $0x68] sm:$0xff]  }
 0x5df   : > { %5572 = vmatmul.mubr.bf16.gmra.mrb[124].mxu0 %v13095_v14  ;;  %v13157_v21 = vld [vmem:[#allocation4] sm:$0xff] }
 0x5e0   : > { %v5111_v1 = vsel %vm14017_vm3, %v5109_v17, %v5107_v22  ;;  %v5117_v3 = vld [vmem:[#allocation4 + $0x94] sm:$0xff]  ;;  %9145 = vmatpush3.bf16.msra.mxu0 %v9923_v2  ;;  %v13126_v47 = vld [vmem:[#allocation4 + $0x90] ss:$12 sps:$4 sm:$0xff]   ;;  %v9939_v22 = vld [vmem:[#allocation20 + $0x40] sm:$0xff]  }
 0x5e1   : > { %v5118_v62 = vsel %vm13021_vm5, %v5111_v1, %v5117_v3  ;;  %v4976_v18 = vpop.permute.xlu1 %4975  ;;  %v5125_v9 = vpop.permute.xlu0 %5124  ;;  %9146 = vmatprep.subr.bf16.mxu0 %v9927_v38  ;;  %v5008_v1 = vld [vmem:[#allocation4 + $0x10] sm:$0x88] }
 0x5e2   : > { %5119 = vst [vmem:[#allocation4 + $0x94] sm:$0xff] %v5118_v62  ;;  %v4977_v32 = vrot.slane %v4976_v18, 4  ;;  %v5128_v31 = vrot.slane %v5125_v9, 4  ;;  %v9936_v62 = vld [vmem:[#allocation23 + $0x70] sm:$0xff]  }
 0x5e4   : > { %v4978_v19 = vsel %vm1636_vm7, %v4977_v32, %v4976_v18  ;;  %v5130_v10 = vsel %vm14018_vm8, %v5128_v31, %v5125_v9  ;;  %9147 = vmatpush3.bf16.msra.mxu0 %v9928_v37  ;;  %v13167_v9 = vld [vmem:[#allocation4 + $0x20] ss:$12 sps:$4 sm:$0xff]   ;;  %v9940_v32 = vld [vmem:[#allocation23 + $0x78] sm:$0xff]   ;;  %v13175_v31 = vld [vmem:[#allocation4 + $0x38] ss:$12 sps:$4 sm:$0xff]  }
 0x5e5   : > { %4980 = vst.msk [vmem:[#allocation4 + $0xa8] sm:$0xff] %vm13012_vm6, %v4978_v19  ;;  %v5135_v0 = vsel %vm13032_vm15, %v5130_v10, %v5134_v6  ;;  %v5127_v49 = vpop.permute.xlu1 %5126  ;;  %v4982_v15 = vpop.permute.xlu0 %4981  ;;  %v13108_v20 = vld [vmem:[#allocation4 + $0x7c] ss:$12 sps:$4 sm:$0xff]   ;;  %7178 = vmatprep.subr.bf16.mxu0 %v12863_v27  ;;  %v9943_v19 = vld [vmem:[#allocation20 + $0x48] sm:$0xff]  }
 0x5e6   : > { %5136 = vst [vmem:[#allocation4 + $0xa0] sm:$0x88] %v5135_v0  ;;  %v4983_v36 = vrot.slane %v4982_v15, 4  ;;  %5579 = vmatprep.mubr.bf16.mxu0 %v13108_v20  ;;  %v5129_v58 = vrot.slane %v5127_v49, 4  ;;  %v9942_v6 = vld [vmem:[#allocation20] sm:$0xff]   ;;  %v9944_v0 = vld [vmem:[#allocation20 + $0x8] sm:$0xff]  }
 0x5e7   : > { %5580 = vmatmul.mubr.bf16.gmra.mrb[128].mxu0 %v13110_v60  ;;  %v13179_v10 = vld [vmem:[#allocation4 + $0x50] ss:$12 sps:$4 sm:$0xff]  }
 0x5e8   : > { %v4984_v29 = vsel %vm1636_vm7, %v4983_v36, %v4982_v15  ;;  %v5131_v56 = vsel %vm14019_vm9, %v5129_v58, %v5127_v49  ;;  %vm14021_vm7 = vmmov %vm14013_vm1  ;;  %v9947_v49 = vld [vmem:[#allocation20 + $0x50] sm:$0xff]   ;;  %v9950_v15 = vld [vmem:[#allocation23 + $0x88] sm:$0xff]  }
 0x5e9   : > { %4986 = vst.msk [vmem:[#allocation4 + $0xc0] sm:$0xff] %vm13012_vm6, %v4984_v29  ;;  %v5145_v34 = vpop.permute.xlu0 %5144  ;;  %vm5490_vm6 = vcmask 261120   ;;  %v9949_v36 = vld [vmem:[#allocation20 + $0x10] sm:$0xff]   ;;  %v9951_v29 = vld [vmem:[#allocation20 + $0x58] sm:$0xff]  }
 0x5ea   : > { %v5148_v5 = vrot.slane %v5145_v34, 4  ;;  %v13187_v58 = vld [vmem:[#allocation4 + $0x68] ss:$12 sps:$4 sm:$0xff]  }
 0x5ec   : > { %v5137_v13 = vld [vmem:[#allocation4 + $0xac] sm:$0xff]  ;;  %v5150_v52 = vsel %vm14020_vm4, %v5148_v5, %v5145_v34  ;;  %v9952_v5 = vld [vmem:[#allocation20 + $0x18] sm:$0xff]  }
 0x5ed   : > { %v5138_v27 = vsel %vm13021_vm5, %v5131_v56, %v5137_v13  ;;  %v5155_v54 = vsel %vm13032_vm15, %v5150_v52, %v5154_v63  ;;  %v6820_v8 = vpop.permute.xlu0 %6819  ;;  %v5147_v43 = vpop.permute.xlu1 %5146  ;;  %v13124_v7 = vld [vmem:[#allocation4 + $0x94] ss:$12 sps:$4 sm:$0xff]   ;;  %v9955_v34 = vld [vmem:[#allocation23 + $0x90] sm:$0xff]  }
 0x5ee   : > { %5139 = vst [vmem:[#allocation4 + $0xac] sm:$0xff] %v5138_v27  ;;  %5156 = vst [vmem:[#allocation4 + $0xb8] sm:$0x88] %v5155_v54  ;;  %v5149_v51 = vrot.slane %v5147_v43, 4  ;;  %5587 = vmatprep.mubr.bf16.mxu0 %v13124_v7  ;;  %v13190_v63 = vld [vmem:[#allocation4 + $0x80] ss:$12 sps:$4 sm:$0xff]  }
 0x5ef   : > { %6822 = vst.msk [vmem:[#allocation3 + $0x10] sm:$0xf] %vm3779_vm0, %v6820_v8  ;;  %5588 = vmatmul.mubr.bf16.gmra.mrb[132].mxu0 %v13126_v47  ;;  %v9954_v56 = vld [vmem:[#allocation20 + $0x60] sm:$0xff]   ;;  %v9960_v13 = vld [vmem:[#allocation23 + $0x98] sm:$0xff]  }
 0x5f0   : > { %v5151_v12 = vsel %vm14021_vm7, %v5149_v51, %v5147_v43  ;;  %v5157_v50 = vld [vmem:[#allocation4 + $0xc4] sm:$0xff]  ;;  %6379 = vmatprep.mubr.bf16.mxu0 %v13063_v39  ;;  %v9958_v43 = vld [vmem:[#allocation20 + $0x68] sm:$0xff]   ;;  %v9964_v51 = vld [vmem:[#allocation23 + $0xa0] sm:$0xff]  }
 0x5f1   : > { %v5158_v44 = vsel %vm13021_vm5, %v5151_v12, %v5157_v50  ;;  %v6828_v23 = vpop.permute.xlu0 %6827  ;;  %v6824_v24 = vpop.permute.xlu1 %6823  ;;  %vm14022_vm5 = vmmov %vm14013_vm1  ;;  %v9957_v54 = vld [vmem:[#allocation20 + $0x20] sm:$0xff]   ;;  %v9959_v50 = vld [vmem:[#allocation20 + $0x28] sm:$0xff]  }
 0x5f2   : > { %5159 = vst [vmem:[#allocation4 + $0xc4] sm:$0xff] %v5158_v44  ;;  %6830 = vst.msk [vmem:[#allocation3 + $0x30] sm:$0xf] %vm3779_vm0, %v6828_v23  ;;  %v13201_v8 = vld [vmem:[#allocation4 + $0x98] ss:$12 sps:$4 sm:$0xff]  }
 0x5f3   : > { %6826 = vst.msk [vmem:[#allocation3 + $0x20] sm:$0xf] %vm3779_vm0, %v6824_v24  ;;  %v9962_v44 = vld [vmem:[#allocation20 + $0x70] sm:$0xff]   ;;  %v9967_v23 = vld [vmem:[#allocation23 + $0xa8] sm:$0xff]  }
 0x5f5   : > { %v6836_v53 = vpop.permute.xlu0 %6835  ;;  %v6832_v40 = vpop.permute.xlu1 %6831  ;;  %v13137_v4 = vld [vmem:[#allocation4 + $0xa8] sm:$0xff]  ;;  %v5226_v33 = vld [vmem:[#allocation4 + $0xb4] sm:$0xff]  ;;  %v13199_v52 = vld [vmem:[#allocation4 + $0xb0] sm:$0xf] }
 0x5f6   : > { %6838 = vst.msk [vmem:[#allocation3 + $0x50] sm:$0xf] %vm3779_vm0, %v6836_v53  ;;  %6834 = vst.msk [vmem:[#allocation3 + $0x40] sm:$0xf] %vm3779_vm0, %v6832_v40  ;;  %v13142_v35 = vcombine.low %v13137_v4, %v5226_v33  ;;  %v13145_v42 = vcombine.high %v13137_v4, %v5226_v33  ;;  %v5227_v27 = vld [vmem:[#allocation4 + $0xbc] sm:$0xf] }
 0x5f7   : > { %6380 = vmatmul.mubr.bf16.vlgmr.msra.gmra.mrb[136].mxu0 %v13065_v55  ;;  %v8662_v12 = vcombine.low %v13199_v52, %v5227_v27  ;;  %v9963_v53 = vld [vmem:[#allocation20 + $0x30] sm:$0xff]   ;;  %v6059_v40 = vld [vmem:[#allocation4 + $0xcc] sm:$0xff] }
 0x5f8   : > { %5595 = vmatprep.mubr.bf16.mxu1 %v13145_v42  ;;  %7179 = vmatpush1.bf16.msra.mxu0 %v9931_v59 }
 0x5f9   : > { %5596 = vmatmul.mubr.bf16.vlgmr.msra.gmra.mrb[176].mxu1 %v13142_v35  ;;  %v6844_v45 = vpop.permute.xlu0 %6843  ;;  %v6840_v61 = vpop.permute.xlu1 %6839  ;;  %v13150_v46 = vld [vmem:[#allocation4 + $0xc0] sm:$0xff]  ;;  %6387 = vmatprep.mubr.bf16.mxu0 %v13078_v30  ;;  %v9961_v33 = vld [vmem:[#allocation4 + $0xc8] ss:$0 sps:$4 sm:$0xff]  }
 0x5fa   : > { %6846 = vst.msk [vmem:[#allocation3 + $0x70] sm:$0xf] %vm3779_vm0, %v6844_v45  ;;  %6842 = vst.msk [vmem:[#allocation3 + $0x60] sm:$0xf] %vm3779_vm0, %v6840_v61  ;;  %v8664_v2 = vcombine.high %v13150_v46, %v13150_v46  ;;  %7180 = vmatprep.subr.bf16.mxu0 %v13157_v21  ;;  %9207 = vmatpush3.bf16.msra.mxu1 %v12995_v57  ;;  %v8663_v18 = vcombine.low %v13150_v46, %v13150_v46  ;;  %v9966_v61 = vld [vmem:[#allocation20 + $0x38] sm:$0xff]  }
 0x5fb   : > { %9208 = vmatprep.subr.bf16.mxu1 %v9937_v11  ;;  %v8743_v59 = vcombine.high %v13150_v46, %v6059_v40 }
 0x5fc   : > { %5603 = vmatprep.mubr.bf16.mxu1 %v8664_v2  ;;  %7181 = vmatpush1.bf16.msra.mxu0 %v9933_v25  ;;  %v9972_v25 = vld [vmem:[#allocation23 + $0xb8] sm:$0xff]   ;;  %v9995_v2 = vld [vmem:[#allocation20 + $0x80] sm:$0xff]  }
 0x5fd   : > { %v6848_v17 = vpop.permute.xlu0 %6847  ;;  %v4992_v38 = vpop.permute.xlu1 %4991  ;;  %7182 = vmatprep.subr.bf16.mxu0 %v13157_v21 }
 0x5fe   : > { %6850 = vst.msk [vmem:[#allocation3 + $0x80] sm:$0xf] %vm3779_vm0, %v6848_v17  ;;  %v4995_v3 = vrot.slane %v4992_v38, 4  ;;  %9209 = vmatpush3.bf16.msra.mxu1 %v9937_v11  ;;  %v9965_v11 = vld [vmem:[#allocation20 + $0x78] sm:$0xff]   ;;  %vm14023_vm0 = vmmov %vm14013_vm1 }
 0x5ff   : > { %6388 = vmatmul.mubr.bf16.gmra.mrb[140].mxu0 %v13080_v28  ;;  %9058 = vmatprep.subr.bf16.mxu1 %v9939_v22  ;;  %v8746_v22 = vcombine.high %v13157_v21, %v13157_v21  ;;  %vm14025_vm11 = vmmov %vm14023_vm0 }
 0x600   : > { %v4998_v57 = vsel %vm14022_vm5, %v4995_v3, %v4992_v38  ;;  %6395 = vmatprep.mubr.bf16.mxu0 %v13093_v41  ;;  %7183 = vmatpush1.bf16.msra.mxu0 %v9936_v62  ;;  %v10000_v38 = vld [vmem:[#allocation20 + $0x88] sm:$0xff]   ;;  %v8745_v3 = vcombine.low %v13157_v21, %v13157_v21  ;;  %v13234_v62 = vld [vmem:[#allocation3 + $0x10] ss:$8 sps:$4 sm:$0xff]   ;;  %vm14026_vm13 = vmmov %vm14023_vm0 }
 0x601   : > { %v5009_v37 = vsel %vm13032_vm15, %v4998_v57, %v5008_v1  ;;  %5604 = vmatmul.mubr.bf16.gmra.mrb[180].mxu1 %v8663_v18  ;;  %7184 = vmatprep.subr.bf16.mxu0 %v13157_v21  ;;  %v13223_v1 = vld [vmem:[#allocation20 + $0x1a0] sm:$0xff]   ;;  %vm14024_vm15 = vmmov %vm14023_vm0 }
 0x602   : > { %5010 = vst [vmem:[#allocation4 + $0x10] sm:$0x88] %v5009_v37  ;;  %9210 = vmatprep.mubr.msk.bf16.mxu1 %vm5490_vm6, %v13167_v9  ;;  %v13237_v18 = vld [vmem:[#allocation3 + $0x24] ss:$8 sps:$4 sm:$0xff]   ;;  %v9976_v57 = vld [vmem:[#allocation23 + $0x8] sm:$0xff]   ;;  %vm14027_vm14 = vmmov %vm14023_vm0 }
 0x603   : > { %v13247_v37 = vld [vmem:[#allocation3 + $0x34] ss:$8 sps:$4 sm:$0xff]   ;;  %vm14028_vm1 = vmmov %vm14023_vm0 }
 0x604   : > { %7185 = vmatpush1.bf16.msra.mxu0 %v9940_v32  ;;  %v9985_v32 = vld [vmem:[#allocation23 + $0x20] sm:$0xff]   ;;  %vm14029_vm2 = vmmov %vm14023_vm0 }
 0x605   : > { %7186 = vmatprep.subr.bf16.mxu0 %v13157_v21  ;;  %v13304_v27 = vld [vmem:[#allocation3 + $0x80] sm:$0xff]  ;;  %vm14030_vm12 = vmmov %vm14023_vm0 }
 0x606   : > { %vm14031_vm10 = vmmov %vm14023_vm0 }
 0x607   : > { %6396 = vmatmul.mubr.bf16.gmra.mrb[144].mxu0 %v13095_v14  ;;  %vm14032_vm3 = vmmov %vm14023_vm0 }
 0x608   : > { %6403 = vmatprep.mubr.bf16.mxu0 %v13108_v20  ;;  %7187 = vmatpush1.bf16.msra.mxu0 %v9945_v16  ;;  %v13268_v16 = vld [vmem:[#allocation3 + $0x54] ss:$8 sps:$4 sm:$0xff]   ;;  %vm14033_vm8 = vmmov %vm14023_vm0 }
 0x609   : > { %9211 = vmatmul.mubr.msk.bf16.vlgmr.msra.gmra.mrb[184].mxu1 %vm5490_vm6, %v13175_v31  ;;  %7188 = vmatprep.subr.bf16.mxu0 %v13157_v21  ;;  %v5162_v24 = vld [vmem:[#allocation4 + $0xc] sm:$0xff]  ;;  %vm14034_vm9 = vmmov %vm14023_vm0 }
 0x60a   : > { %9214 = vmatprep.mubr.msk.bf16.mxu1 %vm5490_vm6, %v13179_v10  ;;  %9059 = vmatpush3.bf16.msra.mxu1 %v9942_v6  ;;  %v8693_v45 = vcombine.high %v13157_v21, %v5162_v24  ;;  %v8692_v17 = vcombine.low %v13157_v21, %v5162_v24  ;;  %v13257_v6 = vld [vmem:[#allocation3 + $0x44] ss:$8 sps:$4 sm:$0xff]   ;;  %v10023_v24 = vld [vmem:[#allocation23 + $0xe8] sm:$0xff]   ;;  %vm14035_vm4 = vmmov %vm14023_vm0 }
 0x60b   : > { %9060 = vmatprep.subr.bf16.mxu1 %v9943_v19  ;;  %v9991_v19 = vld [vmem:[#allocation23 + $0x30] sm:$0xff]   ;;  %vm14036_vm7 = vmmov %vm14023_vm0 }
 0x60c   : > { %7189 = vmatpush1.bf16.msra.mxu0 %v9950_v15  ;;  %v13289_v15 = vld [vmem:[#allocation3 + $0x70] sm:$0xff]  ;;  %vm14037_vm5 = vmmov %vm14023_vm0 }
 0x60d   : > { %7190 = vmatprep.subr.bf16.mxu0 %v13157_v21 }
 0x60e   : > { %9061 = vmatpush3.bf16.msra.mxu1 %v9944_v0  ;;  %v9999_v0 = vld [vmem:[#allocation23 + $0x40] sm:$0xff]  }
 0x60f   : > { %9062 = vmatprep.subr.bf16.mxu1 %v9947_v49  ;;  %6404 = vmatmul.mubr.bf16.gmra.mrb[148].mxu0 %v13110_v60  ;;  %v13279_v49 = vld [vmem:[#allocation3 + $0x64] ss:$8 sps:$4 sm:$0xff]  }
 0x610   : > { %6411 = vmatprep.mubr.bf16.mxu0 %v13124_v7  ;;  %7191 = vmatpush1.bf16.msra.mxu0 %v9955_v34  ;;  %v10004_v34 = vld [vmem:[#allocation23 + $0x50] sm:$0xff]  }
 0x611   : > { %9215 = vmatmul.mubr.msk.bf16.gmra.mrb[188].mxu1 %vm5490_vm6, %v13187_v58  ;;  %7192 = vmatprep.subr.bf16.mxu0 %v13157_v21 }
 0x612   : > { %9218 = vmatprep.mubr.msk.bf16.mxu1 %vm5490_vm6, %v13190_v63  ;;  %9063 = vmatpush3.bf16.msra.mxu1 %v9949_v36  ;;  %v13291_v36 = vld [vmem:[#allocation3 + $0x60] ss:$8 sps:$4 sm:$0xff]  }
 0x613   : > { %9064 = vmatprep.subr.bf16.mxu1 %v9951_v29  ;;  %v6986_v29 = vld [vmem:[#allocation3 + $0x78] sm:$0xff] }
 0x614   : > { %7193 = vmatpush1.bf16.msra.mxu0 %v9960_v13  ;;  %v10009_v13 = vld [vmem:[#allocation23 + $0x58] sm:$0xff]  }
 0x615   : > { %7194 = vmatprep.subr.bf16.mxu0 %v13157_v21 }
 0x616   : > { %9065 = vmatpush3.bf16.msra.mxu1 %v9952_v5  ;;  %v8695_v5 = vcombine.low %v13137_v4, %v13137_v4 }
 0x617   : > { %9066 = vmatprep.subr.bf16.mxu1 %v9954_v56  ;;  %6412 = vmatmul.mubr.bf16.gmra.mrb[152].mxu0 %v13126_v47  ;;  %v9997_v56 = vld [vmem:[#allocation4 + $0x8] ss:$12 sps:$4 sm:$0xff]  }
 0x618   : > { %6419 = vmatprep.mubr.bf16.mxu0 %v13145_v42  ;;  %7195 = vmatpush1.bf16.msra.mxu0 %v9964_v51  ;;  %v9968_v42 = vld [vmem:[#allocation23 + $0xb0] sm:$0xff]   ;;  %v8812_v51 = vcombine.low %v13304_v27, %v13304_v27 }
 0x619   : > { %9219 = vmatmul.mubr.msk.bf16.gmra.mrb[192].mxu1 %vm5490_vm6, %v13201_v8  ;;  %7196 = vmatprep.subr.bf16.mxu0 %v13157_v21 }
 0x61a   : > { %9222 = vmatprep.mubr.msk.bf16.mxu1 %vm5490_vm6, %v8662_v12  ;;  %9067 = vmatpush3.bf16.msra.mxu1 %v9957_v54  ;;  %v8813_v54 = vcombine.high %v13304_v27, %v13304_v27  ;;  %v10008_v12 = vld [vmem:[#allocation3 + $0x4] ss:$8 sps:$4 sm:$0xff]  }
 0x61b   : > { %9068 = vmatprep.subr.bf16.mxu1 %v9958_v43  ;;  %v10016_v43 = vld [vmem:[#allocation20 + $0x1a8] sm:$0xff]  }
 0x61c   : > { %7197 = vmatpush1.bf16.msra.mxu0 %v9967_v23  ;;  %v10017_v23 = vld [vmem:[#allocation4 + $0x50] ss:$12 sps:$4 sm:$0xff]  }
 0x61d   : > { %7198 = vmatprep.subr.bf16.mxu0 %v13157_v21 }
 0x61e   : > { %9069 = vmatpush3.bf16.msra.mxu1 %v9959_v50  ;;  %v10006_v50 = vld [vmem:[#allocation3] ss:$8 sps:$4 sm:$0xff]  }
 0x61f   : > { %9070 = vmatprep.subr.bf16.mxu1 %v9962_v44  ;;  %6420 = vmatmul.mubr.bf16.gmra.mrb[156].mxu0 %v13142_v35  ;;  %v8742_v35 = vcombine.low %v13150_v46, %v6059_v40  ;;  %v13227_v46 = vld [vmem:[#allocation3 + $0x14] ss:$8 sps:$4 sm:$0xff]   ;;  %v10021_v40 = vld [vmem:[#allocation4 + $0x80] ss:$12 sps:$4 sm:$0xff]  }
 0x620   : > { %6427 = vmatprep.mubr.bf16.mxu0 %v8743_v59  ;;  %7199 = vmatpush1.bf16.msra.mxu0 %v9968_v42  ;;  %v10020_v44 = vld [vmem:[#allocation23 + $0xe0] sm:$0xff]   ;;  %v10027_v59 = vld [vmem:[#allocation23 + $0xf8] sm:$0xff]  }
 0x621   : > { %9223 = vmatmul.mubr.msk.bf16.gmra.mrb[196].mxu1 %vm5490_vm6, %v9961_v33  ;;  %7200 = vmatprep.subr.bf16.mxu0 %v13157_v21  ;;  %v10022_v33 = vld [vmem:[#allocation4 + $0x98] ss:$12 sps:$4 sm:$0xff]   ;;  %v10024_v42 = vld [vmem:[#allocation4 + $0xb0] ss:$12 sps:$4 sm:$0xff]  }
 0x622   : > { %9071 = vmatpush3.bf16.msra.mxu1 %v9963_v53  ;;  %5873 = vmatprep.mubr.bf16.mxu1 %v8693_v45  ;;  %v10025_v53 = vld [vmem:[#allocation23 + $0xf0] sm:$0xff]  }
 0x623   : > { %9072 = vmatprep.subr.bf16.mxu1 %v9965_v11  ;;  %v10029_v11 = vld [vmem:[#allocation23 + $0x100] sm:$0xff]   ;;  %v10026_v45 = vld [vmem:[#allocation4 + $0xc8] ss:$12 sps:$4 sm:$0xff]  }
 0x624   : > { %7201 = vmatpush1.bf16.msra.mxu0 %v9972_v25 }
 0x625   : > { %7357 = vmatprep.subr.bf16.mxu0 %v13157_v21 }
 0x626   : > { %9073 = vmatpush3.bf16.msra.mxu1 %v9966_v61  ;;  %v10030_v61 = vld [vmem:[#allocation23 + $0x108] sm:$0xff]  }
 0x627   : > { %9226 = vmatprep.subr.bf16.mxu1 %v9995_v2  ;;  %6428 = vmatmul.mubr.bf16.gmra.mrb[160].mxu0 %v8742_v35 }
 0x628   : > { %6435 = vmatprep.mubr.bf16.mxu0 %v8746_v22 }
 0x629   : > { %5874 = vmatmul.mubr.bf16.vlgmr.msra.gmra.mrb[200].mxu1 %v8692_v17  ;;  %v10028_v17 = vld [vmem:[#allocation4 + $0xe0] ss:$0 sps:$4 sm:$0xff]  }
 0x62a   : > { %5881 = vmatprep.mubr.bf16.mxu1 %v13050_v26  ;;  %9227 = vmatpush3.bf16.msra.mxu1 %v9995_v2  ;;  %v9973_v26 = vld [vmem:[#allocation23] sm:$0xff]  }
 0x62b   : > { %9228 = vmatprep.subr.bf16.mxu1 %v10000_v38 }
 0x62e   : > { %9229 = vmatpush3.bf16.msra.mxu1 %v10000_v38 }
 0x62f   : > { %9246 = vmatprep.subr.bf16.mxu1 %v13223_v1  ;;  %6436 = vmatmul.mubr.bf16.gmra.mrb[164].mxu0 %v8745_v3 }
 0x630   : > { %8826 = vmatprep.mubr.msk.bf16.mxu0 %vm14023_vm0, %v13227_v46 }
 0x631   : > { %5882 = vmatmul.mubr.bf16.gmra.mrb[204].mxu1 %v13048_v48  ;;  %v13244_v48 = vld [vmem:[#allocation3 + $0x20] ss:$8 sps:$4 sm:$0xff]  }
 0x632   : > { %5889 = vmatprep.mubr.bf16.mxu1 %v13063_v39  ;;  %v9980_v39 = vld [vmem:[#allocation23 + $0x10] sm:$0xff]  }
 0x637   : > { %7211 = vmatmul.mubr.bf16.vlgmr.msra.gmra.mrb[168].mxu0 %v13234_v62 }
 0x638   : > { %7358 = vmatpush1.bf16.msra.mxu0 %v9973_v26  ;;  %8827 = vmatprep.mubr.msk.bf16.mxu0 %vm14024_vm15, %v13237_v18  ;;  %vm14039_vm15 = vmmov %vm14023_vm0 }
 0x639   : > { %5890 = vmatmul.mubr.bf16.gmra.mrb[208].mxu1 %v13065_v55  ;;  %7359 = vmatprep.subr.bf16.mxu0 %v13157_v21  ;;  %v9982_v55 = vld [vmem:[#allocation23 + $0x18] sm:$0xff]  }
 0x63a   : > { %5897 = vmatprep.mubr.bf16.mxu1 %v13078_v30  ;;  %v13255_v30 = vld [vmem:[#allocation3 + $0x30] ss:$8 sps:$4 sm:$0xff]  }
 0x63c   : > { %7360 = vmatpush1.bf16.msra.mxu0 %v9976_v57 }
 0x63d   : > { %7361 = vmatprep.subr.bf16.mxu0 %v13157_v21 }
 0x63f   : > { %7218 = vmatmul.mubr.bf16.gmra.mrb[172].mxu0 %v13244_v48 }
 0x640   : > { %8828 = vmatprep.mubr.msk.bf16.mxu0 %vm14025_vm11, %v13247_v37  ;;  %7362 = vmatpush1.bf16.msra.mxu0 %v9980_v39  ;;  %vm14040_vm11 = vmmov %vm14023_vm0 }
 0x641   : > { %5898 = vmatmul.mubr.bf16.gmra.mrb[212].mxu1 %v13080_v28  ;;  %7363 = vmatprep.subr.bf16.mxu0 %v13157_v21  ;;  %v9989_v28 = vld [vmem:[#allocation23 + $0x28] sm:$0xff]  }
 0x642   : > { %5905 = vmatprep.mubr.bf16.mxu1 %v13093_v41  ;;  %v13266_v41 = vld [vmem:[#allocation3 + $0x40] ss:$8 sps:$4 sm:$0xff]  }
 0x644   : > { %7364 = vmatpush1.bf16.msra.mxu0 %v9982_v55 }
 0x645   : > { %7365 = vmatprep.subr.bf16.mxu0 %v13157_v21 }
 0x647   : > { %7225 = vmatmul.mubr.bf16.gmra.mrb[176].mxu0 %v13255_v30 }
 0x648   : > { %8829 = vmatprep.mubr.msk.bf16.mxu0 %vm14026_vm13, %v13257_v6  ;;  %7366 = vmatpush1.bf16.msra.mxu0 %v9985_v32  ;;  %vm14041_vm13 = vmmov %vm14023_vm0 }
 0x649   : > { %5906 = vmatmul.mubr.bf16.gmra.mrb[216].mxu1 %v13095_v14  ;;  %7367 = vmatprep.subr.bf16.mxu0 %v13157_v21  ;;  %v9994_v14 = vld [vmem:[#allocation23 + $0x38] sm:$0xff]  }
 0x64a   : > { %5913 = vmatprep.mubr.bf16.mxu1 %v13108_v20  ;;  %v13277_v20 = vld [vmem:[#allocation3 + $0x50] ss:$8 sps:$4 sm:$0xff]  }
 0x64c   : > { %7368 = vmatpush1.bf16.msra.mxu0 %v9989_v28  ;;  %v8837_v28 = vcombine.high %v13289_v15, %v13289_v15 }
 0x64d   : > { %7369 = vmatprep.subr.bf16.mxu0 %v13157_v21 }
 0x64f   : > { %7232 = vmatmul.mubr.bf16.gmra.mrb[180].mxu0 %v13266_v41 }
 0x650   : > { %8830 = vmatprep.mubr.msk.bf16.mxu0 %vm14027_vm14, %v13268_v16  ;;  %7370 = vmatpush1.bf16.msra.mxu0 %v9991_v19  ;;  %vm14042_vm14 = vmmov %vm14023_vm0 }
 0x651   : > { %5914 = vmatmul.mubr.bf16.gmra.mrb[220].mxu1 %v13110_v60  ;;  %7371 = vmatprep.subr.bf16.mxu0 %v13157_v21  ;;  %v8696_v60 = vcombine.high %v13137_v4, %v13137_v4  ;;  %v13307_v4 = vcombine.low %v13289_v15, %v6986_v29 }
 0x652   : > { %5921 = vmatprep.mubr.bf16.mxu1 %v13124_v7  ;;  %v10002_v7 = vld [vmem:[#allocation23 + $0x48] sm:$0xff]  }
 0x654   : > { %7372 = vmatpush1.bf16.msra.mxu0 %v9994_v14 }
 0x655   : > { %7373 = vmatprep.subr.bf16.mxu0 %v13157_v21 }
 0x657   : > { %7239 = vmatmul.mubr.bf16.gmra.mrb[184].mxu0 %v13277_v20 }
 0x658   : > { %8831 = vmatprep.mubr.msk.bf16.mxu0 %vm14028_vm1, %v13279_v49  ;;  %7374 = vmatpush1.bf16.msra.mxu0 %v9999_v0  ;;  %vm14043_vm1 = vmmov %vm14023_vm0 }
 0x659   : > { %5922 = vmatmul.mubr.bf16.gmra.mrb[224].mxu1 %v13126_v47  ;;  %7375 = vmatprep.subr.bf16.mxu0 %v13157_v21  ;;  %v13296_v47 = vcombine.high %v13289_v15, %v6986_v29 }
 0x65a   : > { %5929 = vmatprep.mubr.bf16.mxu1 %v8696_v60 }
 0x65c   : > { %7376 = vmatpush1.bf16.msra.mxu0 %v10002_v7  ;;  %v8836_v7 = vcombine.low %v13289_v15, %v13289_v15 }
 0x65d   : > { %7377 = vmatprep.subr.bf16.mxu0 %v13157_v21 }
 0x65f   : > { %7246 = vmatmul.mubr.bf16.gmra.mrb[188].mxu0 %v13291_v36 }
 0x660   : > { %8832 = vmatprep.mubr.msk.bf16.mxu0 %vm14029_vm2, %v13296_v47  ;;  %7378 = vmatpush1.bf16.msra.mxu0 %v10004_v34  ;;  %vm14044_vm2 = vmmov %vm14023_vm0 }
 0x661   : > { %5930 = vmatmul.mubr.bf16.gmra.mrb[228].mxu1 %v8695_v5  ;;  %7379 = vmatprep.subr.bf16.mxu0 %v13157_v21 }
 0x662   : > { %9230 = vmatprep.mubr.msk.bf16.mxu1 %vm5490_vm6, %v9997_v56 }
 0x664   : > { %7380 = vmatpush1.bf16.msra.mxu0 %v10009_v13 }
 0x665   : > { %7651 = vmatprep.subr.bf16.mxu0 %v13157_v21 }
 0x667   : > { %7253 = vmatmul.mubr.bf16.gmra.mrb[192].mxu0 %v13307_v4 }
 0x668   : > { %8833 = vmatprep.mubr.msk.bf16.mxu0 %vm14030_vm12, %v8813_v54  ;;  %vm14045_vm12 = vmmov %vm14023_vm0 }
 0x669   : > { %9231 = vmatmul.mubr.msk.bf16.vlgmr.msra.gmra.mrb[184].mxu1 %vm5490_vm6, %v13167_v9  ;;  %v10010_v9 = vld [vmem:[#allocation23 + $0xc0] sm:$0xff]  }
 0x66a   : > { %9234 = vmatprep.mubr.msk.bf16.mxu1 %vm5490_vm6, %v13175_v31  ;;  %9247 = vmatpush3.bf16.msra.mxu1 %v13223_v1  ;;  %v10011_v31 = vld [vmem:[#allocation23 + $0xc8] sm:$0xff]   ;;  %v10032_v1 = vld [vmem:[#allocation23 + $0x110] sm:$0xff]  }
 0x66b   : > { %9248 = vmatprep.subr.bf16.mxu1 %v10016_v43 }
 0x66e   : > { %9249 = vmatpush3.bf16.msra.mxu1 %v10016_v43 }
 0x66f   : > { %7260 = vmatmul.mubr.bf16.gmra.mrb[196].mxu0 %v8812_v51 }
 0x670   : > { %8850 = vmatprep.mubr.msk.bf16.mxu0 %vm14031_vm10, %v10008_v12 }
 0x671   : > { %9235 = vmatmul.mubr.msk.bf16.gmra.mrb[188].mxu1 %vm5490_vm6, %v13179_v10  ;;  %v10015_v10 = vld [vmem:[#allocation23 + $0xd0] sm:$0xff]  }
 0x672   : > { %9238 = vmatprep.mubr.msk.bf16.mxu1 %vm5490_vm6, %v13187_v58  ;;  %v8697_v58 = vcombine.low %v13199_v52, %v13199_v52  ;;  %v10019_v52 = vld [vmem:[#allocation4 + $0x68] ss:$12 sps:$4 sm:$0xff]  }
 0x677   : > { %7390 = vmatmul.mubr.bf16.vlgmr.msra.gmra.mrb[168].mxu0 %v10006_v50 }
 0x678   : > { %7652 = vmatpush1.bf16.msra.mxu0 %v10010_v9  ;;  %8851 = vmatprep.mubr.msk.bf16.mxu0 %vm14032_vm3, %v13227_v46  ;;  %v10034_v46 = vld [vmem:[#allocation23 + $0x118] sm:$0xff]  }
 0x679   : > { %9239 = vmatmul.mubr.msk.bf16.gmra.mrb[192].mxu1 %vm5490_vm6, %v13190_v63  ;;  %7653 = vmatprep.subr.bf16.mxu0 %v13157_v21  ;;  %v10014_v63 = vld [vmem:[#allocation4 + $0x38] ss:$12 sps:$4 sm:$0xff]  }
 0x67a   : > { %9242 = vmatprep.mubr.msk.bf16.mxu1 %vm5490_vm6, %v13201_v8  ;;  %v10018_v8 = vld [vmem:[#allocation23 + $0xd8] sm:$0xff]  }
 0x67c   : > { %7654 = vmatpush1.bf16.msra.mxu0 %v10011_v31 }
 0x67d   : > { %7655 = vmatprep.subr.bf16.mxu0 %v13157_v21 }
 0x67f   : > { %7397 = vmatmul.mubr.bf16.gmra.mrb[172].mxu0 %v13234_v62 }
 0x680   : > { %8852 = vmatprep.mubr.msk.bf16.mxu0 %vm14033_vm8, %v13237_v18  ;;  %7656 = vmatpush1.bf16.msra.mxu0 %v10015_v10 }
 0x681   : > { %9243 = vmatmul.mubr.msk.bf16.gmra.mrb[232].mxu1 %vm5490_vm6, %v8697_v58  ;;  %7657 = vmatprep.subr.bf16.mxu0 %v13157_v21 }
 0x682   : > { %9250 = vmatprep.mubr.msk.bf16.mxu1 %vm5490_vm6, %v10014_v63 }
 0x684   : > { %7658 = vmatpush1.bf16.msra.mxu0 %v10018_v8 }
 0x685   : > { %7659 = vmatprep.subr.bf16.mxu0 %v13157_v21 }
 0x687   : > { %7404 = vmatmul.mubr.bf16.gmra.mrb[176].mxu0 %v13244_v48 }
 0x688   : > { %8853 = vmatprep.mubr.msk.bf16.mxu0 %vm14034_vm9, %v13247_v37  ;;  %7660 = vmatpush1.bf16.msra.mxu0 %v10020_v44 }
 0x689   : > { %9251 = vmatmul.mubr.msk.bf16.vlgmr.msra.gmra.mrb[184].mxu1 %vm5490_vm6, %v10017_v23  ;;  %7661 = vmatprep.subr.bf16.mxu0 %v13157_v21 }
 0x68a   : > { %9254 = vmatprep.mubr.msk.bf16.mxu1 %vm5490_vm6, %v10019_v52 }
 0x68c   : > { %7662 = vmatpush1.bf16.msra.mxu0 %v10023_v24 }
 0x68d   : > { %7663 = vmatprep.subr.bf16.mxu0 %v13157_v21 }
 0x68f   : > { %7411 = vmatmul.mubr.bf16.gmra.mrb[180].mxu0 %v13255_v30 }
 0x690   : > { %8854 = vmatprep.mubr.msk.bf16.mxu0 %vm14035_vm4, %v13257_v6  ;;  %7664 = vmatpush1.bf16.msra.mxu0 %v10025_v53 }
 0x691   : > { %9255 = vmatmul.mubr.msk.bf16.gmra.mrb[188].mxu1 %vm5490_vm6, %v10021_v40  ;;  %7665 = vmatprep.subr.bf16.mxu0 %v13157_v21 }
 0x692   : > { %9258 = vmatprep.mubr.msk.bf16.mxu1 %vm5490_vm6, %v10022_v33 }
 0x694   : > { %7666 = vmatpush1.bf16.msra.mxu0 %v10027_v59 }
 0x695   : > { %7667 = vmatprep.subr.bf16.mxu0 %v13157_v21 }
 0x697   : > { %7418 = vmatmul.mubr.bf16.gmra.mrb[184].mxu0 %v13266_v41 }
 0x698   : > { %8855 = vmatprep.mubr.msk.bf16.mxu0 %vm14036_vm7, %v13268_v16  ;;  %7668 = vmatpush1.bf16.msra.mxu0 %v10029_v11 }
 0x699   : > { %9259 = vmatmul.mubr.msk.bf16.gmra.mrb[192].mxu1 %vm5490_vm6, %v10024_v42  ;;  %7669 = vmatprep.subr.bf16.mxu0 %v13157_v21 }
 0x69a   : > { %9262 = vmatprep.mubr.msk.bf16.mxu1 %vm5490_vm6, %v10026_v45  ;;  %v9000_v25 = vpop.f32.mrb[112].mxu0 }
 0x69b   : > { %v9001_v2 = vpop.f32.mrb[113].mxu0 }
 0x69c   : > { %v13363_v22 = vadd.f32 %v9001_v2, %v9000_v25  ;;  %v9003_v35 = vpop.f32.mrb[114].mxu0  ;;  %7670 = vmatpush1.bf16.msra.mxu0 %v10030_v61 }
 0x69d   : > { %v9004_v38 = vpop.f32.mrb[115].mxu0  ;;  %7671 = vmatprep.subr.bf16.mxu0 %v13157_v21 }
 0x69e   : > { %v13365_v3 = vadd.f32 %v9004_v38, %v9003_v35 }
 0x69f   : > { %7425 = vmatmul.mubr.bf16.gmra.mrb[188].mxu0 %v13277_v20 }
 0x6a0   : > { %8856 = vmatprep.mubr.msk.bf16.mxu0 %vm14037_vm5, %v13279_v49  ;;  %7672 = vmatpush1.bf16.msra.mxu0 %v10032_v1 }
 0x6a1   : > { %9263 = vmatmul.mubr.msk.bf16.gmra.mrb[236].mxu1 %vm5490_vm6, %v10028_v17  ;;  %7673 = vmatprep.subr.bf16.mxu0 %v13157_v21  ;;  %vm14038_vm6 = vmmov %vm14023_vm0 }
 0x6a2   : > { %v9006_v26 = vpop.f32.mrb[116].mxu0 }
 0x6a3   : > { %v9007_v62 = vpop.f32.mrb[117].mxu0 }
 0x6a4   : > { %v13373_v57 = vadd.f32 %v9007_v62, %v9006_v26  ;;  %v9009_v39 = vpop.f32.mrb[118].mxu0  ;;  %7674 = vmatpush1.bf16.msra.mxu0 %v10034_v46 }
 0x6a5   : > { %v9010_v55 = vpop.f32.mrb[119].mxu0 }
 0x6a6   : > { %v13375_v32 = vadd.f32 %v9010_v55, %v9009_v39  ;;  %v7459_v39 = vld [vmem:[#allocation3 + $0x88] sm:$0xff] }
 0x6a7   : > { %7432 = vmatmul.mubr.bf16.gmra.mrb[192].mxu0 %v13291_v36 }
 0x6a8   : > { %8857 = vmatprep.mubr.msk.bf16.mxu0 %vm14038_vm6, %v8837_v28  ;;  %v8871_v28 = vcombine.high %v13304_v27, %v7459_v39 }
 0x6aa   : > { %v9012_v19 = vpop.f32.mrb[120].mxu0 }
 0x6ab   : > { %v9013_v14 = vpop.f32.mrb[121].mxu0 }
 0x6ac   : > { %v13381_v0 = vadd.f32 %v9013_v14, %v9012_v19  ;;  %v9015_v21 = vpop.f32.mrb[122].mxu0  ;;  %v7460_v19 = vld [vmem:[#allocation3 + $0x90] sm:$0xff] }
 0x6ad   : > { %v9016_v60 = vpop.f32.mrb[123].mxu0 }
 0x6ae   : > { %v13385_v29 = vadd.f32 %v9016_v60, %v9015_v21  ;;  %v8873_v60 = vcombine.high %v7460_v19, %v7460_v19 }
 0x6af   : > { %7439 = vmatmul.mubr.bf16.gmra.mrb[196].mxu0 %v8836_v7 }
 0x6b0   : > { %8886 = vmatprep.mubr.msk.bf16.mxu0 %vm14023_vm0, %v13237_v18 }
 0x6b2   : > { %v9018_v34 = vpop.f32.mrb[124].mxu0 }
 0x6b3   : > { %v9019_v5 = vpop.f32.mrb[125].mxu0 }
 0x6b4   : > { %v13389_v56 = vadd.f32 %v9019_v5, %v9018_v34  ;;  %v9021_v13 = vpop.f32.mrb[126].mxu0  ;;  %v8870_v34 = vcombine.low %v13304_v27, %v7459_v39 }
 0x6b5   : > { %v9022_v54 = vpop.f32.mrb[127].mxu0 }
 0x6b6   : > { %v13391_v43 = vadd.f32 %v9022_v54, %v9021_v13 }
 0x6b7   : > { %7684 = vmatmul.mubr.bf16.vlgmr.msra.gmra.mrb[168].mxu0 %v13244_v48 }
 0x6b8   : > { %8887 = vmatprep.mubr.msk.bf16.mxu0 %vm14039_vm15, %v13247_v37 }
 0x6ba   : > { %v9024_v15 = vpop.f32.mrb[128].mxu0 }
 0x6bb   : > { %v9025_v51 = vpop.f32.mrb[129].mxu0 }
 0x6bc   : > { %v13396_v12 = vadd.f32 %v9025_v51, %v9024_v15  ;;  %v9027_v9 = vpop.f32.mrb[130].mxu0 }
 0x6bd   : > { %v9028_v50 = vpop.f32.mrb[131].mxu0 }
 0x6be   : > { %v13398_v18 = vadd.f32 %v9028_v50, %v9027_v9 }
 0x6bf   : > { %7691 = vmatmul.mubr.bf16.gmra.mrb[172].mxu0 %v13255_v30 }
 0x6c0   : > { %8888 = vmatprep.mubr.msk.bf16.mxu0 %vm14040_vm11, %v13257_v6 }
 0x6c2   : > { %v9030_v31 = vpop.f32.mrb[132].mxu0 }
 0x6c3   : > { %v9031_v10 = vpop.f32.mrb[133].mxu0 }
 0x6c4   : > { %v13403_v58 = vadd.f32 %v9031_v10, %v9030_v31  ;;  %v9033_v48 = vpop.f32.mrb[134].mxu0 }
 0x6c5   : > { %v9034_v63 = vpop.f32.mrb[135].mxu0 }
 0x6c6   : > { %v13405_v37 = vadd.f32 %v9034_v63, %v9033_v48 }
 0x6c7   : > { %7698 = vmatmul.mubr.bf16.gmra.mrb[176].mxu0 %v13266_v41 }
 0x6c8   : > { %8889 = vmatprep.mubr.msk.bf16.mxu0 %vm14041_vm13, %v13268_v16 }
 0x6ca   : > { %v9148_v8 = vpop.f32.mrb[136].mxu0 }
 0x6cb   : > { %v9149_v23 = vpop.f32.mrb[137].mxu0 }
 0x6cc   : > { %v9036_v44 = vpop.f32.mrb[176].mxu1  ;;  %v13410_v52 = vadd.f32 %v9149_v23, %v9148_v8  ;;  %v9151_v6 = vpop.f32.mrb[138].mxu0 }
 0x6cd   : > { %v9037_v30 = vpop.f32.mrb[177].mxu1  ;;  %v9152_v40 = vpop.f32.mrb[139].mxu0 }
 0x6ce   : > { %v9038_v24 = vadd.f32 %v9037_v30, %v9036_v44  ;;  %v9039_v53 = vpop.f32.mrb[178].mxu1  ;;  %v13412_v59 = vadd.f32 %v9152_v40, %v9151_v6 }
 0x6cf   : > { %v9040_v33 = vpop.f32.mrb[179].mxu1  ;;  %7705 = vmatmul.mubr.bf16.gmra.mrb[180].mxu0 %v13277_v20 }
 0x6d0   : > { %v9041_v11 = vadd.f32 %v9040_v33, %v9039_v53  ;;  %8890 = vmatprep.mubr.msk.bf16.mxu0 %vm14042_vm14, %v13279_v49 }
 0x6d2   : > { %v9154_v41 = vpop.f32.mrb[140].mxu0 }
 0x6d3   : > { %v9155_v42 = vpop.f32.mrb[141].mxu0 }
 0x6d4   : > { %v9042_v16 = vpop.f32.mrb[180].mxu1  ;;  %v13417_v61 = vadd.f32 %v9155_v42, %v9154_v41  ;;  %v9157_v25 = vpop.f32.mrb[142].mxu0 }
 0x6d5   : > { %v9043_v45 = vpop.f32.mrb[181].mxu1  ;;  %v9158_v17 = vpop.f32.mrb[143].mxu0 }
 0x6d6   : > { %v9044_v2 = vadd.f32 %v9043_v45, %v9042_v16  ;;  %v9045_v35 = vpop.f32.mrb[182].mxu1  ;;  %v13419_v1 = vadd.f32 %v9158_v17, %v9157_v25 }
 0x6d7   : > { %v9046_v38 = vpop.f32.mrb[183].mxu1  ;;  %7712 = vmatmul.mubr.bf16.gmra.mrb[184].mxu0 %v13291_v36 }
 0x6d8   : > { %8891 = vmatprep.mubr.msk.bf16.mxu0 %vm14043_vm1, %v13296_v47 }
 0x6da   : > { %v9160_v20 = vpop.f32.mrb[144].mxu0 }
 0x6db   : > { %v9161_v49 = vpop.f32.mrb[145].mxu0 }
 0x6dc   : > { %v13424_v46 = vadd.f32 %v9161_v49, %v9160_v20  ;;  %v9163_v26 = vpop.f32.mrb[146].mxu0 }
 0x6dd   : > { %v9164_v62 = vpop.f32.mrb[147].mxu0 }
 0x6de   : > { %v13426_v55 = vadd.f32 %v9164_v62, %v9163_v26 }
 0x6df   : > { %7719 = vmatmul.mubr.bf16.gmra.mrb[188].mxu0 %v13307_v4  ;;  %v8872_v4 = vcombine.low %v7460_v19, %v7460_v19 }
 0x6e0   : > { %8892 = vmatprep.mubr.msk.bf16.mxu0 %vm14044_vm2, %v8871_v28 }
 0x6e2   : > { %v9166_v36 = vpop.f32.mrb[148].mxu0 }
 0x6e3   : > { %v9167_v14 = vpop.f32.mrb[149].mxu0 }
 0x6e4   : > { %v13431_v21 = vadd.f32 %v9167_v14, %v9166_v36  ;;  %v9169_v47 = vpop.f32.mrb[150].mxu0 }
 0x6e5   : > { %v9170_v7 = vpop.f32.mrb[151].mxu0 }
 0x6e6   : > { %v13434_v5 = vadd.f32 %v9170_v7, %v9169_v47 }
 0x6e7   : > { %7726 = vmatmul.mubr.bf16.gmra.mrb[192].mxu0 %v8870_v34 }
 0x6e8   : > { %8893 = vmatprep.mubr.msk.bf16.mxu0 %vm14045_vm12, %v8873_v60 }
 0x6ea   : > { %v9172_v13 = vpop.f32.mrb[152].mxu0 }
 0x6eb   : > { %v9173_v54 = vpop.f32.mrb[153].mxu0 }
 0x6ec   : > { %v13437_v15 = vadd.f32 %v9173_v54, %v9172_v13  ;;  %v9175_v51 = vpop.f32.mrb[154].mxu0 }
 0x6ed   : > { %v9176_v9 = vpop.f32.mrb[155].mxu0 }
 0x6ee   : > { %v13439_v50 = vadd.f32 %v9176_v9, %v9175_v51 }
 0x6ef   : > { %7733 = vmatmul.mubr.bf16.gmra.mrb[196].mxu0 %v8872_v4 }
 0x6f2   : > { %v9178_v31 = vpop.f32.mrb[156].mxu0 }
 0x6f3   : > { %v9179_v48 = vpop.f32.mrb[157].mxu0 }
 0x6f4   : > { %v9224_v10 = vpop.f32.mrb[196].mxu1  ;;  %v13443_v8 = vadd.f32 %v9179_v48, %v9178_v31  ;;  %v9181_v44 = vpop.f32.mrb[158].mxu0 }
 0x6f5   : > { %v13441_v63 = vadd.f32 %v9224_v10, %v9044_v2  ;;  %v5693_v27 = vpop.f32.mrb[197].mxu1  ;;  %v9182_v6 = vpop.f32.mrb[159].mxu0 }
 0x6f6   : > { %v13445_v23 = vadd.f32 %v9038_v24, %v5693_v27  ;;  %v9225_v30 = vpop.f32.mrb[198].mxu1  ;;  %v13447_v40 = vadd.f32 %v9182_v6, %v9181_v44 }
 0x6f7   : > { %v5696_v53 = vpop.f32.mrb[199].mxu1 }
 0x6f8   : > { %v13449_v33 = vadd.f32 %v9041_v11, %v5696_v53 }
 0x6fa   : > { %v9184_v41 = vpop.f32.mrb[160].mxu0 }
 0x6fb   : > { %v9185_v42 = vpop.f32.mrb[161].mxu0 }
 0x6fc   : > { %v9074_v16 = vpop.f32.mrb[200].mxu1  ;;  %v13451_v25 = vadd.f32 %v9185_v42, %v9184_v41  ;;  %v9187_v2 = vpop.f32.mrb[162].mxu0 }
 0x6fd   : > { %v9075_v45 = vpop.f32.mrb[201].mxu1  ;;  %v9188_v38 = vpop.f32.mrb[163].mxu0 }
 0x6fe   : > { %v9076_v35 = vadd.f32 %v9075_v45, %v9074_v16  ;;  %v9077_v17 = vpop.f32.mrb[202].mxu1  ;;  %v13453_v24 = vadd.f32 %v9188_v38, %v9187_v2 }
 0x6ff   : > { %v9078_v20 = vpop.f32.mrb[203].mxu1 }
 0x700   : > { %v9285_v49 = vadd.f32 %v9076_v35, %v13363_v22  ;;  %v9079_v26 = vadd.f32 %v9078_v20, %v9077_v17 }
 0x702   : > { %v9291_v62 = vadd.f32 %v9079_v26, %v13365_v3  ;;  %v13458_v11 = vadd.f32 %v9285_v49, %v13410_v52  ;;  %v9190_v39 = vpop.f32.mrb[164].mxu0 }
 0x703   : > { %v9191_v19 = vpop.f32.mrb[165].mxu0 }
 0x704   : > { %v9080_v28 = vpop.f32.mrb[204].mxu1  ;;  %v13461_v36 = vadd.f32 %v9291_v62, %v13412_v59  ;;  %v13463_v47 = vadd.f32 %v9191_v19, %v9190_v39  ;;  %v9193_v60 = vpop.f32.mrb[166].mxu0 }
 0x705   : > { %v9081_v14 = vpop.f32.mrb[205].mxu1  ;;  %v9194_v13 = vpop.f32.mrb[167].mxu0 }
 0x706   : > { %v9082_v7 = vadd.f32 %v9081_v14, %v9080_v28  ;;  %v9083_v34 = vpop.f32.mrb[206].mxu1 }
 0x707   : > { %v9084_v22 = vpop.f32.mrb[207].mxu1 }
 0x708   : > { %v9282_v54 = vadd.f32 %v9082_v7, %v13373_v57  ;;  %v9085_v3 = vadd.f32 %v9084_v22, %v9083_v34 }
 0x70a   : > { %v9288_v52 = vadd.f32 %v9085_v3, %v13375_v32  ;;  %v13468_v4 = vadd.f32 %v9282_v54, %v13417_v61 }
 0x70c   : > { %v9086_v51 = vpop.f32.mrb[208].mxu1  ;;  %v13471_v59 = vadd.f32 %v9288_v52, %v13419_v1 }
 0x70d   : > { %v9087_v9 = vpop.f32.mrb[209].mxu1 }
 0x70e   : > { %v9088_v31 = vadd.f32 %v9087_v9, %v9086_v51  ;;  %v9089_v10 = vpop.f32.mrb[210].mxu1 }
 0x70f   : > { %v9090_v48 = vpop.f32.mrb[211].mxu1 }
 0x710   : > { %v9297_v27 = vadd.f32 %v9088_v31, %v13381_v0  ;;  %v9091_v44 = vadd.f32 %v9090_v48, %v9089_v10 }
 0x712   : > { %v9303_v30 = vadd.f32 %v9091_v44, %v13385_v29  ;;  %v13476_v57 = vadd.f32 %v9297_v27, %v13424_v46 }
 0x714   : > { %v9092_v32 = vpop.f32.mrb[212].mxu1  ;;  %v13479_v61 = vadd.f32 %v9303_v30, %v13426_v55 }
 0x715   : > { %v9093_v6 = vpop.f32.mrb[213].mxu1 }
 0x716   : > { %v9094_v53 = vadd.f32 %v9093_v6, %v9092_v32  ;;  %v9095_v1 = vpop.f32.mrb[214].mxu1 }
 0x717   : > { %v9096_v41 = vpop.f32.mrb[215].mxu1 }
 0x718   : > { %v9294_v16 = vadd.f32 %v9094_v53, %v13389_v56  ;;  %v9097_v42 = vadd.f32 %v9096_v41, %v9095_v1 }
 0x71a   : > { %v9300_v45 = vadd.f32 %v9097_v42, %v13391_v43  ;;  %v13484_v0 = vadd.f32 %v9294_v16, %v13431_v21 }
 0x71c   : > { %v9098_v29 = vpop.f32.mrb[216].mxu1  ;;  %v13487_v46 = vadd.f32 %v9300_v45, %v13434_v5 }
 0x71d   : > { %v9099_v2 = vpop.f32.mrb[217].mxu1 }
 0x71e   : > { %v9100_v35 = vadd.f32 %v9099_v2, %v9098_v29  ;;  %v9101_v55 = vpop.f32.mrb[218].mxu1 }
 0x71f   : > { %v9102_v17 = vpop.f32.mrb[219].mxu1 }
 0x720   : > { %v9309_v38 = vadd.f32 %v9100_v35, %v13396_v12  ;;  %v9103_v20 = vadd.f32 %v9102_v17, %v9101_v55 }
 0x722   : > { %v9315_v49 = vadd.f32 %v9103_v20, %v13398_v18  ;;  %v13492_v56 = vadd.f32 %v9309_v38, %v13437_v15 }
 0x724   : > { %v9104_v43 = vpop.f32.mrb[220].mxu1  ;;  %v13495_v21 = vadd.f32 %v9315_v49, %v13439_v50 }
 0x725   : > { %v9105_v26 = vpop.f32.mrb[221].mxu1 }
 0x726   : > { %v9106_v62 = vadd.f32 %v9105_v26, %v9104_v43  ;;  %v9107_v5 = vpop.f32.mrb[222].mxu1 }
 0x727   : > { %v9108_v39 = vpop.f32.mrb[223].mxu1 }
 0x728   : > { %v9306_v28 = vadd.f32 %v9106_v62, %v13403_v58  ;;  %v9109_v19 = vadd.f32 %v9108_v39, %v9107_v5 }
 0x72a   : > { %v9312_v14 = vadd.f32 %v9109_v19, %v13405_v37  ;;  %v13500_v12 = vadd.f32 %v9306_v28, %v13443_v8 }
 0x72c   : > { %v9110_v18 = vpop.f32.mrb[224].mxu1  ;;  %v13503_v15 = vadd.f32 %v9312_v14, %v13447_v40 }
 0x72d   : > { %v9111_v50 = vpop.f32.mrb[225].mxu1 }
 0x72e   : > { %v9112_v60 = vadd.f32 %v9111_v50, %v9110_v18  ;;  %v9113_v7 = vpop.f32.mrb[226].mxu1 }
 0x72f   : > { %v9114_v34 = vpop.f32.mrb[227].mxu1 }
 0x730   : > { %v9115_v13 = vadd.f32 %v9114_v34, %v9113_v7  ;;  %v13506_v58 = vadd.f32 %v9112_v60, %v13445_v23 }
 0x732   : > { %v13509_v37 = vadd.f32 %v9115_v13, %v13449_v33 }
 0x734   : > { %v9116_v8 = vpop.f32.mrb[228].mxu1 }
 0x735   : > { %v9117_v22 = vpop.f32.mrb[229].mxu1 }
 0x736   : > { %v9118_v54 = vadd.f32 %v9117_v22, %v9116_v8  ;;  %v9119_v3 = vpop.f32.mrb[230].mxu1 }
 0x737   : > { %v9120_v52 = vpop.f32.mrb[231].mxu1 }
 0x738   : > { %v13512_v40 = vadd.f32 %v9118_v54, %v13441_v63 }
 0x739   : > { %10424 = shalt.err (!%p10421_p7)
}
 0x73a   : > { %s10425_s17 = scalar_lea.hbm %s13523_s0, 960  ;;  %s10429_s4 = scalar_lea.hbm %s14046_s19, 1920 }
 0x73b   : > { %p10426_p6 = scmp.ne.s32.totalorder %s13523_s0, %s10425_s17  ;;  %p10430_p1 = scmp.lt.u32.totalorder %s13523_s0, %s14046_s19 }
 0x73c   : > { %p10431_p13 = scmp.lt.u32.totalorder %s10429_s4, %s10425_s17  ;;  %p10433_p2 = scmp.lt.u32.totalorder %s10425_s17, %s13523_s0 }
 0x73d   : > { %p10427_p9 = pnand %p10426_p6, %p14047_p8 }
 0x73e   : > { %p10432_p0 = por %p10431_p13, %p10430_p1 }
 0x73f   : > { %p10428_p12 = pneg %p10427_p9 }
 0x740   : > { %p10434_p4 = por %p10433_p2, %p10432_p0 }
 0x742   : > { %p10435_p10 = pnand %p10434_p4, %p10428_p12 }
 0x744   : > { %10438 = shalt.err (!%p10435_p10)
}
 0x745   : > { %s10620_s2 = smov 4   ;;  %s14048_s20 = smov 64  }
 0x746   : > { %9461 = dma.vmem_to_hbm [thread:$0]  (%p14047_p8), %s13525_s16, 960, %s13523_s0, %s13527_s30, %s14048_s20, %s14048_s20, %s10620_s2  }
 0x747   : > { %s8983_s6 = sshll.u32 %s13884_s21, 9  ;;  %s14049_s26 = sld [smem:[#allocation66_spill]] }
 0x748   : > { %s7886_s5 = sshll.u32 %s11325_s3, 4  ;;  %s7858_s7 = scalar_lea.sflag [#allocation7], %s11088_s1  ;;  %s13561_s5 = int_to_ptr.vmem [resolvable:$true] %s7886_s5 }
 0x749   : > { %s10439_s8 = scalar_lea.vmem %s13561_s5, 512  ;;  %s10621_s0 = smov [#allocation26]  }
 0x74a   : > { %p10440_p11 = scmp.ne.s32.totalorder %s13561_s5, %s10439_s8  ;;  %s10443_s21 = sshll.u32 %s10621_s0, 4  ;;  %s10444_s21 = int_to_ptr.vmem [resolvable:$false] %s10443_s21 }
 0x74b   : > { %s10445_s16 = scalar_lea.vmem %s10444_s21, 1024  ;;  %p10446_p7 = scmp.lt.s32.totalorder %s13561_s5, %s10444_s21 }
 0x74c   : > { %p10441_p3 = pnand %p10440_p11, %p14047_p8  ;;  %p10447_p6 = scmp.lt.s32.totalorder %s10445_s16, %s10439_s8 }
 0x74d   : > { %s13558_s4 = scalar_lea.hbm %s14049_s26, %s8983_s6 }
 0x74e   : > { %p10442_p5 = pneg %p10441_p3  ;;  %p10448_p9 = por %p10447_p6, %p10446_p7 }
 0x750   : > { %p10449_p12 = pnand %p10448_p9, %p10442_p5 }
 0x754   : > { %v9244_v63 = vpop.f32.mrb[232].mxu1 }
 0x755   : > { %10452 = shalt.err (!%p10449_p12)
}
 0x756   : > { %s10453_s3 = scalar_lea.hbm %s13558_s4, 512  ;;  %s10457_s17 = scalar_lea.hbm %s14049_s26, 1024 }
 0x757   : > { %p10454_p1 = scmp.ne.s32.totalorder %s13558_s4, %s10453_s3  ;;  %p10458_p2 = scmp.lt.u32.totalorder %s13558_s4, %s14049_s26 }
 0x758   : > { %p10459_p4 = scmp.lt.u32.totalorder %s10457_s17, %s10453_s3  ;;  %p10461_p11 = scmp.lt.u32.totalorder %s10453_s3, %s13558_s4 }
 0x759   : > { %p10455_p13 = pnand %p10454_p1, %p14047_p8 }
 0x75a   : > { %p10460_p10 = por %p10459_p4, %p10458_p2 }
 0x75b   : > { %p10456_p0 = pneg %p10455_p13 }
 0x75c   : > { %p10462_p3 = por %p10461_p11, %p10460_p10 }
 0x75e   : > { %p10463_p5 = pnand %p10462_p3, %p10456_p0 }
 0x760   : > { %10466 = shalt.err (!%p10463_p5)
}
 0x761   : > { %9460 = dma.vmem_to_hbm [thread:$0]  (%p14047_p8), %s13561_s5, 512, %s13558_s4, %s7858_s7, %s14048_s20, %s14048_s20, %s10620_s2   ;;  %v13591_v23 = vadd.f32 %v9244_v63, %v13512_v40  ;;  %v6019_v33 = vpop.f32.mrb[233].mxu1  ;;  %v13599_v27 = vld [vmem:[#allocation22] ss:$0 sm:$0xff]  ;;  %vm14050_vm10 = vcmask 781312   ;;  %v7748_v49 = vlaneseq }
 0x762   : > { %v13594_v51 = vadd.f32 %v6019_v33, %v13506_v58  ;;  %v9245_v9 = vpop.f32.mrb[234].mxu1  ;;  %s13610_s7 = scalar_lea.vmem [#allocation29], %s12742_s29  ;;  %vm14051_vm3 = vmmov %vm14050_vm10  ;;  %s14064_s16 = sld [smem:[#allocation68_spill]] }
 0x763   : > { %v6022_v31 = vpop.f32.mrb[235].mxu1  ;;  %vm14052_vm8 = vmmov %vm14051_vm3  ;;  %v10622_v9 = vmov 0.0   ;;  %s7918_s8 = sshll.u32 %s13610_s7, 4  ;;  %s10623_s25 = smov [#allocation29]   ;;  %s13672_s8 = int_to_ptr.vmem [resolvable:$true] %s7918_s8 }
 0x764   : > { %v13597_v10 = vadd.f32 %v6022_v31, %v13509_v37  ;;  %v9252_v48 = vpop.f32.mrb[184].mxu1  ;;  %vm14053_vm9 = vmmov %vm14051_vm3  ;;  %s10467_s6 = scalar_lea.vmem %s13672_s8, 960  ;;  %s10471_s17 = sshll.u32 %s10623_s25, 4  ;;  %s10472_s17 = int_to_ptr.vmem [resolvable:$false] %s10471_s17 }
 0x765   : > { %v9284_v44 = vadd.f32 %v13468_v4, %v9252_v48  ;;  %v6477_v30 = vpop.f32.mrb[185].mxu1  ;;  %vm14054_vm4 = vmmov %vm14051_vm3  ;;  %p10468_p7 = scmp.ne.s32.totalorder %s13672_s8, %s10467_s6  ;;  %s10473_s0 = scalar_lea.vmem %s10472_s17, 1920 }
 0x766   : > { %v9287_v32 = vadd.f32 %v13458_v11, %v6477_v30  ;;  %v9253_v6 = vpop.f32.mrb[186].mxu1  ;;  %vm14055_vm5 = vmmov %vm14051_vm3  ;;  %p10474_p12 = scmp.lt.s32.totalorder %s13672_s8, %s10472_s17  ;;  %p10475_p1 = scmp.lt.s32.totalorder %s10473_s0, %s10467_s6 }
 0x767   : > { %v6563_v53 = vadd.f32 %v9284_v44, %v13599_v27  ;;  %v9290_v1 = vadd.f32 %v13471_v59, %v9253_v6  ;;  %v6480_v41 = vpop.f32.mrb[187].mxu1  ;;  %vm14056_vm6 = vmmov %vm14051_vm3  ;;  %p10469_p6 = pnand %p10468_p7, %p14047_p8 }
 0x768   : > { %v6561_v16 = vadd.f32 %v9287_v32, %v13599_v27  ;;  %v9293_v42 = vadd.f32 %v13461_v36, %v6480_v41  ;;  %v9256_v38 = vpop.f32.mrb[188].mxu1  ;;  %vm14057_vm0 = vmmov %vm14051_vm3  ;;  %s13670_s3 = scalar_lea.hbm %s14064_s16, %s13516_s28  ;;  %p10476_p13 = por %p10475_p1, %p10474_p12 }
 0x769   : > { %v6578_v45 = vmax.f32 %v6563_v53, 0.0  ;;  %v6564_v29 = vadd.f32 %v9290_v1, %v13599_v27  ;;  %v9296_v59 = vadd.f32 %v13484_v0, %v9256_v38  ;;  %v6493_v20 = vpop.f32.mrb[189].mxu1  ;;  %vm14058_vm11 = vmmov %vm14057_vm0  ;;  %p10470_p9 = pneg %p10469_p6 }
 0x76a   : > { %v6576_v2 = vmax.f32 %v6561_v16, 0.0  ;;  %v6562_v4 = vadd.f32 %v9293_v42, %v13599_v27  ;;  %v9299_v26 = vadd.f32 %v13476_v57, %v6493_v20  ;;  %v9257_v62 = vpop.f32.mrb[190].mxu1  ;;  %v7749_v57 = vshrl.u32 %v7748_v49, 7  ;;  %vm14059_vm13 = vmmov %vm14057_vm0 }
 0x76b   : > { %v8962_v35 = vpack.c.bf16 %v6578_v45, %v6578_v45  ;;  %v6579_v55 = vmax.f32 %v6564_v29, 0.0  ;;  %v6567_v5 = vadd.f32 %v9296_v59, %v13599_v27  ;;  %v9302_v39 = vadd.f32 %v13487_v46, %v9257_v62  ;;  %v6496_v28 = vpop.f32.mrb[191].mxu1  ;;  %vm14060_vm14 = vmmov %vm14057_vm0  ;;  %p10477_p0 = pnand %p10476_p13, %p10470_p9 }
 0x76c   : > { %v8960_v11 = vpack.c.bf16 %v6576_v2, %v6576_v2  ;;  %v6577_v17 = vmax.f32 %v6562_v4, 0.0  ;;  %v6565_v0 = vadd.f32 %v9299_v26, %v13599_v27  ;;  %v9305_v19 = vadd.f32 %v13479_v61, %v6496_v28  ;;  %v9260_v58 = vpop.f32.mrb[192].mxu1  ;;  %vm14061_vm1 = vmmov %vm14057_vm0 }
 0x76d   : > { %6654 = vst.msk [vmem:[%s13610_s7 + $0x8] sm:$0xf] %vm14050_vm10, %v8962_v35  ;;  %v8963_v36 = vpack.c.bf16 %v6579_v55, %v6579_v55  ;;  %v6582_v14 = vmax.f32 %v6567_v5, 0.0  ;;  %v6568_v18 = vadd.f32 %v9302_v39, %v13599_v27  ;;  %v9308_v61 = vadd.f32 %v13500_v12, %v9260_v58  ;;  %v6509_v8 = vpop.f32.mrb[193].mxu1  ;;  %vm14062_vm2 = vmmov %vm14057_vm0 }
 0x76e   : > { %6652 = vst.msk [vmem:[%s13610_s7] sm:$0xf] %vm14051_vm3, %v8960_v11  ;;  %v8961_v43 = vpack.c.bf16 %v6577_v17, %v6577_v17  ;;  %v6580_v50 = vmax.f32 %v6565_v0, 0.0  ;;  %v6566_v60 = vadd.f32 %v9305_v19, %v13599_v27  ;;  %vm7750_vm7 = vcmp.eq.s32.totalorder %v7749_v57, 0  ;;  %v9261_v3 = vpop.f32.mrb[194].mxu1  ;;  %vm14063_vm12 = vmmov %vm14057_vm0 }
 0x76f   : > { %6655 = vst.msk [vmem:[%s13610_s7 + $0xc] sm:$0xf] %vm14052_vm8, %v8963_v36  ;;  %v8966_v7 = vpack.c.bf16 %v6582_v14, %v6582_v14  ;;  %v6583_v34 = vmax.f32 %v6568_v18, 0.0  ;;  %v9311_v54 = vadd.f32 %v13492_v56, %v6509_v8  ;;  %v6571_v52 = vadd.f32 %v9308_v61, %v13599_v27  ;;  %v6512_v63 = vpop.f32.mrb[195].mxu1  ;;  %vm14065_vm10 = vmmov %vm14057_vm0 }
 0x770   : > { %6653 = vst.msk [vmem:[%s13610_s7 + $0x4] sm:$0xf] %vm14053_vm9, %v8961_v43  ;;  %v8964_v13 = vpack.c.bf16 %v6580_v50, %v6580_v50  ;;  %v6581_v46 = vmax.f32 %v6566_v60, 0.0  ;;  %v9314_v40 = vadd.f32 %v13503_v15, %v9261_v3  ;;  %v9317_v12 = vadd.f32 %v13495_v21, %v6512_v63 }
 0x771   : > { %6658 = vst.msk [vmem:[%s13610_s7 + $0x18] sm:$0xf] %vm14054_vm4, %v8966_v7  ;;  %v8967_v37 = vpack.c.bf16 %v6583_v34, %v6583_v34  ;;  %v6569_v33 = vadd.f32 %v9311_v54, %v13599_v27  ;;  %v8894_v31 = vsel %vm7750_vm7, 1.0, %v10622_v9  ;;  %v6586_v48 = vmax.f32 %v6571_v52, 0.0 }
 0x772   : > { %6656 = vst.msk [vmem:[%s13610_s7 + $0x10] sm:$0xf] %vm14055_vm5, %v8964_v13  ;;  %v8965_v22 = vpack.c.bf16 %v6581_v46, %v6581_v46  ;;  %v6572_v56 = vadd.f32 %v9314_v40, %v13599_v27  ;;  %vm7754_vm15 = vcmp.eq.s32.totalorder %v7749_v57, 7  ;;  %v6570_v30 = vadd.f32 %v9317_v12, %v13599_v27 }
 0x773   : > { %6659 = vst.msk [vmem:[%s13610_s7 + $0x1c] sm:$0xf] %vm14056_vm6, %v8967_v37  ;;  %v6584_v44 = vmax.f32 %v6569_v33, 0.0  ;;  %v8970_v15 = vpack.c.bf16 %v6586_v48, %v6586_v48  ;;  %v7753_v6 = vsub.f32 3.0, %v8894_v31  ;;  %v8895_v16 = vsel %vm7754_vm15, 1.0, %v10622_v9 }
 0x774   : > { %6657 = vst.msk [vmem:[%s13610_s7 + $0x14] sm:$0xf] %vm14057_vm0, %v8965_v22  ;;  %v6587_v32 = vmax.f32 %v6572_v56, 0.0  ;;  %v6585_v1 = vmax.f32 %v6570_v30, 0.0  ;;  %v9264_v41 = vpop.f32.mrb[236].mxu1 }
 0x775   : > { %v8968_v53 = vpack.c.bf16 %v6584_v44, %v6584_v44  ;;  %6662 = vst.msk [vmem:[%s13610_s7 + $0x28] sm:$0xf] %vm14058_vm11, %v8970_v15  ;;  %v6534_v42 = vadd.f32 %v9264_v41, %v13463_v47  ;;  %v6525_v45 = vpop.f32.mrb[237].mxu1  ;;  %v7757_v11 = vsub.f32 %v7753_v6, %v8895_v16 }
 0x776   : > { %v8971_v21 = vpack.c.bf16 %v6587_v32, %v6587_v32  ;;  %v8969_v29 = vpack.c.bf16 %v6585_v1, %v6585_v1  ;;  %v6526_v2 = vadd.f32 %v13451_v25, %v6525_v45  ;;  %v9265_v4 = vpop.f32.mrb[238].mxu1 }
 0x777   : > { %6660 = vst.msk [vmem:[%s13610_s7 + $0x20] sm:$0xf] %vm14059_vm13, %v8968_v53  ;;  %v6553_v35 = vadd.f32 %v6534_v42, %v13591_v23  ;;  %v6528_v55 = vpop.f32.mrb[239].mxu1  ;;  %10039 = vrcp.f32 %v7757_v11 }
 0x778   : > { %6663 = vst.msk [vmem:[%s13610_s7 + $0x2c] sm:$0xf] %vm14060_vm14, %v8971_v21  ;;  %v6551_v47 = vadd.f32 %v6526_v2, %v13594_v51  ;;  %v6529_v17 = vadd.f32 %v13453_v24, %v6528_v55 }
 0x779   : > { %6661 = vst.msk [vmem:[%s13610_s7 + $0x24] sm:$0xf] %vm14061_vm1, %v8969_v29  ;;  %v6575_v38 = vadd.f32 %v13599_v27, %v6553_v35 }
 0x77a   : > { %v6573_v25 = vadd.f32 %v13599_v27, %v6551_v47  ;;  %v6552_v36 = vadd.f32 %v6529_v17, %v13597_v10 }
 0x77b   : > { %v6590_v59 = vmax.f32 %v6575_v38, 0.0 }
 0x77c   : > { %v6588_v23 = vmax.f32 %v6573_v25, 0.0  ;;  %v6574_v20 = vadd.f32 %v13599_v27, %v6552_v36 }
 0x77d   : > { %v8974_v49 = vpack.c.bf16 %v6590_v59, %v6590_v59 }
 0x77e   : > { %v8972_v43 = vpack.c.bf16 %v6588_v23, %v6588_v23  ;;  %v6589_v51 = vmax.f32 %v6574_v20, 0.0 }
 0x77f   : > { %6666 = vst.msk [vmem:[%s13610_s7 + $0x38] sm:$0xf] %vm14062_vm2, %v8974_v49 }
 0x780   : > { %6664 = vst.msk [vmem:[%s13610_s7 + $0x30] sm:$0xf] %vm14063_vm12, %v8972_v43  ;;  %v8973_v24 = vpack.c.bf16 %v6589_v51, %v6589_v51 }
 0x782   : > { %6665 = vst.msk [vmem:[%s13610_s7 + $0x34] sm:$0xf] %vm14065_vm10, %v8973_v24 }
 0x783   : > { %10480 = shalt.err (!%p10477_p0)
}
 0x784   : > { %s10481_s21 = scalar_lea.hbm %s13670_s3, 960  ;;  %s10485_s5 = scalar_lea.hbm %s14064_s16, 1920 }
 0x785   : > { %p10482_p2 = scmp.ne.s32.totalorder %s13670_s3, %s10481_s21  ;;  %p10486_p11 = scmp.lt.u32.totalorder %s13670_s3, %s14064_s16 }
 0x786   : > { %p10487_p3 = scmp.lt.u32.totalorder %s10485_s5, %s10481_s21  ;;  %p10489_p7 = scmp.lt.u32.totalorder %s10481_s21, %s13670_s3 }
 0x787   : > { %p10483_p4 = pnand %p10482_p2, %p14047_p8 }
 0x788   : > { %p10488_p5 = por %p10487_p3, %p10486_p11 }
 0x789   : > { %p10484_p10 = pneg %p10483_p4 }
 0x78a   : > { %p10490_p6 = por %p10489_p7, %p10488_p5 }
 0x78c   : > { %p10491_p9 = pnand %p10490_p6, %p10484_p10 }
 0x78e   : > { %10494 = shalt.err (!%p10491_p9)
}
 0x78f   : > { %9462 = dma.vmem_to_hbm [thread:$0]  (%p14047_p8), %s13672_s8, 960, %s13670_s3, %s13527_s30, %s14048_s20, %s14048_s20, %s10620_s2   ;;  %v10040_v10 = vpop.eup %10039  ;;  %v7685_v26 = vpop.f32.mrb[168].mxu0  ;;  %v13703_v62 = vld [vmem:[#allocation25] ss:$0 sm:$0xff]  ;;  %vm14066_vm3 = vcmask 519168  }
 0x790   : > { %v13701_v27 = vmul.f32 0.5, %v10040_v10  ;;  %v7687_v39 = vpop.f32.mrb[169].mxu0  ;;  %v7772_v18 = vmul.f32 0.33333334, %v10040_v10  ;;  %s13708_s6 = scalar_lea.vmem [#allocation30], %s12742_s29  ;;  %vm14067_vm8 = vmmov %vm14066_vm3  ;;  %s14073_s3 = sld [smem:[#allocation69_spill]] }
 0x791   : > { %v7688_v28 = vpop.f32.mrb[170].mxu0  ;;  %vm14068_vm9 = vmmov %vm14066_vm3  ;;  %s7934_s30 = sshll.u32 %s13708_s6, 4  ;;  %s7873_s21 = scalar_lea.sflag [#allocation31], %s11088_s1  ;;  %s13739_s30 = int_to_ptr.vmem [resolvable:$true] %s7934_s30 }
 0x792   : > { %v7760_v5 = vmul.f32 %v13701_v27, %v7685_v26  ;;  %v7689_v19 = vpop.f32.mrb[171].mxu0  ;;  %vm14069_vm4 = vmmov %vm14066_vm3  ;;  %s10495_s7 = scalar_lea.vmem %s13739_s30, 960  ;;  %s10624_s4 = smov [#allocation30]  }
 0x793   : > { %v7692_v50 = vpop.f32.mrb[172].mxu0  ;;  %vm14070_vm7 = vmmov %vm14066_vm3  ;;  %p10496_p12 = scmp.ne.s32.totalorder %s13739_s30, %s10495_s7  ;;  %s10499_s5 = sshll.u32 %s10624_s4, 4  ;;  %s10500_s5 = int_to_ptr.vmem [resolvable:$false] %s10499_s5 }
 0x794   : > { %v7768_v0 = vadd.f32 %v13703_v62, %v7760_v5  ;;  %v7773_v60 = vmul.f32 %v7772_v18, %v7692_v50  ;;  %v7694_v7 = vpop.f32.mrb[173].mxu0  ;;  %vm14071_vm5 = vmmov %vm14066_vm3  ;;  %s10501_s25 = scalar_lea.vmem %s10500_s5, 1920  ;;  %p10502_p0 = scmp.lt.s32.totalorder %s13739_s30, %s10500_s5 }
 0x795   : > { %v7695_v34 = vpop.f32.mrb[174].mxu0  ;;  %vm14072_vm6 = vmmov %vm14066_vm3  ;;  %p10497_p1 = pnand %p10496_p12, %p14047_p8  ;;  %p10503_p2 = scmp.lt.s32.totalorder %s10501_s25, %s10495_s7 }
 0x796   : > { %v7769_v14 = vmax.f32 %v7768_v0, 0.0  ;;  %v7781_v13 = vadd.f32 %v13703_v62, %v7773_v60  ;;  %v7696_v46 = vpop.f32.mrb[175].mxu0  ;;  %s13737_s0 = scalar_lea.hbm %s14073_s3, %s13516_s28  ;;  %vm14074_vm0 = vmmov %vm14066_vm3 }
 0x797   : > { %p10498_p13 = pneg %p10497_p1  ;;  %p10504_p4 = por %p10503_p2, %p10502_p0 }
 0x798   : > { %v7770_v57 = vpack.c.bf16 %v7769_v14, %v7769_v14  ;;  %v7782_v58 = vmax.f32 %v7781_v13, 0.0 }
 0x799   : > { %p10505_p10 = pnand %p10504_p4, %p10498_p13 }
 0x79a   : > { %7771 = vst.msk [vmem:[%s13708_s6] sm:$0xf] %vm14066_vm3, %v7770_v57  ;;  %v7783_v37 = vpack.c.bf16 %v7782_v58, %v7782_v58  ;;  %v7699_v61 = vpop.f32.mrb[176].mxu0 }
 0x79b   : > { %v7785_v8 = vmul.f32 %v7772_v18, %v7699_v61  ;;  %v7701_v22 = vpop.f32.mrb[177].mxu0 }
 0x79c   : > { %7784 = vst.msk [vmem:[%s13708_s6 + $0x8] sm:$0xf] %vm14067_vm8, %v7783_v37  ;;  %v7702_v54 = vpop.f32.mrb[178].mxu0 }
 0x79d   : > { %v7793_v3 = vadd.f32 %v13703_v62, %v7785_v8  ;;  %v7703_v52 = vpop.f32.mrb[179].mxu0 }
 0x79f   : > { %v7794_v40 = vmax.f32 %v7793_v3, 0.0 }
 0x7a1   : > { %v7795_v63 = vpack.c.bf16 %v7794_v40, %v7794_v40 }
 0x7a2   : > { %v7706_v33 = vpop.f32.mrb[180].mxu0 }
 0x7a3   : > { %7796 = vst.msk [vmem:[%s13708_s6 + $0x10] sm:$0xf] %vm14068_vm9, %v7795_v63  ;;  %v7797_v12 = vmul.f32 %v7772_v18, %v7706_v33  ;;  %v7708_v9 = vpop.f32.mrb[181].mxu0 }
 0x7a4   : > { %v7709_v31 = vpop.f32.mrb[182].mxu0 }
 0x7a5   : > { %v7805_v48 = vadd.f32 %v13703_v62, %v7797_v12  ;;  %v7710_v56 = vpop.f32.mrb[183].mxu0 }
 0x7a7   : > { %v7806_v44 = vmax.f32 %v7805_v48, 0.0 }
 0x7a9   : > { %v7807_v30 = vpack.c.bf16 %v7806_v44, %v7806_v44 }
 0x7aa   : > { %v7713_v15 = vpop.f32.mrb[184].mxu0 }
 0x7ab   : > { %7808 = vst.msk [vmem:[%s13708_s6 + $0x18] sm:$0xf] %vm14069_vm4, %v7807_v30  ;;  %v7809_v32 = vmul.f32 %v7772_v18, %v7713_v15  ;;  %v7715_v6 = vpop.f32.mrb[185].mxu0 }
 0x7ac   : > { %v7716_v53 = vpop.f32.mrb[186].mxu0 }
 0x7ad   : > { %v7817_v1 = vadd.f32 %v13703_v62, %v7809_v32  ;;  %v7717_v41 = vpop.f32.mrb[187].mxu0 }
 0x7af   : > { %v7818_v16 = vmax.f32 %v7817_v1, 0.0 }
 0x7b1   : > { %v7819_v21 = vpack.c.bf16 %v7818_v16, %v7818_v16 }
 0x7b2   : > { %v7720_v42 = vpop.f32.mrb[188].mxu0 }
 0x7b3   : > { %7820 = vst.msk [vmem:[%s13708_s6 + $0x20] sm:$0xf] %vm14070_vm7, %v7819_v21  ;;  %v7821_v45 = vmul.f32 %v7772_v18, %v7720_v42  ;;  %v7722_v29 = vpop.f32.mrb[189].mxu0 }
 0x7b4   : > { %v7723_v2 = vpop.f32.mrb[190].mxu0 }
 0x7b5   : > { %v7829_v4 = vadd.f32 %v13703_v62, %v7821_v45  ;;  %v7724_v35 = vpop.f32.mrb[191].mxu0 }
 0x7b7   : > { %v7830_v55 = vmax.f32 %v7829_v4, 0.0 }
 0x7b9   : > { %v7831_v11 = vpack.c.bf16 %v7830_v55, %v7830_v55 }
 0x7ba   : > { %v7727_v47 = vpop.f32.mrb[192].mxu0 }
 0x7bb   : > { %7832 = vst.msk [vmem:[%s13708_s6 + $0x28] sm:$0xf] %vm14071_vm5, %v7831_v11  ;;  %v7833_v17 = vmul.f32 %v7772_v18, %v7727_v47  ;;  %v7729_v38 = vpop.f32.mrb[193].mxu0 }
 0x7bc   : > { %v7730_v25 = vpop.f32.mrb[194].mxu0 }
 0x7bd   : > { %v7841_v36 = vadd.f32 %v13703_v62, %v7833_v17  ;;  %v7731_v59 = vpop.f32.mrb[195].mxu0 }
 0x7bf   : > { %v7842_v23 = vmax.f32 %v7841_v36, 0.0 }
 0x7c1   : > { %v7843_v20 = vpack.c.bf16 %v7842_v23, %v7842_v23 }
 0x7c2   : > { %v7734_v49 = vpop.f32.mrb[196].mxu0 }
 0x7c3   : > { %7844 = vst.msk [vmem:[%s13708_s6 + $0x30] sm:$0xf] %vm14072_vm6, %v7843_v20  ;;  %v7845_v43 = vmul.f32 %v13701_v27, %v7734_v49  ;;  %v7736_v51 = vpop.f32.mrb[197].mxu0 }
 0x7c4   : > { %v7737_v24 = vpop.f32.mrb[198].mxu0 }
 0x7c5   : > { %v7853_v10 = vadd.f32 %v13703_v62, %v7845_v43  ;;  %v7738_v26 = vpop.f32.mrb[199].mxu0 }
 0x7c7   : > { %v7854_v5 = vmax.f32 %v7853_v10, 0.0 }
 0x7c9   : > { %v7855_v39 = vpack.c.bf16 %v7854_v5, %v7854_v5 }
 0x7cb   : > { %7856 = vst.msk [vmem:[%s13708_s6 + $0x38] sm:$0xf] %vm14074_vm0, %v7855_v39 }
 0x7cc   : > { %10508 = shalt.err (!%p10505_p10)
}
 0x7cd   : > { %s10509_s28 = scalar_lea.hbm %s13737_s0, 960  ;;  %s10513_s29 = scalar_lea.hbm %s14073_s3, 1920 }
 0x7ce   : > { %p10510_p11 = scmp.ne.s32.totalorder %s13737_s0, %s10509_s28  ;;  %p10514_p7 = scmp.lt.u32.totalorder %s13737_s0, %s14073_s3 }
 0x7cf   : > { %p10515_p6 = scmp.lt.u32.totalorder %s10513_s29, %s10509_s28  ;;  %p10517_p12 = scmp.lt.u32.totalorder %s10509_s28, %s13737_s0 }
 0x7d0   : > { %p10511_p3 = pnand %p10510_p11, %p14047_p8 }
 0x7d1   : > { %p10516_p9 = por %p10515_p6, %p10514_p7 }
 0x7d2   : > { %p10512_p5 = pneg %p10511_p3 }
 0x7d3   : > { %p10518_p1 = por %p10517_p12, %p10516_p9 }
 0x7d5   : > { %p10519_p13 = pnand %p10518_p1, %p10512_p5 }
 0x7d7   : > { %10522 = shalt.err (!%p10519_p13)
}
 0x7d8   : > { %9463 = dma.vmem_to_hbm [thread:$0]  (%p14047_p8), %s13739_s30, 960, %s13737_s0, %s7873_s21, %s14048_s20, %s14048_s20, %s10620_s2  }
 0x7d9 PF: > { %s14075_s7 = sld [smem:[#allocation42_spill]]  ;;  %p14076_p0 = scmp.ne.s32.totalorder %s13879_s15, 0 }
 0x7da   : > { %p14077_p2 = scmp.ge.s32.totalorder %s10593_s24, 2 }
 0x7dc   : > { %p9510_p4 = pnand %p14077_p2, %p14076_p0 }
 0x7df   : > { %s7949_s5 = sand.u32 1, %s14075_s7  }
 0x7e0   : > { %s7950_s25 = scalar_lea.sflag [#allocation7], %s7949_s5 }
 0x7e1   : > { %10568 = dma.done.wait (!%p9510_p4), %s7950_s25, 512  }
 0x7e2   : > { %10570 = vsyncadd (!%p9510_p4), %s7950_s25, 4294966784  ;;  %s14078_s27 = sadd.s32 4294967294, %s10593_s24  }
 0x7e3   : > { %s7958_s28 = sand.u32 1, %s14078_s27  }
 0x7e4   : > { %s7959_s17 = scalar_lea.sflag [#allocation28], %s7958_s28 }
 0x7e5   : > { %10572 = dma.done.wait (!%p9510_p4), %s7959_s17, 1920  }
 0x7e6   : > { %10574 = vsyncadd (!%p9510_p4), %s7959_s17, 4294965376  ;;  %s7977_s1 = scalar_lea.sflag [#allocation31], %s7949_s5 }
 0x7e7   : > { %10576 = dma.done.wait (!%p9510_p4), %s7977_s1, 960  }
 0x7e8   : > { %10578 = vsyncadd (!%p9510_p4), %s7977_s1, 4294966336  ;;  %p42_p8 = scmp.ge.s32.totalorder %s11007_s14, 4   ;;  %s14079_s21 = smov %s10585_s22 }
 0x7e9   : > { %s14080_s22 = smov %s10589_s23  ;;  %s14081_s23 = smov %s11018_s13 }
 0x7ea   : > { %s14082_s24 = smov %s11007_s14  ;;  %44 = sbr.rel (!%p42_p8) target bundleno = 29 (0x1d), region = 224 }
 0x7f1   :  { %7982 = vsyncpa [#allocation6], 1 }
 0x7f2   :  { %7984 = vsyncpa [#allocation6 + $0x1], 1 }
 0x7f3   :  { %7985 = vsyncpa [#allocation9], 1 }
 0x7f4   :  { %7986 = vsyncpa [#allocation12], 1 }
 0x7f5   :  { %7987 = vsyncpa [#allocation15], 1 }
 0x7f6   :  { %7988 = vsyncpa [#allocation18], 1 }
 0x7f7   :  { %7989 = vsyncpa [#allocation21], 1 }
 0x7f8   :  { %7990 = vsyncpa [#allocation24], 1 }
 0x7f9   :  { %7991 = vsyncpa [#allocation7], 1 }
 0x7fa   :  { %7993 = vsyncpa [#allocation7 + $0x1], 1 }
 0x7fb   :  { %7994 = vsyncpa [#allocation28], 1 }
 0x7fc   :  { %7996 = vsyncpa [#allocation28 + $0x1], 1 }
 0x7fd   :  { %7997 = vsyncpa [#allocation31], 1 }
 0x7fe   :  { %7999 = vsyncpa [#allocation31 + $0x1], 1 }

</bundles_post_ra>
